<compile_context>
chip_gen: v6e
topology: v6e:2x2x1
jax: 0.10.0
libtpu: 0.0.40
codegen_flags: <defaults>
</compile_context>

<pallas_src>
import functools

import jax
import jax.numpy as jnp
from jax.experimental import pallas as pl
from jax.experimental.pallas import tpu as pltpu


def _round_up(x, n):
    return ((x + n - 1) // n) * n


# ---------------------------------------------------------------------------
# Pallas kernel: all coupling layers for one batch tile (batch-major layout).
# ---------------------------------------------------------------------------
def realnvp_fwd_kernel(t_ref, cond_ref,
                       w1u_ref, w1c_ref, b1_ref,
                       w2_ref, b2_ref,
                       w3_ref, b3_ref,
                       out_ref, *, num_layers, matmul_dtype):
    """One batch tile, all coupling layers.

    Layout: batch on sublanes, features / hidden on lanes.
      t_ref    [TB, t_dim]      f32
      cond_ref [TB, cond_dim]   f32
      h1, h2   [TB, H]          (H = 128 -> lane-dense matmul outputs)
      out_ref  [TB, t_dim + 2]  f32 : [ z | log_det | -0.5*sum(z^2) ]
    """
    f32 = jnp.float32
    t = t_ref[...]                                    # [TB, t_dim] f32
    tb, t_dim = t.shape
    m = t_dim // 2
    cond = cond_ref[...].astype(matmul_dtype)         # cast once for the MXU

    # z is carried as its two contiguous mask halves across the unrolled loop
    # (no per-layer concatenations).
    z_lo = t[:, :m]                                   # masked half of even layers
    z_hi = t[:, m:]                                   # masked half of odd layers
    log_det = jnp.zeros((tb, 1), f32)

    for i in range(num_layers):                       # static unroll, L is small
        if i % 2 == 0:
            z_masked, z_unmasked = z_lo, z_hi
        else:
            z_masked, z_unmasked = z_hi, z_lo

        # 3-layer MLP; bf16 operands, f32 accumulation, f32 elementwise.
        h1 = (jnp.dot(z_unmasked.astype(matmul_dtype), w1u_ref[i],
                      preferred_element_type=f32)
              + jnp.dot(cond, w1c_ref[i], preferred_element_type=f32)
              + b1_ref[i])                            # [TB, H] f32
        h1 = jnp.maximum(h1, 0.0).astype(matmul_dtype)
        h2 = jnp.dot(h1, w2_ref[i], preferred_element_type=f32) + b2_ref[i]
        h2 = jnp.maximum(h2, 0.0).astype(matmul_dtype)
        p = jnp.dot(h2, w3_ref[i], preferred_element_type=f32) + b3_ref[i]

        s = jnp.tanh(p[:, :m])                        # [TB, m] f32
        t_shift = p[:, m:]                            # [TB, m] f32
        y_masked = z_masked * jnp.exp(s) + t_shift
        if i % 2 == 0:
            z_lo = y_masked
        else:
            z_hi = y_masked
        log_det = log_det + jnp.sum(s, axis=1, keepdims=True)

    z = jnp.concatenate([z_lo, z_hi], axis=1)         # [TB, t_dim]
    base = -0.5 * jnp.sum(z * z, axis=1, keepdims=True)
    out_ref[...] = jnp.concatenate([z, log_det, base], axis=1)


# ---------------------------------------------------------------------------
# Wrapper: parameter prep + batch-tiled pallas_call.
# ---------------------------------------------------------------------------
def _prep_params(params, t_dim, matmul_dtype):
    """Split / cast params into the kernel's batch-major layout."""
    W1, b1, W2, b2, W3, b3 = params
    m = t_dim // 2
    # W1 input rows are ordered [t_unmasked (m), cond (cond_dim)].
    W1u = W1[:, :m, :].astype(matmul_dtype)           # [L, m, H]
    W1c = W1[:, m:, :].astype(matmul_dtype)           # [L, cond_dim, H]
    b1r = b1[:, None, :].astype(jnp.float32)          # [L, 1, H]  (lane-dense)
    W2c = W2.astype(matmul_dtype)                     # [L, H, H]
    b2r = b2[:, None, :].astype(jnp.float32)          # [L, 1, H]
    W3c = W3.astype(matmul_dtype)                     # [L, H, 2m] (fused s|t)
    b3r = b3[:, None, :].astype(jnp.float32)          # [L, 1, 2m]
    return (W1u, W1c, b1r, W2c, b2r, W3c, b3r)


def _realnvp_pallas(T, cond, params, *, num_layers, block_b, matmul_dtype):
    batch, t_dim = T.shape
    assert t_dim % 2 == 0, "t_dim must be even (contiguous half-split masks)"
    cond_dim = cond.shape[1]
    prepped = _prep_params(params, t_dim, matmul_dtype)

    # Tile clamp: keep >= 2 grid steps when the batch allows (v7x megacore),
    # keep the sublane axis 8/128-aligned.
    # TODO(synk): sweep block_b in [512, 2048] per TPU generation.
    granule = 128 if batch >= 256 else 8
    tb = max(granule, min(block_b, _round_up(pl.cdiv(batch, 2), granule)))
    bp = _round_up(batch, tb)
    pad = bp - batch

    Tp = T.astype(jnp.float32)
    Cp = cond.astype(jnp.float32)
    if pad:
        Tp = jnp.pad(Tp, ((0, pad), (0, 0)))
        Cp = jnp.pad(Cp, ((0, pad), (0, 0)))

    def const_spec(a):
        nd = a.ndim
        return pl.BlockSpec(a.shape, lambda i, _nd=nd: (0,) * _nd)

    in_specs = [
        pl.BlockSpec((tb, t_dim), lambda i: (i, 0)),
        pl.BlockSpec((tb, cond_dim), lambda i: (i, 0)),
    ] + [const_spec(w) for w in prepped]

    out_specs = pl.BlockSpec((tb, t_dim + 2), lambda i: (i, 0))

    # Raise scoped VMEM for large tiles (v5e default is only 16 MiB).
    vmem_limit = 48 * 1024 * 1024 if tb >= 1024 else None

    out = pl.pallas_call(
        functools.partial(realnvp_fwd_kernel, num_layers=num_layers,
                          matmul_dtype=matmul_dtype),
        out_shape=jax.ShapeDtypeStruct((bp, t_dim + 2), jnp.float32),
        grid=(bp // tb,),
        in_specs=in_specs,
        out_specs=out_specs,
        compiler_params=pltpu.CompilerParams(
            dimension_semantics=("parallel",),
            vmem_limit_bytes=vmem_limit),
    )(Tp, Cp, *prepped)

    z = out[:batch, :t_dim]
    log_det = out[:batch, t_dim]
    neg_half_zsq = out[:batch, t_dim + 1]
    return z, log_det, neg_half_zsq


def realnvp_forward(T, cond, params, *, num_layers, block_b=1024,
                    matmul_dtype=jnp.bfloat16):
    """Maps T -> z and accumulates the log-determinant (Pallas kernel)."""
    z, log_det, _ = _realnvp_pallas(T, cond, params, num_layers=num_layers,
                                    block_b=block_b, matmul_dtype=matmul_dtype)
    return z, log_det


def realnvp_log_prob(T, cond, params, *, num_layers, block_b=1024,
                     matmul_dtype=jnp.bfloat16):
    """log p(T | cond); the -0.5*sum(z^2) term is computed inside the kernel."""
    z, log_det, neg_half_zsq = _realnvp_pallas(
        T, cond, params, num_layers=num_layers, block_b=block_b,
        matmul_dtype=matmul_dtype)
    t_dim = T.shape[1]
    return neg_half_zsq - 0.5 * t_dim * jnp.log(2.0 * jnp.pi) + log_det


# ---------------------------------------------------------------------------
# Pure-JAX reference (mirrors the PyTorch module) for verification.
# ---------------------------------------------------------------------------
def realnvp_forward_ref(T, cond, params, *, num_layers):
    W1, b1, W2, b2, W3, b3 = params
    t_dim = T.shape[1]
    m = t_dim // 2
    hp = jax.lax.Precision.HIGHEST
    z = T
    log_det = jnp.zeros((T.shape[0],), jnp.float32)
    for i in range(num_layers):
        if i % 2 == 0:
            t_masked, t_unmasked = z[:, :m], z[:, m:]
        else:
            t_masked, t_unmasked = z[:, m:], z[:, :m]
        h = jnp.concatenate([t_unmasked, cond], axis=1)
        h1 = jax.nn.relu(jnp.dot(h, W1[i], precision=hp) + b1[i])
        h2 = jax.nn.relu(jnp.dot(h1, W2[i], precision=hp) + b2[i])
        p = jnp.dot(h2, W3[i], precision=hp) + b3[i]
        s = jnp.tanh(p[:, :m])
        t_shift = p[:, m:]
        y_masked = t_masked * jnp.exp(s) + t_shift
        if i % 2 == 0:
            z = jnp.concatenate([y_masked, t_unmasked], axis=1)
        else:
            z = jnp.concatenate([t_unmasked, y_masked], axis=1)
        log_det = log_det + jnp.sum(s, axis=1)
    return z, log_det


# ---------------------------------------------------------------------------
# Deterministic parameter construction (shapes per the module __init__).
# ---------------------------------------------------------------------------
def init_params(key, *, t_dim, cond_dim, hidden_dim, num_layers):
    m = t_dim // 2
    nn_in = m + cond_dim        # num_unmasked + cond_dim
    nn_out = 2 * m              # num_masked * 2
    keys = jax.random.split(key, 6)
    scale = 0.1
    W1 = scale * jax.random.normal(keys[0], (num_layers, nn_in, hidden_dim), jnp.float32)
    b1 = scale * jax.random.normal(keys[1], (num_layers, hidden_dim), jnp.float32)
    W2 = scale * jax.random.normal(keys[2], (num_layers, hidden_dim, hidden_dim), jnp.float32)
    b2 = scale * jax.random.normal(keys[3], (num_layers, hidden_dim), jnp.float32)
    W3 = scale * jax.random.normal(keys[4], (num_layers, hidden_dim, nn_out), jnp.float32)
    b3 = scale * jax.random.normal(keys[5], (num_layers, nn_out), jnp.float32)
    return (W1, b1, W2, b2, W3, b3)


# TODO(synk): the module's inverse() (z -> T sampling path) is a separate
# serial recurrence and is not implemented here (forward / log_prob only).

if __name__ == "__main__":
    T_DIM = 8
    COND_DIM = 8
    HIDDEN_DIM = 128      # module default
    NUM_LAYERS = 6
    BATCH = 300           # not a tile multiple -> exercises padding + 2-step grid

    key = jax.random.PRNGKey(0)
    k_t, k_c, k_p = jax.random.split(key, 3)
    T = jax.random.normal(k_t, (BATCH, T_DIM), jnp.float32)
    cond = jax.random.normal(k_c, (BATCH, COND_DIM), jnp.float32)
    params = init_params(k_p, t_dim=T_DIM, cond_dim=COND_DIM,
                         hidden_dim=HIDDEN_DIM, num_layers=NUM_LAYERS)

    z_ref, ld_ref = realnvp_forward_ref(T, cond, params, num_layers=NUM_LAYERS)

    # f32 matmul path: structural check.
    z32, ld32 = realnvp_forward(T, cond, params, num_layers=NUM_LAYERS,
                                matmul_dtype=jnp.float32)
    jax.block_until_ready((z32, ld32))
    assert jnp.allclose(z32, z_ref, atol=2e-2, rtol=2e-2), "z mismatch (f32)"
    assert jnp.allclose(ld32, ld_ref, atol=2e-2, rtol=2e-2), "log_det mismatch (f32)"

    # bf16 matmul path (default; MXU-native on v6e/v7x).
    z, ld = realnvp_forward(T, cond, params, num_layers=NUM_LAYERS)
    jax.block_until_ready((z, ld))
    assert jnp.allclose(z, z_ref, atol=5e-2, rtol=5e-2), "z mismatch (bf16)"
    assert jnp.allclose(ld, ld_ref, atol=5e-2, rtol=5e-2), "log_det mismatch (bf16)"

    # Fused log_prob path (base-dist term computed in-kernel).
    lp = realnvp_log_prob(T, cond, params, num_layers=NUM_LAYERS)
    jax.block_until_ready(lp)
    lp_ref = (-0.5 * jnp.sum(z_ref * z_ref, axis=1)
              - 0.5 * T_DIM * jnp.log(2.0 * jnp.pi) + ld_ref)
    assert jnp.allclose(lp, lp_ref, atol=5e-2, rtol=5e-2), "log_prob mismatch"

    print("KERNEL_OK")
</pallas_src>

<mosaic_0001>
module attributes {stable_mosaic.version = 11 : i64} {
  func.func @realnvp_fwd_kernel(%arg0: i32, %arg1: memref<256x8xf32, #tpu.memory_space<vmem>>, %arg2: memref<256x8xf32, #tpu.memory_space<vmem>>, %arg3: memref<6x4x128xf32, #tpu.memory_space<vmem>>, %arg4: memref<6x8x128xf32, #tpu.memory_space<vmem>>, %arg5: memref<6x1x128xf32, #tpu.memory_space<vmem>>, %arg6: memref<6x128x128xf32, #tpu.memory_space<vmem>>, %arg7: memref<6x1x128xf32, #tpu.memory_space<vmem>>, %arg8: memref<6x128x8xf32, #tpu.memory_space<vmem>>, %arg9: memref<6x1x8xf32, #tpu.memory_space<vmem>>, %arg10: memref<256x10xf32, #tpu.memory_space<vmem>>) attributes {dimension_semantics = [#tpu.dimension_semantics<parallel>], iteration_bounds = array<i64: 2>, scalar_prefetch = 0 : i64, scratch_operands = 0 : i64, tpu.core_type = #tpu.core_type<tc>, window_params = [{transform_indices = @transform_0, window_bounds = array<i64: 256, 8>}, {transform_indices = @transform_1, window_bounds = array<i64: 256, 8>}, {pipeline_mode = #tpu.pipeline_mode<synchronous>, transform_indices = @transform_2, window_bounds = array<i64: 6, 4, 128>}, {pipeline_mode = #tpu.pipeline_mode<synchronous>, transform_indices = @transform_3, window_bounds = array<i64: 6, 8, 128>}, {pipeline_mode = #tpu.pipeline_mode<synchronous>, transform_indices = @transform_4, window_bounds = array<i64: 6, 1, 128>}, {pipeline_mode = #tpu.pipeline_mode<synchronous>, transform_indices = @transform_5, window_bounds = array<i64: 6, 128, 128>}, {pipeline_mode = #tpu.pipeline_mode<synchronous>, transform_indices = @transform_6, window_bounds = array<i64: 6, 1, 128>}, {pipeline_mode = #tpu.pipeline_mode<synchronous>, transform_indices = @transform_7, window_bounds = array<i64: 6, 128, 8>}, {pipeline_mode = #tpu.pipeline_mode<synchronous>, transform_indices = @transform_8, window_bounds = array<i64: 6, 1, 8>}, {transform_indices = @transform_9, window_bounds = array<i64: 256, 10>}]} {
    %c0 = arith.constant 0 : index
    %c0_0 = arith.constant 0 : index
    %0 = vector.load %arg1[%c0, %c0_0] : memref<256x8xf32, #tpu.memory_space<vmem>>, vector<256x8xf32>
    %c0_1 = arith.constant 0 : index
    %c0_2 = arith.constant 0 : index
    %1 = vector.load %arg2[%c0_1, %c0_2] : memref<256x8xf32, #tpu.memory_space<vmem>>, vector<256x8xf32>
    %2 = vector.extract_strided_slice %0 {offsets = [0, 0], sizes = [256, 4], strides = [1, 1]} : vector<256x8xf32> to vector<256x4xf32>
    %3 = vector.extract_strided_slice %0 {offsets = [0, 4], sizes = [256, 4], strides = [1, 1]} : vector<256x8xf32> to vector<256x4xf32>
    %cst = arith.constant 0.000000e+00 : f32
    %4 = vector.broadcast %cst : f32 to vector<256x1xf32>
    %c0_3 = arith.constant 0 : index
    %c0_4 = arith.constant 0 : index
    %c0_5 = arith.constant 0 : index
    %5 = vector.load %arg3[%c0_3, %c0_4, %c0_5] : memref<6x4x128xf32, #tpu.memory_space<vmem>>, vector<1x4x128xf32>
    %6 = vector.shape_cast %5 : vector<1x4x128xf32> to vector<4x128xf32>
    %cst_6 = arith.constant dense<0.000000e+00> : vector<256x128xf32>
    %7 = tpu.matmul %3, %6, %cst_6 {dimension_numbers = #tpu.dot_dimension_numbers<[1], [0], [0], [1], [0, 0, 1, 1], [], []>} : vector<256x4xf32>, vector<4x128xf32>, vector<256x128xf32> -> vector<256x128xf32>
    %c0_7 = arith.constant 0 : index
    %c0_8 = arith.constant 0 : index
    %c0_9 = arith.constant 0 : index
    %8 = vector.load %arg4[%c0_7, %c0_8, %c0_9] : memref<6x8x128xf32, #tpu.memory_space<vmem>>, vector<1x8x128xf32>
    %9 = vector.shape_cast %8 : vector<1x8x128xf32> to vector<8x128xf32>
    %cst_10 = arith.constant dense<0.000000e+00> : vector<256x128xf32>
    %10 = tpu.matmul %1, %9, %cst_10 {dimension_numbers = #tpu.dot_dimension_numbers<[1], [0], [0], [1], [0, 0, 1, 1], [], []>} : vector<256x8xf32>, vector<8x128xf32>, vector<256x128xf32> -> vector<256x128xf32>
    %11 = arith.addf %7, %10 : vector<256x128xf32>
    %c0_11 = arith.constant 0 : index
    %c0_12 = arith.constant 0 : index
    %c0_13 = arith.constant 0 : index
    %12 = vector.load %arg5[%c0_11, %c0_12, %c0_13] : memref<6x1x128xf32, #tpu.memory_space<vmem>>, vector<1x1x128xf32>
    %13 = vector.shape_cast %12 : vector<1x1x128xf32> to vector<1x128xf32>
    %14 = vector.broadcast %13 : vector<1x128xf32> to vector<256x128xf32>
    %15 = arith.addf %11, %14 : vector<256x128xf32>
    %cst_14 = arith.constant 0.000000e+00 : f32
    %16 = vector.broadcast %cst_14 : f32 to vector<256x128xf32>
    %17 = arith.maximumf %15, %16 : vector<256x128xf32>
    %c0_15 = arith.constant 0 : index
    %c0_16 = arith.constant 0 : index
    %c0_17 = arith.constant 0 : index
    %18 = vector.load %arg6[%c0_15, %c0_16, %c0_17] : memref<6x128x128xf32, #tpu.memory_space<vmem>>, vector<1x128x128xf32>
    %19 = vector.shape_cast %18 : vector<1x128x128xf32> to vector<128x128xf32>
    %cst_18 = arith.constant dense<0.000000e+00> : vector<256x128xf32>
    %20 = tpu.matmul %17, %19, %cst_18 {dimension_numbers = #tpu.dot_dimension_numbers<[1], [0], [0], [1], [0, 0, 1, 1], [], []>} : vector<256x128xf32>, vector<128x128xf32>, vector<256x128xf32> -> vector<256x128xf32>
    %c0_19 = arith.constant 0 : index
    %c0_20 = arith.constant 0 : index
    %c0_21 = arith.constant 0 : index
    %21 = vector.load %arg7[%c0_19, %c0_20, %c0_21] : memref<6x1x128xf32, #tpu.memory_space<vmem>>, vector<1x1x128xf32>
    %22 = vector.shape_cast %21 : vector<1x1x128xf32> to vector<1x128xf32>
    %23 = vector.broadcast %22 : vector<1x128xf32> to vector<256x128xf32>
    %24 = arith.addf %20, %23 : vector<256x128xf32>
    %cst_22 = arith.constant 0.000000e+00 : f32
    %25 = vector.broadcast %cst_22 : f32 to vector<256x128xf32>
    %26 = arith.maximumf %24, %25 : vector<256x128xf32>
    %c0_23 = arith.constant 0 : index
    %c0_24 = arith.constant 0 : index
    %c0_25 = arith.constant 0 : index
    %27 = vector.load %arg8[%c0_23, %c0_24, %c0_25] : memref<6x128x8xf32, #tpu.memory_space<vmem>>, vector<1x128x8xf32>
    %28 = vector.shape_cast %27 : vector<1x128x8xf32> to vector<128x8xf32>
    %cst_26 = arith.constant dense<0.000000e+00> : vector<256x8xf32>
    %29 = tpu.matmul %26, %28, %cst_26 {dimension_numbers = #tpu.dot_dimension_numbers<[1], [0], [0], [1], [0, 0, 1, 1], [], []>} : vector<256x128xf32>, vector<128x8xf32>, vector<256x8xf32> -> vector<256x8xf32>
    %c0_27 = arith.constant 0 : index
    %c0_28 = arith.constant 0 : index
    %c0_29 = arith.constant 0 : index
    %30 = vector.load %arg9[%c0_27, %c0_28, %c0_29] : memref<6x1x8xf32, #tpu.memory_space<vmem>>, vector<1x1x8xf32>
    %31 = vector.shape_cast %30 : vector<1x1x8xf32> to vector<1x8xf32>
    %32 = vector.broadcast %31 : vector<1x8xf32> to vector<256x8xf32>
    %33 = arith.addf %29, %32 : vector<256x8xf32>
    %34 = vector.extract_strided_slice %33 {offsets = [0, 0], sizes = [256, 4], strides = [1, 1]} : vector<256x8xf32> to vector<256x4xf32>
    %35 = math.tanh %34 : vector<256x4xf32>
    %36 = vector.extract_strided_slice %33 {offsets = [0, 4], sizes = [256, 4], strides = [1, 1]} : vector<256x8xf32> to vector<256x4xf32>
    %37 = math.exp %35 : vector<256x4xf32>
    %38 = arith.mulf %2, %37 : vector<256x4xf32>
    %39 = arith.addf %38, %36 : vector<256x4xf32>
    %cst_30 = arith.constant dense<0.000000e+00> : vector<256xf32>
    %40 = vector.multi_reduction <add>, %35, %cst_30 [1] : vector<256x4xf32> to vector<256xf32>
    %41 = vector.shape_cast %40 : vector<256xf32> to vector<256x1xf32>
    %42 = arith.addf %4, %41 : vector<256x1xf32>
    %c1 = arith.constant 1 : index
    %c0_31 = arith.constant 0 : index
    %c0_32 = arith.constant 0 : index
    %43 = vector.load %arg3[%c1, %c0_31, %c0_32] : memref<6x4x128xf32, #tpu.memory_space<vmem>>, vector<1x4x128xf32>
    %44 = vector.shape_cast %43 : vector<1x4x128xf32> to vector<4x128xf32>
    %cst_33 = arith.constant dense<0.000000e+00> : vector<256x128xf32>
    %45 = tpu.matmul %39, %44, %cst_33 {dimension_numbers = #tpu.dot_dimension_numbers<[1], [0], [0], [1], [0, 0, 1, 1], [], []>} : vector<256x4xf32>, vector<4x128xf32>, vector<256x128xf32> -> vector<256x128xf32>
    %c1_34 = arith.constant 1 : index
    %c0_35 = arith.constant 0 : index
    %c0_36 = arith.constant 0 : index
    %46 = vector.load %arg4[%c1_34, %c0_35, %c0_36] : memref<6x8x128xf32, #tpu.memory_space<vmem>>, vector<1x8x128xf32>
    %47 = vector.shape_cast %46 : vector<1x8x128xf32> to vector<8x128xf32>
    %cst_37 = arith.constant dense<0.000000e+00> : vector<256x128xf32>
    %48 = tpu.matmul %1, %47, %cst_37 {dimension_numbers = #tpu.dot_dimension_numbers<[1], [0], [0], [1], [0, 0, 1, 1], [], []>} : vector<256x8xf32>, vector<8x128xf32>, vector<256x128xf32> -> vector<256x128xf32>
    %49 = arith.addf %45, %48 : vector<256x128xf32>
    %c1_38 = arith.constant 1 : index
    %c0_39 = arith.constant 0 : index
    %c0_40 = arith.constant 0 : index
    %50 = vector.load %arg5[%c1_38, %c0_39, %c0_40] : memref<6x1x128xf32, #tpu.memory_space<vmem>>, vector<1x1x128xf32>
    %51 = vector.shape_cast %50 : vector<1x1x128xf32> to vector<1x128xf32>
    %52 = vector.broadcast %51 : vector<1x128xf32> to vector<256x128xf32>
    %53 = arith.addf %49, %52 : vector<256x128xf32>
    %cst_41 = arith.constant 0.000000e+00 : f32
    %54 = vector.broadcast %cst_41 : f32 to vector<256x128xf32>
    %55 = arith.maximumf %53, %54 : vector<256x128xf32>
    %c1_42 = arith.constant 1 : index
    %c0_43 = arith.constant 0 : index
    %c0_44 = arith.constant 0 : index
    %56 = vector.load %arg6[%c1_42, %c0_43, %c0_44] : memref<6x128x128xf32, #tpu.memory_space<vmem>>, vector<1x128x128xf32>
    %57 = vector.shape_cast %56 : vector<1x128x128xf32> to vector<128x128xf32>
    %cst_45 = arith.constant dense<0.000000e+00> : vector<256x128xf32>
    %58 = tpu.matmul %55, %57, %cst_45 {dimension_numbers = #tpu.dot_dimension_numbers<[1], [0], [0], [1], [0, 0, 1, 1], [], []>} : vector<256x128xf32>, vector<128x128xf32>, vector<256x128xf32> -> vector<256x128xf32>
    %c1_46 = arith.constant 1 : index
    %c0_47 = arith.constant 0 : index
    %c0_48 = arith.constant 0 : index
    %59 = vector.load %arg7[%c1_46, %c0_47, %c0_48] : memref<6x1x128xf32, #tpu.memory_space<vmem>>, vector<1x1x128xf32>
    %60 = vector.shape_cast %59 : vector<1x1x128xf32> to vector<1x128xf32>
    %61 = vector.broadcast %60 : vector<1x128xf32> to vector<256x128xf32>
    %62 = arith.addf %58, %61 : vector<256x128xf32>
    %cst_49 = arith.constant 0.000000e+00 : f32
    %63 = vector.broadcast %cst_49 : f32 to vector<256x128xf32>
    %64 = arith.maximumf %62, %63 : vector<256x128xf32>
    %c1_50 = arith.constant 1 : index
    %c0_51 = arith.constant 0 : index
    %c0_52 = arith.constant 0 : index
    %65 = vector.load %arg8[%c1_50, %c0_51, %c0_52] : memref<6x128x8xf32, #tpu.memory_space<vmem>>, vector<1x128x8xf32>
    %66 = vector.shape_cast %65 : vector<1x128x8xf32> to vector<128x8xf32>
    %cst_53 = arith.constant dense<0.000000e+00> : vector<256x8xf32>
    %67 = tpu.matmul %64, %66, %cst_53 {dimension_numbers = #tpu.dot_dimension_numbers<[1], [0], [0], [1], [0, 0, 1, 1], [], []>} : vector<256x128xf32>, vector<128x8xf32>, vector<256x8xf32> -> vector<256x8xf32>
    %c1_54 = arith.constant 1 : index
    %c0_55 = arith.constant 0 : index
    %c0_56 = arith.constant 0 : index
    %68 = vector.load %arg9[%c1_54, %c0_55, %c0_56] : memref<6x1x8xf32, #tpu.memory_space<vmem>>, vector<1x1x8xf32>
    %69 = vector.shape_cast %68 : vector<1x1x8xf32> to vector<1x8xf32>
    %70 = vector.broadcast %69 : vector<1x8xf32> to vector<256x8xf32>
    %71 = arith.addf %67, %70 : vector<256x8xf32>
    %72 = vector.extract_strided_slice %71 {offsets = [0, 0], sizes = [256, 4], strides = [1, 1]} : vector<256x8xf32> to vector<256x4xf32>
    %73 = math.tanh %72 : vector<256x4xf32>
    %74 = vector.extract_strided_slice %71 {offsets = [0, 4], sizes = [256, 4], strides = [1, 1]} : vector<256x8xf32> to vector<256x4xf32>
    %75 = math.exp %73 : vector<256x4xf32>
    %76 = arith.mulf %3, %75 : vector<256x4xf32>
    %77 = arith.addf %76, %74 : vector<256x4xf32>
    %cst_57 = arith.constant dense<0.000000e+00> : vector<256xf32>
    %78 = vector.multi_reduction <add>, %73, %cst_57 [1] : vector<256x4xf32> to vector<256xf32>
    %79 = vector.shape_cast %78 : vector<256xf32> to vector<256x1xf32>
    %80 = arith.addf %42, %79 : vector<256x1xf32>
    %c2 = arith.constant 2 : index
    %c0_58 = arith.constant 0 : index
    %c0_59 = arith.constant 0 : index
    %81 = vector.load %arg3[%c2, %c0_58, %c0_59] : memref<6x4x128xf32, #tpu.memory_space<vmem>>, vector<1x4x128xf32>
    %82 = vector.shape_cast %81 : vector<1x4x128xf32> to vector<4x128xf32>
    %cst_60 = arith.constant dense<0.000000e+00> : vector<256x128xf32>
    %83 = tpu.matmul %77, %82, %cst_60 {dimension_numbers = #tpu.dot_dimension_numbers<[1], [0], [0], [1], [0, 0, 1, 1], [], []>} : vector<256x4xf32>, vector<4x128xf32>, vector<256x128xf32> -> vector<256x128xf32>
    %c2_61 = arith.constant 2 : index
    %c0_62 = arith.constant 0 : index
    %c0_63 = arith.constant 0 : index
    %84 = vector.load %arg4[%c2_61, %c0_62, %c0_63] : memref<6x8x128xf32, #tpu.memory_space<vmem>>, vector<1x8x128xf32>
    %85 = vector.shape_cast %84 : vector<1x8x128xf32> to vector<8x128xf32>
    %cst_64 = arith.constant dense<0.000000e+00> : vector<256x128xf32>
    %86 = tpu.matmul %1, %85, %cst_64 {dimension_numbers = #tpu.dot_dimension_numbers<[1], [0], [0], [1], [0, 0, 1, 1], [], []>} : vector<256x8xf32>, vector<8x128xf32>, vector<256x128xf32> -> vector<256x128xf32>
    %87 = arith.addf %83, %86 : vector<256x128xf32>
    %c2_65 = arith.constant 2 : index
    %c0_66 = arith.constant 0 : index
    %c0_67 = arith.constant 0 : index
    %88 = vector.load %arg5[%c2_65, %c0_66, %c0_67] : memref<6x1x128xf32, #tpu.memory_space<vmem>>, vector<1x1x128xf32>
    %89 = vector.shape_cast %88 : vector<1x1x128xf32> to vector<1x128xf32>
    %90 = vector.broadcast %89 : vector<1x128xf32> to vector<256x128xf32>
    %91 = arith.addf %87, %90 : vector<256x128xf32>
    %cst_68 = arith.constant 0.000000e+00 : f32
    %92 = vector.broadcast %cst_68 : f32 to vector<256x128xf32>
    %93 = arith.maximumf %91, %92 : vector<256x128xf32>
    %c2_69 = arith.constant 2 : index
    %c0_70 = arith.constant 0 : index
    %c0_71 = arith.constant 0 : index
    %94 = vector.load %arg6[%c2_69, %c0_70, %c0_71] : memref<6x128x128xf32, #tpu.memory_space<vmem>>, vector<1x128x128xf32>
    %95 = vector.shape_cast %94 : vector<1x128x128xf32> to vector<128x128xf32>
    %cst_72 = arith.constant dense<0.000000e+00> : vector<256x128xf32>
    %96 = tpu.matmul %93, %95, %cst_72 {dimension_numbers = #tpu.dot_dimension_numbers<[1], [0], [0], [1], [0, 0, 1, 1], [], []>} : vector<256x128xf32>, vector<128x128xf32>, vector<256x128xf32> -> vector<256x128xf32>
    %c2_73 = arith.constant 2 : index
    %c0_74 = arith.constant 0 : index
    %c0_75 = arith.constant 0 : index
    %97 = vector.load %arg7[%c2_73, %c0_74, %c0_75] : memref<6x1x128xf32, #tpu.memory_space<vmem>>, vector<1x1x128xf32>
    %98 = vector.shape_cast %97 : vector<1x1x128xf32> to vector<1x128xf32>
    %99 = vector.broadcast %98 : vector<1x128xf32> to vector<256x128xf32>
    %100 = arith.addf %96, %99 : vector<256x128xf32>
    %cst_76 = arith.constant 0.000000e+00 : f32
    %101 = vector.broadcast %cst_76 : f32 to vector<256x128xf32>
    %102 = arith.maximumf %100, %101 : vector<256x128xf32>
    %c2_77 = arith.constant 2 : index
    %c0_78 = arith.constant 0 : index
    %c0_79 = arith.constant 0 : index
    %103 = vector.load %arg8[%c2_77, %c0_78, %c0_79] : memref<6x128x8xf32, #tpu.memory_space<vmem>>, vector<1x128x8xf32>
    %104 = vector.shape_cast %103 : vector<1x128x8xf32> to vector<128x8xf32>
    %cst_80 = arith.constant dense<0.000000e+00> : vector<256x8xf32>
    %105 = tpu.matmul %102, %104, %cst_80 {dimension_numbers = #tpu.dot_dimension_numbers<[1], [0], [0], [1], [0, 0, 1, 1], [], []>} : vector<256x128xf32>, vector<128x8xf32>, vector<256x8xf32> -> vector<256x8xf32>
    %c2_81 = arith.constant 2 : index
    %c0_82 = arith.constant 0 : index
    %c0_83 = arith.constant 0 : index
    %106 = vector.load %arg9[%c2_81, %c0_82, %c0_83] : memref<6x1x8xf32, #tpu.memory_space<vmem>>, vector<1x1x8xf32>
    %107 = vector.shape_cast %106 : vector<1x1x8xf32> to vector<1x8xf32>
    %108 = vector.broadcast %107 : vector<1x8xf32> to vector<256x8xf32>
    %109 = arith.addf %105, %108 : vector<256x8xf32>
    %110 = vector.extract_strided_slice %109 {offsets = [0, 0], sizes = [256, 4], strides = [1, 1]} : vector<256x8xf32> to vector<256x4xf32>
    %111 = math.tanh %110 : vector<256x4xf32>
    %112 = vector.extract_strided_slice %109 {offsets = [0, 4], sizes = [256, 4], strides = [1, 1]} : vector<256x8xf32> to vector<256x4xf32>
    %113 = math.exp %111 : vector<256x4xf32>
    %114 = arith.mulf %39, %113 : vector<256x4xf32>
    %115 = arith.addf %114, %112 : vector<256x4xf32>
    %cst_84 = arith.constant dense<0.000000e+00> : vector<256xf32>
    %116 = vector.multi_reduction <add>, %111, %cst_84 [1] : vector<256x4xf32> to vector<256xf32>
    %117 = vector.shape_cast %116 : vector<256xf32> to vector<256x1xf32>
    %118 = arith.addf %80, %117 : vector<256x1xf32>
    %c3 = arith.constant 3 : index
    %c0_85 = arith.constant 0 : index
    %c0_86 = arith.constant 0 : index
    %119 = vector.load %arg3[%c3, %c0_85, %c0_86] : memref<6x4x128xf32, #tpu.memory_space<vmem>>, vector<1x4x128xf32>
    %120 = vector.shape_cast %119 : vector<1x4x128xf32> to vector<4x128xf32>
    %cst_87 = arith.constant dense<0.000000e+00> : vector<256x128xf32>
    %121 = tpu.matmul %115, %120, %cst_87 {dimension_numbers = #tpu.dot_dimension_numbers<[1], [0], [0], [1], [0, 0, 1, 1], [], []>} : vector<256x4xf32>, vector<4x128xf32>, vector<256x128xf32> -> vector<256x128xf32>
    %c3_88 = arith.constant 3 : index
    %c0_89 = arith.constant 0 : index
    %c0_90 = arith.constant 0 : index
    %122 = vector.load %arg4[%c3_88, %c0_89, %c0_90] : memref<6x8x128xf32, #tpu.memory_space<vmem>>, vector<1x8x128xf32>
    %123 = vector.shape_cast %122 : vector<1x8x128xf32> to vector<8x128xf32>
    %cst_91 = arith.constant dense<0.000000e+00> : vector<256x128xf32>
    %124 = tpu.matmul %1, %123, %cst_91 {dimension_numbers = #tpu.dot_dimension_numbers<[1], [0], [0], [1], [0, 0, 1, 1], [], []>} : vector<256x8xf32>, vector<8x128xf32>, vector<256x128xf32> -> vector<256x128xf32>
    %125 = arith.addf %121, %124 : vector<256x128xf32>
    %c3_92 = arith.constant 3 : index
    %c0_93 = arith.constant 0 : index
    %c0_94 = arith.constant 0 : index
    %126 = vector.load %arg5[%c3_92, %c0_93, %c0_94] : memref<6x1x128xf32, #tpu.memory_space<vmem>>, vector<1x1x128xf32>
    %127 = vector.shape_cast %126 : vector<1x1x128xf32> to vector<1x128xf32>
    %128 = vector.broadcast %127 : vector<1x128xf32> to vector<256x128xf32>
    %129 = arith.addf %125, %128 : vector<256x128xf32>
    %cst_95 = arith.constant 0.000000e+00 : f32
    %130 = vector.broadcast %cst_95 : f32 to vector<256x128xf32>
    %131 = arith.maximumf %129, %130 : vector<256x128xf32>
    %c3_96 = arith.constant 3 : index
    %c0_97 = arith.constant 0 : index
    %c0_98 = arith.constant 0 : index
    %132 = vector.load %arg6[%c3_96, %c0_97, %c0_98] : memref<6x128x128xf32, #tpu.memory_space<vmem>>, vector<1x128x128xf32>
    %133 = vector.shape_cast %132 : vector<1x128x128xf32> to vector<128x128xf32>
    %cst_99 = arith.constant dense<0.000000e+00> : vector<256x128xf32>
    %134 = tpu.matmul %131, %133, %cst_99 {dimension_numbers = #tpu.dot_dimension_numbers<[1], [0], [0], [1], [0, 0, 1, 1], [], []>} : vector<256x128xf32>, vector<128x128xf32>, vector<256x128xf32> -> vector<256x128xf32>
    %c3_100 = arith.constant 3 : index
    %c0_101 = arith.constant 0 : index
    %c0_102 = arith.constant 0 : index
    %135 = vector.load %arg7[%c3_100, %c0_101, %c0_102] : memref<6x1x128xf32, #tpu.memory_space<vmem>>, vector<1x1x128xf32>
    %136 = vector.shape_cast %135 : vector<1x1x128xf32> to vector<1x128xf32>
    %137 = vector.broadcast %136 : vector<1x128xf32> to vector<256x128xf32>
    %138 = arith.addf %134, %137 : vector<256x128xf32>
    %cst_103 = arith.constant 0.000000e+00 : f32
    %139 = vector.broadcast %cst_103 : f32 to vector<256x128xf32>
    %140 = arith.maximumf %138, %139 : vector<256x128xf32>
    %c3_104 = arith.constant 3 : index
    %c0_105 = arith.constant 0 : index
    %c0_106 = arith.constant 0 : index
    %141 = vector.load %arg8[%c3_104, %c0_105, %c0_106] : memref<6x128x8xf32, #tpu.memory_space<vmem>>, vector<1x128x8xf32>
    %142 = vector.shape_cast %141 : vector<1x128x8xf32> to vector<128x8xf32>
    %cst_107 = arith.constant dense<0.000000e+00> : vector<256x8xf32>
    %143 = tpu.matmul %140, %142, %cst_107 {dimension_numbers = #tpu.dot_dimension_numbers<[1], [0], [0], [1], [0, 0, 1, 1], [], []>} : vector<256x128xf32>, vector<128x8xf32>, vector<256x8xf32> -> vector<256x8xf32>
    %c3_108 = arith.constant 3 : index
    %c0_109 = arith.constant 0 : index
    %c0_110 = arith.constant 0 : index
    %144 = vector.load %arg9[%c3_108, %c0_109, %c0_110] : memref<6x1x8xf32, #tpu.memory_space<vmem>>, vector<1x1x8xf32>
    %145 = vector.shape_cast %144 : vector<1x1x8xf32> to vector<1x8xf32>
    %146 = vector.broadcast %145 : vector<1x8xf32> to vector<256x8xf32>
    %147 = arith.addf %143, %146 : vector<256x8xf32>
    %148 = vector.extract_strided_slice %147 {offsets = [0, 0], sizes = [256, 4], strides = [1, 1]} : vector<256x8xf32> to vector<256x4xf32>
    %149 = math.tanh %148 : vector<256x4xf32>
    %150 = vector.extract_strided_slice %147 {offsets = [0, 4], sizes = [256, 4], strides = [1, 1]} : vector<256x8xf32> to vector<256x4xf32>
    %151 = math.exp %149 : vector<256x4xf32>
    %152 = arith.mulf %77, %151 : vector<256x4xf32>
    %153 = arith.addf %152, %150 : vector<256x4xf32>
    %cst_111 = arith.constant dense<0.000000e+00> : vector<256xf32>
    %154 = vector.multi_reduction <add>, %149, %cst_111 [1] : vector<256x4xf32> to vector<256xf32>
    %155 = vector.shape_cast %154 : vector<256xf32> to vector<256x1xf32>
    %156 = arith.addf %118, %155 : vector<256x1xf32>
    %c4 = arith.constant 4 : index
    %c0_112 = arith.constant 0 : index
    %c0_113 = arith.constant 0 : index
    %157 = vector.load %arg3[%c4, %c0_112, %c0_113] : memref<6x4x128xf32, #tpu.memory_space<vmem>>, vector<1x4x128xf32>
    %158 = vector.shape_cast %157 : vector<1x4x128xf32> to vector<4x128xf32>
    %cst_114 = arith.constant dense<0.000000e+00> : vector<256x128xf32>
    %159 = tpu.matmul %153, %158, %cst_114 {dimension_numbers = #tpu.dot_dimension_numbers<[1], [0], [0], [1], [0, 0, 1, 1], [], []>} : vector<256x4xf32>, vector<4x128xf32>, vector<256x128xf32> -> vector<256x128xf32>
    %c4_115 = arith.constant 4 : index
    %c0_116 = arith.constant 0 : index
    %c0_117 = arith.constant 0 : index
    %160 = vector.load %arg4[%c4_115, %c0_116, %c0_117] : memref<6x8x128xf32, #tpu.memory_space<vmem>>, vector<1x8x128xf32>
    %161 = vector.shape_cast %160 : vector<1x8x128xf32> to vector<8x128xf32>
    %cst_118 = arith.constant dense<0.000000e+00> : vector<256x128xf32>
    %162 = tpu.matmul %1, %161, %cst_118 {dimension_numbers = #tpu.dot_dimension_numbers<[1], [0], [0], [1], [0, 0, 1, 1], [], []>} : vector<256x8xf32>, vector<8x128xf32>, vector<256x128xf32> -> vector<256x128xf32>
    %163 = arith.addf %159, %162 : vector<256x128xf32>
    %c4_119 = arith.constant 4 : index
    %c0_120 = arith.constant 0 : index
    %c0_121 = arith.constant 0 : index
    %164 = vector.load %arg5[%c4_119, %c0_120, %c0_121] : memref<6x1x128xf32, #tpu.memory_space<vmem>>, vector<1x1x128xf32>
    %165 = vector.shape_cast %164 : vector<1x1x128xf32> to vector<1x128xf32>
    %166 = vector.broadcast %165 : vector<1x128xf32> to vector<256x128xf32>
    %167 = arith.addf %163, %166 : vector<256x128xf32>
    %cst_122 = arith.constant 0.000000e+00 : f32
    %168 = vector.broadcast %cst_122 : f32 to vector<256x128xf32>
    %169 = arith.maximumf %167, %168 : vector<256x128xf32>
    %c4_123 = arith.constant 4 : index
    %c0_124 = arith.constant 0 : index
    %c0_125 = arith.constant 0 : index
    %170 = vector.load %arg6[%c4_123, %c0_124, %c0_125] : memref<6x128x128xf32, #tpu.memory_space<vmem>>, vector<1x128x128xf32>
    %171 = vector.shape_cast %170 : vector<1x128x128xf32> to vector<128x128xf32>
    %cst_126 = arith.constant dense<0.000000e+00> : vector<256x128xf32>
    %172 = tpu.matmul %169, %171, %cst_126 {dimension_numbers = #tpu.dot_dimension_numbers<[1], [0], [0], [1], [0, 0, 1, 1], [], []>} : vector<256x128xf32>, vector<128x128xf32>, vector<256x128xf32> -> vector<256x128xf32>
    %c4_127 = arith.constant 4 : index
    %c0_128 = arith.constant 0 : index
    %c0_129 = arith.constant 0 : index
    %173 = vector.load %arg7[%c4_127, %c0_128, %c0_129] : memref<6x1x128xf32, #tpu.memory_space<vmem>>, vector<1x1x128xf32>
    %174 = vector.shape_cast %173 : vector<1x1x128xf32> to vector<1x128xf32>
    %175 = vector.broadcast %174 : vector<1x128xf32> to vector<256x128xf32>
    %176 = arith.addf %172, %175 : vector<256x128xf32>
    %cst_130 = arith.constant 0.000000e+00 : f32
    %177 = vector.broadcast %cst_130 : f32 to vector<256x128xf32>
    %178 = arith.maximumf %176, %177 : vector<256x128xf32>
    %c4_131 = arith.constant 4 : index
    %c0_132 = arith.constant 0 : index
    %c0_133 = arith.constant 0 : index
    %179 = vector.load %arg8[%c4_131, %c0_132, %c0_133] : memref<6x128x8xf32, #tpu.memory_space<vmem>>, vector<1x128x8xf32>
    %180 = vector.shape_cast %179 : vector<1x128x8xf32> to vector<128x8xf32>
    %cst_134 = arith.constant dense<0.000000e+00> : vector<256x8xf32>
    %181 = tpu.matmul %178, %180, %cst_134 {dimension_numbers = #tpu.dot_dimension_numbers<[1], [0], [0], [1], [0, 0, 1, 1], [], []>} : vector<256x128xf32>, vector<128x8xf32>, vector<256x8xf32> -> vector<256x8xf32>
    %c4_135 = arith.constant 4 : index
    %c0_136 = arith.constant 0 : index
    %c0_137 = arith.constant 0 : index
    %182 = vector.load %arg9[%c4_135, %c0_136, %c0_137] : memref<6x1x8xf32, #tpu.memory_space<vmem>>, vector<1x1x8xf32>
    %183 = vector.shape_cast %182 : vector<1x1x8xf32> to vector<1x8xf32>
    %184 = vector.broadcast %183 : vector<1x8xf32> to vector<256x8xf32>
    %185 = arith.addf %181, %184 : vector<256x8xf32>
    %186 = vector.extract_strided_slice %185 {offsets = [0, 0], sizes = [256, 4], strides = [1, 1]} : vector<256x8xf32> to vector<256x4xf32>
    %187 = math.tanh %186 : vector<256x4xf32>
    %188 = vector.extract_strided_slice %185 {offsets = [0, 4], sizes = [256, 4], strides = [1, 1]} : vector<256x8xf32> to vector<256x4xf32>
    %189 = math.exp %187 : vector<256x4xf32>
    %190 = arith.mulf %115, %189 : vector<256x4xf32>
    %191 = arith.addf %190, %188 : vector<256x4xf32>
    %cst_138 = arith.constant dense<0.000000e+00> : vector<256xf32>
    %192 = vector.multi_reduction <add>, %187, %cst_138 [1] : vector<256x4xf32> to vector<256xf32>
    %193 = vector.shape_cast %192 : vector<256xf32> to vector<256x1xf32>
    %194 = arith.addf %156, %193 : vector<256x1xf32>
    %c5 = arith.constant 5 : index
    %c0_139 = arith.constant 0 : index
    %c0_140 = arith.constant 0 : index
    %195 = vector.load %arg3[%c5, %c0_139, %c0_140] : memref<6x4x128xf32, #tpu.memory_space<vmem>>, vector<1x4x128xf32>
    %196 = vector.shape_cast %195 : vector<1x4x128xf32> to vector<4x128xf32>
    %cst_141 = arith.constant dense<0.000000e+00> : vector<256x128xf32>
    %197 = tpu.matmul %191, %196, %cst_141 {dimension_numbers = #tpu.dot_dimension_numbers<[1], [0], [0], [1], [0, 0, 1, 1], [], []>} : vector<256x4xf32>, vector<4x128xf32>, vector<256x128xf32> -> vector<256x128xf32>
    %c5_142 = arith.constant 5 : index
    %c0_143 = arith.constant 0 : index
    %c0_144 = arith.constant 0 : index
    %198 = vector.load %arg4[%c5_142, %c0_143, %c0_144] : memref<6x8x128xf32, #tpu.memory_space<vmem>>, vector<1x8x128xf32>
    %199 = vector.shape_cast %198 : vector<1x8x128xf32> to vector<8x128xf32>
    %cst_145 = arith.constant dense<0.000000e+00> : vector<256x128xf32>
    %200 = tpu.matmul %1, %199, %cst_145 {dimension_numbers = #tpu.dot_dimension_numbers<[1], [0], [0], [1], [0, 0, 1, 1], [], []>} : vector<256x8xf32>, vector<8x128xf32>, vector<256x128xf32> -> vector<256x128xf32>
    %201 = arith.addf %197, %200 : vector<256x128xf32>
    %c5_146 = arith.constant 5 : index
    %c0_147 = arith.constant 0 : index
    %c0_148 = arith.constant 0 : index
    %202 = vector.load %arg5[%c5_146, %c0_147, %c0_148] : memref<6x1x128xf32, #tpu.memory_space<vmem>>, vector<1x1x128xf32>
    %203 = vector.shape_cast %202 : vector<1x1x128xf32> to vector<1x128xf32>
    %204 = vector.broadcast %203 : vector<1x128xf32> to vector<256x128xf32>
    %205 = arith.addf %201, %204 : vector<256x128xf32>
    %cst_149 = arith.constant 0.000000e+00 : f32
    %206 = vector.broadcast %cst_149 : f32 to vector<256x128xf32>
    %207 = arith.maximumf %205, %206 : vector<256x128xf32>
    %c5_150 = arith.constant 5 : index
    %c0_151 = arith.constant 0 : index
    %c0_152 = arith.constant 0 : index
    %208 = vector.load %arg6[%c5_150, %c0_151, %c0_152] : memref<6x128x128xf32, #tpu.memory_space<vmem>>, vector<1x128x128xf32>
    %209 = vector.shape_cast %208 : vector<1x128x128xf32> to vector<128x128xf32>
    %cst_153 = arith.constant dense<0.000000e+00> : vector<256x128xf32>
    %210 = tpu.matmul %207, %209, %cst_153 {dimension_numbers = #tpu.dot_dimension_numbers<[1], [0], [0], [1], [0, 0, 1, 1], [], []>} : vector<256x128xf32>, vector<128x128xf32>, vector<256x128xf32> -> vector<256x128xf32>
    %c5_154 = arith.constant 5 : index
    %c0_155 = arith.constant 0 : index
    %c0_156 = arith.constant 0 : index
    %211 = vector.load %arg7[%c5_154, %c0_155, %c0_156] : memref<6x1x128xf32, #tpu.memory_space<vmem>>, vector<1x1x128xf32>
    %212 = vector.shape_cast %211 : vector<1x1x128xf32> to vector<1x128xf32>
    %213 = vector.broadcast %212 : vector<1x128xf32> to vector<256x128xf32>
    %214 = arith.addf %210, %213 : vector<256x128xf32>
    %cst_157 = arith.constant 0.000000e+00 : f32
    %215 = vector.broadcast %cst_157 : f32 to vector<256x128xf32>
    %216 = arith.maximumf %214, %215 : vector<256x128xf32>
    %c5_158 = arith.constant 5 : index
    %c0_159 = arith.constant 0 : index
    %c0_160 = arith.constant 0 : index
    %217 = vector.load %arg8[%c5_158, %c0_159, %c0_160] : memref<6x128x8xf32, #tpu.memory_space<vmem>>, vector<1x128x8xf32>
    %218 = vector.shape_cast %217 : vector<1x128x8xf32> to vector<128x8xf32>
    %cst_161 = arith.constant dense<0.000000e+00> : vector<256x8xf32>
    %219 = tpu.matmul %216, %218, %cst_161 {dimension_numbers = #tpu.dot_dimension_numbers<[1], [0], [0], [1], [0, 0, 1, 1], [], []>} : vector<256x128xf32>, vector<128x8xf32>, vector<256x8xf32> -> vector<256x8xf32>
    %c5_162 = arith.constant 5 : index
    %c0_163 = arith.constant 0 : index
    %c0_164 = arith.constant 0 : index
    %220 = vector.load %arg9[%c5_162, %c0_163, %c0_164] : memref<6x1x8xf32, #tpu.memory_space<vmem>>, vector<1x1x8xf32>
    %221 = vector.shape_cast %220 : vector<1x1x8xf32> to vector<1x8xf32>
    %222 = vector.broadcast %221 : vector<1x8xf32> to vector<256x8xf32>
    %223 = arith.addf %219, %222 : vector<256x8xf32>
    %224 = vector.extract_strided_slice %223 {offsets = [0, 0], sizes = [256, 4], strides = [1, 1]} : vector<256x8xf32> to vector<256x4xf32>
    %225 = math.tanh %224 : vector<256x4xf32>
    %226 = vector.extract_strided_slice %223 {offsets = [0, 4], sizes = [256, 4], strides = [1, 1]} : vector<256x8xf32> to vector<256x4xf32>
    %227 = math.exp %225 : vector<256x4xf32>
    %228 = arith.mulf %153, %227 : vector<256x4xf32>
    %229 = arith.addf %228, %226 : vector<256x4xf32>
    %cst_165 = arith.constant dense<0.000000e+00> : vector<256xf32>
    %230 = vector.multi_reduction <add>, %225, %cst_165 [1] : vector<256x4xf32> to vector<256xf32>
    %231 = vector.shape_cast %230 : vector<256xf32> to vector<256x1xf32>
    %232 = arith.addf %194, %231 : vector<256x1xf32>
    %233 = tpu.concatenate %191, %229 in 1 : vector<256x4xf32>, vector<256x4xf32> -> vector<256x8xf32>
    %234 = arith.mulf %233, %233 : vector<256x8xf32>
    %cst_166 = arith.constant dense<0.000000e+00> : vector<256xf32>
    %235 = vector.multi_reduction <add>, %234, %cst_166 [1] : vector<256x8xf32> to vector<256xf32>
    %236 = vector.shape_cast %235 : vector<256xf32> to vector<256x1xf32>
    %cst_167 = arith.constant -5.000000e-01 : f32
    %237 = vector.broadcast %cst_167 : f32 to vector<256x1xf32>
    %238 = arith.mulf %237, %236 : vector<256x1xf32>
    %239 = tpu.concatenate %233, %232, %238 in 1 : vector<256x8xf32>, vector<256x1xf32>, vector<256x1xf32> -> vector<256x10xf32>
    %c0_168 = arith.constant 0 : index
    %c0_169 = arith.constant 0 : index
    %240 = vector.load %arg10[%c0_168, %c0_169] : memref<256x10xf32, #tpu.memory_space<vmem>>, vector<256x10xf32>
    tpu.vector_store %arg10[%c0_168, %c0_169], %239 {strides = array<i32>} : memref<256x10xf32, #tpu.memory_space<vmem>>, vector<256x10xf32>,
    return
  }
  func.func @transform_0(%arg0: i32) -> (i32, i32) {
    %c0_i32 = arith.constant 0 : i32
    %c0_i32_0 = arith.constant 0 : i32
    return %arg0, %c0_i32 : i32, i32
  }
  func.func @transform_1(%arg0: i32) -> (i32, i32) {
    %c0_i32 = arith.constant 0 : i32
    %c0_i32_0 = arith.constant 0 : i32
    return %arg0, %c0_i32 : i32, i32
  }
  func.func @transform_2(%arg0: i32) -> (i32, i32, i32) {
    %c0_i32 = arith.constant 0 : i32
    %c0_i32_0 = arith.constant 0 : i32
    %c0_i32_1 = arith.constant 0 : i32
    %c0_i32_2 = arith.constant 0 : i32
    return %c0_i32, %c0_i32_0, %c0_i32_1 : i32, i32, i32
  }
  func.func @transform_3(%arg0: i32) -> (i32, i32, i32) {
    %c0_i32 = arith.constant 0 : i32
    %c0_i32_0 = arith.constant 0 : i32
    %c0_i32_1 = arith.constant 0 : i32
    %c0_i32_2 = arith.constant 0 : i32
    return %c0_i32, %c0_i32_0, %c0_i32_1 : i32, i32, i32
  }
  func.func @transform_4(%arg0: i32) -> (i32, i32, i32) {
    %c0_i32 = arith.constant 0 : i32
    %c0_i32_0 = arith.constant 0 : i32
    %c0_i32_1 = arith.constant 0 : i32
    %c0_i32_2 = arith.constant 0 : i32
    return %c0_i32, %c0_i32_0, %c0_i32_1 : i32, i32, i32
  }
  func.func @transform_5(%arg0: i32) -> (i32, i32, i32) {
    %c0_i32 = arith.constant 0 : i32
    %c0_i32_0 = arith.constant 0 : i32
    %c0_i32_1 = arith.constant 0 : i32
    %c0_i32_2 = arith.constant 0 : i32
    return %c0_i32, %c0_i32_0, %c0_i32_1 : i32, i32, i32
  }
  func.func @transform_6(%arg0: i32) -> (i32, i32, i32) {
    %c0_i32 = arith.constant 0 : i32
    %c0_i32_0 = arith.constant 0 : i32
    %c0_i32_1 = arith.constant 0 : i32
    %c0_i32_2 = arith.constant 0 : i32
    return %c0_i32, %c0_i32_0, %c0_i32_1 : i32, i32, i32
  }
  func.func @transform_7(%arg0: i32) -> (i32, i32, i32) {
    %c0_i32 = arith.constant 0 : i32
    %c0_i32_0 = arith.constant 0 : i32
    %c0_i32_1 = arith.constant 0 : i32
    %c0_i32_2 = arith.constant 0 : i32
    return %c0_i32, %c0_i32_0, %c0_i32_1 : i32, i32, i32
  }
  func.func @transform_8(%arg0: i32) -> (i32, i32, i32) {
    %c0_i32 = arith.constant 0 : i32
    %c0_i32_0 = arith.constant 0 : i32
    %c0_i32_1 = arith.constant 0 : i32
    %c0_i32_2 = arith.constant 0 : i32
    return %c0_i32, %c0_i32_0, %c0_i32_1 : i32, i32, i32
  }
  func.func @transform_9(%arg0: i32) -> (i32, i32) {
    %c0_i32 = arith.constant 0 : i32
    %c0_i32_0 = arith.constant 0 : i32
    return %arg0, %c0_i32 : i32, i32
  }
}

</mosaic_0001>

<bundles_post_ra>
// kernel: tpu_custom_call.1
= control target key start
LH: loop header
LB: loop body
LE: loop exit
PB: predicated region body
PF: predicated region fallthrough
CT: control target
= control target key end

     0   :  { %s14702_s30 = smov 0   ;;  %s20492_s0 = inlined_call_operand.vmem [shape: f32[512,8], index: 0, kind: input, shape index: {}]   ;;  %s20493_s1 = inlined_call_operand.vmem [shape: f32[512,8], index: 1, kind: input, shape index: {}]   ;;  %s20494_s2 = inlined_call_operand.vmem [shape: f32[6,4,128], index: 2, kind: input, shape index: {}]   ;;  %s20495_s3 = inlined_call_operand.vmem [shape: f32[6,8,128], index: 3, kind: input, shape index: {}]   ;;  %s20496_s4 = inlined_call_operand.vmem [shape: f32[6,1,128], index: 4, kind: input, shape index: {}]   ;;  %s20497_s5 = inlined_call_operand.vmem [shape: f32[6,128,128], index: 5, kind: input, shape index: {}]   ;;  %s20498_s6 = inlined_call_operand.vmem [shape: f32[6,1,128], index: 6, kind: input, shape index: {}]   ;;  %s20499_s7 = inlined_call_operand.vmem [shape: f32[6,128,8], index: 7, kind: input, shape index: {}]   ;;  %s20500_s8 = inlined_call_operand.vmem [shape: f32[6,1,8], index: 8, kind: input, shape index: {}]   ;;  %s20501_s9 = inlined_call_operand.vmem [shape: f32[512,10], index: 9, kind: output, shape index: {}]  }
   0x1 LB: > { %s10502_s10 = sadd.s32 4294967295, %s14648_s30   ;;  %p10506_p0 = scmp.ge.s32.totalorder %s14648_s30, 1  ;;  %s14648_s30 = sphi %s14702_s30, %s19_s30  }
   0x2   : > { %p299_p1 = scmp.lt.s32.totalorder %s14648_s30, 3 }
   0x4   : > { %p300_p2 = pnand %p10506_p0, %p299_p1 }
   0x6   : > { %303 = sbr.rel (%p300_p2) target bundleno = 5591 (0x15d7), region = 56 }
   0xb   : > { %s10507_s11 = sshll.u32 %s10502_s10, 5  ;;  %v423_v0 = vld [vmem:[%s20495_s3] sm:$0xff]  ;;  %vm907_vm0 = vcmask 1043456   ;;  %s14650_s20 = smov 124   ;;  %vm424_vm1 = vcmask 64512   ;;  %v1222_v53 = vld [vmem:[%s20497_s5 + $0x78] sm:$0xff] }
   0xc   : > { %p341_p3 = scmp.lt.s32.totalorder %s10507_s11, 63  ;;  %12080 = vmatprep.subr.mxu0 %v423_v0  ;;  %v422_v1 = vld [vmem:[%s20494_s2] sm:$0xf]  ;;  %v1221_v54 = vld [vmem:[%s20497_s5 + $0x70] sm:$0xff]  ;;  %v1220_v59 = vld [vmem:[%s20497_s5 + $0x68] sm:$0xff]  ;;  %vm842_vm2 = vcmask 31744  }
   0xd   : > { %12081 = vmatpush3.msra.mxu0 %v423_v0  ;;  %12130 = vmatprep.subr.msk.mxu1 %vm907_vm0, %v422_v1  ;;  %v1219_v0 = vld [vmem:[%s20497_s5 + $0x60] sm:$0xff]  ;;  %s14651_s24 = smov 4   ;;  %vm10368_vm3 = vcmask 72704   ;;  %vm10401_vm4 = vcmask 80896  }
   0xe   : > { %s21532_s11 = smov (!%p341_p3, %s10507_s11), 63  ;;  %12131 = vmatpush3.msk.msra.mxu1 %vm907_vm0, %v422_v1  ;;  %12180 = vmatprep.subr.mxu0 %v1222_v53 }
   0xf   : > { %s14718_s16 = sshll.u32 %s21532_s11, 3 }
  0x10   : > { %s14724_s19 = scalar_lea.vmem %s20492_s0, %s14718_s16  ;;  %s14740_s23 = scalar_lea.vmem %s20493_s1, %s14718_s16 }
  0x11   : > { %v358_v2 = vld [vmem:[%s14724_s19] sm:$0xff]  ;;  %v360_v3 = vld [vmem:[%s14724_s19 + $0x10] sm:$0xff]  ;;  %v359_v4 = vld [vmem:[%s14724_s19 + $0x8] sm:$0xff]  ;;  %s20359_s28 = scalar_lea.vmem %s20501_s9, %s14718_s16 }
  0x12   : > { %778 = vrot.lane.b32.xlu0 %v358_v2, %s14650_s20  ;;  %782 = vrot.lane.b32.xlu1 %v360_v3, %s14650_s20  ;;  %v361_v5 = vld [vmem:[%s14724_s19 + $0x18] sm:$0xff]  ;;  %v362_v6 = vld [vmem:[%s14724_s19 + $0x20] sm:$0xff] }
  0x13   : > { %v363_v7 = vld [vmem:[%s14724_s19 + $0x28] sm:$0xff]  ;;  %v364_v8 = vld [vmem:[%s14724_s19 + $0x30] sm:$0xff]  ;;  %v365_v9 = vld [vmem:[%s14724_s19 + $0x38] sm:$0xff] }
  0x14   : > { %v14747_v10 = vld [vmem:[%s14740_s23] sm:$0xff]  ;;  %v391_v11 = vld [vmem:[%s14740_s23 + $0x8] sm:$0xff]  ;;  %v392_v12 = vld [vmem:[%s14740_s23 + $0x10] sm:$0xff] }
  0x15   : > { %12082 = vmatprep.mubr.msk.f32.mxu0 %vm424_vm1, %v14747_v10  ;;  %v366_v13 = vld [vmem:[%s14724_s19 + $0x40] sm:$0xff]  ;;  %v367_v14 = vld [vmem:[%s14724_s19 + $0x48] sm:$0xff]  ;;  %v393_v15 = vld [vmem:[%s14740_s23 + $0x18] sm:$0xff] }
  0x16   : > { %780 = vrot.lane.b32.xlu0 %v359_v4, %s14650_s20  ;;  %784 = vrot.lane.b32.xlu1 %v361_v5, %s14650_s20  ;;  %v394_v16 = vld [vmem:[%s14740_s23 + $0x20] sm:$0xff]  ;;  %v368_v17 = vld [vmem:[%s14724_s19 + $0x50] sm:$0xff] }
  0x17   : > { %12083 = vmatmul.mubr.msk.f32.vlgmr.msra.gmra.mxu0 %vm424_vm1, %v391_v11  ;;  %v369_v18 = vld [vmem:[%s14724_s19 + $0x58] sm:$0xff]  ;;  %v395_v19 = vld [vmem:[%s14740_s23 + $0x28] sm:$0xff]  ;;  %v396_v20 = vld [vmem:[%s14740_s23 + $0x30] sm:$0xff] }
  0x18   : > { %12085 = vmatprep.mubr.msk.f32.mxu0 %vm424_vm1, %v392_v12  ;;  %v370_v21 = vld [vmem:[%s14724_s19 + $0x60] sm:$0xff]  ;;  %v371_v22 = vld [vmem:[%s14724_s19 + $0x68] sm:$0xff]  ;;  %v397_v23 = vld [vmem:[%s14740_s23 + $0x38] sm:$0xff]  ;;  %12181 = vmatpush3.msra.mxu0 %v1222_v53 }
  0x19   : > { %v398_v24 = vld [vmem:[%s14740_s23 + $0x40] sm:$0xff]  ;;  %v372_v25 = vld [vmem:[%s14724_s19 + $0x70] sm:$0xff]  ;;  %v373_v26 = vld [vmem:[%s14724_s19 + $0x78] sm:$0xff]  ;;  %12182 = vmatprep.subr.mxu0 %v1221_v54 }
  0x1a   : > { %786 = vrot.lane.b32.xlu0 %v362_v6, %s14650_s20  ;;  %788 = vrot.lane.b32.xlu1 %v363_v7, %s14650_s20  ;;  %v399_v27 = vld [vmem:[%s14740_s23 + $0x48] sm:$0xff]  ;;  %v400_v28 = vld [vmem:[%s14740_s23 + $0x50] sm:$0xff] }
  0x1b   : > { %12086 = vmatmul.mubr.msk.f32.gmra.mxu0 %vm424_vm1, %v393_v15  ;;  %v374_v29 = vld [vmem:[%s14724_s19 + $0x80] sm:$0xff]  ;;  %v375_v30 = vld [vmem:[%s14724_s19 + $0x88] sm:$0xff]  ;;  %v401_v31 = vld [vmem:[%s14740_s23 + $0x58] sm:$0xff] }
  0x1c   : > { %12088 = vmatprep.mubr.msk.f32.mxu0 %vm424_vm1, %v394_v16  ;;  %v402_v32 = vld [vmem:[%s14740_s23 + $0x60] sm:$0xff]  ;;  %v376_v33 = vld [vmem:[%s14724_s19 + $0x90] sm:$0xff]  ;;  %v377_v34 = vld [vmem:[%s14724_s19 + $0x98] sm:$0xff]  ;;  %12183 = vmatpush3.msra.mxu0 %v1221_v54 }
  0x1d   : > { %v403_v35 = vld [vmem:[%s14740_s23 + $0x68] sm:$0xff]  ;;  %v404_v36 = vld [vmem:[%s14740_s23 + $0x70] sm:$0xff]  ;;  %v378_v37 = vld [vmem:[%s14724_s19 + $0xa0] sm:$0xff]  ;;  %12184 = vmatprep.subr.mxu0 %v1220_v59 }
  0x1e   : > { %790 = vrot.lane.b32.xlu0 %v364_v8, %s14650_s20  ;;  %792 = vrot.lane.b32.xlu1 %v365_v9, %s14650_s20  ;;  %v379_v38 = vld [vmem:[%s14724_s19 + $0xa8] sm:$0xff]  ;;  %v405_v39 = vld [vmem:[%s14740_s23 + $0x78] sm:$0xff] }
  0x1f   : > { %12089 = vmatmul.mubr.msk.f32.gmra.mxu0 %vm424_vm1, %v395_v19  ;;  %v406_v40 = vld [vmem:[%s14740_s23 + $0x80] sm:$0xff]  ;;  %v380_v41 = vld [vmem:[%s14724_s19 + $0xb0] sm:$0xff]  ;;  %v381_v42 = vld [vmem:[%s14724_s19 + $0xb8] sm:$0xff] }
  0x20   : > { %12091 = vmatprep.mubr.msk.f32.mxu0 %vm424_vm1, %v396_v20  ;;  %v407_v43 = vld [vmem:[%s14740_s23 + $0x88] sm:$0xff]  ;;  %v408_v44 = vld [vmem:[%s14740_s23 + $0x90] sm:$0xff]  ;;  %v382_v45 = vld [vmem:[%s14724_s19 + $0xc0] sm:$0xff]  ;;  %12185 = vmatpush3.msra.mxu0 %v1220_v59 }
  0x21   : > { %v383_v46 = vld [vmem:[%s14724_s19 + $0xc8] sm:$0xff]  ;;  %v409_v47 = vld [vmem:[%s14740_s23 + $0x98] sm:$0xff]  ;;  %v410_v48 = vld [vmem:[%s14740_s23 + $0xa0] sm:$0xff]  ;;  %12186 = vmatprep.subr.mxu0 %v1219_v0 }
  0x22   : > { %794 = vrot.lane.b32.xlu0 %v366_v13, %s14650_s20  ;;  %796 = vrot.lane.b32.xlu1 %v367_v14, %s14650_s20  ;;  %v384_v49 = vld [vmem:[%s14724_s19 + $0xd0] sm:$0xff]  ;;  %v385_v50 = vld [vmem:[%s14724_s19 + $0xd8] sm:$0xff] }
  0x23   : > { %12092 = vmatmul.mubr.msk.f32.gmra.mxu0 %vm424_vm1, %v397_v23  ;;  %v411_v51 = vld [vmem:[%s14740_s23 + $0xa8] sm:$0xff]  ;;  %v412_v52 = vld [vmem:[%s14740_s23 + $0xb0] sm:$0xff]  ;;  %v386_v55 = vld [vmem:[%s14724_s19 + $0xe0] sm:$0xff] }
  0x24   : > { %12094 = vmatprep.mubr.msk.f32.mxu0 %vm424_vm1, %v398_v24  ;;  %v387_v56 = vld [vmem:[%s14724_s19 + $0xe8] sm:$0xff]  ;;  %v413_v57 = vld [vmem:[%s14740_s23 + $0xb8] sm:$0xff]  ;;  %v414_v58 = vld [vmem:[%s14740_s23 + $0xc0] sm:$0xff]  ;;  %12187 = vmatpush3.msra.mxu0 %v1219_v0 }
  0x25   : > { %v388_v60 = vld [vmem:[%s14724_s19 + $0xf0] sm:$0xff]  ;;  %v389_v61 = vld [vmem:[%s14724_s19 + $0xf8] sm:$0xff]  ;;  %v415_v62 = vld [vmem:[%s14740_s23 + $0xc8] sm:$0xff] }
  0x26   : > { %798 = vrot.lane.b32.xlu0 %v368_v17, %s14650_s20  ;;  %800 = vrot.lane.b32.xlu1 %v369_v18, %s14650_s20  ;;  %v416_v63 = vld [vmem:[%s14740_s23 + $0xd0] sm:$0xff]  ;;  %v417_v1 = vld [vmem:[%s14740_s23 + $0xd8] sm:$0xff] }
  0x27   : > { %12095 = vmatmul.mubr.msk.f32.gmra.mxu0 %vm424_vm1, %v399_v27  ;;  %v1218_v2 = vld [vmem:[%s20497_s5 + $0x58] sm:$0xff]  ;;  %v418_v3 = vld [vmem:[%s14740_s23 + $0xe0] sm:$0xff]  ;;  %v1217_v4 = vld [vmem:[%s20497_s5 + $0x50] sm:$0xff] }
  0x28   : > { %12097 = vmatprep.mubr.msk.f32.mxu0 %vm424_vm1, %v400_v28  ;;  %12188 = vmatprep.subr.mxu0 %v1218_v2  ;;  %v419_v5 = vld [vmem:[%s14740_s23 + $0xe8] sm:$0xff]  ;;  %v420_v7 = vld [vmem:[%s14740_s23 + $0xf0] sm:$0xff]  ;;  %v1215_v8 = vld [vmem:[%s20497_s5 + $0x40] sm:$0xff] }
  0x29   : > { %12189 = vmatpush3.msra.mxu0 %v1218_v2  ;;  %v1216_v6 = vld [vmem:[%s20497_s5 + $0x48] sm:$0xff]  ;;  %v421_v9 = vld [vmem:[%s14740_s23 + $0xf8] sm:$0xff]  ;;  %v1213_v12 = vld [vmem:[%s20497_s5 + $0x30] sm:$0xff] }
  0x2a   : > { %802 = vrot.lane.b32.xlu0 %v370_v21, %s14650_s20  ;;  %804 = vrot.lane.b32.xlu1 %v371_v22, %s14650_s20  ;;  %v1214_v11 = vld [vmem:[%s20497_s5 + $0x38] sm:$0xff]  ;;  %v1212_v13 = vld [vmem:[%s20497_s5 + $0x28] sm:$0xff] }
  0x2b   : > { %12098 = vmatmul.mubr.msk.f32.gmra.mxu0 %vm424_vm1, %v401_v31  ;;  %12190 = vmatprep.subr.mxu0 %v1217_v4  ;;  %v1211_v14 = vld [vmem:[%s20497_s5 + $0x20] sm:$0xff]  ;;  %v1210_v15 = vld [vmem:[%s20497_s5 + $0x18] sm:$0xff]  ;;  %v1209_v16 = vld [vmem:[%s20497_s5 + $0x10] sm:$0xff] }
  0x2c   : > { %12100 = vmatprep.mubr.msk.f32.mxu0 %vm424_vm1, %v402_v32  ;;  %12191 = vmatpush3.msra.mxu0 %v1217_v4  ;;  %v1502_v53 = vld [vmem:[%s20499_s7 + $0x78] sm:$0xff]  ;;  %v1501_v54 = vld [vmem:[%s20499_s7 + $0x70] sm:$0xff] }
  0x2d   : > { %12192 = vmatprep.subr.mxu0 %v1216_v6  ;;  %12260 = vmatprep.subr.mxu1 %v1502_v53  ;;  %v1494_v0 = vld [vmem:[%s20499_s7 + $0x38] sm:$0xff]  ;;  %v1493_v2 = vld [vmem:[%s20499_s7 + $0x30] sm:$0xff] }
  0x2e   : > { %806 = vrot.lane.b32.xlu0 %v372_v25, %s14650_s20  ;;  %808 = vrot.lane.b32.xlu1 %v373_v26, %s14650_s20 }
  0x2f   : > { %12101 = vmatmul.mubr.msk.f32.gmra.mxu0 %vm424_vm1, %v403_v35 }
  0x30   : > { %12103 = vmatprep.mubr.msk.f32.mxu0 %vm424_vm1, %v404_v36  ;;  %12193 = vmatpush3.msra.mxu0 %v1216_v6  ;;  %v1490_v6 = vld [vmem:[%s20499_s7 + $0x18] sm:$0xff] }
  0x31   : > { %12194 = vmatprep.subr.mxu0 %v1215_v8 }
  0x32   : > { %810 = vrot.lane.b32.xlu0 %v374_v29, %s14650_s20  ;;  %812 = vrot.lane.b32.xlu1 %v375_v30, %s14650_s20 }
  0x33   : > { %12104 = vmatmul.mubr.msk.f32.gmra.mxu0 %vm424_vm1, %v405_v39 }
  0x34   : > { %12106 = vmatprep.mubr.msk.f32.mxu0 %vm424_vm1, %v406_v40  ;;  %12195 = vmatpush3.msra.mxu0 %v1215_v8  ;;  %v1489_v8 = vld [vmem:[%s20499_s7 + $0x10] sm:$0xff] }
  0x35   : > { %12196 = vmatprep.subr.mxu0 %v1214_v11 }
  0x36   : > { %814 = vrot.lane.b32.xlu0 %v376_v33, %s14650_s20  ;;  %816 = vrot.lane.b32.xlu1 %v377_v34, %s14650_s20 }
  0x37   : > { %12107 = vmatmul.mubr.msk.f32.gmra.mxu0 %vm424_vm1, %v407_v43 }
  0x38   : > { %12109 = vmatprep.mubr.msk.f32.mxu0 %vm424_vm1, %v408_v44  ;;  %12197 = vmatpush3.msra.mxu0 %v1214_v11  ;;  %v1488_v11 = vld [vmem:[%s20499_s7 + $0x8] sm:$0xff] }
  0x39   : > { %12198 = vmatprep.subr.mxu0 %v1213_v12 }
  0x3a   : > { %818 = vrot.lane.b32.xlu0 %v378_v37, %s14650_s20  ;;  %820 = vrot.lane.b32.xlu1 %v379_v38, %s14650_s20 }
  0x3b   : > { %12110 = vmatmul.mubr.msk.f32.gmra.mxu0 %vm424_vm1, %v409_v47 }
  0x3c   : > { %12112 = vmatprep.mubr.msk.f32.mxu0 %vm424_vm1, %v410_v48  ;;  %12199 = vmatpush3.msra.mxu0 %v1213_v12 }
  0x3d   : > { %12200 = vmatprep.subr.mxu0 %v1212_v13 }
  0x3e   : > { %822 = vrot.lane.b32.xlu0 %v380_v41, %s14650_s20  ;;  %824 = vrot.lane.b32.xlu1 %v381_v42, %s14650_s20 }
  0x3f   : > { %12113 = vmatmul.mubr.msk.f32.gmra.mxu0 %vm424_vm1, %v411_v51 }
  0x40   : > { %12115 = vmatprep.mubr.msk.f32.mxu0 %vm424_vm1, %v412_v52  ;;  %12201 = vmatpush3.msra.mxu0 %v1212_v13 }
  0x41   : > { %12202 = vmatprep.subr.mxu0 %v1211_v14 }
  0x42   : > { %826 = vrot.lane.b32.xlu0 %v382_v45, %s14650_s20  ;;  %828 = vrot.lane.b32.xlu1 %v383_v46, %s14650_s20 }
  0x43   : > { %12116 = vmatmul.mubr.msk.f32.gmra.mxu0 %vm424_vm1, %v413_v57  ;;  %v1499_v57 = vld [vmem:[%s20499_s7 + $0x60] sm:$0xff] }
  0x44   : > { %12118 = vmatprep.mubr.msk.f32.mxu0 %vm424_vm1, %v414_v58  ;;  %12203 = vmatpush3.msra.mxu0 %v1211_v14  ;;  %v1498_v58 = vld [vmem:[%s20499_s7 + $0x58] sm:$0xff] }
  0x45   : > { %12204 = vmatprep.subr.mxu0 %v1210_v15 }
  0x46   : > { %830 = vrot.lane.b32.xlu0 %v384_v49, %s14650_s20  ;;  %832 = vrot.lane.b32.xlu1 %v385_v50, %s14650_s20  ;;  %v1208_v49 = vld [vmem:[%s20497_s5 + $0x8] sm:$0xff]  ;;  %v1207_v50 = vld [vmem:[%s20497_s5] sm:$0xff] }
  0x47   : > { %12119 = vmatmul.mubr.msk.f32.gmra.mxu0 %vm424_vm1, %v415_v62 }
  0x48   : > { %12121 = vmatprep.mubr.msk.f32.mxu0 %vm424_vm1, %v416_v63  ;;  %12205 = vmatpush3.msra.mxu0 %v1210_v15  ;;  %v1495_v63 = vld [vmem:[%s20499_s7 + $0x40] sm:$0xff] }
  0x49   : > { %12206 = vmatprep.subr.mxu0 %v1209_v16 }
  0x4a   : > { %834 = vrot.lane.b32.xlu0 %v386_v55, %s14650_s20  ;;  %836 = vrot.lane.b32.xlu1 %v387_v56, %s14650_s20  ;;  %v1500_v55 = vld [vmem:[%s20499_s7 + $0x68] sm:$0xff] }
  0x4b   : > { %12122 = vmatmul.mubr.msk.f32.gmra.mxu0 %vm424_vm1, %v417_v1 }
  0x4c   : > { %12124 = vmatprep.mubr.msk.f32.mxu0 %vm424_vm1, %v418_v3  ;;  %12207 = vmatpush3.msra.mxu0 %v1209_v16  ;;  %v1492_v3 = vld [vmem:[%s20499_s7 + $0x28] sm:$0xff] }
  0x4d   : > { %12208 = vmatprep.subr.mxu0 %v1208_v49 }
  0x4e   : > { %838 = vrot.lane.b32.xlu0 %v388_v60, %s14650_s20  ;;  %840 = vrot.lane.b32.xlu1 %v389_v61, %s14650_s20  ;;  %v1497_v60 = vld [vmem:[%s20499_s7 + $0x50] sm:$0xff]  ;;  %v1496_v61 = vld [vmem:[%s20499_s7 + $0x48] sm:$0xff] }
  0x4f   : > { %12125 = vmatmul.mubr.msk.f32.gmra.mxu0 %vm424_vm1, %v419_v5  ;;  %v1491_v5 = vld [vmem:[%s20499_s7 + $0x20] sm:$0xff] }
  0x50   : > { %12127 = vmatprep.mubr.msk.f32.mxu0 %vm424_vm1, %v420_v7  ;;  %12209 = vmatpush3.msra.mxu0 %v1208_v49 }
  0x51   : > { %12210 = vmatprep.subr.mxu0 %v1207_v50 }
  0x52   : > { %12211 = vmatpush3.msra.mxu0 %v1207_v50 }
  0x53   : > { %12128 = vmatmul.mubr.msk.f32.gmra.mxu0 %vm424_vm1, %v421_v9 }
  0x84   : > { %v779_v17 = vpop.permute.xlu0 %778  ;;  %v783_v18 = vpop.permute.xlu1 %782 }
  0x85   : > { %12132 = vmatprep.mubr.msk.f32.mxu1 %vm842_vm2, %v779_v17 }
  0x88   : > { %v781_v19 = vpop.permute.xlu0 %780  ;;  %v785_v20 = vpop.permute.xlu1 %784 }
  0x89   : > { %12133 = vmatmul.mubr.msk.f32.vlgmr.msra.gmra.mxu1 %vm842_vm2, %v781_v19 }
  0x8a   : > { %12135 = vmatprep.mubr.msk.f32.mxu1 %vm842_vm2, %v783_v18  ;;  %12261 = vmatpush3.msra.mxu1 %v1502_v53 }
  0x8b   : > { %12262 = vmatprep.subr.mxu1 %v1501_v54 }
  0x8c   : > { %v787_v21 = vpop.permute.xlu0 %786  ;;  %v789_v22 = vpop.permute.xlu1 %788  ;;  %12263 = vmatpush3.msra.mxu1 %v1501_v54 }
  0x8d   : > { %12136 = vmatmul.mubr.msk.f32.gmra.mxu1 %vm842_vm2, %v785_v20  ;;  %12264 = vmatprep.subr.mxu1 %v1500_v55 }
  0x8e   : > { %12138 = vmatprep.mubr.msk.f32.mxu1 %vm842_vm2, %v787_v21  ;;  %12265 = vmatpush3.msra.mxu1 %v1500_v55 }
  0x8f   : > { %12266 = vmatprep.subr.mxu1 %v1499_v57 }
  0x90   : > { %v791_v23 = vpop.permute.xlu0 %790  ;;  %v793_v24 = vpop.permute.xlu1 %792  ;;  %12267 = vmatpush3.msra.mxu1 %v1499_v57 }
  0x91   : > { %12139 = vmatmul.mubr.msk.f32.gmra.mxu1 %vm842_vm2, %v789_v22  ;;  %12268 = vmatprep.subr.mxu1 %v1498_v58  ;;  %v15010_v22 = vld [vmem:[%s20496_s4] ss:$0 sm:$0xff] }
  0x92   : > { %12141 = vmatprep.mubr.msk.f32.mxu1 %vm842_vm2, %v791_v23  ;;  %12269 = vmatpush3.msra.mxu1 %v1498_v58 }
  0x93   : > { %12270 = vmatprep.subr.mxu1 %v1497_v60 }
  0x94   : > { %v795_v25 = vpop.permute.xlu0 %794  ;;  %v797_v26 = vpop.permute.xlu1 %796  ;;  %12271 = vmatpush3.msra.mxu1 %v1497_v60 }
  0x95   : > { %12142 = vmatmul.mubr.msk.f32.gmra.mxu1 %vm842_vm2, %v793_v24  ;;  %12272 = vmatprep.subr.mxu1 %v1496_v61 }
  0x96   : > { %12144 = vmatprep.mubr.msk.f32.mxu1 %vm842_vm2, %v795_v25  ;;  %12273 = vmatpush3.msra.mxu1 %v1496_v61 }
  0x97   : > { %12274 = vmatprep.subr.mxu1 %v1495_v63 }
  0x98   : > { %v799_v27 = vpop.permute.xlu0 %798  ;;  %v801_v28 = vpop.permute.xlu1 %800  ;;  %12275 = vmatpush3.msra.mxu1 %v1495_v63 }
  0x99   : > { %12145 = vmatmul.mubr.msk.f32.gmra.mxu1 %vm842_vm2, %v797_v26  ;;  %12276 = vmatprep.subr.mxu1 %v1494_v0 }
  0x9a   : > { %12147 = vmatprep.mubr.msk.f32.mxu1 %vm842_vm2, %v799_v27  ;;  %12277 = vmatpush3.msra.mxu1 %v1494_v0 }
  0x9b   : > { %12278 = vmatprep.subr.mxu1 %v1493_v2 }
  0x9c   : > { %v803_v29 = vpop.permute.xlu0 %802  ;;  %v805_v30 = vpop.permute.xlu1 %804  ;;  %12279 = vmatpush3.msra.mxu1 %v1493_v2 }
  0x9d   : > { %12148 = vmatmul.mubr.msk.f32.gmra.mxu1 %vm842_vm2, %v801_v28  ;;  %12280 = vmatprep.subr.mxu1 %v1492_v3 }
  0x9e   : > { %12150 = vmatprep.mubr.msk.f32.mxu1 %vm842_vm2, %v803_v29  ;;  %12281 = vmatpush3.msra.mxu1 %v1492_v3 }
  0x9f   : > { %12282 = vmatprep.subr.mxu1 %v1491_v5 }
  0xa0   : > { %v807_v31 = vpop.permute.xlu0 %806  ;;  %v809_v32 = vpop.permute.xlu1 %808  ;;  %12283 = vmatpush3.msra.mxu1 %v1491_v5 }
  0xa1   : > { %12151 = vmatmul.mubr.msk.f32.gmra.mxu1 %vm842_vm2, %v805_v30  ;;  %12284 = vmatprep.subr.mxu1 %v1490_v6 }
  0xa2   : > { %12153 = vmatprep.mubr.msk.f32.mxu1 %vm842_vm2, %v807_v31  ;;  %12285 = vmatpush3.msra.mxu1 %v1490_v6 }
  0xa3   : > { %12286 = vmatprep.subr.mxu1 %v1489_v8 }
  0xa4   : > { %v811_v33 = vpop.permute.xlu0 %810  ;;  %v813_v34 = vpop.permute.xlu1 %812  ;;  %12287 = vmatpush3.msra.mxu1 %v1489_v8 }
  0xa5   : > { %12154 = vmatmul.mubr.msk.f32.gmra.mxu1 %vm842_vm2, %v809_v32  ;;  %12288 = vmatprep.subr.mxu1 %v1488_v11 }
  0xa6   : > { %12156 = vmatprep.mubr.msk.f32.mxu1 %vm842_vm2, %v811_v33  ;;  %12289 = vmatpush3.msra.mxu1 %v1488_v11 }
  0xa8   : > { %v815_v35 = vpop.permute.xlu0 %814  ;;  %v817_v36 = vpop.permute.xlu1 %816 }
  0xa9   : > { %12157 = vmatmul.mubr.msk.f32.gmra.mxu1 %vm842_vm2, %v813_v34 }
  0xaa   : > { %12159 = vmatprep.mubr.msk.f32.mxu1 %vm842_vm2, %v815_v35 }
  0xac   : > { %v819_v37 = vpop.permute.xlu0 %818  ;;  %v821_v38 = vpop.permute.xlu1 %820 }
  0xad   : > { %12160 = vmatmul.mubr.msk.f32.gmra.mxu1 %vm842_vm2, %v817_v36 }
  0xae   : > { %12162 = vmatprep.mubr.msk.f32.mxu1 %vm842_vm2, %v819_v37 }
  0xb0   : > { %v823_v39 = vpop.permute.xlu0 %822  ;;  %v825_v40 = vpop.permute.xlu1 %824 }
  0xb1   : > { %12163 = vmatmul.mubr.msk.f32.gmra.mxu1 %vm842_vm2, %v821_v38 }
  0xb2   : > { %12165 = vmatprep.mubr.msk.f32.mxu1 %vm842_vm2, %v823_v39 }
  0xb4   : > { %v827_v41 = vpop.permute.xlu0 %826  ;;  %v829_v42 = vpop.permute.xlu1 %828 }
  0xb5   : > { %12166 = vmatmul.mubr.msk.f32.gmra.mxu1 %vm842_vm2, %v825_v40 }
  0xb6   : > { %12168 = vmatprep.mubr.msk.f32.mxu1 %vm842_vm2, %v827_v41 }
  0xb8   : > { %v831_v43 = vpop.permute.xlu0 %830  ;;  %v833_v44 = vpop.permute.xlu1 %832 }
  0xb9   : > { %12169 = vmatmul.mubr.msk.f32.gmra.mxu1 %vm842_vm2, %v829_v42 }
  0xba   : > { %12171 = vmatprep.mubr.msk.f32.mxu1 %vm842_vm2, %v831_v43 }
  0xbc   : > { %v835_v45 = vpop.permute.xlu0 %834  ;;  %v837_v46 = vpop.permute.xlu1 %836 }
  0xbd   : > { %12172 = vmatmul.mubr.msk.f32.gmra.mxu1 %vm842_vm2, %v833_v44 }
  0xbe   : > { %12174 = vmatprep.mubr.msk.f32.mxu1 %vm842_vm2, %v835_v45 }
  0xc0   : > { %v839_v47 = vpop.permute.xlu0 %838  ;;  %v841_v48 = vpop.permute.xlu1 %840 }
  0xc1   : > { %12175 = vmatmul.mubr.msk.f32.gmra.mxu1 %vm842_vm2, %v837_v46 }
  0xc2   : > { %12177 = vmatprep.mubr.msk.f32.mxu1 %vm842_vm2, %v839_v47 }
  0xc5   : > { %12178 = vmatmul.mubr.msk.f32.gmra.mxu1 %vm842_vm2, %v841_v48 }
  0xd7   : > { %v14943_v51 = vpop.f32.mrf.mxu0 }
  0xd9   : > { %v14945_v52 = vpop.f32.mrf.mxu0 }
  0xdb   : > { %v14956_v56 = vpop.f32.mrf.mxu0 }
  0xdd   : > { %v597_v59 = vpop.f32.mrf.mxu0 }
  0xdf   : > { %v12090_v62 = vpop.f32.mrf.mxu0 }
  0xe1   : > { %v607_v1 = vpop.f32.mrf.mxu0 }
  0xe3   : > { %v12093_v4 = vpop.f32.mrf.mxu0 }
  0xe5   : > { %v617_v7 = vpop.f32.mrf.mxu0 }
  0xe7   : > { %v12096_v9 = vpop.f32.mrf.mxu0 }
  0xe9   : > { %v627_v12 = vpop.f32.mrf.mxu0 }
  0xeb   : > { %v12099_v13 = vpop.f32.mrf.mxu0 }
  0xed   : > { %v14994_v14 = vpop.f32.mrf.mxu0 }
  0xef   : > { %v14996_v15 = vpop.f32.mrf.mxu0 }
  0xf1   : > { %v14998_v16 = vpop.f32.mrf.mxu0 }
  0xf3   : > { %v15000_v17 = vpop.f32.mrf.mxu0 }
  0xf5   : > { %v15002_v18 = vpop.f32.mrf.mxu0 }
  0xf7   : > { %v15004_v20 = vpop.f32.mrf.mxu0 }
  0xf9   : > { %v15014_v27 = vpop.f32.mrf.mxu0 }
  0xfb   : > { %v15019_v36 = vpop.f32.mrf.mxu0 }
  0xfd   : > { %v15023_v45 = vpop.f32.mrf.mxu0 }
  0xff   : > { %v15027_v54 = vpop.f32.mrf.mxu0 }
 0x101   : > { %v15031_v63 = vpop.f32.mrf.mxu0 }
 0x103   : > { %v12117_v8 = vpop.f32.mrf.mxu0 }
 0x149   : > { %v12134_v19 = vpop.f32.mrf.mxu1 }
 0x14a   : > { %v983_v21 = vadd.f32 %v12134_v19, %v14943_v51 }
 0x14b   : > { %v977_v23 = vpop.f32.mrf.mxu1 }
 0x14c   : > { %v978_v24 = vadd.f32 %v977_v23, %v14945_v52  ;;  %v1144_v25 = vadd.f32 %v15010_v22, %v983_v21 }
 0x14d   : > { %v12137_v26 = vpop.f32.mrf.mxu1 }
 0x14e   : > { %v1143_v28 = vadd.f32 %v15010_v22, %v978_v24  ;;  %v993_v29 = vadd.f32 %v12137_v26, %v14956_v56  ;;  %v1176_v33 = vmax.f32 %v1144_v25, 0.0  ;;  %v697_v25 = vpop.f32.mrf.mxu0 }
 0x14f   : > { %v987_v30 = vpop.f32.mrf.mxu1 }
 0x150   : > { %v988_v31 = vadd.f32 %v987_v30, %v597_v59  ;;  %v1175_v32 = vmax.f32 %v1143_v28, 0.0  ;;  %v1146_v34 = vadd.f32 %v15010_v22, %v993_v29 }
 0x151   : > { %v12140_v35 = vpop.f32.mrf.mxu1 }
 0x152   : > { %v1145_v37 = vadd.f32 %v15010_v22, %v988_v31  ;;  %v1003_v38 = vadd.f32 %v12140_v35, %v12090_v62  ;;  %12212 = vmatprep.mubr.f32.mxu0 %v1175_v32  ;;  %v1178_v42 = vmax.f32 %v1146_v34, 0.0 }
 0x153   : > { %v997_v39 = vpop.f32.mrf.mxu1  ;;  %12213 = vmatmul.mubr.f32.vlgmr.msra.gmra.mxu0 %v1176_v33  ;;  %v12120_v33 = vpop.f32.mrf.mxu0 }
 0x154   : > { %v998_v40 = vadd.f32 %v997_v39, %v607_v1  ;;  %v1177_v41 = vmax.f32 %v1145_v37, 0.0  ;;  %v1148_v43 = vadd.f32 %v15010_v22, %v1003_v38 }
 0x155   : > { %v12143_v44 = vpop.f32.mrf.mxu1 }
 0x156   : > { %v1147_v46 = vadd.f32 %v15010_v22, %v998_v40  ;;  %v1013_v47 = vadd.f32 %v12143_v44, %v12093_v4  ;;  %12215 = vmatprep.mubr.f32.mxu0 %v1177_v41  ;;  %v1180_v51 = vmax.f32 %v1148_v43, 0.0  ;;  %v707_v41 = vpop.f32.mrf.mxu0 }
 0x157   : > { %v1007_v48 = vpop.f32.mrf.mxu1  ;;  %12216 = vmatmul.mubr.f32.gmra.mxu0 %v1178_v42 }
 0x158   : > { %v1008_v49 = vadd.f32 %v1007_v48, %v617_v7  ;;  %v1179_v50 = vmax.f32 %v1147_v46, 0.0  ;;  %v1150_v52 = vadd.f32 %v15010_v22, %v1013_v47 }
 0x159   : > { %v12146_v53 = vpop.f32.mrf.mxu1 }
 0x15a   : > { %v1149_v55 = vadd.f32 %v15010_v22, %v1008_v49  ;;  %v1023_v56 = vadd.f32 %v12146_v53, %v12096_v9  ;;  %12218 = vmatprep.mubr.f32.mxu0 %v1179_v50  ;;  %v1182_v61 = vmax.f32 %v1150_v52, 0.0  ;;  %v12123_v49 = vpop.f32.mrf.mxu0 }
 0x15b   : > { %v1017_v57 = vpop.f32.mrf.mxu1  ;;  %12219 = vmatmul.mubr.f32.gmra.mxu0 %v1180_v51 }
 0x15c   : > { %v1152_v58 = vadd.f32 %v15010_v22, %v1023_v56  ;;  %v1018_v59 = vadd.f32 %v1017_v57, %v627_v12  ;;  %v1181_v60 = vmax.f32 %v1149_v55, 0.0  ;;  %v717_v57 = vpop.f32.mrf.mxu0 }
 0x15d   : > { %v12149_v62 = vpop.f32.mrf.mxu1 }
 0x15e   : > { %v1151_v0 = vadd.f32 %v15010_v22, %v1018_v59  ;;  %v1033_v1 = vadd.f32 %v12149_v62, %v12099_v13  ;;  %12221 = vmatprep.mubr.f32.mxu0 %v1181_v60  ;;  %v1184_v2 = vmax.f32 %v1152_v58, 0.0 }
 0x15f   : > { %v1027_v3 = vpop.f32.mrf.mxu1  ;;  %12222 = vmatmul.mubr.f32.gmra.mxu0 %v1182_v61 }
 0x160   : > { %v1154_v4 = vadd.f32 %v15010_v22, %v1033_v1  ;;  %v1028_v5 = vadd.f32 %v1027_v3, %v14994_v14  ;;  %v1183_v6 = vmax.f32 %v1151_v0, 0.0  ;;  %v12126_v1 = vpop.f32.mrf.mxu0 }
 0x161   : > { %v12152_v7 = vpop.f32.mrf.mxu1 }
 0x162   : > { %v1153_v9 = vadd.f32 %v15010_v22, %v1028_v5  ;;  %v1043_v11 = vadd.f32 %v12152_v7, %v14996_v15  ;;  %12224 = vmatprep.mubr.f32.mxu0 %v1183_v6  ;;  %v1186_v12 = vmax.f32 %v1154_v4, 0.0 }
 0x163   : > { %v1037_v19 = vpop.f32.mrf.mxu1  ;;  %12225 = vmatmul.mubr.f32.gmra.mxu0 %v1184_v2 }
 0x164   : > { %v1156_v13 = vadd.f32 %v15010_v22, %v1043_v11  ;;  %v1038_v21 = vadd.f32 %v1037_v19, %v14998_v16  ;;  %v1185_v23 = vmax.f32 %v1153_v9, 0.0  ;;  %v727_v9 = vpop.f32.mrf.mxu0 }
 0x165   : > { %v12155_v24 = vpop.f32.mrf.mxu1 }
 0x166   : > { %v1155_v14 = vadd.f32 %v15010_v22, %v1038_v21  ;;  %v1053_v26 = vadd.f32 %v12155_v24, %v15000_v17  ;;  %12227 = vmatprep.mubr.f32.mxu0 %v1185_v23  ;;  %v1188_v28 = vmax.f32 %v1156_v13, 0.0 }
 0x167   : > { %v1047_v29 = vpop.f32.mrf.mxu1  ;;  %12228 = vmatmul.mubr.f32.gmra.mxu0 %v1186_v12 }
 0x168   : > { %v1158_v15 = vadd.f32 %v15010_v22, %v1053_v26  ;;  %v1048_v30 = vadd.f32 %v1047_v29, %v15002_v18  ;;  %v1187_v31 = vmax.f32 %v1155_v14, 0.0  ;;  %v12129_v14 = vpop.f32.mrf.mxu0 }
 0x169   : > { %v12158_v32 = vpop.f32.mrf.mxu1 }
 0x16a   : > { %v1157_v16 = vadd.f32 %v15010_v22, %v1048_v30  ;;  %v1063_v34 = vadd.f32 %v12158_v32, %v15004_v20  ;;  %12230 = vmatprep.mubr.f32.mxu0 %v1187_v31  ;;  %v1190_v35 = vmax.f32 %v1158_v15, 0.0 }
 0x16b   : > { %v1057_v37 = vpop.f32.mrf.mxu1  ;;  %12231 = vmatmul.mubr.f32.gmra.mxu0 %v1188_v28 }
 0x16c   : > { %v1160_v17 = vadd.f32 %v15010_v22, %v1063_v34  ;;  %v1058_v38 = vadd.f32 %v1057_v37, %v15014_v27  ;;  %v1189_v39 = vmax.f32 %v1157_v16, 0.0  ;;  %v737_v16 = vpop.f32.mrf.mxu0 }
 0x16d   : > { %v12161_v40 = vpop.f32.mrf.mxu1 }
 0x16e   : > { %v1159_v18 = vadd.f32 %v15010_v22, %v1058_v38  ;;  %v1073_v42 = vadd.f32 %v12161_v40, %v15019_v36  ;;  %12233 = vmatprep.mubr.f32.mxu0 %v1189_v39  ;;  %v1192_v43 = vmax.f32 %v1160_v17, 0.0 }
 0x16f   : > { %v1067_v44 = vpop.f32.mrf.mxu1  ;;  %12234 = vmatmul.mubr.f32.gmra.mxu0 %v1190_v35 }
 0x170   : > { %v1162_v20 = vadd.f32 %v15010_v22, %v1073_v42  ;;  %v1068_v46 = vadd.f32 %v1067_v44, %v15023_v45  ;;  %v1191_v47 = vmax.f32 %v1159_v18, 0.0  ;;  %v15075_v44 = vld [vmem:[%s20498_s6] ss:$0 sm:$0xff] }
 0x171   : > { %v12164_v48 = vpop.f32.mrf.mxu1 }
 0x172   : > { %v1161_v27 = vadd.f32 %v15010_v22, %v1068_v46  ;;  %v1083_v50 = vadd.f32 %v12164_v48, %v15027_v54  ;;  %12236 = vmatprep.mubr.f32.mxu0 %v1191_v47  ;;  %v1194_v51 = vmax.f32 %v1162_v20, 0.0 }
 0x173   : > { %v1077_v52 = vpop.f32.mrf.mxu1  ;;  %12237 = vmatmul.mubr.f32.gmra.mxu0 %v1192_v43  ;;  %v1487_v43 = vld [vmem:[%s20499_s7] sm:$0xff] }
 0x174   : > { %v1164_v36 = vadd.f32 %v15010_v22, %v1083_v50  ;;  %v1078_v53 = vadd.f32 %v1077_v52, %v15031_v63  ;;  %v1193_v55 = vmax.f32 %v1161_v27, 0.0  ;;  %12290 = vmatprep.subr.mxu1 %v1487_v43 }
 0x175   : > { %v12167_v56 = vpop.f32.mrf.mxu1  ;;  %12291 = vmatpush3.msra.mxu1 %v1487_v43 }
 0x176   : > { %v1163_v45 = vadd.f32 %v15010_v22, %v1078_v53  ;;  %v1093_v58 = vadd.f32 %v12167_v56, %v12117_v8  ;;  %12239 = vmatprep.mubr.f32.mxu0 %v1193_v55  ;;  %v1196_v59 = vmax.f32 %v1164_v36, 0.0 }
 0x177   : > { %v1087_v60 = vpop.f32.mrf.mxu1  ;;  %12240 = vmatmul.mubr.f32.gmra.mxu0 %v1194_v51 }
 0x178   : > { %v1166_v54 = vadd.f32 %v15010_v22, %v1093_v58  ;;  %v1088_v61 = vadd.f32 %v1087_v60, %v697_v25  ;;  %v1195_v62 = vmax.f32 %v1163_v45, 0.0 }
 0x179   : > { %v12170_v0 = vpop.f32.mrf.mxu1 }
 0x17a   : > { %v1165_v2 = vadd.f32 %v15010_v22, %v1088_v61  ;;  %v1103_v3 = vadd.f32 %v12170_v0, %v12120_v33  ;;  %12242 = vmatprep.mubr.f32.mxu0 %v1195_v62  ;;  %v1198_v63 = vmax.f32 %v1166_v54, 0.0 }
 0x17b   : > { %v1097_v4 = vpop.f32.mrf.mxu1  ;;  %12243 = vmatmul.mubr.f32.gmra.mxu0 %v1196_v59 }
 0x17c   : > { %v1168_v5 = vadd.f32 %v15010_v22, %v1103_v3  ;;  %v1098_v6 = vadd.f32 %v1097_v4, %v707_v41  ;;  %v1197_v7 = vmax.f32 %v1165_v2, 0.0 }
 0x17d   : > { %v12173_v8 = vpop.f32.mrf.mxu1 }
 0x17e   : > { %v1167_v11 = vadd.f32 %v15010_v22, %v1098_v6  ;;  %v1113_v12 = vadd.f32 %v12173_v8, %v12123_v49  ;;  %12245 = vmatprep.mubr.f32.mxu0 %v1197_v7  ;;  %v1200_v19 = vmax.f32 %v1168_v5, 0.0 }
 0x17f   : > { %v1107_v13 = vpop.f32.mrf.mxu1  ;;  %12246 = vmatmul.mubr.f32.gmra.mxu0 %v1198_v63 }
 0x180   : > { %v1170_v21 = vadd.f32 %v15010_v22, %v1113_v12  ;;  %v1108_v23 = vadd.f32 %v1107_v13, %v717_v57  ;;  %v1199_v24 = vmax.f32 %v1167_v11, 0.0 }
 0x181   : > { %v12176_v25 = vpop.f32.mrf.mxu1 }
 0x182   : > { %v1169_v26 = vadd.f32 %v15010_v22, %v1108_v23  ;;  %v1123_v28 = vadd.f32 %v12176_v25, %v12126_v1  ;;  %12248 = vmatprep.mubr.f32.mxu0 %v1199_v24  ;;  %v1202_v29 = vmax.f32 %v1170_v21, 0.0 }
 0x183   : > { %v1117_v15 = vpop.f32.mrf.mxu1  ;;  %12249 = vmatmul.mubr.f32.gmra.mxu0 %v1200_v19 }
 0x184   : > { %v1172_v30 = vadd.f32 %v15010_v22, %v1123_v28  ;;  %v1118_v31 = vadd.f32 %v1117_v15, %v727_v9  ;;  %v1201_v32 = vmax.f32 %v1169_v26, 0.0 }
 0x185   : > { %v12179_v33 = vpop.f32.mrf.mxu1 }
 0x186   : > { %v1171_v34 = vadd.f32 %v15010_v22, %v1118_v31  ;;  %v1133_v35 = vadd.f32 %v12179_v33, %v12129_v14  ;;  %12251 = vmatprep.mubr.f32.mxu0 %v1201_v32  ;;  %v1204_v37 = vmax.f32 %v1172_v30, 0.0 }
 0x187   : > { %v1127_v17 = vpop.f32.mrf.mxu1  ;;  %12252 = vmatmul.mubr.f32.gmra.mxu0 %v1202_v29 }
 0x188   : > { %v1174_v38 = vadd.f32 %v15010_v22, %v1133_v35  ;;  %v1128_v39 = vadd.f32 %v1127_v17, %v737_v16  ;;  %v1203_v40 = vmax.f32 %v1171_v34, 0.0 }
 0x18a   : > { %v1173_v41 = vadd.f32 %v15010_v22, %v1128_v39  ;;  %12254 = vmatprep.mubr.f32.mxu0 %v1203_v40  ;;  %v1206_v18 = vmax.f32 %v1174_v38, 0.0 }
 0x18b   : > { %12255 = vmatmul.mubr.f32.gmra.mxu0 %v1204_v37 }
 0x18c   : > { %v1205_v42 = vmax.f32 %v1173_v41, 0.0 }
 0x18e   : > { %12257 = vmatprep.mubr.f32.mxu0 %v1205_v42 }
 0x18f   : > { %12258 = vmatmul.mubr.f32.gmra.mxu0 %v1206_v18 }
 0x190   : > { %12342 = vmatprep.mubr.msk.f32.mxu0 %vm424_vm1, %v14747_v10 }
 0x213   : > { %v12214_v22 = vpop.f32.mrf.mxu0 }
 0x214   : > { %v1302_v20 = vadd.f32 %v12214_v22, %v15075_v44 }
 0x215   : > { %v1296_v46 = vpop.f32.mrf.mxu0 }
 0x216   : > { %v1297_v47 = vadd.f32 %v15075_v44, %v1296_v46  ;;  %v1456_v10 = vmax.f32 %v1302_v20, 0.0 }
 0x217   : > { %v12217_v48 = vpop.f32.mrf.mxu0 }
 0x218   : > { %v1455_v49 = vmax.f32 %v1297_v47, 0.0  ;;  %v1312_v27 = vadd.f32 %v12217_v48, %v15075_v44 }
 0x219   : > { %v1306_v50 = vpop.f32.mrf.mxu0 }
 0x21a   : > { %v1307_v51 = vadd.f32 %v15075_v44, %v1306_v50  ;;  %12292 = vmatprep.mubr.f32.mxu1 %v1455_v49  ;;  %v1458_v53 = vmax.f32 %v1312_v27, 0.0 }
 0x21b   : > { %v12220_v52 = vpop.f32.mrf.mxu0  ;;  %12293 = vmatmul.mubr.f32.vlgmr.msra.gmra.mxu1 %v1456_v10 }
 0x21c   : > { %v1457_v36 = vmax.f32 %v1307_v51, 0.0  ;;  %v1322_v55 = vadd.f32 %v12220_v52, %v15075_v44 }
 0x21d   : > { %v1316_v56 = vpop.f32.mrf.mxu0 }
 0x21e   : > { %v1317_v57 = vadd.f32 %v15075_v44, %v1316_v56  ;;  %12295 = vmatprep.mubr.f32.mxu1 %v1457_v36  ;;  %v1460_v59 = vmax.f32 %v1322_v55, 0.0 }
 0x21f   : > { %v12223_v45 = vpop.f32.mrf.mxu0  ;;  %12296 = vmatmul.mubr.f32.gmra.mxu1 %v1458_v53 }
 0x220   : > { %v1459_v58 = vmax.f32 %v1317_v57, 0.0  ;;  %v1332_v60 = vadd.f32 %v12223_v45, %v15075_v44 }
 0x221   : > { %v1326_v54 = vpop.f32.mrf.mxu0 }
 0x222   : > { %v1327_v61 = vadd.f32 %v15075_v44, %v1326_v54  ;;  %12298 = vmatprep.mubr.f32.mxu1 %v1459_v58  ;;  %v1462_v2 = vmax.f32 %v1332_v60, 0.0 }
 0x223   : > { %v12226_v62 = vpop.f32.mrf.mxu0  ;;  %12299 = vmatmul.mubr.f32.gmra.mxu1 %v1460_v59 }
 0x224   : > { %v1461_v0 = vmax.f32 %v1327_v61, 0.0  ;;  %v1342_v1 = vadd.f32 %v12226_v62, %v15075_v44 }
 0x225   : > { %v1336_v3 = vpop.f32.mrf.mxu0 }
 0x226   : > { %v1337_v63 = vadd.f32 %v15075_v44, %v1336_v3  ;;  %12301 = vmatprep.mubr.f32.mxu1 %v1461_v0  ;;  %v1464_v4 = vmax.f32 %v1342_v1, 0.0 }
 0x227   : > { %v12229_v5 = vpop.f32.mrf.mxu0  ;;  %12302 = vmatmul.mubr.f32.gmra.mxu1 %v1462_v2 }
 0x228   : > { %v1463_v6 = vmax.f32 %v1337_v63, 0.0  ;;  %v1352_v7 = vadd.f32 %v12229_v5, %v15075_v44 }
 0x229   : > { %v1346_v8 = vpop.f32.mrf.mxu0 }
 0x22a   : > { %v1347_v9 = vadd.f32 %v15075_v44, %v1346_v8  ;;  %12304 = vmatprep.mubr.f32.mxu1 %v1463_v6  ;;  %v1466_v11 = vmax.f32 %v1352_v7, 0.0 }
 0x22b   : > { %v12232_v12 = vpop.f32.mrf.mxu0  ;;  %12305 = vmatmul.mubr.f32.gmra.mxu1 %v1464_v4 }
 0x22c   : > { %v1465_v19 = vmax.f32 %v1347_v9, 0.0  ;;  %v1362_v13 = vadd.f32 %v12232_v12, %v15075_v44  ;;  %v10582_v9 = vld [vmem:[%s20495_s3 + $0x8] sm:$0xff]  ;;  %v14419_v12 = vld [vmem:[%s14740_s23 + $0x10] sm:$0xff] }
 0x22d   : > { %v1356_v21 = vpop.f32.mrf.mxu0  ;;  %12340 = vmatprep.subr.mxu0 %v10582_v9 }
 0x22e   : > { %v1357_v23 = vadd.f32 %v15075_v44, %v1356_v21  ;;  %12307 = vmatprep.mubr.f32.mxu1 %v1465_v19  ;;  %v1468_v24 = vmax.f32 %v1362_v13, 0.0  ;;  %12341 = vmatpush3.msra.mxu0 %v10582_v9  ;;  %v14420_v19 = vld [vmem:[%s14740_s23 + $0x18] sm:$0xff]  ;;  %v14421_v13 = vld [vmem:[%s14740_s23 + $0x20] sm:$0xff]  ;;  %v14422_v21 = vld [vmem:[%s14740_s23 + $0x28] sm:$0xff] }
 0x22f   : > { %v12235_v25 = vpop.f32.mrf.mxu0  ;;  %12308 = vmatmul.mubr.f32.gmra.mxu1 %v1466_v11  ;;  %v10581_v11 = vld [vmem:[%s20494_s2 + $0x4] sm:$0xf] }
 0x230   : > { %v1467_v14 = vmax.f32 %v1357_v23, 0.0  ;;  %v1372_v26 = vadd.f32 %v12235_v25, %v15075_v44  ;;  %12390 = vmatprep.subr.msk.mxu1 %vm907_vm0, %v10581_v11  ;;  %v14423_v23 = vld [vmem:[%s14740_s23 + $0x30] sm:$0xff]  ;;  %v14425_v25 = vld [vmem:[%s14740_s23 + $0x40] sm:$0xff] }
 0x231   : > { %v1366_v28 = vpop.f32.mrf.mxu0  ;;  %12391 = vmatpush3.msk.msra.mxu1 %vm907_vm0, %v10581_v11 }
 0x232   : > { %v1367_v29 = vadd.f32 %v15075_v44, %v1366_v28  ;;  %12310 = vmatprep.mubr.f32.mxu1 %v1467_v14  ;;  %v1470_v15 = vmax.f32 %v1372_v26, 0.0  ;;  %v14426_v14 = vld [vmem:[%s14740_s23 + $0x48] sm:$0xff]  ;;  %v14427_v26 = vld [vmem:[%s14740_s23 + $0x50] sm:$0xff]  ;;  %v14428_v28 = vld [vmem:[%s14740_s23 + $0x58] sm:$0xff] }
 0x233   : > { %v12238_v30 = vpop.f32.mrf.mxu0  ;;  %12311 = vmatmul.mubr.f32.gmra.mxu1 %v1468_v24  ;;  %v14424_v24 = vld [vmem:[%s14740_s23 + $0x38] sm:$0xff] }
 0x234   : > { %v1469_v31 = vmax.f32 %v1367_v29, 0.0  ;;  %v1382_v32 = vadd.f32 %v12238_v30, %v15075_v44  ;;  %v14429_v29 = vld [vmem:[%s14740_s23 + $0x60] sm:$0xff]  ;;  %v14431_v30 = vld [vmem:[%s14740_s23 + $0x70] sm:$0xff] }
 0x235   : > { %v1376_v33 = vpop.f32.mrf.mxu0 }
 0x236   : > { %v1377_v16 = vadd.f32 %v15075_v44, %v1376_v33  ;;  %12313 = vmatprep.mubr.f32.mxu1 %v1469_v31  ;;  %v1472_v34 = vmax.f32 %v1382_v32, 0.0  ;;  %v14432_v31 = vld [vmem:[%s14740_s23 + $0x78] sm:$0xff]  ;;  %v14433_v32 = vld [vmem:[%s14740_s23 + $0x80] sm:$0xff]  ;;  %v14434_v33 = vld [vmem:[%s14740_s23 + $0x88] sm:$0xff] }
 0x237   : > { %v12241_v35 = vpop.f32.mrf.mxu0  ;;  %12314 = vmatmul.mubr.f32.gmra.mxu1 %v1470_v15  ;;  %v14430_v15 = vld [vmem:[%s14740_s23 + $0x68] sm:$0xff] }
 0x238   : > { %v1471_v37 = vmax.f32 %v1377_v16, 0.0  ;;  %v1392_v17 = vadd.f32 %v12241_v35, %v15075_v44  ;;  %v14435_v16 = vld [vmem:[%s14740_s23 + $0x90] sm:$0xff]  ;;  %v14437_v35 = vld [vmem:[%s14740_s23 + $0xa0] sm:$0xff] }
 0x239   : > { %v1386_v38 = vpop.f32.mrf.mxu0 }
 0x23a   : > { %v1387_v39 = vadd.f32 %v15075_v44, %v1386_v38  ;;  %12316 = vmatprep.mubr.f32.mxu1 %v1471_v37  ;;  %v1474_v40 = vmax.f32 %v1392_v17, 0.0  ;;  %v14438_v37 = vld [vmem:[%s14740_s23 + $0xa8] sm:$0xff]  ;;  %v14439_v17 = vld [vmem:[%s14740_s23 + $0xb0] sm:$0xff]  ;;  %v14440_v38 = vld [vmem:[%s14740_s23 + $0xb8] sm:$0xff] }
 0x23b   : > { %v12244_v41 = vpop.f32.mrf.mxu0  ;;  %12317 = vmatmul.mubr.f32.gmra.mxu1 %v1472_v34  ;;  %v14436_v34 = vld [vmem:[%s14740_s23 + $0x98] sm:$0xff] }
 0x23c   : > { %v1473_v18 = vmax.f32 %v1387_v39, 0.0  ;;  %v1402_v42 = vadd.f32 %v12244_v41, %v15075_v44  ;;  %v14441_v39 = vld [vmem:[%s14740_s23 + $0xc0] sm:$0xff]  ;;  %v14442_v41 = vld [vmem:[%s14740_s23 + $0xc8] sm:$0xff] }
 0x23d   : > { %v1396_v43 = vpop.f32.mrf.mxu0 }
 0x23e   : > { %v1397_v22 = vadd.f32 %v15075_v44, %v1396_v43  ;;  %12319 = vmatprep.mubr.f32.mxu1 %v1473_v18  ;;  %v1476_v20 = vmax.f32 %v1402_v42, 0.0  ;;  %v14443_v42 = vld [vmem:[%s14740_s23 + $0xd0] sm:$0xff] }
 0x23f   : > { %v12247_v46 = vpop.f32.mrf.mxu0  ;;  %12320 = vmatmul.mubr.f32.gmra.mxu1 %v1474_v40  ;;  %v15168_v40 = vld [vmem:[%s20500_s8] ss:$0 sm:$0xff] }
 0x240   : > { %v1475_v47 = vmax.f32 %v1397_v22, 0.0  ;;  %v1412_v48 = vadd.f32 %v12247_v46, %v15075_v44  ;;  %v14444_v46 = vld [vmem:[%s14740_s23 + $0xd8] sm:$0xff] }
 0x241   : > { %v1406_v49 = vpop.f32.mrf.mxu0 }
 0x242   : > { %v1407_v10 = vadd.f32 %v15075_v44, %v1406_v49  ;;  %12322 = vmatprep.mubr.f32.mxu1 %v1475_v47  ;;  %v1478_v27 = vmax.f32 %v1412_v48, 0.0  ;;  %v14445_v48 = vld [vmem:[%s14740_s23 + $0xe0] sm:$0xff] }
 0x243   : > { %v12250_v50 = vpop.f32.mrf.mxu0  ;;  %12323 = vmatmul.mubr.f32.gmra.mxu1 %v1476_v20 }
 0x244   : > { %v1477_v51 = vmax.f32 %v1407_v10, 0.0  ;;  %v1422_v52 = vadd.f32 %v12250_v50, %v15075_v44  ;;  %v14446_v50 = vld [vmem:[%s14740_s23 + $0xe8] sm:$0xff] }
 0x245   : > { %v1416_v36 = vpop.f32.mrf.mxu0 }
 0x246   : > { %v1417_v53 = vadd.f32 %v15075_v44, %v1416_v36  ;;  %12325 = vmatprep.mubr.f32.mxu1 %v1477_v51  ;;  %v1480_v55 = vmax.f32 %v1422_v52, 0.0  ;;  %v14447_v52 = vld [vmem:[%s14740_s23 + $0xf0] sm:$0xff] }
 0x247   : > { %v12253_v56 = vpop.f32.mrf.mxu0  ;;  %12326 = vmatmul.mubr.f32.gmra.mxu1 %v1478_v27 }
 0x248   : > { %v1479_v57 = vmax.f32 %v1417_v53, 0.0  ;;  %v1432_v45 = vadd.f32 %v12253_v56, %v15075_v44  ;;  %v14448_v56 = vld [vmem:[%s14740_s23 + $0xf8] sm:$0xff] }
 0x249   : > { %v1426_v58 = vpop.f32.mrf.mxu0 }
 0x24a   : > { %v1427_v59 = vadd.f32 %v15075_v44, %v1426_v58  ;;  %12328 = vmatprep.mubr.f32.mxu1 %v1479_v57  ;;  %v1482_v60 = vmax.f32 %v1432_v45, 0.0 }
 0x24b   : > { %v12256_v54 = vpop.f32.mrf.mxu0  ;;  %12329 = vmatmul.mubr.f32.gmra.mxu1 %v1480_v55 }
 0x24c   : > { %v1481_v61 = vmax.f32 %v1427_v59, 0.0  ;;  %v1442_v62 = vadd.f32 %v12256_v54, %v15075_v44 }
 0x24d   : > { %v1436_v0 = vpop.f32.mrf.mxu0 }
 0x24e   : > { %v1437_v1 = vadd.f32 %v15075_v44, %v1436_v0  ;;  %12331 = vmatprep.mubr.f32.mxu1 %v1481_v61  ;;  %v1484_v2 = vmax.f32 %v1442_v62, 0.0 }
 0x24f   : > { %v12259_v3 = vpop.f32.mrf.mxu0  ;;  %12332 = vmatmul.mubr.f32.gmra.mxu1 %v1482_v60 }
 0x250   : > { %v1483_v63 = vmax.f32 %v1437_v1, 0.0  ;;  %v1452_v4 = vadd.f32 %v12259_v3, %v15075_v44 }
 0x251   : > { %v1446_v5 = vpop.f32.mrf.mxu0 }
 0x252   : > { %v1447_v6 = vadd.f32 %v15075_v44, %v1446_v5  ;;  %12334 = vmatprep.mubr.f32.mxu1 %v1483_v63  ;;  %v1486_v7 = vmax.f32 %v1452_v4, 0.0  ;;  %v14418_v44 = vld [vmem:[%s14740_s23 + $0x8] sm:$0xff] }
 0x253   : > { %12335 = vmatmul.mubr.f32.gmra.mxu1 %v1484_v2  ;;  %12343 = vmatmul.mubr.msk.f32.vlgmr.msra.gmra.mxu0 %vm424_vm1, %v14418_v44 }
 0x254   : > { %v1485_v8 = vmax.f32 %v1447_v6, 0.0  ;;  %12345 = vmatprep.mubr.msk.f32.mxu0 %vm424_vm1, %v14419_v12 }
 0x256   : > { %12337 = vmatprep.mubr.f32.mxu1 %v1485_v8 }
 0x257   : > { %12338 = vmatmul.mubr.f32.gmra.mxu1 %v1486_v7  ;;  %12346 = vmatmul.mubr.msk.f32.gmra.mxu0 %vm424_vm1, %v14420_v19 }
 0x258   : > { %12348 = vmatprep.mubr.msk.f32.mxu0 %vm424_vm1, %v14421_v13 }
 0x25b   : > { %12349 = vmatmul.mubr.msk.f32.gmra.mxu0 %vm424_vm1, %v14422_v21 }
 0x25c   : > { %12351 = vmatprep.mubr.msk.f32.mxu0 %vm424_vm1, %v14423_v23 }
 0x25f   : > { %12352 = vmatmul.mubr.msk.f32.gmra.mxu0 %vm424_vm1, %v14424_v24 }
 0x260   : > { %12354 = vmatprep.mubr.msk.f32.mxu0 %vm424_vm1, %v14425_v25 }
 0x263   : > { %12355 = vmatmul.mubr.msk.f32.gmra.mxu0 %vm424_vm1, %v14426_v14 }
 0x264   : > { %12357 = vmatprep.mubr.msk.f32.mxu0 %vm424_vm1, %v14427_v26 }
 0x267   : > { %12358 = vmatmul.mubr.msk.f32.gmra.mxu0 %vm424_vm1, %v14428_v28 }
 0x268   : > { %12360 = vmatprep.mubr.msk.f32.mxu0 %vm424_vm1, %v14429_v29 }
 0x26b   : > { %12361 = vmatmul.mubr.msk.f32.gmra.mxu0 %vm424_vm1, %v14430_v15 }
 0x26c   : > { %12363 = vmatprep.mubr.msk.f32.mxu0 %vm424_vm1, %v14431_v30 }
 0x26f   : > { %12364 = vmatmul.mubr.msk.f32.gmra.mxu0 %vm424_vm1, %v14432_v31 }
 0x270   : > { %12366 = vmatprep.mubr.msk.f32.mxu0 %vm424_vm1, %v14433_v32 }
 0x273   : > { %12367 = vmatmul.mubr.msk.f32.gmra.mxu0 %vm424_vm1, %v14434_v33 }
 0x274   : > { %12369 = vmatprep.mubr.msk.f32.mxu0 %vm424_vm1, %v14435_v16 }
 0x277   : > { %12370 = vmatmul.mubr.msk.f32.gmra.mxu0 %vm424_vm1, %v14436_v34 }
 0x278   : > { %12372 = vmatprep.mubr.msk.f32.mxu0 %vm424_vm1, %v14437_v35 }
 0x27b   : > { %12373 = vmatmul.mubr.msk.f32.gmra.mxu0 %vm424_vm1, %v14438_v37 }
 0x27c   : > { %12375 = vmatprep.mubr.msk.f32.mxu0 %vm424_vm1, %v14439_v17 }
 0x27f   : > { %12376 = vmatmul.mubr.msk.f32.gmra.mxu0 %vm424_vm1, %v14440_v38 }
 0x280   : > { %12378 = vmatprep.mubr.msk.f32.mxu0 %vm424_vm1, %v14441_v39 }
 0x283   : > { %12379 = vmatmul.mubr.msk.f32.gmra.mxu0 %vm424_vm1, %v14442_v41  ;;  %v10665_v41 = vld [vmem:[%s20497_s5 + $0xf8] sm:$0xff] }
 0x284   : > { %12381 = vmatprep.mubr.msk.f32.mxu0 %vm424_vm1, %v14443_v42  ;;  %12440 = vmatprep.subr.mxu0 %v10665_v41 }
 0x285   : > { %12441 = vmatpush3.msra.mxu0 %v10665_v41  ;;  %v14450_v41 = vld [vmem:[%s14724_s19 + $0x8] sm:$0xff] }
 0x287   : > { %12382 = vmatmul.mubr.msk.f32.gmra.mxu0 %vm424_vm1, %v14444_v46  ;;  %v10663_v46 = vld [vmem:[%s20497_s5 + $0xe8] sm:$0xff] }
 0x288   : > { %12384 = vmatprep.mubr.msk.f32.mxu0 %vm424_vm1, %v14445_v48 }
 0x28b   : > { %12385 = vmatmul.mubr.msk.f32.gmra.mxu0 %vm424_vm1, %v14446_v50 }
 0x28c   : > { %12387 = vmatprep.mubr.msk.f32.mxu0 %vm424_vm1, %v14447_v52  ;;  %v10661_v52 = vld [vmem:[%s20497_s5 + $0xd8] sm:$0xff] }
 0x28f   : > { %12388 = vmatmul.mubr.msk.f32.gmra.mxu0 %vm424_vm1, %v14448_v56 }
 0x2db   : > { %v12294_v18 = vpop.f32.mrf.mxu1 }
 0x2dc   : > { %v15175_v43 = vadd.f32 %v12294_v18, %v15168_v40  ;;  %v10664_v18 = vld [vmem:[%s20497_s5 + $0xf0] sm:$0xff] }
 0x2dd   : > { %v1576_v22 = vpop.f32.mrf.mxu1  ;;  %12442 = vmatprep.subr.mxu0 %v10664_v18 }
 0x2de   : > { %v15178_v20 = vadd.f32 %v15168_v40, %v1576_v22  ;;  %1897 = vrot.lane.b32.xlu1 %v15175_v43, %s14650_s20  ;;  %12443 = vmatpush3.msra.mxu0 %v10664_v18  ;;  %13650 = vtanh.f32 %v15175_v43 }
 0x2df   : > { %v12297_v47 = vpop.f32.mrf.mxu1  ;;  %12444 = vmatprep.subr.mxu0 %v10663_v46 }
 0x2e0   : > { %v15187_v49 = vadd.f32 %v12297_v47, %v15168_v40  ;;  %1895 = vrot.lane.b32.xlu0 %v15178_v20, %s14650_s20  ;;  %12445 = vmatpush3.msra.mxu0 %v10663_v46  ;;  %13652 = vtanh.f32 %v15178_v20 }
 0x2e1   : > { %v1586_v10 = vpop.f32.mrf.mxu1 }
 0x2e2   : > { %v15192_v27 = vadd.f32 %v15168_v40, %v1586_v10  ;;  %1901 = vrot.lane.b32.xlu1 %v15187_v49, %s14650_s20  ;;  %v10662_v10 = vld [vmem:[%s20497_s5 + $0xe0] sm:$0xff] }
 0x2e3   : > { %v12300_v51 = vpop.f32.mrf.mxu1  ;;  %12446 = vmatprep.subr.mxu0 %v10662_v10 }
 0x2e4   : > { %v15201_v36 = vadd.f32 %v12300_v51, %v15168_v40  ;;  %1899 = vrot.lane.b32.xlu0 %v15192_v27, %s14650_s20  ;;  %12447 = vmatpush3.msra.mxu0 %v10662_v10  ;;  %13654 = vtanh.f32 %v15192_v27 }
 0x2e5   : > { %v1596_v53 = vpop.f32.mrf.mxu1  ;;  %12448 = vmatprep.subr.mxu0 %v10661_v52  ;;  %13656 = vtanh.f32 %v15187_v49 }
 0x2e6   : > { %v15206_v55 = vadd.f32 %v15168_v40, %v1596_v53  ;;  %1905 = vrot.lane.b32.xlu1 %v15201_v36, %s14650_s20  ;;  %12449 = vmatpush3.msra.mxu0 %v10661_v52 }
 0x2e7   : > { %v12303_v57 = vpop.f32.mrf.mxu1 }
 0x2e8   : > { %v15213_v45 = vadd.f32 %v12303_v57, %v15168_v40  ;;  %1903 = vrot.lane.b32.xlu0 %v15206_v55, %s14650_s20  ;;  %v10660_v57 = vld [vmem:[%s20497_s5 + $0xd0] sm:$0xff]  ;;  %13658 = vtanh.f32 %v15206_v55 }
 0x2e9   : > { %v1606_v58 = vpop.f32.mrf.mxu1  ;;  %12450 = vmatprep.subr.mxu0 %v10660_v57  ;;  %13660 = vtanh.f32 %v15201_v36 }
 0x2ea   : > { %v15218_v59 = vadd.f32 %v15168_v40, %v1606_v58  ;;  %1909 = vrot.lane.b32.xlu1 %v15213_v45, %s14650_s20  ;;  %v10659_v58 = vld [vmem:[%s20497_s5 + $0xc8] sm:$0xff]  ;;  %12451 = vmatpush3.msra.mxu0 %v10660_v57  ;;  %v14451_v57 = vld [vmem:[%s14724_s19 + $0x10] sm:$0xff] }
 0x2eb   : > { %v12306_v60 = vpop.f32.mrf.mxu1  ;;  %12452 = vmatprep.subr.mxu0 %v10659_v58 }
 0x2ec   : > { %v15223_v54 = vadd.f32 %v12306_v60, %v15168_v40  ;;  %1907 = vrot.lane.b32.xlu0 %v15218_v59, %s14650_s20  ;;  %12453 = vmatpush3.msra.mxu0 %v10659_v58  ;;  %v10657_v60 = vld [vmem:[%s20497_s5 + $0xb8] sm:$0xff]  ;;  %13662 = vtanh.f32 %v15218_v59 }
 0x2ed   : > { %v1616_v61 = vpop.f32.mrf.mxu1  ;;  %13664 = vtanh.f32 %v15213_v45 }
 0x2ee   : > { %v15228_v62 = vadd.f32 %v15168_v40, %v1616_v61  ;;  %1913 = vrot.lane.b32.xlu1 %v15223_v54, %s14650_s20  ;;  %v10656_v61 = vld [vmem:[%s20497_s5 + $0xb0] sm:$0xff] }
 0x2ef   : > { %v12309_v0 = vpop.f32.mrf.mxu1 }
 0x2f0   : > { %v15233_v1 = vadd.f32 %v12309_v0, %v15168_v40  ;;  %1911 = vrot.lane.b32.xlu0 %v15228_v62, %s14650_s20  ;;  %v10655_v0 = vld [vmem:[%s20497_s5 + $0xa8] sm:$0xff]  ;;  %13666 = vtanh.f32 %v15228_v62 }
 0x2f1   : > { %v1626_v2 = vpop.f32.mrf.mxu1  ;;  %13668 = vtanh.f32 %v15223_v54 }
 0x2f2   : > { %v15238_v3 = vadd.f32 %v15168_v40, %v1626_v2  ;;  %1917 = vrot.lane.b32.xlu1 %v15233_v1, %s14650_s20  ;;  %v10654_v2 = vld [vmem:[%s20497_s5 + $0xa0] sm:$0xff] }
 0x2f3   : > { %v12312_v63 = vpop.f32.mrf.mxu1 }
 0x2f4   : > { %v15243_v4 = vadd.f32 %v12312_v63, %v15168_v40  ;;  %1915 = vrot.lane.b32.xlu0 %v15238_v3, %s14650_s20  ;;  %v10653_v63 = vld [vmem:[%s20497_s5 + $0x98] sm:$0xff] }
 0x2f5   : > { %v1636_v5 = vpop.f32.mrf.mxu1 }
 0x2f6   : > { %v15248_v6 = vadd.f32 %v15168_v40, %v1636_v5  ;;  %1921 = vrot.lane.b32.xlu1 %v15243_v4, %s14650_s20  ;;  %v10652_v5 = vld [vmem:[%s20497_s5 + $0x90] sm:$0xff] }
 0x2f7   : > { %v12315_v7 = vpop.f32.mrf.mxu1 }
 0x2f8   : > { %v15253_v8 = vadd.f32 %v12315_v7, %v15168_v40  ;;  %1919 = vrot.lane.b32.xlu0 %v15248_v6, %s14650_s20  ;;  %v15392_v7 = vpop.eup %13650 }
 0x2f9   : > { %v1646_v9 = vpop.f32.mrf.mxu1  ;;  %20753 = vst [vmem:[#allocation2_spill] sm:$0xff] %v15392_v7  ;;  %v1769_v43 = vmul.f32 1.442695, %v15392_v7 }
 0x2fa   : > { %v15258_v11 = vadd.f32 %v15168_v40, %v1646_v9  ;;  %1925 = vrot.lane.b32.xlu1 %v15253_v8, %s14650_s20  ;;  %v15394_v9 = vpop.eup %13652 }
 0x2fb   : > { %v12318_v44 = vpop.f32.mrf.mxu1  ;;  %20754 = vst [vmem:[#allocation3_spill] sm:$0xff] %v15394_v9  ;;  %v1767_v20 = vmul.f32 1.442695, %v15394_v9  ;;  %v15401_v27 = vpop.eup %13654  ;;  %13670 = vpow2.f32 %v1769_v43 }
 0x2fc   : > { %v15263_v12 = vadd.f32 %v12318_v44, %v15168_v40  ;;  %1923 = vrot.lane.b32.xlu0 %v15258_v11, %s14650_s20  ;;  %20755 = vst [vmem:[#allocation4_spill] sm:$0xff] %v15401_v27  ;;  %v15404_v49 = vpop.eup %13656  ;;  %v1771_v36 = vmul.f32 1.442695, %v15401_v27 }
 0x2fd   : > { %v1656_v19 = vpop.f32.mrf.mxu1  ;;  %20756 = vst [vmem:[#allocation5_spill] sm:$0xff] %v15404_v49  ;;  %13672 = vpow2.f32 %v1767_v20  ;;  %v15408_v55 = vpop.eup %13658  ;;  %v1773_v45 = vmul.f32 1.442695, %v15404_v49 }
 0x2fe   : > { %v15268_v13 = vadd.f32 %v15168_v40, %v1656_v19  ;;  %1929 = vrot.lane.b32.xlu1 %v15263_v12, %s14650_s20  ;;  %13674 = vtanh.f32 %v15238_v3  ;;  %20757 = vst [vmem:[#allocation6_spill] sm:$0xff] %v15408_v55  ;;  %v15412_v59 = vpop.eup %13660  ;;  %v1775_v54 = vmul.f32 1.442695, %v15408_v55 }
 0x2ff   : > { %v12321_v21 = vpop.f32.mrf.mxu1  ;;  %13676 = vtanh.f32 %v15233_v1  ;;  %20758 = vst [vmem:[#allocation7_spill] sm:$0xff] %v15412_v59  ;;  %v15417_v62 = vpop.eup %13662  ;;  %v1777_v3 = vmul.f32 1.442695, %v15412_v59 }
 0x300   : > { %v15273_v23 = vadd.f32 %v12321_v21, %v15168_v40  ;;  %1927 = vrot.lane.b32.xlu0 %v15268_v13, %s14650_s20  ;;  %13678 = vtanh.f32 %v15243_v4  ;;  %20759 = vst [vmem:[#allocation8_spill] sm:$0xff] %v15417_v62  ;;  %v15420_v44 = vpop.eup %13664  ;;  %v1779_v1 = vmul.f32 1.442695, %v15417_v62 }
 0x301   : > { %v1666_v24 = vpop.f32.mrf.mxu1  ;;  %13680 = vtanh.f32 %v15248_v6  ;;  %20760 = vst [vmem:[#allocation9_spill] sm:$0xff] %v15420_v44  ;;  %v15425_v4 = vpop.eup %13666  ;;  %v1781_v6 = vmul.f32 1.442695, %v15420_v44 }
 0x302   : > { %v15278_v25 = vadd.f32 %v15168_v40, %v1666_v24  ;;  %1933 = vrot.lane.b32.xlu1 %v15273_v23, %s14650_s20  ;;  %13682 = vpow2.f32 %v1771_v36  ;;  %20761 = vst [vmem:[#allocation10_spill] sm:$0xff] %v15425_v4  ;;  %v15428_v19 = vpop.eup %13668 }
 0x303   : > { %v12324_v14 = vpop.f32.mrf.mxu1  ;;  %13684 = vpow2.f32 %v1773_v45  ;;  %20762 = vst [vmem:[#allocation11_spill] sm:$0xff] %v15428_v19  ;;  %v14453_v45 = vld [vmem:[%s14724_s19 + $0x20] sm:$0xff] }
 0x304   : > { %v15283_v26 = vadd.f32 %v12324_v14, %v15168_v40  ;;  %1931 = vrot.lane.b32.xlu0 %v15278_v25, %s14650_s20  ;;  %13686 = vtanh.f32 %v15253_v8  ;;  %v1783_v8 = vmul.f32 1.442695, %v15425_v4  ;;  %v1785_v14 = vmul.f32 1.442695, %v15428_v19 }
 0x305   : > { %v1676_v28 = vpop.f32.mrf.mxu1  ;;  %13688 = vtanh.f32 %v15258_v11 }
 0x306   : > { %v15288_v29 = vadd.f32 %v15168_v40, %v1676_v28  ;;  %1937 = vrot.lane.b32.xlu1 %v15283_v26, %s14650_s20  ;;  %13690 = vpow2.f32 %v1775_v54 }
 0x307   : > { %v12327_v15 = vpop.f32.mrf.mxu1  ;;  %13692 = vpow2.f32 %v1777_v3 }
 0x308   : > { %v15293_v30 = vadd.f32 %v12327_v15, %v15168_v40  ;;  %1935 = vrot.lane.b32.xlu0 %v15288_v29, %s14650_s20  ;;  %13694 = vtanh.f32 %v15263_v12  ;;  %v13671_v21 = vpop.eup %13670 }
 0x309   : > { %v1686_v31 = vpop.f32.mrf.mxu1  ;;  %13696 = vtanh.f32 %v15268_v13  ;;  %v1832_v18 = vmul.f32 %v14450_v41, %v13671_v21  ;;  %v14456_v41 = vld [vmem:[%s14724_s19 + $0x38] sm:$0xff] }
 0x30a   : > { %v15298_v32 = vadd.f32 %v15168_v40, %v1686_v31  ;;  %1941 = vrot.lane.b32.xlu1 %v15293_v30, %s14650_s20  ;;  %v13673_v24 = vpop.eup %13672  ;;  %13698 = vpow2.f32 %v1779_v1  ;;  %v14454_v1 = vld [vmem:[%s14724_s19 + $0x28] sm:$0xff] }
 0x30b   : > { %v12330_v33 = vpop.f32.mrf.mxu1  ;;  %v15433_v11 = vpop.eup %13674  ;;  %13700 = vpow2.f32 %v1781_v6 }
 0x30c   : > { %v15303_v16 = vadd.f32 %v12330_v33, %v15168_v40  ;;  %1939 = vrot.lane.b32.xlu0 %v15298_v32, %s14650_s20  ;;  %20763 = vst [vmem:[#allocation12_spill] sm:$0xff] %v15433_v11  ;;  %v15436_v28 = vpop.eup %13676  ;;  %13702 = vtanh.f32 %v15273_v23  ;;  %v1787_v31 = vmul.f32 1.442695, %v15433_v11  ;;  %v14449_v33 = vld [vmem:[%s14724_s19] sm:$0xff] }
 0x30d   : > { %v1696_v34 = vpop.f32.mrf.mxu1  ;;  %20764 = vst [vmem:[#allocation13_spill] sm:$0xff] %v15436_v28  ;;  %v15439_v15 = vpop.eup %13678  ;;  %13704 = vtanh.f32 %v15278_v25 }
 0x30e   : > { %v15308_v35 = vadd.f32 %v15168_v40, %v1696_v34  ;;  %1945 = vrot.lane.b32.xlu1 %v15303_v16, %s14650_s20  ;;  %20765 = vst [vmem:[#allocation14_spill] sm:$0xff] %v15439_v15  ;;  %v15442_v13 = vpop.eup %13680  ;;  %v1831_v34 = vmul.f32 %v14449_v33, %v13673_v24  ;;  %13706 = vpow2.f32 %v1783_v8  ;;  %v1793_v25 = vmul.f32 1.442695, %v15439_v15 }
 0x30f   : > { %v12333_v37 = vpop.f32.mrf.mxu1  ;;  %20766 = vst [vmem:[#allocation15_spill] sm:$0xff] %v15442_v13  ;;  %13708 = vpow2.f32 %v1785_v14  ;;  %v1791_v10 = vmul.f32 1.442695, %v15442_v13 }
 0x310   : > { %v15313_v17 = vadd.f32 %v12333_v37, %v15168_v40  ;;  %1943 = vrot.lane.b32.xlu0 %v15308_v35, %s14650_s20  ;;  %v13683_v37 = vpop.eup %13682  ;;  %13710 = vtanh.f32 %v15283_v26 }
 0x311   : > { %v1706_v38 = vpop.f32.mrf.mxu1  ;;  %13712 = vtanh.f32 %v15288_v29  ;;  %v1833_v58 = vmul.f32 %v14451_v57, %v13683_v37 }
 0x312   : > { %v15318_v39 = vadd.f32 %v15168_v40, %v1706_v38  ;;  %1949 = vrot.lane.b32.xlu1 %v15313_v17, %s14650_s20  ;;  %v1789_v38 = vmul.f32 1.442695, %v15436_v28  ;;  %13714 = vpow2.f32 %v1787_v31 }
 0x313   : > { %v12336_v42 = vpop.f32.mrf.mxu1 }
 0x314   : > { %v15329_v22 = vadd.f32 %v12336_v42, %v15168_v40  ;;  %1947 = vrot.lane.b32.xlu0 %v15318_v39, %s14650_s20  ;;  %v13685_v42 = vpop.eup %13684  ;;  %13716 = vpow2.f32 %v1789_v38 }
 0x315   : > { %v1716_v47 = vpop.f32.mrf.mxu1 }
 0x316   : > { %v15337_v48 = vadd.f32 %v15168_v40, %v1716_v47  ;;  %1953 = vrot.lane.b32.xlu1 %v15329_v22, %s14650_s20  ;;  %v15452_v47 = vpop.eup %13686  ;;  %13718 = vpow2.f32 %v1793_v25 }
 0x317   : > { %v12339_v50 = vpop.f32.mrf.mxu1  ;;  %20767 = vst [vmem:[#allocation16_spill] sm:$0xff] %v15452_v47 }
 0x318   : > { %v15345_v51 = vadd.f32 %v12339_v50, %v15168_v40  ;;  %1951 = vrot.lane.b32.xlu0 %v15337_v48, %s14650_s20 }
 0x319   : > { %v1726_v53 = vpop.f32.mrf.mxu1 }
 0x31a   : > { %v15353_v56 = vadd.f32 %v15168_v40, %v1726_v53  ;;  %1957 = vrot.lane.b32.xlu1 %v15345_v51, %s14650_s20  ;;  %v10658_v40 = vld [vmem:[%s20497_s5 + $0xc0] sm:$0xff]  ;;  %v15458_v53 = vpop.eup %13688  ;;  %13720 = vpow2.f32 %v1791_v10 }
 0x31b   : > { %12454 = vmatprep.subr.mxu0 %v10658_v40  ;;  %20768 = vst [vmem:[#allocation17_spill] sm:$0xff] %v15458_v53  ;;  %v13691_v26 = vpop.eup %13690  ;;  %13722 = vtanh.f32 %v15298_v32 }
 0x31c   : > { %1955 = vrot.lane.b32.xlu0 %v15353_v56, %s14650_s20  ;;  %12455 = vmatpush3.msra.mxu0 %v10658_v40  ;;  %v14452_v40 = vld [vmem:[%s14724_s19 + $0x18] sm:$0xff]  ;;  %v13693_v29 = vpop.eup %13692  ;;  %v1835_v54 = vmul.f32 %v14453_v45, %v13691_v26  ;;  %13724 = vtanh.f32 %v15293_v30  ;;  %v14457_v26 = vld [vmem:[%s14724_s19 + $0x40] sm:$0xff] }
 0x31d   : > { %12456 = vmatprep.subr.mxu0 %v10657_v60  ;;  %v1836_v6 = vmul.f32 %v14454_v1, %v13693_v29 }
 0x31e   : > { %12457 = vmatpush3.msra.mxu0 %v10657_v60  ;;  %v1834_v60 = vmul.f32 %v14452_v40, %v13685_v42 }
 0x31f   : > { %12458 = vmatprep.subr.mxu0 %v10656_v61 }
 0x320   : > { %12459 = vmatpush3.msra.mxu0 %v10656_v61 }
 0x321   : > { %12460 = vmatprep.subr.mxu0 %v10655_v0 }
 0x322   : > { %12461 = vmatpush3.msra.mxu0 %v10655_v0  ;;  %v1797_v0 = vmul.f32 1.442695, %v15452_v47 }
 0x323   : > { %12462 = vmatprep.subr.mxu0 %v10654_v2 }
 0x324   : > { %12463 = vmatpush3.msra.mxu0 %v10654_v2 }
 0x325   : > { %12464 = vmatprep.subr.mxu0 %v10653_v63 }
 0x326   : > { %12465 = vmatpush3.msra.mxu0 %v10653_v63  ;;  %v15469_v63 = vpop.eup %13694  ;;  %13726 = vpow2.f32 %v1797_v0 }
 0x327   : > { %12466 = vmatprep.subr.mxu0 %v10652_v5  ;;  %20769 = vst [vmem:[#allocation18_spill] sm:$0xff] %v15469_v63  ;;  %v15474_v36 = vpop.eup %13696  ;;  %v1801_v32 = vmul.f32 1.442695, %v15469_v63 }
 0x328   : > { %12467 = vmatpush3.msra.mxu0 %v10652_v5  ;;  %v1795_v5 = vmul.f32 1.442695, %v15458_v53  ;;  %20770 = vst [vmem:[#allocation19_spill] sm:$0xff] %v15474_v36  ;;  %v13699_v3 = vpop.eup %13698 }
 0x329   : > { %v13701_v24 = vpop.eup %13700 }
 0x32a   : > { %v15487_v14 = vpop.eup %13702  ;;  %13728 = vpow2.f32 %v1795_v5 }
 0x32b   : > { %20771 = vst [vmem:[#allocation20_spill] sm:$0xff] %v15487_v14  ;;  %v15492_v33 = vpop.eup %13704  ;;  %13730 = vtanh.f32 %v15308_v35  ;;  %v1805_v35 = vmul.f32 1.442695, %v15487_v14  ;;  %v14480_v14 = vld [vmem:[%s14724_s19 + $0xf8] sm:$0xff] }
 0x32c   : > { %20772 = vst [vmem:[#allocation21_spill] sm:$0xff] %v15492_v33  ;;  %v13707_v38 = vpop.eup %13706  ;;  %13732 = vtanh.f32 %v15303_v16 }
 0x32d   : > { %v13709_v42 = vpop.eup %13708  ;;  %13734 = vpow2.f32 %v1801_v32  ;;  %v1839_v40 = vmul.f32 %v14457_v26, %v13707_v38  ;;  %v14460_v32 = vld [vmem:[%s14724_s19 + $0x58] sm:$0xff] }
 0x32e   : > { %v15505_v10 = vpop.eup %13710 }
 0x32f   : > { %20773 = vst [vmem:[#allocation22_spill] sm:$0xff] %v15505_v10 }
 0x350   : > { %v1898_v12 = vpop.permute.xlu1 %1897 }
 0x351   : > { %v15456_v50 = vadd.f32 %v1898_v12, %v1832_v18  ;;  %v1799_v12 = vmul.f32 1.442695, %v15474_v36  ;;  %v1838_v18 = vmul.f32 %v14456_v41, %v13701_v24 }
 0x352   : > { %v1896_v23 = vpop.permute.xlu0 %1895 }
 0x353   : > { %v15450_v46 = vadd.f32 %v1896_v23, %v1831_v34  ;;  %v14455_v34 = vld [vmem:[%s14724_s19 + $0x30] sm:$0xff]  ;;  %13736 = vpow2.f32 %v1799_v12 }
 0x354   : > { %v1902_v52 = vpop.permute.xlu1 %1901  ;;  %v1837_v37 = vmul.f32 %v14455_v34, %v13699_v3  ;;  %13738 = vtanh.f32 %v15318_v39  ;;  %v1809_v39 = vmul.f32 1.442695, %v15505_v10 }
 0x355   : > { %12392 = vmatprep.mubr.msk.f32.mxu1 %vm842_vm2, %v15450_v46  ;;  %v15472_v43 = vadd.f32 %v1902_v52, %v1834_v60  ;;  %v1803_v52 = vmul.f32 1.442695, %v15492_v33  ;;  %13740 = vtanh.f32 %v15313_v17 }
 0x356   : > { %v1900_v61 = vpop.permute.xlu0 %1899  ;;  %12393 = vmatmul.mubr.msk.f32.vlgmr.msra.gmra.mxu1 %vm842_vm2, %v15456_v50  ;;  %13742 = vpow2.f32 %v1805_v35 }
 0x357   : > { %v15467_v2 = vadd.f32 %v1900_v61, %v1833_v58  ;;  %v15510_v58 = vpop.eup %13712  ;;  %v14458_v61 = vld [vmem:[%s14724_s19 + $0x48] sm:$0xff]  ;;  %13744 = vpow2.f32 %v1803_v52 }
 0x358   : > { %v1906_v20 = vpop.permute.xlu1 %1905  ;;  %20774 = vst [vmem:[#allocation23_spill] sm:$0xff] %v15510_v58  ;;  %v13715_v60 = vpop.eup %13714  ;;  %v1840_v29 = vmul.f32 %v14458_v61, %v13709_v42  ;;  %13746 = vtanh.f32 %v15337_v48 }
 0x359   : > { %12395 = vmatprep.mubr.msk.f32.mxu1 %vm842_vm2, %v15467_v2  ;;  %v15490_v31 = vadd.f32 %v1906_v20, %v1836_v6  ;;  %v13717_v5 = vpop.eup %13716  ;;  %v14459_v6 = vld [vmem:[%s14724_s19 + $0x50] sm:$0xff]  ;;  %13748 = vtanh.f32 %v15329_v22 }
 0x35a   : > { %v1904_v21 = vpop.permute.xlu0 %1903  ;;  %12396 = vmatmul.mubr.msk.f32.gmra.mxu1 %vm842_vm2, %v15472_v43  ;;  %v13719_v45 = vpop.eup %13718  ;;  %v1842_v12 = vmul.f32 %v14460_v32, %v13717_v5  ;;  %13750 = vpow2.f32 %v1809_v39 }
 0x35b   : > { %v15485_v8 = vadd.f32 %v1904_v21, %v1835_v54  ;;  %v1807_v54 = vmul.f32 1.442695, %v15510_v58  ;;  %v13721_v1 = vpop.eup %13720  ;;  %v1841_v21 = vmul.f32 %v14459_v6, %v13715_v60 }
 0x35c   : > { %v1910_v30 = vpop.permute.xlu1 %1909  ;;  %v15530_v24 = vpop.eup %13722 }
 0x35d   : > { %12398 = vmatprep.mubr.msk.f32.mxu1 %vm842_vm2, %v15485_v8  ;;  %v15508_v57 = vadd.f32 %v1910_v30, %v1838_v18  ;;  %20775 = vst [vmem:[#allocation24_spill] sm:$0xff] %v15530_v24  ;;  %v15536_v34 = vpop.eup %13724  ;;  %13752 = vpow2.f32 %v1807_v54  ;;  %v1811_v22 = vmul.f32 1.442695, %v15530_v24 }
 0x35e   : > { %v1908_v23 = vpop.permute.xlu0 %1907  ;;  %12399 = vmatmul.mubr.msk.f32.gmra.mxu1 %vm842_vm2, %v15490_v31  ;;  %20776 = vst [vmem:[#allocation25_spill] sm:$0xff] %v15536_v34  ;;  %13754 = vtanh.f32 %v15353_v56  ;;  %v1813_v52 = vmul.f32 1.442695, %v15536_v34 }
 0x35f   : > { %v15503_v25 = vadd.f32 %v1908_v23, %v1837_v37  ;;  %v13727_v37 = vpop.eup %13726  ;;  %v14461_v23 = vld [vmem:[%s14724_s19 + $0x60] sm:$0xff]  ;;  %13756 = vtanh.f32 %v15345_v51  ;;  %v14463_v51 = vld [vmem:[%s14724_s19 + $0x70] sm:$0xff] }
 0x360   : > { %v1914_v16 = vpop.permute.xlu1 %1913  ;;  %v13729_v18 = vpop.eup %13728  ;;  %v1843_v42 = vmul.f32 %v14461_v23, %v13721_v1  ;;  %13758 = vpow2.f32 %v1811_v22  ;;  %v14464_v1 = vld [vmem:[%s14724_s19 + $0x78] sm:$0xff] }
 0x361   : > { %12401 = vmatprep.mubr.msk.f32.mxu1 %vm842_vm2, %v15503_v25  ;;  %v15524_v3 = vadd.f32 %v1914_v16, %v1840_v29  ;;  %v15547_v35 = vpop.eup %13730  ;;  %v14462_v16 = vld [vmem:[%s14724_s19 + $0x68] sm:$0xff]  ;;  %13760 = vpow2.f32 %v1813_v52  ;;  %v1846_v6 = vmul.f32 %v14464_v1, %v13727_v37  ;;  %v14465_v37 = vld [vmem:[%s14724_s19 + $0x80] sm:$0xff] }
 0x362   : > { %v1912_v0 = vpop.permute.xlu0 %1911  ;;  %12402 = vmatmul.mubr.msk.f32.gmra.mxu1 %vm842_vm2, %v15508_v57  ;;  %20777 = vst [vmem:[#allocation26_spill] sm:$0xff] %v15547_v35  ;;  %v1844_v26 = vmul.f32 %v14462_v16, %v13719_v45  ;;  %v15554_v56 = vpop.eup %13732  ;;  %v1815_v39 = vmul.f32 1.442695, %v15547_v35  ;;  %v1845_v45 = vmul.f32 %v14463_v51, %v13729_v18  ;;  %v14478_v35 = vld [vmem:[%s14724_s19 + $0xe8] sm:$0xff] }
 0x363   : > { %v15521_v20 = vadd.f32 %v1912_v0, %v1839_v40  ;;  %20778 = vst [vmem:[#allocation27_spill] sm:$0xff] %v15554_v56  ;;  %v13735_v61 = vpop.eup %13734 }
 0x364   : > { %v1918_v17 = vpop.permute.xlu1 %1917  ;;  %v13737_v5 = vpop.eup %13736  ;;  %13762 = vpow2.f32 %v1815_v39 }
 0x365   : > { %12404 = vmatprep.mubr.msk.f32.mxu1 %vm842_vm2, %v15521_v20  ;;  %v15540_v38 = vadd.f32 %v1918_v17, %v1842_v12  ;;  %v15564_v54 = vpop.eup %13738  ;;  %v1817_v17 = vmul.f32 1.442695, %v15554_v56 }
 0x366   : > { %v1916_v30 = vpop.permute.xlu0 %1915  ;;  %12405 = vmatmul.mubr.msk.f32.gmra.mxu1 %vm842_vm2, %v15524_v3  ;;  %20779 = vst [vmem:[#allocation28_spill] sm:$0xff] %v15564_v54  ;;  %v15570_v32 = vpop.eup %13740  ;;  %v1819_v23 = vmul.f32 1.442695, %v15564_v54  ;;  %v14476_v54 = vld [vmem:[%s14724_s19 + $0xd8] sm:$0xff] }
 0x367   : > { %v15538_v48 = vadd.f32 %v1916_v30, %v1841_v21  ;;  %20780 = vst [vmem:[#allocation29_spill] sm:$0xff] %v15570_v32  ;;  %v13743_v30 = vpop.eup %13742  ;;  %13764 = vpow2.f32 %v1817_v17  ;;  %v1821_v16 = vmul.f32 1.442695, %v15570_v32 }
 0x368   : > { %v1922_v41 = vpop.permute.xlu1 %1921  ;;  %v13745_v22 = vpop.eup %13744  ;;  %13766 = vpow2.f32 %v1819_v23 }
 0x369   : > { %12407 = vmatprep.mubr.msk.f32.mxu1 %vm842_vm2, %v15538_v48  ;;  %v15558_v29 = vadd.f32 %v1922_v41, %v1844_v26  ;;  %v15580_v52 = vpop.eup %13746  ;;  %v14466_v26 = vld [vmem:[%s14724_s19 + $0x88] sm:$0xff]  ;;  %13768 = vpow2.f32 %v1821_v16  ;;  %v14469_v16 = vld [vmem:[%s14724_s19 + $0xa0] sm:$0xff] }
 0x36a   : > { %v1920_v40 = vpop.permute.xlu0 %1919  ;;  %12408 = vmatmul.mubr.msk.f32.gmra.mxu1 %vm842_vm2, %v15540_v38  ;;  %20781 = vst [vmem:[#allocation30_spill] sm:$0xff] %v15580_v52  ;;  %v15586_v51 = vpop.eup %13748  ;;  %v1823_v17 = vmul.f32 1.442695, %v15580_v52 }
 0x36b   : > { %v15556_v60 = vadd.f32 %v1920_v40, %v1843_v42  ;;  %v1847_v42 = vmul.f32 %v14465_v37, %v13737_v5  ;;  %v1848_v40 = vmul.f32 %v14466_v26, %v13735_v61  ;;  %20782 = vst [vmem:[#allocation31_spill] sm:$0xff] %v15586_v51  ;;  %v13751_v1 = vpop.eup %13750  ;;  %v14467_v61 = vld [vmem:[%s14724_s19 + $0x90] sm:$0xff]  ;;  %v14468_v26 = vld [vmem:[%s14724_s19 + $0x98] sm:$0xff] }
 0x36c   : > { %v1926_v0 = vpop.permute.xlu1 %1925  ;;  %13770 = vpow2.f32 %v1823_v17 }
 0x36d   : > { %12410 = vmatprep.mubr.msk.f32.mxu1 %vm842_vm2, %v15556_v60  ;;  %v15574_v41 = vadd.f32 %v1926_v0, %v1846_v6  ;;  %v13753_v6 = vpop.eup %13752 }
 0x36e   : > { %v1924_v21 = vpop.permute.xlu0 %1923  ;;  %12411 = vmatmul.mubr.msk.f32.gmra.mxu1 %vm842_vm2, %v15558_v29  ;;  %v15596_v37 = vpop.eup %13754 }
 0x36f   : > { %v15572_v12 = vadd.f32 %v1924_v21, %v1845_v45  ;;  %v1849_v21 = vmul.f32 %v14467_v61, %v13745_v22  ;;  %20783 = vst [vmem:[#allocation32_spill] sm:$0xff] %v15596_v37  ;;  %v1827_v23 = vmul.f32 1.442695, %v15596_v37  ;;  %v1851_v61 = vmul.f32 %v14469_v16, %v13753_v6  ;;  %v14471_v6 = vld [vmem:[%s14724_s19 + $0xb0] sm:$0xff] }
 0x370   : > { %v1930_v18 = vpop.permute.xlu1 %1929 }
 0x371   : > { %12413 = vmatprep.mubr.msk.f32.mxu1 %vm842_vm2, %v15572_v12  ;;  %v15590_v5 = vadd.f32 %v1930_v18, %v1848_v40  ;;  %v1850_v18 = vmul.f32 %v14468_v26, %v13743_v30 }
 0x372   : > { %v1928_v0 = vpop.permute.xlu0 %1927  ;;  %12414 = vmatmul.mubr.msk.f32.gmra.mxu1 %vm842_vm2, %v15574_v41 }
 0x373   : > { %v15588_v45 = vadd.f32 %v1928_v0, %v1847_v42  ;;  %v1825_v42 = vmul.f32 1.442695, %v15586_v51  ;;  %v15602_v0 = vpop.eup %13756  ;;  %v14470_v51 = vld [vmem:[%s14724_s19 + $0xa8] sm:$0xff] }
 0x374   : > { %v1934_v39 = vpop.permute.xlu1 %1933  ;;  %20784 = vst [vmem:[#allocation33_spill] sm:$0xff] %v15602_v0  ;;  %v13759_v30 = vpop.eup %13758  ;;  %v1829_v26 = vmul.f32 1.442695, %v15602_v0 }
 0x375   : > { %12416 = vmatprep.mubr.msk.f32.mxu1 %vm842_vm2, %v15588_v45  ;;  %v15606_v52 = vadd.f32 %v1934_v39, %v1850_v18  ;;  %13772 = vpow2.f32 %v1825_v42  ;;  %v13761_v39 = vpop.eup %13760  ;;  %v1853_v17 = vmul.f32 %v14471_v6, %v13759_v30  ;;  %v14474_v6 = vld [vmem:[%s14724_s19 + $0xc8] sm:$0xff] }
 0x376   : > { %v1932_v40 = vpop.permute.xlu0 %1931  ;;  %12417 = vmatmul.mubr.msk.f32.gmra.mxu1 %vm842_vm2, %v15590_v5  ;;  %13774 = vpow2.f32 %v1827_v23  ;;  %v13763_v42 = vpop.eup %13762  ;;  %v14473_v23 = vld [vmem:[%s14724_s19 + $0xc0] sm:$0xff] }
 0x377   : > { %v15604_v32 = vadd.f32 %v1932_v40, %v1849_v21  ;;  %v1852_v21 = vmul.f32 %v14470_v51, %v13751_v1  ;;  %13776 = vpow2.f32 %v1829_v26  ;;  %v14472_v51 = vld [vmem:[%s14724_s19 + $0xb8] sm:$0xff]  ;;  %v1855_v30 = vmul.f32 %v14473_v23, %v13763_v42 }
 0x378   : > { %v1938_v22 = vpop.permute.xlu1 %1937  ;;  %v1854_v1 = vmul.f32 %v14472_v51, %v13761_v39 }
 0x379   : > { %12419 = vmatprep.mubr.msk.f32.mxu1 %vm842_vm2, %v15604_v32  ;;  %v15618_v37 = vadd.f32 %v1938_v22, %v1852_v21 }
 0x37a   : > { %v1936_v40 = vpop.permute.xlu0 %1935  ;;  %12420 = vmatmul.mubr.msk.f32.gmra.mxu1 %vm842_vm2, %v15606_v52 }
 0x37b   : > { %v15616_v18 = vadd.f32 %v1936_v40, %v1851_v61  ;;  %20786 = vst [vmem:[#allocation35_spill] sm:$0xff] %v15618_v37  ;;  %v13765_v61 = vpop.eup %13764 }
 0x37c   : > { %v1942_v56 = vpop.permute.xlu1 %1941  ;;  %v13767_v26 = vpop.eup %13766  ;;  %v1856_v39 = vmul.f32 %v14474_v6, %v13765_v61 }
 0x37d   : > { %20785 = vst [vmem:[#allocation34_spill] sm:$0xff] %v15616_v18  ;;  %12422 = vmatprep.mubr.msk.f32.mxu1 %vm842_vm2, %v15616_v18  ;;  %v15628_v21 = vadd.f32 %v1942_v56, %v1854_v1  ;;  %v13769_v0 = vpop.eup %13768 }
 0x37e   : > { %v1940_v16 = vpop.permute.xlu0 %1939  ;;  %12423 = vmatmul.mubr.msk.f32.gmra.mxu1 %vm842_vm2, %v15618_v37  ;;  %v13771_v23 = vpop.eup %13770  ;;  %v1858_v61 = vmul.f32 %v14476_v54, %v13769_v0 }
 0x37f   : > { %v15626_v22 = vadd.f32 %v1940_v16, %v1853_v17  ;;  %20788 = vst [vmem:[#allocation37_spill] sm:$0xff] %v15628_v21  ;;  %v14475_v16 = vld [vmem:[%s14724_s19 + $0xd0] sm:$0xff] }
 0x380   : > { %v1946_v40 = vpop.permute.xlu1 %1945  ;;  %v1857_v42 = vmul.f32 %v14475_v16, %v13767_v26 }
 0x381   : > { %20787 = vst [vmem:[#allocation36_spill] sm:$0xff] %v15626_v22  ;;  %12425 = vmatprep.mubr.msk.f32.mxu1 %vm842_vm2, %v15626_v22  ;;  %v15638_v56 = vadd.f32 %v1946_v40, %v1856_v39 }
 0x382   : > { %v1944_v51 = vpop.permute.xlu0 %1943  ;;  %12426 = vmatmul.mubr.msk.f32.gmra.mxu1 %vm842_vm2, %v15628_v21  ;;  %v13773_v34 = vpop.eup %13772 }
 0x383   : > { %v15636_v17 = vadd.f32 %v1944_v51, %v1855_v30  ;;  %20790 = vst [vmem:[#allocation39_spill] sm:$0xff] %v15638_v56  ;;  %v14477_v51 = vld [vmem:[%s14724_s19 + $0xe0] sm:$0xff]  ;;  %v13775_v16 = vpop.eup %13774  ;;  %v1860_v54 = vmul.f32 %v14478_v35, %v13773_v34 }
 0x384   : > { %v1950_v1 = vpop.permute.xlu1 %1949  ;;  %v1859_v26 = vmul.f32 %v14477_v51, %v13771_v23  ;;  %v13777_v10 = vpop.eup %13776 }
 0x385   : > { %20789 = vst [vmem:[#allocation38_spill] sm:$0xff] %v15636_v17  ;;  %12428 = vmatprep.mubr.msk.f32.mxu1 %vm842_vm2, %v15636_v17  ;;  %v15648_v40 = vadd.f32 %v1950_v1, %v1858_v61  ;;  %v14479_v61 = vld [vmem:[%s14724_s19 + $0xf0] sm:$0xff]  ;;  %v1862_v23 = vmul.f32 %v14480_v14, %v13777_v10  ;;  %v10650_v14 = vld [vmem:[%s20497_s5 + $0x80] sm:$0xff]  ;;  %v15680_v10 = vpop.f32.mrf.mxu0 }
 0x386   : > { %v1948_v6 = vpop.permute.xlu0 %1947  ;;  %12429 = vmatmul.mubr.msk.f32.gmra.mxu1 %vm842_vm2, %v15638_v56  ;;  %v1861_v24 = vmul.f32 %v14479_v61, %v13775_v16  ;;  %v10682_v16 = vld [vmem:[%s20499_s7 + $0xf0] sm:$0xff]  ;;  %v10679_v61 = vld [vmem:[%s20499_s7 + $0xd8] sm:$0xff] }
 0x387   : > { %v15646_v30 = vadd.f32 %v1948_v6, %v1857_v42  ;;  %20792 = vst [vmem:[#allocation41_spill] sm:$0xff] %v15648_v40 }
 0x388   : > { %v1954_v39 = vpop.permute.xlu1 %1953 }
 0x389   : > { %20791 = vst [vmem:[#allocation40_spill] sm:$0xff] %v15646_v30  ;;  %12431 = vmatprep.mubr.msk.f32.mxu1 %vm842_vm2, %v15646_v30  ;;  %v15658_v6 = vadd.f32 %v1954_v39, %v1860_v54  ;;  %v10651_v39 = vld [vmem:[%s20497_s5 + $0x88] sm:$0xff] }
 0x38a   : > { %v1952_v0 = vpop.permute.xlu0 %1951  ;;  %12432 = vmatmul.mubr.msk.f32.gmra.mxu1 %vm842_vm2, %v15648_v40  ;;  %12468 = vmatprep.subr.mxu0 %v10651_v39  ;;  %v10681_v54 = vld [vmem:[%s20499_s7 + $0xe8] sm:$0xff] }
 0x38b   : > { %v15656_v42 = vadd.f32 %v1952_v0, %v1859_v26  ;;  %20794 = vst [vmem:[#allocation43_spill] sm:$0xff] %v15658_v6  ;;  %12469 = vmatpush3.msra.mxu0 %v10651_v39  ;;  %v10683_v26 = vld [vmem:[%s20499_s7 + $0xf8] sm:$0xff]  ;;  %v10677_v39 = vld [vmem:[%s20499_s7 + $0xc8] sm:$0xff] }
 0x38c   : > { %v1958_v1 = vpop.permute.xlu1 %1957  ;;  %12470 = vmatprep.subr.mxu0 %v10650_v14  ;;  %12520 = vmatprep.subr.mxu1 %v10683_v26 }
 0x38d   : > { %20793 = vst [vmem:[#allocation42_spill] sm:$0xff] %v15656_v42  ;;  %12434 = vmatprep.mubr.msk.f32.mxu1 %vm842_vm2, %v15656_v42  ;;  %v15668_v51 = vadd.f32 %v1958_v1, %v1862_v23  ;;  %12471 = vmatpush3.msra.mxu0 %v10650_v14  ;;  %v10680_v1 = vld [vmem:[%s20499_s7 + $0xe0] sm:$0xff] }
 0x38e   : > { %12435 = vmatmul.mubr.msk.f32.gmra.mxu1 %vm842_vm2, %v15658_v6  ;;  %v1956_v34 = vpop.permute.xlu0 %1955 }
 0x38f   : > { %v15666_v35 = vadd.f32 %v1956_v34, %v1861_v24  ;;  %20796 = vst [vmem:[#allocation45_spill] sm:$0xff] %v15668_v51  ;;  %v15682_v24 = vpop.f32.mrf.mxu0  ;;  %12521 = vmatpush3.msra.mxu1 %v10683_v26  ;;  %v10678_v34 = vld [vmem:[%s20499_s7 + $0xd0] sm:$0xff]  ;;  %v10676_v26 = vld [vmem:[%s20499_s7 + $0xc0] sm:$0xff] }
 0x390   : > { %12522 = vmatprep.subr.mxu1 %v10682_v16 }
 0x391   : > { %20795 = vst [vmem:[#allocation44_spill] sm:$0xff] %v15666_v35  ;;  %12437 = vmatprep.mubr.msk.f32.mxu1 %vm842_vm2, %v15666_v35  ;;  %v15693_v0 = vpop.f32.mrf.mxu0  ;;  %12523 = vmatpush3.msra.mxu1 %v10682_v16  ;;  %v10675_v16 = vld [vmem:[%s20499_s7 + $0xb8] sm:$0xff] }
 0x392   : > { %12438 = vmatmul.mubr.msk.f32.gmra.mxu1 %vm842_vm2, %v15668_v51  ;;  %12524 = vmatprep.subr.mxu1 %v10681_v54 }
 0x393   : > { %12525 = vmatpush3.msra.mxu1 %v10681_v54  ;;  %v2231_v23 = vpop.f32.mrf.mxu0 }
 0x394   : > { %12526 = vmatprep.subr.mxu1 %v10680_v1 }
 0x395   : > { %12527 = vmatpush3.msra.mxu1 %v10680_v1  ;;  %v12350_v14 = vpop.f32.mrf.mxu0  ;;  %v10674_v1 = vld [vmem:[%s20499_s7 + $0xb0] sm:$0xff] }
 0x396   : > { %12528 = vmatprep.subr.mxu1 %v10679_v61 }
 0x397   : > { %12529 = vmatpush3.msra.mxu1 %v10679_v61  ;;  %v2241_v54 = vpop.f32.mrf.mxu0  ;;  %v10673_v61 = vld [vmem:[%s20499_s7 + $0xa8] sm:$0xff] }
 0x398   : > { %12530 = vmatprep.subr.mxu1 %v10678_v34 }
 0x399   : > { %12531 = vmatpush3.msra.mxu1 %v10678_v34  ;;  %v12353_v34 = vpop.f32.mrf.mxu0 }
 0x39a   : > { %12532 = vmatprep.subr.mxu1 %v10677_v39 }
 0x39b   : > { %12533 = vmatpush3.msra.mxu1 %v10677_v39  ;;  %v10672_v39 = vld [vmem:[%s20499_s7 + $0xa0] sm:$0xff]  ;;  %v2251_v58 = vpop.f32.mrf.mxu0 }
 0x39c   : > { %12534 = vmatprep.subr.mxu1 %v10676_v26 }
 0x39d   : > { %12535 = vmatpush3.msra.mxu1 %v10676_v26  ;;  %v10671_v26 = vld [vmem:[%s20499_s7 + $0x98] sm:$0xff]  ;;  %v12356_v63 = vpop.f32.mrf.mxu0 }
 0x39e   : > { %12536 = vmatprep.subr.mxu1 %v10675_v16 }
 0x39f   : > { %12537 = vmatpush3.msra.mxu1 %v10675_v16  ;;  %v10670_v16 = vld [vmem:[%s20499_s7 + $0x90] sm:$0xff] }
 0x3a0   : > { %12538 = vmatprep.subr.mxu1 %v10674_v1 }
 0x3a1   : > { %12539 = vmatpush3.msra.mxu1 %v10674_v1  ;;  %v10669_v1 = vld [vmem:[%s20499_s7 + $0x88] sm:$0xff] }
 0x3a2   : > { %12540 = vmatprep.subr.mxu1 %v10673_v61 }
 0x3a3   : > { %12541 = vmatpush3.msra.mxu1 %v10673_v61  ;;  %v2261_v61 = vpop.f32.mrf.mxu0 }
 0x3a4   : > { %12542 = vmatprep.subr.mxu1 %v10672_v39 }
 0x3a5   : > { %12543 = vmatpush3.msra.mxu1 %v10672_v39  ;;  %v12359_v33 = vpop.f32.mrf.mxu0 }
 0x3a6   : > { %12544 = vmatprep.subr.mxu1 %v10671_v26 }
 0x3a7   : > { %12545 = vmatpush3.msra.mxu1 %v10671_v26  ;;  %v2271_v47 = vpop.f32.mrf.mxu0 }
 0x3a8   : > { %12546 = vmatprep.subr.mxu1 %v10670_v16 }
 0x3a9   : > { %12547 = vmatpush3.msra.mxu1 %v10670_v16  ;;  %v15731_v36 = vpop.f32.mrf.mxu0  ;;  %v15745_v16 = vld [vmem:[%s20496_s4 + $0x1] ss:$0 sm:$0xff] }
 0x3aa   : > { %12548 = vmatprep.subr.mxu1 %v10669_v1 }
 0x3ab   : > { %12549 = vmatpush3.msra.mxu1 %v10669_v1  ;;  %v15733_v39 = vpop.f32.mrf.mxu0 }
 0x3ad   : > { %v15735_v15 = vpop.f32.mrf.mxu0 }
 0x3af   : > { %v15737_v53 = vpop.f32.mrf.mxu0 }
 0x3b1   : > { %v15739_v28 = vpop.f32.mrf.mxu0 }
 0x3b3   : > { %v15749_v4 = vpop.f32.mrf.mxu0 }
 0x3b5   : > { %v15754_v9 = vpop.f32.mrf.mxu0 }
 0x416   : > { %v12394_v26 = vpop.f32.mrf.mxu1 }
 0x417   : > { %v2551_v13 = vadd.f32 %v12394_v26, %v15680_v10 }
 0x418   : > { %v2545_v1 = vpop.f32.mrf.mxu1 }
 0x419   : > { %v2546_v19 = vadd.f32 %v2545_v1, %v15682_v24  ;;  %v2713_v11 = vadd.f32 %v15745_v16, %v2551_v13 }
 0x41a   : > { %v12397_v44 = vpop.f32.mrf.mxu1 }
 0x41b   : > { %v2712_v59 = vadd.f32 %v15745_v16, %v2546_v19  ;;  %v2561_v62 = vadd.f32 %v12397_v44, %v15693_v0  ;;  %v2745_v26 = vmax.f32 %v2713_v11, 0.0 }
 0x41c   : > { %v2555_v49 = vpop.f32.mrf.mxu1 }
 0x41d   : > { %v2556_v55 = vadd.f32 %v2555_v49, %v2231_v23  ;;  %v2744_v10 = vmax.f32 %v2712_v59, 0.0  ;;  %v2715_v27 = vadd.f32 %v15745_v16, %v2561_v62  ;;  %v15758_v49 = vpop.f32.mrf.mxu0 }
 0x41e   : > { %v12400_v7 = vpop.f32.mrf.mxu1 }
 0x41f   : > { %v2714_v24 = vadd.f32 %v15745_v16, %v2556_v55  ;;  %v2571_v1 = vadd.f32 %v12400_v7, %v12350_v14  ;;  %12472 = vmatprep.mubr.f32.mxu0 %v2744_v10  ;;  %v2747_v19 = vmax.f32 %v2715_v27, 0.0 }
 0x420   : > { %v2565_v13 = vpop.f32.mrf.mxu1  ;;  %12473 = vmatmul.mubr.f32.vlgmr.msra.gmra.mxu0 %v2745_v26 }
 0x421   : > { %v2566_v51 = vadd.f32 %v2565_v13, %v2241_v54  ;;  %v2746_v35 = vmax.f32 %v2714_v24, 0.0  ;;  %v2717_v44 = vadd.f32 %v15745_v16, %v2571_v1  ;;  %v15762_v54 = vpop.f32.mrf.mxu0 }
 0x422   : > { %v12403_v0 = vpop.f32.mrf.mxu1 }
 0x423   : > { %v2716_v59 = vadd.f32 %v15745_v16, %v2566_v51  ;;  %v2581_v62 = vadd.f32 %v12403_v0, %v12353_v34  ;;  %12475 = vmatprep.mubr.f32.mxu0 %v2746_v35  ;;  %v2749_v7 = vmax.f32 %v2717_v44, 0.0 }
 0x424   : > { %v2575_v11 = vpop.f32.mrf.mxu1  ;;  %12476 = vmatmul.mubr.f32.gmra.mxu0 %v2747_v19 }
 0x425   : > { %v2576_v23 = vadd.f32 %v2575_v11, %v2251_v58  ;;  %v2748_v55 = vmax.f32 %v2716_v59, 0.0  ;;  %v2719_v14 = vadd.f32 %v15745_v16, %v2581_v62  ;;  %v2321_v58 = vpop.f32.mrf.mxu0 }
 0x426   : > { %v12406_v10 = vpop.f32.mrf.mxu1 }
 0x427   : > { %v2718_v27 = vadd.f32 %v15745_v16, %v2576_v23  ;;  %v2591_v26 = vadd.f32 %v12406_v10, %v12356_v63  ;;  %12478 = vmatprep.mubr.f32.mxu0 %v2748_v55  ;;  %v2751_v34 = vmax.f32 %v2719_v14, 0.0  ;;  %v12377_v55 = vpop.f32.mrf.mxu0 }
 0x428   : > { %v2585_v24 = vpop.f32.mrf.mxu1  ;;  %12479 = vmatmul.mubr.f32.gmra.mxu0 %v2749_v7 }
 0x429   : > { %v2586_v1 = vadd.f32 %v2585_v24, %v2261_v61  ;;  %v2750_v51 = vmax.f32 %v2718_v27, 0.0  ;;  %v2721_v35 = vadd.f32 %v15745_v16, %v2591_v26  ;;  %v2331_v24 = vpop.f32.mrf.mxu0 }
 0x42a   : > { %v12409_v13 = vpop.f32.mrf.mxu1 }
 0x42b   : > { %v2720_v19 = vadd.f32 %v15745_v16, %v2586_v1  ;;  %v2601_v44 = vadd.f32 %v12409_v13, %v12359_v33  ;;  %12481 = vmatprep.mubr.f32.mxu0 %v2750_v51  ;;  %v2753_v11 = vmax.f32 %v2721_v35, 0.0 }
 0x42c   : > { %v2595_v0 = vpop.f32.mrf.mxu1  ;;  %12482 = vmatmul.mubr.f32.gmra.mxu0 %v2751_v34 }
 0x42d   : > { %v2596_v59 = vadd.f32 %v2595_v0, %v2271_v47  ;;  %v2752_v62 = vmax.f32 %v2720_v19, 0.0  ;;  %v2723_v63 = vadd.f32 %v15745_v16, %v2601_v44  ;;  %v12380_v44 = vpop.f32.mrf.mxu0 }
 0x42e   : > { %v12412_v23 = vpop.f32.mrf.mxu1 }
 0x42f   : > { %v2722_v61 = vadd.f32 %v15745_v16, %v2596_v59  ;;  %v2611_v7 = vadd.f32 %v12412_v23, %v15731_v36  ;;  %12484 = vmatprep.mubr.f32.mxu0 %v2752_v62  ;;  %v2755_v27 = vmax.f32 %v2723_v63, 0.0 }
 0x430   : > { %v2605_v14 = vpop.f32.mrf.mxu1  ;;  %12485 = vmatmul.mubr.f32.gmra.mxu0 %v2753_v11 }
 0x431   : > { %v2606_v10 = vadd.f32 %v2605_v14, %v15733_v39  ;;  %v2754_v33 = vmax.f32 %v2722_v61, 0.0  ;;  %v2725_v26 = vadd.f32 %v15745_v16, %v2611_v7  ;;  %v2341_v61 = vpop.f32.mrf.mxu0 }
 0x432   : > { %v12415_v47 = vpop.f32.mrf.mxu1 }
 0x433   : > { %v2724_v1 = vadd.f32 %v15745_v16, %v2606_v10  ;;  %v2621_v51 = vadd.f32 %v12415_v47, %v15735_v15  ;;  %12487 = vmatprep.mubr.f32.mxu0 %v2754_v33  ;;  %v2757_v13 = vmax.f32 %v2725_v26, 0.0  ;;  %v12383_v47 = vpop.f32.mrf.mxu0 }
 0x434   : > { %v2615_v34 = vpop.f32.mrf.mxu1  ;;  %12488 = vmatmul.mubr.f32.gmra.mxu0 %v2755_v27 }
 0x435   : > { %v2616_v36 = vadd.f32 %v2615_v34, %v15737_v53  ;;  %v2756_v35 = vmax.f32 %v2724_v1, 0.0  ;;  %v2727_v19 = vadd.f32 %v15745_v16, %v2621_v51 }
 0x436   : > { %v12418_v39 = vpop.f32.mrf.mxu1 }
 0x437   : > { %v2726_v0 = vadd.f32 %v15745_v16, %v2616_v36  ;;  %v2631_v59 = vadd.f32 %v12418_v39, %v15739_v28  ;;  %12490 = vmatprep.mubr.f32.mxu0 %v2756_v35  ;;  %v2759_v63 = vmax.f32 %v2727_v19, 0.0 }
 0x438   : > { %v2625_v62 = vpop.f32.mrf.mxu1  ;;  %12491 = vmatmul.mubr.f32.gmra.mxu0 %v2757_v13 }
 0x439   : > { %v2626_v15 = vadd.f32 %v2625_v62, %v15749_v4  ;;  %v2758_v11 = vmax.f32 %v2726_v0, 0.0  ;;  %v2729_v23 = vadd.f32 %v15745_v16, %v2631_v59 }
 0x43a   : > { %v12421_v53 = vpop.f32.mrf.mxu1 }
 0x43b   : > { %v2728_v7 = vadd.f32 %v15745_v16, %v2626_v15  ;;  %v2641_v14 = vadd.f32 %v12421_v53, %v15754_v9  ;;  %12493 = vmatprep.mubr.f32.mxu0 %v2758_v11  ;;  %v2761_v27 = vmax.f32 %v2729_v23, 0.0 }
 0x43c   : > { %v2635_v10 = vpop.f32.mrf.mxu1  ;;  %12494 = vmatmul.mubr.f32.gmra.mxu0 %v2759_v63 }
 0x43d   : > { %v2636_v28 = vadd.f32 %v2635_v10, %v15758_v49  ;;  %v2760_v33 = vmax.f32 %v2728_v7, 0.0  ;;  %v2731_v26 = vadd.f32 %v15745_v16, %v2641_v14  ;;  %v2351_v49 = vpop.f32.mrf.mxu0 }
 0x43e   : > { %v12424_v4 = vpop.f32.mrf.mxu1 }
 0x43f   : > { %v2730_v1 = vadd.f32 %v15745_v16, %v2636_v28  ;;  %v2651_v51 = vadd.f32 %v12424_v4, %v15762_v54  ;;  %12496 = vmatprep.mubr.f32.mxu0 %v2760_v33  ;;  %v2763_v35 = vmax.f32 %v2731_v26, 0.0  ;;  %v12386_v23 = vpop.f32.mrf.mxu0 }
 0x440   : > { %v2645_v34 = vpop.f32.mrf.mxu1  ;;  %12497 = vmatmul.mubr.f32.gmra.mxu0 %v2761_v27 }
 0x441   : > { %v2646_v36 = vadd.f32 %v2645_v34, %v2321_v58  ;;  %v2762_v9 = vmax.f32 %v2730_v1, 0.0  ;;  %v2733_v13 = vadd.f32 %v15745_v16, %v2651_v51  ;;  %v2361_v27 = vpop.f32.mrf.mxu0 }
 0x442   : > { %v12427_v19 = vpop.f32.mrf.mxu1 }
 0x443   : > { %v2732_v39 = vadd.f32 %v15745_v16, %v2646_v36  ;;  %v2661_v0 = vadd.f32 %v12427_v19, %v12377_v55  ;;  %12499 = vmatprep.mubr.f32.mxu0 %v2762_v9  ;;  %v2765_v11 = vmax.f32 %v2733_v13, 0.0  ;;  %v12389_v9 = vpop.f32.mrf.mxu0 }
 0x444   : > { %v2655_v59 = vpop.f32.mrf.mxu1  ;;  %12500 = vmatmul.mubr.f32.gmra.mxu0 %v2763_v35 }
 0x445   : > { %v2656_v62 = vadd.f32 %v2655_v59, %v2331_v24  ;;  %v2764_v15 = vmax.f32 %v2732_v39, 0.0  ;;  %v2735_v54 = vadd.f32 %v15745_v16, %v2661_v0 }
 0x446   : > { %v12430_v63 = vpop.f32.mrf.mxu1 }
 0x447   : > { %v2734_v58 = vadd.f32 %v15745_v16, %v2656_v62  ;;  %v2671_v53 = vadd.f32 %v12430_v63, %v12380_v44  ;;  %12502 = vmatprep.mubr.f32.mxu0 %v2764_v15  ;;  %v2767_v28 = vmax.f32 %v2735_v54, 0.0  ;;  %v2371_v62 = vpop.f32.mrf.mxu0 }
 0x448   : > { %v2665_v7 = vpop.f32.mrf.mxu1  ;;  %12503 = vmatmul.mubr.f32.gmra.mxu0 %v2765_v11 }
 0x449   : > { %v2666_v14 = vadd.f32 %v2665_v7, %v2341_v61  ;;  %v2766_v10 = vmax.f32 %v2734_v58, 0.0  ;;  %v2737_v55 = vadd.f32 %v15745_v16, %v2671_v53 }
 0x44a   : > { %v12433_v33 = vpop.f32.mrf.mxu1 }
 0x44b   : > { %v2736_v24 = vadd.f32 %v15745_v16, %v2666_v14  ;;  %v2681_v26 = vadd.f32 %v12433_v33, %v12383_v47  ;;  %12505 = vmatprep.mubr.f32.mxu0 %v2766_v10  ;;  %v2769_v34 = vmax.f32 %v2737_v55, 0.0  ;;  %v14481_v10 = vld [vmem:[%s14740_s23] sm:$0xff] }
 0x44c   : > { %v2675_v4 = vpop.f32.mrf.mxu1  ;;  %12506 = vmatmul.mubr.f32.gmra.mxu0 %v2767_v28  ;;  %v10668_v28 = vld [vmem:[%s20499_s7 + $0x80] sm:$0xff] }
 0x44d   : > { %v2676_v1 = vadd.f32 %v2675_v4, %v2351_v49  ;;  %v2768_v51 = vmax.f32 %v2736_v24, 0.0  ;;  %v2739_v44 = vadd.f32 %v15745_v16, %v2681_v26  ;;  %12550 = vmatprep.subr.mxu1 %v10668_v28  ;;  %v15806_v55 = vld [vmem:[%s20498_s6 + $0x1] ss:$0 sm:$0xff] }
 0x44e   : > { %v12436_v36 = vpop.f32.mrf.mxu1  ;;  %12551 = vmatpush3.msra.mxu1 %v10668_v28 }
 0x44f   : > { %v2738_v61 = vadd.f32 %v15745_v16, %v2676_v1  ;;  %v2691_v35 = vadd.f32 %v12436_v36, %v12386_v23  ;;  %12508 = vmatprep.mubr.f32.mxu0 %v2768_v51  ;;  %v2771_v0 = vmax.f32 %v2739_v44, 0.0 }
 0x450   : > { %v2685_v13 = vpop.f32.mrf.mxu1  ;;  %12509 = vmatmul.mubr.f32.gmra.mxu0 %v2769_v34 }
 0x451   : > { %v2686_v19 = vadd.f32 %v2685_v13, %v2361_v27  ;;  %v2770_v39 = vmax.f32 %v2738_v61, 0.0  ;;  %v2741_v47 = vadd.f32 %v15745_v16, %v2691_v35 }
 0x452   : > { %v12439_v59 = vpop.f32.mrf.mxu1 }
 0x453   : > { %v2740_v49 = vadd.f32 %v15745_v16, %v2686_v19  ;;  %v2701_v15 = vadd.f32 %v12439_v59, %v12389_v9  ;;  %12511 = vmatprep.mubr.f32.mxu0 %v2770_v39  ;;  %v2773_v23 = vmax.f32 %v2741_v47, 0.0 }
 0x454   : > { %v2695_v11 = vpop.f32.mrf.mxu1  ;;  %12512 = vmatmul.mubr.f32.gmra.mxu0 %v2771_v0 }
 0x455   : > { %v2696_v54 = vadd.f32 %v2695_v11, %v2371_v62  ;;  %v2772_v63 = vmax.f32 %v2740_v49, 0.0  ;;  %v2743_v58 = vadd.f32 %v15745_v16, %v2701_v15 }
 0x457   : > { %v2742_v53 = vadd.f32 %v15745_v16, %v2696_v54  ;;  %12514 = vmatprep.mubr.f32.mxu0 %v2772_v63  ;;  %v2775_v14 = vmax.f32 %v2743_v58, 0.0 }
 0x458   : > { %12515 = vmatmul.mubr.f32.gmra.mxu0 %v2773_v23 }
 0x459   : > { %v2774_v7 = vmax.f32 %v2742_v53, 0.0 }
 0x45b   : > { %12517 = vmatprep.mubr.f32.mxu0 %v2774_v7 }
 0x45c   : > { %12518 = vmatmul.mubr.f32.gmra.mxu0 %v2775_v14 }
 0x45d   : > { %12602 = vmatprep.mubr.msk.f32.mxu0 %vm424_vm1, %v14481_v10 }
 0x4e0   : > { %v12474_v16 = vpop.f32.mrf.mxu0 }
 0x4e1   : > { %v2873_v33 = vadd.f32 %v12474_v16, %v15806_v55 }
 0x4e2   : > { %v2867_v27 = vpop.f32.mrf.mxu0 }
 0x4e3   : > { %v2868_v24 = vadd.f32 %v15806_v55, %v2867_v27  ;;  %v3027_v1 = vmax.f32 %v2873_v33, 0.0 }
 0x4e4   : > { %v12477_v26 = vpop.f32.mrf.mxu0 }
 0x4e5   : > { %v3026_v4 = vmax.f32 %v2868_v24, 0.0  ;;  %v2883_v51 = vadd.f32 %v12477_v26, %v15806_v55 }
 0x4e6   : > { %v2877_v34 = vpop.f32.mrf.mxu0 }
 0x4e7   : > { %v2878_v44 = vadd.f32 %v15806_v55, %v2877_v34  ;;  %12552 = vmatprep.mubr.f32.mxu1 %v3026_v4  ;;  %v3029_v61 = vmax.f32 %v2883_v51, 0.0 }
 0x4e8   : > { %v12480_v36 = vpop.f32.mrf.mxu0  ;;  %12553 = vmatmul.mubr.f32.vlgmr.msra.gmra.mxu1 %v3027_v1 }
 0x4e9   : > { %v3028_v9 = vmax.f32 %v2878_v44, 0.0  ;;  %v2893_v35 = vadd.f32 %v12480_v36, %v15806_v55 }
 0x4ea   : > { %v2887_v13 = vpop.f32.mrf.mxu0 }
 0x4eb   : > { %v2888_v19 = vadd.f32 %v15806_v55, %v2887_v13  ;;  %12555 = vmatprep.mubr.f32.mxu1 %v3028_v9  ;;  %v3031_v47 = vmax.f32 %v2893_v35, 0.0 }
 0x4ec   : > { %v12483_v39 = vpop.f32.mrf.mxu0  ;;  %12556 = vmatmul.mubr.f32.gmra.mxu1 %v3029_v61 }
 0x4ed   : > { %v3030_v0 = vmax.f32 %v2888_v19, 0.0  ;;  %v2903_v59 = vadd.f32 %v12483_v39, %v15806_v55 }
 0x4ee   : > { %v2897_v62 = vpop.f32.mrf.mxu0 }
 0x4ef   : > { %v2898_v49 = vadd.f32 %v15806_v55, %v2897_v62  ;;  %12558 = vmatprep.mubr.f32.mxu1 %v3030_v0  ;;  %v3033_v54 = vmax.f32 %v2903_v59, 0.0 }
 0x4f0   : > { %v12486_v15 = vpop.f32.mrf.mxu0  ;;  %12559 = vmatmul.mubr.f32.gmra.mxu1 %v3031_v47 }
 0x4f1   : > { %v3032_v11 = vmax.f32 %v2898_v49, 0.0  ;;  %v2913_v63 = vadd.f32 %v12486_v15, %v15806_v55 }
 0x4f2   : > { %v2907_v23 = vpop.f32.mrf.mxu0 }
 0x4f3   : > { %v2908_v58 = vadd.f32 %v15806_v55, %v2907_v23  ;;  %12561 = vmatprep.mubr.f32.mxu1 %v3032_v11  ;;  %v3035_v14 = vmax.f32 %v2913_v63, 0.0 }
 0x4f4   : > { %v12489_v53 = vpop.f32.mrf.mxu0  ;;  %12562 = vmatmul.mubr.f32.gmra.mxu1 %v3033_v54 }
 0x4f5   : > { %v3034_v7 = vmax.f32 %v2908_v58, 0.0  ;;  %v2923_v10 = vadd.f32 %v12489_v53, %v15806_v55 }
 0x4f6   : > { %v2917_v28 = vpop.f32.mrf.mxu0 }
 0x4f7   : > { %v2918_v16 = vadd.f32 %v15806_v55, %v2917_v28  ;;  %12564 = vmatprep.mubr.f32.mxu1 %v3034_v7  ;;  %v3037_v24 = vmax.f32 %v2923_v10, 0.0 }
 0x4f8   : > { %v12492_v33 = vpop.f32.mrf.mxu0  ;;  %12565 = vmatmul.mubr.f32.gmra.mxu1 %v3035_v14 }
 0x4f9   : > { %v3036_v27 = vmax.f32 %v2918_v16, 0.0  ;;  %v2933_v26 = vadd.f32 %v12492_v33, %v15806_v55 }
 0x4fa   : > { %v2927_v4 = vpop.f32.mrf.mxu0 }
 0x4fb   : > { %v2928_v1 = vadd.f32 %v15806_v55, %v2927_v4  ;;  %12567 = vmatprep.mubr.f32.mxu1 %v3036_v27  ;;  %v3039_v44 = vmax.f32 %v2933_v26, 0.0 }
 0x4fc   : > { %v12495_v51 = vpop.f32.mrf.mxu0  ;;  %12568 = vmatmul.mubr.f32.gmra.mxu1 %v3037_v24 }
 0x4fd   : > { %v3038_v34 = vmax.f32 %v2928_v1, 0.0  ;;  %v2943_v36 = vadd.f32 %v12495_v51, %v15806_v55 }
 0x4fe   : > { %v2937_v9 = vpop.f32.mrf.mxu0 }
 0x4ff   : > { %v2938_v61 = vadd.f32 %v15806_v55, %v2937_v9  ;;  %12570 = vmatprep.mubr.f32.mxu1 %v3038_v34  ;;  %v3041_v19 = vmax.f32 %v2943_v36, 0.0 }
 0x500   : > { %v12498_v35 = vpop.f32.mrf.mxu0  ;;  %12571 = vmatmul.mubr.f32.gmra.mxu1 %v3039_v44 }
 0x501   : > { %v3040_v13 = vmax.f32 %v2938_v61, 0.0  ;;  %v2953_v39 = vadd.f32 %v12498_v35, %v15806_v55 }
 0x502   : > { %v2947_v0 = vpop.f32.mrf.mxu0 }
 0x503   : > { %v2948_v47 = vadd.f32 %v15806_v55, %v2947_v0  ;;  %12573 = vmatprep.mubr.f32.mxu1 %v3040_v13  ;;  %v3043_v49 = vmax.f32 %v2953_v39, 0.0 }
 0x504   : > { %v12501_v59 = vpop.f32.mrf.mxu0  ;;  %12574 = vmatmul.mubr.f32.gmra.mxu1 %v3041_v19 }
 0x505   : > { %v3042_v62 = vmax.f32 %v2948_v47, 0.0  ;;  %v2963_v15 = vadd.f32 %v12501_v59, %v15806_v55 }
 0x506   : > { %v2957_v11 = vpop.f32.mrf.mxu0 }
 0x507   : > { %v2958_v54 = vadd.f32 %v15806_v55, %v2957_v11  ;;  %12576 = vmatprep.mubr.f32.mxu1 %v3042_v62  ;;  %v3045_v58 = vmax.f32 %v2963_v15, 0.0 }
 0x508   : > { %v12504_v63 = vpop.f32.mrf.mxu0  ;;  %12577 = vmatmul.mubr.f32.gmra.mxu1 %v3043_v49 }
 0x509   : > { %v3044_v23 = vmax.f32 %v2958_v54, 0.0  ;;  %v2973_v53 = vadd.f32 %v12504_v63, %v15806_v55 }
 0x50a   : > { %v2967_v7 = vpop.f32.mrf.mxu0 }
 0x50b   : > { %v2968_v14 = vadd.f32 %v15806_v55, %v2967_v7  ;;  %12579 = vmatprep.mubr.f32.mxu1 %v3044_v23  ;;  %v3047_v16 = vmax.f32 %v2973_v53, 0.0 }
 0x50c   : > { %v12507_v10 = vpop.f32.mrf.mxu0  ;;  %12580 = vmatmul.mubr.f32.gmra.mxu1 %v3045_v58 }
 0x50d   : > { %v3046_v28 = vmax.f32 %v2968_v14, 0.0  ;;  %v2983_v33 = vadd.f32 %v12507_v10, %v15806_v55  ;;  %v15843_v14 = vld [vmem:[%s20500_s8 + $0x1] ss:$0 sm:$0xff] }
 0x50e   : > { %v2977_v27 = vpop.f32.mrf.mxu0 }
 0x50f   : > { %v2978_v24 = vadd.f32 %v15806_v55, %v2977_v27  ;;  %12582 = vmatprep.mubr.f32.mxu1 %v3046_v28  ;;  %v3049_v1 = vmax.f32 %v2983_v33, 0.0 }
 0x510   : > { %v12510_v26 = vpop.f32.mrf.mxu0  ;;  %12583 = vmatmul.mubr.f32.gmra.mxu1 %v3047_v16 }
 0x511   : > { %v3048_v4 = vmax.f32 %v2978_v24, 0.0  ;;  %v2993_v51 = vadd.f32 %v12510_v26, %v15806_v55 }
 0x512   : > { %v2987_v34 = vpop.f32.mrf.mxu0 }
 0x513   : > { %v2988_v44 = vadd.f32 %v15806_v55, %v2987_v34  ;;  %12585 = vmatprep.mubr.f32.mxu1 %v3048_v4  ;;  %v3051_v61 = vmax.f32 %v2993_v51, 0.0 }
 0x514   : > { %v12513_v36 = vpop.f32.mrf.mxu0  ;;  %12586 = vmatmul.mubr.f32.gmra.mxu1 %v3049_v1 }
 0x515   : > { %v3050_v9 = vmax.f32 %v2988_v44, 0.0  ;;  %v3003_v35 = vadd.f32 %v12513_v36, %v15806_v55 }
 0x516   : > { %v2997_v13 = vpop.f32.mrf.mxu0 }
 0x517   : > { %v2998_v19 = vadd.f32 %v15806_v55, %v2997_v13  ;;  %12588 = vmatprep.mubr.f32.mxu1 %v3050_v9  ;;  %v3053_v47 = vmax.f32 %v3003_v35, 0.0 }
 0x518   : > { %v12516_v39 = vpop.f32.mrf.mxu0  ;;  %12589 = vmatmul.mubr.f32.gmra.mxu1 %v3051_v61 }
 0x519   : > { %v3052_v0 = vmax.f32 %v2998_v19, 0.0  ;;  %v3013_v59 = vadd.f32 %v12516_v39, %v15806_v55 }
 0x51a   : > { %v3007_v62 = vpop.f32.mrf.mxu0 }
 0x51b   : > { %v3008_v49 = vadd.f32 %v15806_v55, %v3007_v62  ;;  %12591 = vmatprep.mubr.f32.mxu1 %v3052_v0  ;;  %v3055_v54 = vmax.f32 %v3013_v59, 0.0 }
 0x51c   : > { %v12519_v15 = vpop.f32.mrf.mxu0  ;;  %12592 = vmatmul.mubr.f32.gmra.mxu1 %v3053_v47 }
 0x51d   : > { %v3054_v11 = vmax.f32 %v3008_v49, 0.0  ;;  %v3023_v63 = vadd.f32 %v12519_v15, %v15806_v55 }
 0x51e   : > { %v3017_v23 = vpop.f32.mrf.mxu0 }
 0x51f   : > { %v3018_v58 = vadd.f32 %v15806_v55, %v3017_v23  ;;  %12594 = vmatprep.mubr.f32.mxu1 %v3054_v11  ;;  %v3057_v7 = vmax.f32 %v3023_v63, 0.0 }
 0x520   : > { %12595 = vmatmul.mubr.f32.gmra.mxu1 %v3055_v54 }
 0x521   : > { %v3056_v53 = vmax.f32 %v3018_v58, 0.0 }
 0x523   : > { %12597 = vmatprep.mubr.f32.mxu1 %v3056_v53 }
 0x524   : > { %12598 = vmatmul.mubr.f32.gmra.mxu1 %v3057_v7 }
 0x5a8   : > { %v12554_v10 = vpop.f32.mrf.mxu1 }
 0x5a9   : > { %v15846_v28 = vadd.f32 %v12554_v10, %v15843_v14 }
 0x5aa   : > { %v3149_v16 = vpop.f32.mrf.mxu1 }
 0x5ab   : > { %13778 = vtanh.f32 %v15846_v28  ;;  %v15850_v55 = vadd.f32 %v15843_v14, %v3149_v16 }
 0x5ac   : > { %v12557_v33 = vpop.f32.mrf.mxu1 }
 0x5ad   : > { %13780 = vtanh.f32 %v15850_v55  ;;  %v15854_v27 = vadd.f32 %v12557_v33, %v15843_v14 }
 0x5ae   : > { %v3159_v24 = vpop.f32.mrf.mxu1 }
 0x5af   : > { %13782 = vtanh.f32 %v15854_v27  ;;  %v15858_v26 = vadd.f32 %v15843_v14, %v3159_v24 }
 0x5b0   : > { %v12560_v4 = vpop.f32.mrf.mxu1 }
 0x5b1   : > { %13784 = vtanh.f32 %v15858_v26  ;;  %v15862_v1 = vadd.f32 %v12560_v4, %v15843_v14 }
 0x5b2   : > { %v3169_v51 = vpop.f32.mrf.mxu1 }
 0x5b3   : > { %13786 = vtanh.f32 %v15862_v1  ;;  %v15866_v34 = vadd.f32 %v15843_v14, %v3169_v51 }
 0x5b4   : > { %v12563_v44 = vpop.f32.mrf.mxu1 }
 0x5b5   : > { %13788 = vtanh.f32 %v15866_v34  ;;  %v15870_v36 = vadd.f32 %v12563_v44, %v15843_v14 }
 0x5b6   : > { %v3179_v9 = vpop.f32.mrf.mxu1 }
 0x5b7   : > { %13790 = vtanh.f32 %v15870_v36  ;;  %v15874_v61 = vadd.f32 %v15843_v14, %v3179_v9 }
 0x5b8   : > { %v15876_v35 = vpop.eup %13778  ;;  %v12566_v13 = vpop.f32.mrf.mxu1 }
 0x5b9   : > { %20797 = vst [vmem:[#allocation46_spill] sm:$0xff] %v15876_v35  ;;  %v3342_v19 = vmul.f32 1.442695, %v15876_v35  ;;  %13792 = vtanh.f32 %v15874_v61  ;;  %v15881_v39 = vadd.f32 %v12566_v13, %v15843_v14 }
 0x5ba   : > { %v15883_v0 = vpop.eup %13780  ;;  %v3189_v47 = vpop.f32.mrf.mxu1 }
 0x5bb   : > { %20798 = vst [vmem:[#allocation47_spill] sm:$0xff] %v15883_v0  ;;  %13794 = vpow2.f32 %v3342_v19  ;;  %v3340_v59 = vmul.f32 1.442695, %v15883_v0  ;;  %v15887_v62 = vadd.f32 %v15843_v14, %v3189_v47 }
 0x5bc   : > { %v15889_v49 = vpop.eup %13782  ;;  %13796 = vtanh.f32 %v15881_v39  ;;  %v12569_v15 = vpop.f32.mrf.mxu1 }
 0x5bd   : > { %20799 = vst [vmem:[#allocation48_spill] sm:$0xff] %v15889_v49  ;;  %13798 = vpow2.f32 %v3340_v59  ;;  %v3346_v11 = vmul.f32 1.442695, %v15889_v49  ;;  %v15894_v54 = vadd.f32 %v12569_v15, %v15843_v14 }
 0x5be   : > { %v15896_v63 = vpop.eup %13784  ;;  %13800 = vtanh.f32 %v15887_v62  ;;  %v3199_v23 = vpop.f32.mrf.mxu1 }
 0x5bf   : > { %20800 = vst [vmem:[#allocation49_spill] sm:$0xff] %v15896_v63  ;;  %13802 = vpow2.f32 %v3346_v11  ;;  %v3344_v58 = vmul.f32 1.442695, %v15896_v63  ;;  %v15901_v53 = vadd.f32 %v15843_v14, %v3199_v23 }
 0x5c0   : > { %v15903_v7 = vpop.eup %13786  ;;  %13804 = vtanh.f32 %v15894_v54  ;;  %v12572_v10 = vpop.f32.mrf.mxu1 }
 0x5c1   : > { %20801 = vst [vmem:[#allocation50_spill] sm:$0xff] %v15903_v7  ;;  %13806 = vpow2.f32 %v3344_v58  ;;  %v3350_v16 = vmul.f32 1.442695, %v15903_v7  ;;  %v15908_v33 = vadd.f32 %v12572_v10, %v15843_v14 }
 0x5c2   : > { %v15910_v24 = vpop.eup %13788  ;;  %13808 = vtanh.f32 %v15901_v53  ;;  %v3209_v4 = vpop.f32.mrf.mxu1 }
 0x5c3   : > { %20802 = vst [vmem:[#allocation51_spill] sm:$0xff] %v15910_v24  ;;  %13810 = vpow2.f32 %v3350_v16  ;;  %v3348_v51 = vmul.f32 1.442695, %v15910_v24  ;;  %v15915_v44 = vadd.f32 %v15843_v14, %v3209_v4 }
 0x5c4   : > { %v15917_v9 = vpop.eup %13790  ;;  %13812 = vtanh.f32 %v15908_v33  ;;  %v12575_v13 = vpop.f32.mrf.mxu1 }
 0x5c5   : > { %20803 = vst [vmem:[#allocation52_spill] sm:$0xff] %v15917_v9  ;;  %13814 = vpow2.f32 %v3348_v51  ;;  %v3354_v19 = vmul.f32 1.442695, %v15917_v9  ;;  %v15922_v47 = vadd.f32 %v12575_v13, %v15843_v14 }
 0x5c6   : > { %v15924_v59 = vpop.eup %13792  ;;  %13816 = vtanh.f32 %v15915_v44  ;;  %v3219_v15 = vpop.f32.mrf.mxu1 }
 0x5c7   : > { %20804 = vst [vmem:[#allocation53_spill] sm:$0xff] %v15924_v59  ;;  %13818 = vpow2.f32 %v3354_v19  ;;  %v3352_v11 = vmul.f32 1.442695, %v15924_v59  ;;  %v15929_v23 = vadd.f32 %v15843_v14, %v3219_v15 }
 0x5c8   : > { %v13795_v58 = vpop.eup %13794  ;;  %13820 = vtanh.f32 %v15922_v47  ;;  %v12578_v10 = vpop.f32.mrf.mxu1 }
 0x5c9   : > { %v15932_v16 = vpop.eup %13796  ;;  %13822 = vpow2.f32 %v3352_v11  ;;  %v15935_v4 = vadd.f32 %v12578_v10, %v15843_v14  ;;  %3438 = vrot.lane.b32.xlu1 %v13795_v58, %s14651_s24 }
 0x5ca   : > { %20805 = vst [vmem:[#allocation54_spill] sm:$0xff] %v15932_v16  ;;  %v13799_v51 = vpop.eup %13798  ;;  %v3358_v13 = vmul.f32 1.442695, %v15932_v16  ;;  %13824 = vtanh.f32 %v15929_v23  ;;  %v3229_v19 = vpop.f32.mrf.mxu1 }
 0x5cb   : > { %v15940_v15 = vpop.eup %13800  ;;  %13826 = vtanh.f32 %v15935_v4  ;;  %v15944_v9 = vadd.f32 %v15843_v14, %v3229_v19  ;;  %3436 = vrot.lane.b32.xlu0 %v13799_v51, %s14651_s24 }
 0x5cc   : > { %20806 = vst [vmem:[#allocation55_spill] sm:$0xff] %v15940_v15  ;;  %v13803_v11 = vpop.eup %13802  ;;  %13828 = vpow2.f32 %v3358_v13  ;;  %v3356_v10 = vmul.f32 1.442695, %v15940_v15  ;;  %v12581_v58 = vpop.f32.mrf.mxu1 }
 0x5cd   : > { %v15948_v7 = vpop.eup %13804  ;;  %13830 = vtanh.f32 %v15944_v9  ;;  %v15952_v16 = vadd.f32 %v12581_v58, %v15843_v14  ;;  %3442 = vrot.lane.b32.xlu1 %v13803_v11, %s14651_s24 }
 0x5ce   : > { %20807 = vst [vmem:[#allocation56_spill] sm:$0xff] %v15948_v7  ;;  %v13807_v59 = vpop.eup %13806  ;;  %13832 = vpow2.f32 %v3356_v10  ;;  %v3362_v19 = vmul.f32 1.442695, %v15948_v7  ;;  %v3239_v49 = vpop.f32.mrf.mxu1 }
 0x5cf   : > { %v15956_v51 = vpop.eup %13808  ;;  %13834 = vtanh.f32 %v15952_v16  ;;  %v15960_v13 = vadd.f32 %v15843_v14, %v3239_v49  ;;  %3440 = vrot.lane.b32.xlu0 %v13807_v59, %s14651_s24 }
 0x5d0   : > { %20808 = vst [vmem:[#allocation57_spill] sm:$0xff] %v15956_v51  ;;  %v13811_v15 = vpop.eup %13810  ;;  %13836 = vpow2.f32 %v3362_v19  ;;  %v3360_v58 = vmul.f32 1.442695, %v15956_v51  ;;  %v12584_v24 = vpop.f32.mrf.mxu1 }
 0x5d1   : > { %v15964_v11 = vpop.eup %13812  ;;  %13838 = vtanh.f32 %v15960_v13  ;;  %v15968_v10 = vadd.f32 %v12584_v24, %v15843_v14  ;;  %3446 = vrot.lane.b32.xlu1 %v13811_v15, %s14651_s24 }
 0x5d2   : > { %20809 = vst [vmem:[#allocation58_spill] sm:$0xff] %v15964_v11  ;;  %v13815_v7 = vpop.eup %13814  ;;  %13840 = vpow2.f32 %v3360_v58  ;;  %v3366_v49 = vmul.f32 1.442695, %v15964_v11  ;;  %v3249_v35 = vpop.f32.mrf.mxu1 }
 0x5d3   : > { %v15972_v59 = vpop.eup %13816  ;;  %13842 = vtanh.f32 %v15968_v10  ;;  %v15976_v19 = vadd.f32 %v15843_v14, %v3249_v35  ;;  %3444 = vrot.lane.b32.xlu0 %v13815_v7, %s14651_s24 }
 0x5d4   : > { %20810 = vst [vmem:[#allocation59_spill] sm:$0xff] %v15972_v59  ;;  %v13819_v51 = vpop.eup %13818  ;;  %13844 = vpow2.f32 %v3366_v49  ;;  %v3364_v24 = vmul.f32 1.442695, %v15972_v59  ;;  %v12587_v63 = vpop.f32.mrf.mxu1 }
 0x5d5   : > { %v15980_v15 = vpop.eup %13820  ;;  %13846 = vtanh.f32 %v15976_v19  ;;  %v15984_v58 = vadd.f32 %v12587_v63, %v15843_v14  ;;  %3450 = vrot.lane.b32.xlu1 %v13819_v51, %s14651_s24 }
 0x5d6   : > { %20811 = vst [vmem:[#allocation60_spill] sm:$0xff] %v15980_v15  ;;  %v13823_v11 = vpop.eup %13822  ;;  %13848 = vpow2.f32 %v3364_v24  ;;  %v3370_v35 = vmul.f32 1.442695, %v15980_v15  ;;  %v3259_v0 = vpop.f32.mrf.mxu1 }
 0x5d7   : > { %v15988_v7 = vpop.eup %13824  ;;  %13850 = vtanh.f32 %v15984_v58  ;;  %v15992_v49 = vadd.f32 %v15843_v14, %v3259_v0  ;;  %3448 = vrot.lane.b32.xlu0 %v13823_v11, %s14651_s24 }
 0x5d8   : > { %20812 = vst [vmem:[#allocation61_spill] sm:$0xff] %v15988_v7  ;;  %v15995_v59 = vpop.eup %13826  ;;  %13852 = vpow2.f32 %v3370_v35  ;;  %v3368_v63 = vmul.f32 1.442695, %v15988_v7  ;;  %v12590_v51 = vpop.f32.mrf.mxu1 }
 0x5d9   : > { %20813 = vst [vmem:[#allocation62_spill] sm:$0xff] %v15995_v59  ;;  %v13829_v6 = vpop.eup %13828  ;;  %v3374_v24 = vmul.f32 1.442695, %v15995_v59  ;;  %13854 = vtanh.f32 %v15992_v49  ;;  %v16001_v15 = vadd.f32 %v12590_v51, %v15843_v14 }
 0x5da   : > { %v16003_v42 = vpop.eup %13830  ;;  %13856 = vpow2.f32 %v3368_v63  ;;  %3454 = vrot.lane.b32.xlu1 %v13829_v6, %s14651_s24  ;;  %v3269_v0 = vpop.f32.mrf.mxu1 }
 0x5db   : > { %20814 = vst [vmem:[#allocation63_spill] sm:$0xff] %v16003_v42  ;;  %v13833_v11 = vpop.eup %13832  ;;  %13858 = vpow2.f32 %v3374_v24  ;;  %v3372_v35 = vmul.f32 1.442695, %v16003_v42  ;;  %v16008_v7 = vadd.f32 %v15843_v14, %v3269_v0 }
 0x5dc   : > { %v16010_v40 = vpop.eup %13834  ;;  %13860 = vtanh.f32 %v16001_v15  ;;  %3452 = vrot.lane.b32.xlu0 %v13833_v11, %s14651_s24  ;;  %v12593_v51 = vpop.f32.mrf.mxu1 }
 0x5dd   : > { %20815 = vst [vmem:[#allocation64_spill] sm:$0xff] %v16010_v40  ;;  %v13837_v59 = vpop.eup %13836  ;;  %13862 = vpow2.f32 %v3372_v35  ;;  %v3378_v63 = vmul.f32 1.442695, %v16010_v40  ;;  %v16016_v6 = vadd.f32 %v12593_v51, %v15843_v14 }
 0x5de   : > { %v16018_v24 = vpop.eup %13838  ;;  %13864 = vtanh.f32 %v16008_v7  ;;  %3458 = vrot.lane.b32.xlu1 %v13837_v59, %s14651_s24  ;;  %v3279_v0 = vpop.f32.mrf.mxu1 }
 0x5df   : > { %20816 = vst [vmem:[#allocation65_spill] sm:$0xff] %v16018_v24  ;;  %v13841_v42 = vpop.eup %13840  ;;  %13866 = vpow2.f32 %v3378_v63  ;;  %v3376_v30 = vmul.f32 1.442695, %v16018_v24  ;;  %v16024_v11 = vadd.f32 %v15843_v14, %v3279_v0 }
 0x5e0   : > { %v16026_v35 = vpop.eup %13842  ;;  %13868 = vtanh.f32 %v16016_v6  ;;  %3456 = vrot.lane.b32.xlu0 %v13841_v42, %s14651_s24  ;;  %v12596_v51 = vpop.f32.mrf.mxu1 }
 0x5e1   : > { %20817 = vst [vmem:[#allocation66_spill] sm:$0xff] %v16026_v35  ;;  %v13845_v40 = vpop.eup %13844  ;;  %13870 = vpow2.f32 %v3376_v30  ;;  %v3382_v56 = vmul.f32 1.442695, %v16026_v35  ;;  %v16032_v59 = vadd.f32 %v12596_v51, %v15843_v14 }
 0x5e2   : > { %v16034_v63 = vpop.eup %13846  ;;  %13872 = vtanh.f32 %v16024_v11  ;;  %3462 = vrot.lane.b32.xlu1 %v13845_v40, %s14651_s24  ;;  %v3289_v0 = vpop.f32.mrf.mxu1 }
 0x5e3   : > { %20818 = vst [vmem:[#allocation67_spill] sm:$0xff] %v16034_v63  ;;  %v13849_v24 = vpop.eup %13848  ;;  %13874 = vpow2.f32 %v3382_v56  ;;  %v3380_v17 = vmul.f32 1.442695, %v16034_v63  ;;  %v16040_v42 = vadd.f32 %v15843_v14, %v3289_v0 }
 0x5e4   : > { %v16042_v30 = vpop.eup %13850  ;;  %13876 = vtanh.f32 %v16032_v59  ;;  %3460 = vrot.lane.b32.xlu0 %v13849_v24, %s14651_s24  ;;  %v12599_v51 = vpop.f32.mrf.mxu1 }
 0x5e5   : > { %20819 = vst [vmem:[#allocation68_spill] sm:$0xff] %v16042_v30  ;;  %v13853_v35 = vpop.eup %13852  ;;  %13878 = vpow2.f32 %v3380_v17  ;;  %v3386_v21 = vmul.f32 1.442695, %v16042_v30  ;;  %v16048_v40 = vadd.f32 %v12599_v51, %v15843_v14 }
 0x5e6   : > { %v16050_v56 = vpop.eup %13854  ;;  %13880 = vtanh.f32 %v16040_v42  ;;  %3466 = vrot.lane.b32.xlu1 %v13853_v35, %s14651_s24  ;;  %v3299_v0 = vpop.f32.mrf.mxu1 }
 0x5e7   : > { %20820 = vst [vmem:[#allocation69_spill] sm:$0xff] %v16050_v56  ;;  %v13857_v63 = vpop.eup %13856  ;;  %13882 = vpow2.f32 %v3386_v21  ;;  %v3384_v22 = vmul.f32 1.442695, %v16050_v56  ;;  %v16056_v24 = vadd.f32 %v15843_v14, %v3299_v0 }
 0x5e8   : > { %v13859_v17 = vpop.eup %13858  ;;  %13884 = vtanh.f32 %v16048_v40  ;;  %3464 = vrot.lane.b32.xlu0 %v13857_v63, %s14651_s24 }
 0x5e9   : > { %v16060_v51 = vpop.eup %13860  ;;  %13886 = vpow2.f32 %v3384_v22 }
 0x5ea   : > { %20821 = vst [vmem:[#allocation70_spill] sm:$0xff] %v16060_v51  ;;  %v13863_v30 = vpop.eup %13862  ;;  %v3390_v37 = vmul.f32 1.442695, %v16060_v51  ;;  %13888 = vtanh.f32 %v16056_v24  ;;  %3470 = vrot.lane.b32.xlu1 %v13859_v17, %s14651_s24 }
 0x5eb   : > { %v16065_v21 = vpop.eup %13864 }
 0x5ec   : > { %20822 = vst [vmem:[#allocation71_spill] sm:$0xff] %v16065_v21  ;;  %v13867_v35 = vpop.eup %13866  ;;  %13890 = vpow2.f32 %v3390_v37  ;;  %v3388_v14 = vmul.f32 1.442695, %v16065_v21  ;;  %3468 = vrot.lane.b32.xlu0 %v13863_v30, %s14651_s24 }
 0x5ed   : > { %v16069_v0 = vpop.eup %13868 }
 0x5ee   : > { %20823 = vst [vmem:[#allocation72_spill] sm:$0xff] %v16069_v0  ;;  %v13871_v63 = vpop.eup %13870  ;;  %13892 = vpow2.f32 %v3388_v14  ;;  %v3394_v22 = vmul.f32 1.442695, %v16069_v0  ;;  %3474 = vrot.lane.b32.xlu1 %v13867_v35, %s14651_s24 }
 0x5ef   : > { %v16073_v51 = vpop.eup %13872 }
 0x5f0   : > { %20824 = vst [vmem:[#allocation73_spill] sm:$0xff] %v16073_v51  ;;  %v13875_v56 = vpop.eup %13874  ;;  %13894 = vpow2.f32 %v3394_v22  ;;  %v3392_v17 = vmul.f32 1.442695, %v16073_v51  ;;  %3472 = vrot.lane.b32.xlu0 %v13871_v63, %s14651_s24 }
 0x5f1   : > { %v16077_v37 = vpop.eup %13876 }
 0x5f2   : > { %20825 = vst [vmem:[#allocation74_spill] sm:$0xff] %v16077_v37  ;;  %v13879_v21 = vpop.eup %13878  ;;  %13896 = vpow2.f32 %v3392_v17  ;;  %v3398_v30 = vmul.f32 1.442695, %v16077_v37  ;;  %3478 = vrot.lane.b32.xlu1 %v13875_v56, %s14651_s24  ;;  %v10687_v56 = vld [vmem:[%s20495_s3 + $0x10] sm:$0xff] }
 0x5f3   : > { %v16081_v14 = vpop.eup %13880  ;;  %12600 = vmatprep.subr.mxu0 %v10687_v56 }
 0x5f4   : > { %20826 = vst [vmem:[#allocation75_spill] sm:$0xff] %v16081_v14  ;;  %v13883_v0 = vpop.eup %13882  ;;  %13898 = vpow2.f32 %v3398_v30  ;;  %v3396_v35 = vmul.f32 1.442695, %v16081_v14  ;;  %3476 = vrot.lane.b32.xlu0 %v13879_v21, %s14651_s24  ;;  %v10686_v21 = vld [vmem:[%s20494_s2 + $0x8] sm:$0xf]  ;;  %12601 = vmatpush3.msra.mxu0 %v10687_v56 }
 0x5f5   : > { %v16085_v22 = vpop.eup %13884  ;;  %12650 = vmatprep.subr.msk.mxu1 %vm907_vm0, %v10686_v21 }
 0x5f6   : > { %20827 = vst [vmem:[#allocation76_spill] sm:$0xff] %v16085_v22  ;;  %v13887_v51 = vpop.eup %13886  ;;  %13900 = vpow2.f32 %v3396_v35  ;;  %v3402_v63 = vmul.f32 1.442695, %v16085_v22  ;;  %3482 = vrot.lane.b32.xlu1 %v13883_v0, %s14651_s24  ;;  %12651 = vmatpush3.msk.msra.mxu1 %vm907_vm0, %v10686_v21  ;;  %v14482_v22 = vld [vmem:[%s14740_s23 + $0x8] sm:$0xff]  ;;  %v14485_v21 = vld [vmem:[%s14740_s23 + $0x20] sm:$0xff] }
 0x5f7   : > { %v16089_v17 = vpop.eup %13888  ;;  %12603 = vmatmul.mubr.msk.f32.vlgmr.msra.gmra.mxu0 %vm424_vm1, %v14482_v22 }
 0x5f8   : > { %20828 = vst [vmem:[#allocation77_spill] sm:$0xff] %v16089_v17  ;;  %13902 = vpow2.f32 %v3402_v63  ;;  %v3400_v30 = vmul.f32 1.442695, %v16089_v17  ;;  %3480 = vrot.lane.b32.xlu0 %v13887_v51, %s14651_s24  ;;  %v14483_v51 = vld [vmem:[%s14740_s23 + $0x10] sm:$0xff] }
 0x5f9   : > { %v13891_v35 = vpop.eup %13890  ;;  %12605 = vmatprep.mubr.msk.f32.mxu0 %vm424_vm1, %v14483_v51  ;;  %v14487_v51 = vld [vmem:[%s14740_s23 + $0x30] sm:$0xff] }
 0x5fa   : > { %13904 = vpow2.f32 %v3400_v30  ;;  %3486 = vrot.lane.b32.xlu1 %v13891_v35, %s14651_s24  ;;  %v14484_v30 = vld [vmem:[%s14740_s23 + $0x18] sm:$0xff] }
 0x5fb   : > { %v13893_v0 = vpop.eup %13892  ;;  %12606 = vmatmul.mubr.msk.f32.gmra.mxu0 %vm424_vm1, %v14484_v30  ;;  %v14488_v30 = vld [vmem:[%s14740_s23 + $0x38] sm:$0xff] }
 0x5fc   : > { %3484 = vrot.lane.b32.xlu0 %v13893_v0, %s14651_s24  ;;  %12608 = vmatprep.mubr.msk.f32.mxu0 %vm424_vm1, %v14485_v21  ;;  %v14486_v0 = vld [vmem:[%s14740_s23 + $0x28] sm:$0xff]  ;;  %v14489_v21 = vld [vmem:[%s14740_s23 + $0x40] sm:$0xff] }
 0x5fd   : > { %v13895_v63 = vpop.eup %13894 }
 0x5fe   : > { %3490 = vrot.lane.b32.xlu1 %v13895_v63, %s14651_s24 }
 0x5ff   : > { %v13897_v56 = vpop.eup %13896  ;;  %12609 = vmatmul.mubr.msk.f32.gmra.mxu0 %vm424_vm1, %v14486_v0  ;;  %v14492_v0 = vld [vmem:[%s14740_s23 + $0x58] sm:$0xff] }
 0x600   : > { %3488 = vrot.lane.b32.xlu0 %v13897_v56, %s14651_s24  ;;  %12611 = vmatprep.mubr.msk.f32.mxu0 %vm424_vm1, %v14487_v51  ;;  %v14493_v51 = vld [vmem:[%s14740_s23 + $0x60] sm:$0xff] }
 0x601   : > { %v13899_v22 = vpop.eup %13898 }
 0x602   : > { %3494 = vrot.lane.b32.xlu1 %v13899_v22, %s14651_s24  ;;  %v14490_v22 = vld [vmem:[%s14740_s23 + $0x48] sm:$0xff] }
 0x603   : > { %v13901_v35 = vpop.eup %13900  ;;  %12612 = vmatmul.mubr.msk.f32.gmra.mxu0 %vm424_vm1, %v14488_v30  ;;  %v14496_v30 = vld [vmem:[%s14740_s23 + $0x78] sm:$0xff] }
 0x604   : > { %3492 = vrot.lane.b32.xlu0 %v13901_v35, %s14651_s24  ;;  %12614 = vmatprep.mubr.msk.f32.mxu0 %vm424_vm1, %v14489_v21  ;;  %v14491_v35 = vld [vmem:[%s14740_s23 + $0x50] sm:$0xff]  ;;  %v14497_v21 = vld [vmem:[%s14740_s23 + $0x80] sm:$0xff] }
 0x605   : > { %v13903_v63 = vpop.eup %13902 }
 0x606   : > { %3498 = vrot.lane.b32.xlu1 %v13903_v63, %s14651_s24  ;;  %v14494_v63 = vld [vmem:[%s14740_s23 + $0x68] sm:$0xff] }
 0x607   : > { %v13905_v56 = vpop.eup %13904  ;;  %12615 = vmatmul.mubr.msk.f32.gmra.mxu0 %vm424_vm1, %v14490_v22  ;;  %v14498_v22 = vld [vmem:[%s14740_s23 + $0x88] sm:$0xff] }
 0x608   : > { %3496 = vrot.lane.b32.xlu0 %v13905_v56, %s14651_s24  ;;  %12617 = vmatprep.mubr.msk.f32.mxu0 %vm424_vm1, %v14491_v35  ;;  %v14495_v56 = vld [vmem:[%s14740_s23 + $0x70] sm:$0xff] }
 0x609   : > { %v14499_v35 = vld [vmem:[%s14740_s23 + $0x90] sm:$0xff] }
 0x60b   : > { %12618 = vmatmul.mubr.msk.f32.gmra.mxu0 %vm424_vm1, %v14492_v0  ;;  %v14500_v0 = vld [vmem:[%s14740_s23 + $0x98] sm:$0xff] }
 0x60c   : > { %12620 = vmatprep.mubr.msk.f32.mxu0 %vm424_vm1, %v14493_v51  ;;  %v14501_v51 = vld [vmem:[%s14740_s23 + $0xa0] sm:$0xff] }
 0x60f   : > { %12621 = vmatmul.mubr.msk.f32.gmra.mxu0 %vm424_vm1, %v14494_v63  ;;  %v14502_v63 = vld [vmem:[%s14740_s23 + $0xa8] sm:$0xff] }
 0x610   : > { %12623 = vmatprep.mubr.msk.f32.mxu0 %vm424_vm1, %v14495_v56  ;;  %v14503_v56 = vld [vmem:[%s14740_s23 + $0xb0] sm:$0xff] }
 0x613   : > { %12624 = vmatmul.mubr.msk.f32.gmra.mxu0 %vm424_vm1, %v14496_v30  ;;  %v14504_v30 = vld [vmem:[%s14740_s23 + $0xb8] sm:$0xff] }
 0x614   : > { %12626 = vmatprep.mubr.msk.f32.mxu0 %vm424_vm1, %v14497_v21  ;;  %v14505_v21 = vld [vmem:[%s14740_s23 + $0xc0] sm:$0xff] }
 0x617   : > { %12627 = vmatmul.mubr.msk.f32.gmra.mxu0 %vm424_vm1, %v14498_v22  ;;  %v14506_v22 = vld [vmem:[%s14740_s23 + $0xc8] sm:$0xff] }
 0x618   : > { %12629 = vmatprep.mubr.msk.f32.mxu0 %vm424_vm1, %v14499_v35  ;;  %v14507_v35 = vld [vmem:[%s14740_s23 + $0xd0] sm:$0xff] }
 0x61b   : > { %12630 = vmatmul.mubr.msk.f32.gmra.mxu0 %vm424_vm1, %v14500_v0  ;;  %v14508_v0 = vld [vmem:[%s14740_s23 + $0xd8] sm:$0xff] }
 0x61c   : > { %12632 = vmatprep.mubr.msk.f32.mxu0 %vm424_vm1, %v14501_v51  ;;  %v14509_v51 = vld [vmem:[%s14740_s23 + $0xe0] sm:$0xff] }
 0x61f   : > { %12633 = vmatmul.mubr.msk.f32.gmra.mxu0 %vm424_vm1, %v14502_v63  ;;  %v14510_v63 = vld [vmem:[%s14740_s23 + $0xe8] sm:$0xff] }
 0x620   : > { %12635 = vmatprep.mubr.msk.f32.mxu0 %vm424_vm1, %v14503_v56  ;;  %v14511_v56 = vld [vmem:[%s14740_s23 + $0xf0] sm:$0xff] }
 0x623   : > { %12636 = vmatmul.mubr.msk.f32.gmra.mxu0 %vm424_vm1, %v14504_v30  ;;  %v14512_v30 = vld [vmem:[%s14740_s23 + $0xf8] sm:$0xff] }
 0x624   : > { %12638 = vmatprep.mubr.msk.f32.mxu0 %vm424_vm1, %v14505_v21 }
 0x627   : > { %12639 = vmatmul.mubr.msk.f32.gmra.mxu0 %vm424_vm1, %v14506_v22  ;;  %v14513_v22 = vld [vmem:[%s14724_s19 + $0x8] sm:$0xff] }
 0x628   : > { %12641 = vmatprep.mubr.msk.f32.mxu0 %vm424_vm1, %v14507_v35 }
 0x62b   : > { %12642 = vmatmul.mubr.msk.f32.gmra.mxu0 %vm424_vm1, %v14508_v0 }
 0x62c   : > { %12644 = vmatprep.mubr.msk.f32.mxu0 %vm424_vm1, %v14509_v51  ;;  %v14514_v51 = vld [vmem:[%s14724_s19] sm:$0xff] }
 0x62f   : > { %12645 = vmatmul.mubr.msk.f32.gmra.mxu0 %vm424_vm1, %v14510_v63 }
 0x630   : > { %12647 = vmatprep.mubr.msk.f32.mxu0 %vm424_vm1, %v14511_v56  ;;  %v14515_v56 = vld [vmem:[%s14724_s19 + $0x18] sm:$0xff] }
 0x633   : > { %12648 = vmatmul.mubr.msk.f32.gmra.mxu0 %vm424_vm1, %v14512_v30 }
 0x63b   : > { %v3439_v21 = vpop.permute.xlu1 %3438 }
 0x63c   : > { %v3533_v35 = vmul.f32 %v14513_v22, %v3439_v21  ;;  %v14516_v22 = vld [vmem:[%s14724_s19 + $0x10] sm:$0xff] }
 0x63d   : > { %v3437_v37 = vpop.permute.xlu0 %3436 }
 0x63e   : > { %v16173_v0 = vadd.f32 %v3533_v35, %v15846_v28  ;;  %v3532_v17 = vmul.f32 %v14514_v51, %v3437_v37 }
 0x63f   : > { %v3443_v14 = vpop.permute.xlu1 %3442 }
 0x640   : > { %v16177_v63 = vadd.f32 %v3532_v17, %v15850_v55  ;;  %v3535_v18 = vmul.f32 %v14515_v56, %v3443_v14  ;;  %3987 = vrot.lane.b32.xlu1 %v16173_v0, %s14650_s20  ;;  %v14517_v17 = vld [vmem:[%s14724_s19 + $0x28] sm:$0xff] }
 0x641   : > { %v3441_v30 = vpop.permute.xlu0 %3440 }
 0x642   : > { %v16183_v21 = vadd.f32 %v3535_v18, %v15854_v27  ;;  %v3534_v28 = vmul.f32 %v14516_v22, %v3441_v30  ;;  %3985 = vrot.lane.b32.xlu0 %v16177_v63, %s14650_s20  ;;  %v14518_v27 = vld [vmem:[%s14724_s19 + $0x20] sm:$0xff]  ;;  %v14519_v30 = vld [vmem:[%s14724_s19 + $0x38] sm:$0xff] }
 0x643   : > { %v3447_v37 = vpop.permute.xlu1 %3446 }
 0x644   : > { %v16189_v55 = vadd.f32 %v3534_v28, %v15858_v26  ;;  %v3537_v14 = vmul.f32 %v14517_v17, %v3447_v37  ;;  %3991 = vrot.lane.b32.xlu1 %v16183_v21, %s14650_s20  ;;  %v14520_v37 = vld [vmem:[%s14724_s19 + $0x30] sm:$0xff] }
 0x645   : > { %v3445_v35 = vpop.permute.xlu0 %3444 }
 0x646   : > { %v16195_v18 = vadd.f32 %v3537_v14, %v15862_v1  ;;  %v3536_v51 = vmul.f32 %v14518_v27, %v3445_v35  ;;  %3989 = vrot.lane.b32.xlu0 %v16189_v55, %s14650_s20  ;;  %v14521_v35 = vld [vmem:[%s14724_s19 + $0x48] sm:$0xff] }
 0x647   : > { %v3451_v56 = vpop.permute.xlu1 %3450 }
 0x648   : > { %v16201_v26 = vadd.f32 %v3536_v51, %v15866_v34  ;;  %v3539_v22 = vmul.f32 %v14519_v30, %v3451_v56  ;;  %3995 = vrot.lane.b32.xlu1 %v16195_v18, %s14650_s20  ;;  %v14522_v56 = vld [vmem:[%s14724_s19 + $0x40] sm:$0xff] }
 0x649   : > { %v3449_v28 = vpop.permute.xlu0 %3448 }
 0x64a   : > { %v16207_v1 = vadd.f32 %v3539_v22, %v15870_v36  ;;  %v3538_v17 = vmul.f32 %v14520_v37, %v3449_v28  ;;  %3993 = vrot.lane.b32.xlu0 %v16201_v26, %s14650_s20  ;;  %v14523_v28 = vld [vmem:[%s14724_s19 + $0x58] sm:$0xff] }
 0x64c   : > { %20829 = vst [vmem:[#allocation78_spill] sm:$0xff] %v16207_v1  ;;  %v16213_v14 = vadd.f32 %v3538_v17, %v15874_v61  ;;  %v3455_v34 = vpop.permute.xlu1 %3454  ;;  %3999 = vrot.lane.b32.xlu1 %v16207_v1, %s14650_s20 }
 0x64d   : > { %v3541_v27 = vmul.f32 %v14521_v35, %v3455_v34  ;;  %v14524_v35 = vld [vmem:[%s14724_s19 + $0x50] sm:$0xff] }
 0x64e   : > { %20830 = vst [vmem:[#allocation79_spill] sm:$0xff] %v16213_v14  ;;  %v3453_v51 = vpop.permute.xlu0 %3452  ;;  %3997 = vrot.lane.b32.xlu0 %v16213_v14, %s14650_s20 }
 0x64f   : > { %v16221_v36 = vadd.f32 %v3541_v27, %v15881_v39  ;;  %v3540_v30 = vmul.f32 %v14522_v56, %v3453_v51  ;;  %v14525_v51 = vld [vmem:[%s14724_s19 + $0x68] sm:$0xff] }
 0x650   : > { %v3459_v22 = vpop.permute.xlu1 %3458 }
 0x651   : > { %20831 = vst [vmem:[#allocation80_spill] sm:$0xff] %v16221_v36  ;;  %v16225_v61 = vadd.f32 %v3540_v30, %v15887_v62  ;;  %v3543_v37 = vmul.f32 %v14523_v28, %v3459_v22  ;;  %4003 = vrot.lane.b32.xlu1 %v16221_v36, %s14650_s20  ;;  %v14526_v22 = vld [vmem:[%s14724_s19 + $0x60] sm:$0xff] }
 0x652   : > { %v3457_v17 = vpop.permute.xlu0 %3456 }
 0x653   : > { %20832 = vst [vmem:[#allocation81_spill] sm:$0xff] %v16225_v61  ;;  %v16231_v34 = vadd.f32 %v3543_v37, %v15894_v54  ;;  %v3542_v39 = vmul.f32 %v14524_v35, %v3457_v17  ;;  %4001 = vrot.lane.b32.xlu0 %v16225_v61, %s14650_s20  ;;  %v14527_v17 = vld [vmem:[%s14724_s19 + $0x78] sm:$0xff] }
 0x654   : > { %v3463_v27 = vpop.permute.xlu1 %3462 }
 0x655   : > { %20833 = vst [vmem:[#allocation82_spill] sm:$0xff] %v16231_v34  ;;  %v16237_v62 = vadd.f32 %v3542_v39, %v15901_v53  ;;  %v3545_v56 = vmul.f32 %v14525_v51, %v3463_v27  ;;  %4007 = vrot.lane.b32.xlu1 %v16231_v34, %s14650_s20  ;;  %v14528_v27 = vld [vmem:[%s14724_s19 + $0x70] sm:$0xff] }
 0x656   : > { %v3461_v30 = vpop.permute.xlu0 %3460 }
 0x657   : > { %20834 = vst [vmem:[#allocation83_spill] sm:$0xff] %v16237_v62  ;;  %v16243_v54 = vadd.f32 %v3545_v56, %v15908_v33  ;;  %v3544_v28 = vmul.f32 %v14526_v22, %v3461_v30  ;;  %4005 = vrot.lane.b32.xlu0 %v16237_v62, %s14650_s20  ;;  %v14529_v30 = vld [vmem:[%s14724_s19 + $0x88] sm:$0xff] }
 0x658   : > { %v3467_v37 = vpop.permute.xlu1 %3466 }
 0x659   : > { %20835 = vst [vmem:[#allocation84_spill] sm:$0xff] %v16243_v54  ;;  %v16249_v53 = vadd.f32 %v3544_v28, %v15915_v44  ;;  %v3547_v35 = vmul.f32 %v14527_v17, %v3467_v37  ;;  %4011 = vrot.lane.b32.xlu1 %v16243_v54, %s14650_s20  ;;  %v14530_v37 = vld [vmem:[%s14724_s19 + $0x80] sm:$0xff] }
 0x65a   : > { %v3465_v39 = vpop.permute.xlu0 %3464 }
 0x65b   : > { %20836 = vst [vmem:[#allocation85_spill] sm:$0xff] %v16249_v53  ;;  %v16255_v33 = vadd.f32 %v3547_v35, %v15922_v47  ;;  %v3546_v51 = vmul.f32 %v14528_v27, %v3465_v39  ;;  %4009 = vrot.lane.b32.xlu0 %v16249_v53, %s14650_s20  ;;  %v14531_v39 = vld [vmem:[%s14724_s19 + $0x98] sm:$0xff] }
 0x65c   : > { %v3471_v56 = vpop.permute.xlu1 %3470 }
 0x65d   : > { %20837 = vst [vmem:[#allocation86_spill] sm:$0xff] %v16255_v33  ;;  %v16261_v44 = vadd.f32 %v3546_v51, %v15929_v23  ;;  %v3549_v22 = vmul.f32 %v14529_v30, %v3471_v56  ;;  %4015 = vrot.lane.b32.xlu1 %v16255_v33, %s14650_s20  ;;  %v14532_v56 = vld [vmem:[%s14724_s19 + $0x90] sm:$0xff] }
 0x65e   : > { %v3469_v28 = vpop.permute.xlu0 %3468 }
 0x65f   : > { %20838 = vst [vmem:[#allocation87_spill] sm:$0xff] %v16261_v44  ;;  %v16267_v47 = vadd.f32 %v3549_v22, %v15935_v4  ;;  %v3548_v17 = vmul.f32 %v14530_v37, %v3469_v28  ;;  %4013 = vrot.lane.b32.xlu0 %v16261_v44, %s14650_s20  ;;  %v14533_v28 = vld [vmem:[%s14724_s19 + $0xa8] sm:$0xff] }
 0x660   : > { %v3475_v35 = vpop.permute.xlu1 %3474 }
 0x661   : > { %20839 = vst [vmem:[#allocation88_spill] sm:$0xff] %v16267_v47  ;;  %v16273_v23 = vadd.f32 %v3548_v17, %v15944_v9  ;;  %v3551_v27 = vmul.f32 %v14531_v39, %v3475_v35  ;;  %4019 = vrot.lane.b32.xlu1 %v16267_v47, %s14650_s20  ;;  %v14534_v35 = vld [vmem:[%s14724_s19 + $0xa0] sm:$0xff] }
 0x662   : > { %v3473_v51 = vpop.permute.xlu0 %3472 }
 0x663   : > { %20840 = vst [vmem:[#allocation89_spill] sm:$0xff] %v16273_v23  ;;  %v16279_v4 = vadd.f32 %v3551_v27, %v15952_v16  ;;  %v3550_v30 = vmul.f32 %v14532_v56, %v3473_v51  ;;  %4017 = vrot.lane.b32.xlu0 %v16273_v23, %s14650_s20  ;;  %v14535_v51 = vld [vmem:[%s14724_s19 + $0xb8] sm:$0xff] }
 0x664   : > { %v3479_v22 = vpop.permute.xlu1 %3478 }
 0x665   : > { %20841 = vst [vmem:[#allocation90_spill] sm:$0xff] %v16279_v4  ;;  %v16285_v9 = vadd.f32 %v3550_v30, %v15960_v13  ;;  %v3553_v37 = vmul.f32 %v14533_v28, %v3479_v22  ;;  %4023 = vrot.lane.b32.xlu1 %v16279_v4, %s14650_s20  ;;  %v14536_v22 = vld [vmem:[%s14724_s19 + $0xb0] sm:$0xff] }
 0x666   : > { %v3477_v17 = vpop.permute.xlu0 %3476 }
 0x667   : > { %20842 = vst [vmem:[#allocation91_spill] sm:$0xff] %v16285_v9  ;;  %v16291_v16 = vadd.f32 %v3553_v37, %v15968_v10  ;;  %v3552_v39 = vmul.f32 %v14534_v35, %v3477_v17  ;;  %4021 = vrot.lane.b32.xlu0 %v16285_v9, %s14650_s20  ;;  %v14537_v17 = vld [vmem:[%s14724_s19 + $0xc8] sm:$0xff] }
 0x668   : > { %v3483_v27 = vpop.permute.xlu1 %3482 }
 0x669   : > { %20843 = vst [vmem:[#allocation92_spill] sm:$0xff] %v16291_v16  ;;  %v16297_v13 = vadd.f32 %v3552_v39, %v15976_v19  ;;  %v3555_v56 = vmul.f32 %v14535_v51, %v3483_v27  ;;  %4027 = vrot.lane.b32.xlu1 %v16291_v16, %s14650_s20  ;;  %v14538_v27 = vld [vmem:[%s14724_s19 + $0xc0] sm:$0xff] }
 0x66a   : > { %v3481_v30 = vpop.permute.xlu0 %3480 }
 0x66b   : > { %20844 = vst [vmem:[#allocation93_spill] sm:$0xff] %v16297_v13  ;;  %v16303_v10 = vadd.f32 %v3555_v56, %v15984_v58  ;;  %v3554_v28 = vmul.f32 %v14536_v22, %v3481_v30  ;;  %4025 = vrot.lane.b32.xlu0 %v16297_v13, %s14650_s20  ;;  %v14539_v30 = vld [vmem:[%s14724_s19 + $0xd8] sm:$0xff] }
 0x66c   : > { %v3487_v37 = vpop.permute.xlu1 %3486 }
 0x66d   : > { %20845 = vst [vmem:[#allocation94_spill] sm:$0xff] %v16303_v10  ;;  %v16309_v19 = vadd.f32 %v3554_v28, %v15992_v49  ;;  %v3557_v35 = vmul.f32 %v14537_v17, %v3487_v37  ;;  %4031 = vrot.lane.b32.xlu1 %v16303_v10, %s14650_s20 }
 0x66e   : > { %v3485_v39 = vpop.permute.xlu0 %3484 }
 0x66f   : > { %20846 = vst [vmem:[#allocation95_spill] sm:$0xff] %v16309_v19  ;;  %v16315_v58 = vadd.f32 %v3557_v35, %v16001_v15  ;;  %v3556_v51 = vmul.f32 %v14538_v27, %v3485_v39  ;;  %4029 = vrot.lane.b32.xlu0 %v16309_v19, %s14650_s20  ;;  %v14540_v15 = vld [vmem:[%s14724_s19 + $0xd0] sm:$0xff]  ;;  %v16501_v19 = vld [vmem:[%s20496_s4 + $0x2] ss:$0 sm:$0xff] }
 0x670   : > { %v3491_v56 = vpop.permute.xlu1 %3490  ;;  %v10769_v35 = vld [vmem:[%s20497_s5 + $0x170] sm:$0xff] }
 0x671   : > { %20847 = vst [vmem:[#allocation96_spill] sm:$0xff] %v16315_v58  ;;  %v16321_v49 = vadd.f32 %v3556_v51, %v16008_v7  ;;  %v3559_v22 = vmul.f32 %v14539_v30, %v3491_v56  ;;  %4035 = vrot.lane.b32.xlu1 %v16315_v58, %s14650_s20  ;;  %v10770_v7 = vld [vmem:[%s20497_s5 + $0x178] sm:$0xff]  ;;  %v10768_v56 = vld [vmem:[%s20497_s5 + $0x168] sm:$0xff] }
 0x672   : > { %v3489_v28 = vpop.permute.xlu0 %3488  ;;  %12700 = vmatprep.subr.mxu0 %v10770_v7 }
 0x673   : > { %20848 = vst [vmem:[#allocation97_spill] sm:$0xff] %v16321_v49  ;;  %v16327_v37 = vadd.f32 %v3559_v22, %v16016_v6  ;;  %v3558_v17 = vmul.f32 %v14540_v15, %v3489_v28  ;;  %4033 = vrot.lane.b32.xlu0 %v16321_v49, %s14650_s20  ;;  %v14541_v6 = vld [vmem:[%s14724_s19 + $0xe8] sm:$0xff]  ;;  %12701 = vmatpush3.msra.mxu0 %v10770_v7  ;;  %v14542_v28 = vld [vmem:[%s14724_s19 + $0xe0] sm:$0xff] }
 0x674   : > { %v3495_v39 = vpop.permute.xlu1 %3494  ;;  %12702 = vmatprep.subr.mxu0 %v10769_v35  ;;  %v10767_v15 = vld [vmem:[%s20497_s5 + $0x160] sm:$0xff] }
 0x675   : > { %20849 = vst [vmem:[#allocation98_spill] sm:$0xff] %v16327_v37  ;;  %v16339_v27 = vadd.f32 %v3558_v17, %v16024_v11  ;;  %v3561_v51 = vmul.f32 %v14541_v6, %v3495_v39  ;;  %4039 = vrot.lane.b32.xlu1 %v16327_v37, %s14650_s20  ;;  %12703 = vmatpush3.msra.mxu0 %v10769_v35  ;;  %v14543_v39 = vld [vmem:[%s14724_s19 + $0xf8] sm:$0xff] }
 0x676   : > { %v3493_v30 = vpop.permute.xlu0 %3492  ;;  %12704 = vmatprep.subr.mxu0 %v10768_v56 }
 0x677   : > { %20850 = vst [vmem:[#allocation99_spill] sm:$0xff] %v16339_v27  ;;  %v16348_v22 = vadd.f32 %v3561_v51, %v16032_v59  ;;  %v3560_v11 = vmul.f32 %v14542_v28, %v3493_v30  ;;  %4037 = vrot.lane.b32.xlu0 %v16339_v27, %s14650_s20  ;;  %12705 = vmatpush3.msra.mxu0 %v10768_v56  ;;  %v10766_v59 = vld [vmem:[%s20497_s5 + $0x158] sm:$0xff]  ;;  %v14544_v30 = vld [vmem:[%s14724_s19 + $0xf0] sm:$0xff] }
 0x678   : > { %v3499_v17 = vpop.permute.xlu1 %3498  ;;  %12706 = vmatprep.subr.mxu0 %v10767_v15 }
 0x679   : > { %20851 = vst [vmem:[#allocation100_spill] sm:$0xff] %v16348_v22  ;;  %v16357_v7 = vadd.f32 %v3560_v11, %v16040_v42  ;;  %v3563_v6 = vmul.f32 %v14543_v39, %v3499_v17  ;;  %4043 = vrot.lane.b32.xlu1 %v16348_v22, %s14650_s20  ;;  %12707 = vmatpush3.msra.mxu0 %v10767_v15  ;;  %v10765_v42 = vld [vmem:[%s20497_s5 + $0x150] sm:$0xff]  ;;  %v10763_v11 = vld [vmem:[%s20497_s5 + $0x140] sm:$0xff]  ;;  %v10760_v17 = vld [vmem:[%s20497_s5 + $0x128] sm:$0xff] }
 0x67a   : > { %v3497_v35 = vpop.permute.xlu0 %3496  ;;  %12708 = vmatprep.subr.mxu0 %v10766_v59  ;;  %v10761_v15 = vld [vmem:[%s20497_s5 + $0x130] sm:$0xff]  ;;  %v10759_v39 = vld [vmem:[%s20497_s5 + $0x120] sm:$0xff] }
 0x67b   : > { %20852 = vst [vmem:[#allocation101_spill] sm:$0xff] %v16357_v7  ;;  %v16366_v51 = vadd.f32 %v3563_v6, %v16048_v40  ;;  %v3562_v28 = vmul.f32 %v14544_v30, %v3497_v35  ;;  %4041 = vrot.lane.b32.xlu0 %v16357_v7, %s14650_s20  ;;  %12709 = vmatpush3.msra.mxu0 %v10766_v59  ;;  %v10764_v40 = vld [vmem:[%s20497_s5 + $0x148] sm:$0xff]  ;;  %v10758_v6 = vld [vmem:[%s20497_s5 + $0x118] sm:$0xff]  ;;  %v10757_v59 = vld [vmem:[%s20497_s5 + $0x110] sm:$0xff] }
 0x67c   : > { %12710 = vmatprep.subr.mxu0 %v10765_v42 }
 0x67d   : > { %20853 = vst [vmem:[#allocation102_spill] sm:$0xff] %v16366_v51  ;;  %v16375_v56 = vadd.f32 %v3562_v28, %v16056_v24  ;;  %4047 = vrot.lane.b32.xlu1 %v16366_v51, %s14650_s20  ;;  %12711 = vmatpush3.msra.mxu0 %v10765_v42  ;;  %v10762_v24 = vld [vmem:[%s20497_s5 + $0x138] sm:$0xff] }
 0x67e   : > { %12712 = vmatprep.subr.mxu0 %v10764_v40 }
 0x67f   : > { %20854 = vst [vmem:[#allocation103_spill] sm:$0xff] %v16375_v56  ;;  %4045 = vrot.lane.b32.xlu0 %v16375_v56, %s14650_s20  ;;  %12713 = vmatpush3.msra.mxu0 %v10764_v40 }
 0x680   : > { %12714 = vmatprep.subr.mxu0 %v10763_v11 }
 0x681   : > { %12715 = vmatpush3.msra.mxu0 %v10763_v11 }
 0x682   : > { %12716 = vmatprep.subr.mxu0 %v10762_v24 }
 0x683   : > { %12717 = vmatpush3.msra.mxu0 %v10762_v24 }
 0x684   : > { %12718 = vmatprep.subr.mxu0 %v10761_v15 }
 0x685   : > { %12719 = vmatpush3.msra.mxu0 %v10761_v15 }
 0x686   : > { %12720 = vmatprep.subr.mxu0 %v10760_v17 }
 0x687   : > { %12721 = vmatpush3.msra.mxu0 %v10760_v17 }
 0x688   : > { %12722 = vmatprep.subr.mxu0 %v10759_v39 }
 0x689   : > { %12723 = vmatpush3.msra.mxu0 %v10759_v39 }
 0x68a   : > { %12724 = vmatprep.subr.mxu0 %v10758_v6 }
 0x68b   : > { %12725 = vmatpush3.msra.mxu0 %v10758_v6 }
 0x68c   : > { %12726 = vmatprep.subr.mxu0 %v10757_v59 }
 0x68d   : > { %12727 = vmatpush3.msra.mxu0 %v10757_v59 }
 0x6b2   : > { %v3988_v35 = vpop.permute.xlu1 %3987 }
 0x6b4   : > { %v3986_v30 = vpop.permute.xlu0 %3985 }
 0x6b5   : > { %12652 = vmatprep.mubr.msk.f32.mxu1 %vm842_vm2, %v3986_v30 }
 0x6b6   : > { %v3992_v28 = vpop.permute.xlu1 %3991  ;;  %12653 = vmatmul.mubr.msk.f32.vlgmr.msra.gmra.mxu1 %vm842_vm2, %v3988_v35 }
 0x6b8   : > { %v3990_v42 = vpop.permute.xlu0 %3989 }
 0x6b9   : > { %12655 = vmatprep.mubr.msk.f32.mxu1 %vm842_vm2, %v3990_v42 }
 0x6ba   : > { %v3996_v40 = vpop.permute.xlu1 %3995  ;;  %12656 = vmatmul.mubr.msk.f32.gmra.mxu1 %vm842_vm2, %v3992_v28 }
 0x6bc   : > { %v3994_v11 = vpop.permute.xlu0 %3993 }
 0x6bd   : > { %12658 = vmatprep.mubr.msk.f32.mxu1 %vm842_vm2, %v3994_v11 }
 0x6be   : > { %v4000_v24 = vpop.permute.xlu1 %3999  ;;  %12659 = vmatmul.mubr.msk.f32.gmra.mxu1 %vm842_vm2, %v3996_v40 }
 0x6c0   : > { %v3998_v15 = vpop.permute.xlu0 %3997 }
 0x6c1   : > { %12661 = vmatprep.mubr.msk.f32.mxu1 %vm842_vm2, %v3998_v15 }
 0x6c2   : > { %12662 = vmatmul.mubr.msk.f32.gmra.mxu1 %vm842_vm2, %v4000_v24 }
 0x6c3   : > { %v4004_v17 = vpop.permute.xlu1 %4003 }
 0x6c5   : > { %v4002_v39 = vpop.permute.xlu0 %4001 }
 0x6c6   : > { %12664 = vmatprep.mubr.msk.f32.mxu1 %vm842_vm2, %v4002_v39 }
 0x6c7   : > { %v4008_v6 = vpop.permute.xlu1 %4007  ;;  %12665 = vmatmul.mubr.msk.f32.gmra.mxu1 %vm842_vm2, %v4004_v17 }
 0x6c9   : > { %v4006_v59 = vpop.permute.xlu0 %4005 }
 0x6ca   : > { %12667 = vmatprep.mubr.msk.f32.mxu1 %vm842_vm2, %v4006_v59 }
 0x6cb   : > { %v4012_v35 = vpop.permute.xlu1 %4011  ;;  %12668 = vmatmul.mubr.msk.f32.gmra.mxu1 %vm842_vm2, %v4008_v6 }
 0x6cd   : > { %v4010_v30 = vpop.permute.xlu0 %4009 }
 0x6ce   : > { %12670 = vmatprep.mubr.msk.f32.mxu1 %vm842_vm2, %v4010_v30 }
 0x6cf   : > { %v4016_v28 = vpop.permute.xlu1 %4015  ;;  %12671 = vmatmul.mubr.msk.f32.gmra.mxu1 %vm842_vm2, %v4012_v35 }
 0x6d1   : > { %v4014_v42 = vpop.permute.xlu0 %4013 }
 0x6d2   : > { %12673 = vmatprep.mubr.msk.f32.mxu1 %vm842_vm2, %v4014_v42 }
 0x6d3   : > { %v4020_v40 = vpop.permute.xlu1 %4019  ;;  %12674 = vmatmul.mubr.msk.f32.gmra.mxu1 %vm842_vm2, %v4016_v28 }
 0x6d5   : > { %v4018_v11 = vpop.permute.xlu0 %4017 }
 0x6d6   : > { %12676 = vmatprep.mubr.msk.f32.mxu1 %vm842_vm2, %v4018_v11 }
 0x6d7   : > { %v4024_v24 = vpop.permute.xlu1 %4023  ;;  %12677 = vmatmul.mubr.msk.f32.gmra.mxu1 %vm842_vm2, %v4020_v40 }
 0x6d9   : > { %v4022_v15 = vpop.permute.xlu0 %4021 }
 0x6da   : > { %12679 = vmatprep.mubr.msk.f32.mxu1 %vm842_vm2, %v4022_v15 }
 0x6db   : > { %v4028_v17 = vpop.permute.xlu1 %4027  ;;  %12680 = vmatmul.mubr.msk.f32.gmra.mxu1 %vm842_vm2, %v4024_v24 }
 0x6dd   : > { %v4026_v39 = vpop.permute.xlu0 %4025 }
 0x6de   : > { %12682 = vmatprep.mubr.msk.f32.mxu1 %vm842_vm2, %v4026_v39  ;;  %v10755_v39 = vld [vmem:[%s20497_s5 + $0x100] sm:$0xff] }
 0x6df   : > { %v4032_v6 = vpop.permute.xlu1 %4031  ;;  %12683 = vmatmul.mubr.msk.f32.gmra.mxu1 %vm842_vm2, %v4028_v17  ;;  %v10756_v17 = vld [vmem:[%s20497_s5 + $0x108] sm:$0xff] }
 0x6e0   : > { %12728 = vmatprep.subr.mxu0 %v10756_v17 }
 0x6e1   : > { %v4030_v59 = vpop.permute.xlu0 %4029  ;;  %12729 = vmatpush3.msra.mxu0 %v10756_v17  ;;  %v10782_v17 = vld [vmem:[%s20499_s7 + $0x148] sm:$0xff] }
 0x6e2   : > { %12685 = vmatprep.mubr.msk.f32.mxu1 %vm842_vm2, %v4030_v59  ;;  %12730 = vmatprep.subr.mxu0 %v10755_v39 }
 0x6e3   : > { %v4036_v35 = vpop.permute.xlu1 %4035  ;;  %12686 = vmatmul.mubr.msk.f32.gmra.mxu1 %vm842_vm2, %v4032_v6  ;;  %12731 = vmatpush3.msra.mxu0 %v10755_v39  ;;  %v12604_v6 = vpop.f32.mrf.mxu0 }
 0x6e5   : > { %v4034_v30 = vpop.permute.xlu0 %4033  ;;  %v16443_v59 = vpop.f32.mrf.mxu0 }
 0x6e6   : > { %12688 = vmatprep.mubr.msk.f32.mxu1 %vm842_vm2, %v4034_v30  ;;  %v10787_v30 = vld [vmem:[%s20499_s7 + $0x170] sm:$0xff] }
 0x6e7   : > { %v4040_v28 = vpop.permute.xlu1 %4039  ;;  %12689 = vmatmul.mubr.msk.f32.gmra.mxu1 %vm842_vm2, %v4036_v35  ;;  %v10788_v35 = vld [vmem:[%s20499_s7 + $0x178] sm:$0xff] }
 0x6e8   : > { %12780 = vmatprep.subr.mxu1 %v10788_v35 }
 0x6e9   : > { %v4038_v42 = vpop.permute.xlu0 %4037  ;;  %12781 = vmatpush3.msra.mxu1 %v10788_v35  ;;  %v10781_v35 = vld [vmem:[%s20499_s7 + $0x140] sm:$0xff] }
 0x6ea   : > { %12691 = vmatprep.mubr.msk.f32.mxu1 %vm842_vm2, %v4038_v42  ;;  %12782 = vmatprep.subr.mxu1 %v10787_v30  ;;  %v12607_v42 = vpop.f32.mrf.mxu0 }
 0x6eb   : > { %12692 = vmatmul.mubr.msk.f32.gmra.mxu1 %vm842_vm2, %v4040_v28  ;;  %v4044_v40 = vpop.permute.xlu1 %4043  ;;  %v10786_v28 = vld [vmem:[%s20499_s7 + $0x168] sm:$0xff] }
 0x6ec   : > { %12783 = vmatpush3.msra.mxu1 %v10787_v30  ;;  %v10780_v30 = vld [vmem:[%s20499_s7 + $0x138] sm:$0xff] }
 0x6ed   : > { %v4042_v11 = vpop.permute.xlu0 %4041  ;;  %12784 = vmatprep.subr.mxu1 %v10786_v28 }
 0x6ee   : > { %12694 = vmatprep.mubr.msk.f32.mxu1 %vm842_vm2, %v4042_v11  ;;  %12785 = vmatpush3.msra.mxu1 %v10786_v28  ;;  %v10784_v11 = vld [vmem:[%s20499_s7 + $0x158] sm:$0xff] }
 0x6ef   : > { %12695 = vmatmul.mubr.msk.f32.gmra.mxu1 %vm842_vm2, %v4044_v40  ;;  %v4048_v15 = vpop.permute.xlu1 %4047  ;;  %v10785_v40 = vld [vmem:[%s20499_s7 + $0x160] sm:$0xff] }
 0x6f0   : > { %12786 = vmatprep.subr.mxu1 %v10785_v40 }
 0x6f1   : > { %v4046_v24 = vpop.permute.xlu0 %4045  ;;  %12787 = vmatpush3.msra.mxu1 %v10785_v40  ;;  %v10779_v40 = vld [vmem:[%s20499_s7 + $0x130] sm:$0xff] }
 0x6f2   : > { %12697 = vmatprep.mubr.msk.f32.mxu1 %vm842_vm2, %v4046_v24  ;;  %v3804_v24 = vpop.f32.mrf.mxu0  ;;  %12788 = vmatprep.subr.mxu1 %v10784_v11 }
 0x6f3   : > { %12698 = vmatmul.mubr.msk.f32.gmra.mxu1 %vm842_vm2, %v4048_v15  ;;  %v10783_v15 = vld [vmem:[%s20499_s7 + $0x150] sm:$0xff] }
 0x6f4   : > { %12789 = vmatpush3.msra.mxu1 %v10784_v11  ;;  %v12610_v39 = vpop.f32.mrf.mxu0  ;;  %v10778_v11 = vld [vmem:[%s20499_s7 + $0x128] sm:$0xff] }
 0x6f5   : > { %12790 = vmatprep.subr.mxu1 %v10783_v15 }
 0x6f6   : > { %12791 = vmatpush3.msra.mxu1 %v10783_v15  ;;  %v3814_v28 = vpop.f32.mrf.mxu0 }
 0x6f7   : > { %12792 = vmatprep.subr.mxu1 %v10782_v17 }
 0x6f8   : > { %12793 = vmatpush3.msra.mxu1 %v10782_v17  ;;  %v12613_v15 = vpop.f32.mrf.mxu0  ;;  %v10777_v17 = vld [vmem:[%s20499_s7 + $0x120] sm:$0xff] }
 0x6f9   : > { %12794 = vmatprep.subr.mxu1 %v10781_v35 }
 0x6fa   : > { %12795 = vmatpush3.msra.mxu1 %v10781_v35  ;;  %v10776_v35 = vld [vmem:[%s20499_s7 + $0x118] sm:$0xff]  ;;  %v3824_v56 = vpop.f32.mrf.mxu0 }
 0x6fb   : > { %12796 = vmatprep.subr.mxu1 %v10780_v30 }
 0x6fc   : > { %12797 = vmatpush3.msra.mxu1 %v10780_v30  ;;  %v10775_v30 = vld [vmem:[%s20499_s7 + $0x110] sm:$0xff]  ;;  %v12616_v51 = vpop.f32.mrf.mxu0 }
 0x6fd   : > { %12798 = vmatprep.subr.mxu1 %v10779_v40 }
 0x6fe   : > { %12799 = vmatpush3.msra.mxu1 %v10779_v40  ;;  %v10774_v40 = vld [vmem:[%s20499_s7 + $0x108] sm:$0xff] }
 0x6ff   : > { %12800 = vmatprep.subr.mxu1 %v10778_v11 }
 0x700   : > { %12801 = vmatpush3.msra.mxu1 %v10778_v11  ;;  %v3834_v11 = vpop.f32.mrf.mxu0 }
 0x701   : > { %12802 = vmatprep.subr.mxu1 %v10777_v17 }
 0x702   : > { %12803 = vmatpush3.msra.mxu1 %v10777_v17  ;;  %v12619_v7 = vpop.f32.mrf.mxu0 }
 0x703   : > { %12804 = vmatprep.subr.mxu1 %v10776_v35 }
 0x704   : > { %12805 = vmatpush3.msra.mxu1 %v10776_v35  ;;  %v3844_v22 = vpop.f32.mrf.mxu0 }
 0x705   : > { %12806 = vmatprep.subr.mxu1 %v10775_v30 }
 0x706   : > { %12807 = vmatpush3.msra.mxu1 %v10775_v30  ;;  %v16490_v27 = vpop.f32.mrf.mxu0 }
 0x707   : > { %12808 = vmatprep.subr.mxu1 %v10774_v40 }
 0x708   : > { %12809 = vmatpush3.msra.mxu1 %v10774_v40  ;;  %v16492_v17 = vpop.f32.mrf.mxu0 }
 0x70a   : > { %v16494_v37 = vpop.f32.mrf.mxu0 }
 0x70c   : > { %v16496_v49 = vpop.f32.mrf.mxu0 }
 0x70e   : > { %v16503_v30 = vpop.f32.mrf.mxu0 }
 0x710   : > { %v16508_v23 = vpop.f32.mrf.mxu0 }
 0x776   : > { %v12654_v35 = vpop.f32.mrf.mxu1 }
 0x777   : > { %v4188_v58 = vadd.f32 %v12654_v35, %v12604_v6 }
 0x778   : > { %v4182_v40 = vpop.f32.mrf.mxu1 }
 0x779   : > { %v4183_v10 = vadd.f32 %v4182_v40, %v16443_v59  ;;  %v4350_v13 = vadd.f32 %v16501_v19, %v4188_v58  ;;  %v16512_v59 = vpop.f32.mrf.mxu0 }
 0x77a   : > { %v12657_v16 = vpop.f32.mrf.mxu1 }
 0x77b   : > { %v4349_v9 = vadd.f32 %v16501_v19, %v4183_v10  ;;  %v4198_v4 = vadd.f32 %v12657_v16, %v12607_v42  ;;  %v4382_v44 = vmax.f32 %v4350_v13, 0.0 }
 0x77c   : > { %v4192_v47 = vpop.f32.mrf.mxu1 }
 0x77d   : > { %v4193_v6 = vadd.f32 %v4192_v47, %v3804_v24  ;;  %v4381_v35 = vmax.f32 %v4349_v9, 0.0  ;;  %v4352_v33 = vadd.f32 %v16501_v19, %v4198_v4  ;;  %v16516_v4 = vpop.f32.mrf.mxu0 }
 0x77e   : > { %v12660_v53 = vpop.f32.mrf.mxu1 }
 0x77f   : > { %v4351_v54 = vadd.f32 %v16501_v19, %v4193_v6  ;;  %v4208_v62 = vadd.f32 %v12660_v53, %v12610_v39  ;;  %12732 = vmatprep.mubr.f32.mxu0 %v4381_v35  ;;  %v4384_v16 = vmax.f32 %v4352_v33, 0.0  ;;  %v16520_v33 = vpop.f32.mrf.mxu0 }
 0x780   : > { %v4202_v58 = vpop.f32.mrf.mxu1  ;;  %12733 = vmatmul.mubr.f32.vlgmr.msra.gmra.mxu0 %v4382_v44 }
 0x781   : > { %v4203_v40 = vadd.f32 %v4202_v58, %v3814_v28  ;;  %v4383_v10 = vmax.f32 %v4351_v54, 0.0  ;;  %v4354_v42 = vadd.f32 %v16501_v19, %v4208_v62 }
 0x782   : > { %v12663_v34 = vpop.f32.mrf.mxu1 }
 0x783   : > { %v4353_v47 = vadd.f32 %v16501_v19, %v4203_v40  ;;  %v4218_v9 = vadd.f32 %v12663_v34, %v12613_v15  ;;  %12735 = vmatprep.mubr.f32.mxu0 %v4383_v10  ;;  %v4386_v39 = vmax.f32 %v4354_v42, 0.0 }
 0x784   : > { %v4212_v13 = vpop.f32.mrf.mxu1  ;;  %12736 = vmatmul.mubr.f32.gmra.mxu0 %v4384_v16 }
 0x785   : > { %v4213_v53 = vadd.f32 %v4212_v13, %v3824_v56  ;;  %v4385_v24 = vmax.f32 %v4353_v47, 0.0  ;;  %v4356_v6 = vadd.f32 %v16501_v19, %v4218_v9  ;;  %v3894_v56 = vpop.f32.mrf.mxu0 }
 0x787   : > { %v4355_v44 = vadd.f32 %v16501_v19, %v4213_v53  ;;  %v12666_v54 = vpop.f32.mrf.mxu1  ;;  %12738 = vmatprep.mubr.f32.mxu0 %v4385_v24  ;;  %v4388_v15 = vmax.f32 %v4356_v6, 0.0  ;;  %v12637_v24 = vpop.f32.mrf.mxu0 }
 0x788   : > { %v4228_v62 = vadd.f32 %v12666_v54, %v12616_v51  ;;  %12739 = vmatmul.mubr.f32.gmra.mxu0 %v4386_v39 }
 0x789   : > { %v4222_v28 = vpop.f32.mrf.mxu1  ;;  %v4387_v34 = vmax.f32 %v4355_v44, 0.0 }
 0x78a   : > { %v4223_v35 = vadd.f32 %v4222_v28, %v3834_v11  ;;  %v4358_v58 = vadd.f32 %v16501_v19, %v4228_v62  ;;  %v3904_v28 = vpop.f32.mrf.mxu0 }
 0x78b   : > { %v12669_v40 = vpop.f32.mrf.mxu1  ;;  %12741 = vmatprep.mubr.f32.mxu0 %v4387_v34 }
 0x78c   : > { %v4357_v10 = vadd.f32 %v16501_v19, %v4223_v35  ;;  %v4238_v16 = vadd.f32 %v12669_v40, %v12619_v7  ;;  %12742 = vmatmul.mubr.f32.gmra.mxu0 %v4388_v15  ;;  %v4390_v13 = vmax.f32 %v4358_v58, 0.0 }
 0x78d   : > { %v4232_v42 = vpop.f32.mrf.mxu1 }
 0x78e   : > { %v4233_v47 = vadd.f32 %v4232_v42, %v3844_v22  ;;  %v4389_v9 = vmax.f32 %v4357_v10, 0.0  ;;  %v4360_v51 = vadd.f32 %v16501_v19, %v4238_v16  ;;  %v12640_v16 = vpop.f32.mrf.mxu0 }
 0x78f   : > { %v12672_v53 = vpop.f32.mrf.mxu1 }
 0x790   : > { %v4359_v39 = vadd.f32 %v16501_v19, %v4233_v47  ;;  %v4248_v11 = vadd.f32 %v12672_v53, %v16490_v27  ;;  %12744 = vmatprep.mubr.f32.mxu0 %v4389_v9  ;;  %v4392_v7 = vmax.f32 %v4360_v51, 0.0 }
 0x791   : > { %v4242_v6 = vpop.f32.mrf.mxu1  ;;  %12745 = vmatmul.mubr.f32.gmra.mxu0 %v4390_v13 }
 0x792   : > { %v4243_v44 = vadd.f32 %v4242_v6, %v16492_v17  ;;  %v4391_v54 = vmax.f32 %v4359_v39, 0.0  ;;  %v4362_v62 = vadd.f32 %v16501_v19, %v4248_v11  ;;  %v3914_v39 = vpop.f32.mrf.mxu0 }
 0x793   : > { %v12675_v22 = vpop.f32.mrf.mxu1 }
 0x794   : > { %v4361_v34 = vadd.f32 %v16501_v19, %v4243_v44  ;;  %v4258_v15 = vadd.f32 %v12675_v22, %v16494_v37  ;;  %12747 = vmatprep.mubr.f32.mxu0 %v4391_v54  ;;  %v4394_v40 = vmax.f32 %v4362_v62, 0.0  ;;  %v12643_v22 = vpop.f32.mrf.mxu0 }
 0x795   : > { %v4252_v35 = vpop.f32.mrf.mxu1  ;;  %12748 = vmatmul.mubr.f32.gmra.mxu0 %v4392_v7 }
 0x796   : > { %v4253_v27 = vadd.f32 %v4252_v35, %v16496_v49  ;;  %v4393_v58 = vmax.f32 %v4361_v34, 0.0  ;;  %v4364_v10 = vadd.f32 %v16501_v19, %v4258_v15 }
 0x797   : > { %v12678_v17 = vpop.f32.mrf.mxu1 }
 0x798   : > { %v4363_v42 = vadd.f32 %v16501_v19, %v4253_v27  ;;  %v4268_v47 = vadd.f32 %v12678_v17, %v16503_v30  ;;  %12750 = vmatprep.mubr.f32.mxu0 %v4393_v58  ;;  %v4396_v51 = vmax.f32 %v4364_v10, 0.0 }
 0x799   : > { %v4262_v9 = vpop.f32.mrf.mxu1  ;;  %12751 = vmatmul.mubr.f32.gmra.mxu0 %v4394_v40 }
 0x79a   : > { %v4263_v37 = vadd.f32 %v4262_v9, %v16508_v23  ;;  %v4395_v13 = vmax.f32 %v4363_v42, 0.0  ;;  %v4366_v53 = vadd.f32 %v16501_v19, %v4268_v47 }
 0x79b   : > { %v12681_v49 = vpop.f32.mrf.mxu1 }
 0x79c   : > { %v4365_v11 = vadd.f32 %v16501_v19, %v4263_v37  ;;  %v4278_v6 = vadd.f32 %v12681_v49, %v16512_v59  ;;  %12753 = vmatprep.mubr.f32.mxu0 %v4395_v13  ;;  %v4398_v7 = vmax.f32 %v4366_v53, 0.0 }
 0x79d   : > { %v4272_v44 = vpop.f32.mrf.mxu1  ;;  %12754 = vmatmul.mubr.f32.gmra.mxu0 %v4396_v51 }
 0x79e   : > { %v4273_v30 = vadd.f32 %v4272_v44, %v16516_v4  ;;  %v4397_v54 = vmax.f32 %v4365_v11, 0.0  ;;  %v4368_v62 = vadd.f32 %v16501_v19, %v4278_v6  ;;  %v3924_v4 = vpop.f32.mrf.mxu0 }
 0x79f   : > { %v12684_v23 = vpop.f32.mrf.mxu1 }
 0x7a0   : > { %v4367_v34 = vadd.f32 %v16501_v19, %v4273_v30  ;;  %v4288_v15 = vadd.f32 %v12684_v23, %v16520_v33  ;;  %12756 = vmatprep.mubr.f32.mxu0 %v4397_v54  ;;  %v4400_v58 = vmax.f32 %v4368_v62, 0.0  ;;  %v12646_v53 = vpop.f32.mrf.mxu0 }
 0x7a1   : > { %v4282_v35 = vpop.f32.mrf.mxu1  ;;  %12757 = vmatmul.mubr.f32.gmra.mxu0 %v4398_v7 }
 0x7a2   : > { %v4283_v27 = vadd.f32 %v4282_v35, %v3894_v56  ;;  %v4399_v59 = vmax.f32 %v4367_v34, 0.0  ;;  %v4370_v40 = vadd.f32 %v16501_v19, %v4288_v15  ;;  %v3934_v7 = vpop.f32.mrf.mxu0 }
 0x7a3   : > { %v12687_v10 = vpop.f32.mrf.mxu1 }
 0x7a4   : > { %v4369_v17 = vadd.f32 %v16501_v19, %v4283_v27  ;;  %v4298_v42 = vadd.f32 %v12687_v10, %v12637_v24  ;;  %12759 = vmatprep.mubr.f32.mxu0 %v4399_v59  ;;  %v4402_v13 = vmax.f32 %v4370_v40, 0.0  ;;  %v12649_v59 = vpop.f32.mrf.mxu0 }
 0x7a5   : > { %v4292_v47 = vpop.f32.mrf.mxu1  ;;  %12760 = vmatmul.mubr.f32.gmra.mxu0 %v4400_v58 }
 0x7a6   : > { %v4293_v9 = vadd.f32 %v4292_v47, %v3904_v28  ;;  %v4401_v37 = vmax.f32 %v4369_v17, 0.0  ;;  %v4372_v33 = vadd.f32 %v16501_v19, %v4298_v42 }
 0x7a7   : > { %v12690_v51 = vpop.f32.mrf.mxu1 }
 0x7a8   : > { %v4371_v56 = vadd.f32 %v16501_v19, %v4293_v9  ;;  %v4308_v49 = vadd.f32 %v12690_v51, %v12640_v16  ;;  %12762 = vmatprep.mubr.f32.mxu0 %v4401_v37  ;;  %v4404_v30 = vmax.f32 %v4372_v33, 0.0  ;;  %v3944_v9 = vpop.f32.mrf.mxu0 }
 0x7a9   : > { %v4302_v11 = vpop.f32.mrf.mxu1  ;;  %12763 = vmatmul.mubr.f32.gmra.mxu0 %v4402_v13 }
 0x7aa   : > { %v4303_v6 = vadd.f32 %v4302_v11, %v3914_v39  ;;  %v4403_v44 = vmax.f32 %v4371_v56, 0.0  ;;  %v4374_v24 = vadd.f32 %v16501_v19, %v4308_v49 }
 0x7ab   : > { %v12693_v54 = vpop.f32.mrf.mxu1 }
 0x7ac   : > { %v4373_v28 = vadd.f32 %v16501_v19, %v4303_v6  ;;  %v4318_v62 = vadd.f32 %v12693_v54, %v12643_v22  ;;  %12765 = vmatprep.mubr.f32.mxu0 %v4403_v44  ;;  %v4406_v35 = vmax.f32 %v4374_v24, 0.0  ;;  %v14545_v44 = vld [vmem:[%s14740_s23] sm:$0xff] }
 0x7ad   : > { %v4312_v23 = vpop.f32.mrf.mxu1  ;;  %12766 = vmatmul.mubr.f32.gmra.mxu0 %v4404_v30  ;;  %v10773_v30 = vld [vmem:[%s20499_s7 + $0x100] sm:$0xff] }
 0x7ae   : > { %v4313_v34 = vadd.f32 %v4312_v23, %v3924_v4  ;;  %v4405_v15 = vmax.f32 %v4373_v28, 0.0  ;;  %v4376_v16 = vadd.f32 %v16501_v19, %v4318_v62  ;;  %12810 = vmatprep.subr.mxu1 %v10773_v30  ;;  %v16563_v24 = vld [vmem:[%s20498_s6 + $0x2] ss:$0 sm:$0xff] }
 0x7af   : > { %v12696_v27 = vpop.f32.mrf.mxu1  ;;  %12811 = vmatpush3.msra.mxu1 %v10773_v30 }
 0x7b0   : > { %v4375_v39 = vadd.f32 %v16501_v19, %v4313_v34  ;;  %v4328_v58 = vadd.f32 %v12696_v27, %v12646_v53  ;;  %12768 = vmatprep.mubr.f32.mxu0 %v4405_v15  ;;  %v4408_v42 = vmax.f32 %v4376_v16, 0.0 }
 0x7b1   : > { %v4322_v40 = vpop.f32.mrf.mxu1  ;;  %12769 = vmatmul.mubr.f32.gmra.mxu0 %v4406_v35 }
 0x7b2   : > { %v4323_v10 = vadd.f32 %v4322_v40, %v3934_v7  ;;  %v4407_v17 = vmax.f32 %v4375_v39, 0.0  ;;  %v4378_v22 = vadd.f32 %v16501_v19, %v4328_v58 }
 0x7b3   : > { %v12699_v47 = vpop.f32.mrf.mxu1 }
 0x7b4   : > { %v4377_v4 = vadd.f32 %v16501_v19, %v4323_v10  ;;  %v4338_v37 = vadd.f32 %v12699_v47, %v12649_v59  ;;  %12771 = vmatprep.mubr.f32.mxu0 %v4407_v17  ;;  %v4410_v53 = vmax.f32 %v4378_v22, 0.0 }
 0x7b5   : > { %v4332_v13 = vpop.f32.mrf.mxu1  ;;  %12772 = vmatmul.mubr.f32.gmra.mxu0 %v4408_v42 }
 0x7b6   : > { %v4333_v33 = vadd.f32 %v4332_v13, %v3944_v9  ;;  %v4409_v51 = vmax.f32 %v4377_v4, 0.0  ;;  %v4380_v56 = vadd.f32 %v16501_v19, %v4338_v37 }
 0x7b8   : > { %v4379_v49 = vadd.f32 %v16501_v19, %v4333_v33  ;;  %12774 = vmatprep.mubr.f32.mxu0 %v4409_v51  ;;  %v4412_v6 = vmax.f32 %v4380_v56, 0.0 }
 0x7b9   : > { %12775 = vmatmul.mubr.f32.gmra.mxu0 %v4410_v53 }
 0x7ba   : > { %v4411_v11 = vmax.f32 %v4379_v49, 0.0 }
 0x7bc   : > { %12777 = vmatprep.mubr.f32.mxu0 %v4411_v11 }
 0x7bd   : > { %12778 = vmatmul.mubr.f32.gmra.mxu0 %v4412_v6 }
 0x7be   : > { %12862 = vmatprep.mubr.msk.f32.mxu0 %vm424_vm1, %v14545_v44 }
 0x840   : > { %v12734_v19 = vpop.f32.mrf.mxu0 }
 0x841   : > { %v4510_v54 = vadd.f32 %v12734_v19, %v16563_v24 }
 0x842   : > { %v4504_v7 = vpop.f32.mrf.mxu0 }
 0x843   : > { %v4505_v28 = vadd.f32 %v16563_v24, %v4504_v7  ;;  %v4664_v34 = vmax.f32 %v4510_v54, 0.0 }
 0x844   : > { %v12737_v62 = vpop.f32.mrf.mxu0 }
 0x845   : > { %v4663_v23 = vmax.f32 %v4505_v28, 0.0  ;;  %v4520_v15 = vadd.f32 %v12737_v62, %v16563_v24 }
 0x846   : > { %v4514_v35 = vpop.f32.mrf.mxu0 }
 0x847   : > { %v4515_v16 = vadd.f32 %v16563_v24, %v4514_v35  ;;  %12812 = vmatprep.mubr.f32.mxu1 %v4663_v23  ;;  %v4666_v39 = vmax.f32 %v4520_v15, 0.0 }
 0x848   : > { %v12740_v27 = vpop.f32.mrf.mxu0  ;;  %12813 = vmatmul.mubr.f32.vlgmr.msra.gmra.mxu1 %v4664_v34 }
 0x849   : > { %v4665_v59 = vmax.f32 %v4515_v16, 0.0  ;;  %v4530_v58 = vadd.f32 %v12740_v27, %v16563_v24 }
 0x84a   : > { %v4524_v40 = vpop.f32.mrf.mxu0 }
 0x84b   : > { %v4525_v10 = vadd.f32 %v16563_v24, %v4524_v40  ;;  %12815 = vmatprep.mubr.f32.mxu1 %v4665_v59  ;;  %v4668_v22 = vmax.f32 %v4530_v58, 0.0 }
 0x84c   : > { %v12743_v17 = vpop.f32.mrf.mxu0  ;;  %12816 = vmatmul.mubr.f32.gmra.mxu1 %v4666_v39 }
 0x84d   : > { %v4667_v42 = vmax.f32 %v4525_v10, 0.0  ;;  %v4540_v47 = vadd.f32 %v12743_v17, %v16563_v24 }
 0x84e   : > { %v4534_v9 = vpop.f32.mrf.mxu0 }
 0x84f   : > { %v4535_v4 = vadd.f32 %v16563_v24, %v4534_v9  ;;  %12818 = vmatprep.mubr.f32.mxu1 %v4667_v42  ;;  %v4670_v33 = vmax.f32 %v4540_v47, 0.0 }
 0x850   : > { %12819 = vmatmul.mubr.f32.gmra.mxu1 %v4668_v22 }
 0x851   : > { %v4669_v37 = vmax.f32 %v4535_v4, 0.0  ;;  %v12746_v13 = vpop.f32.mrf.mxu0 }
 0x852   : > { %v4550_v51 = vadd.f32 %v12746_v13, %v16563_v24 }
 0x853   : > { %v4544_v53 = vpop.f32.mrf.mxu0  ;;  %12821 = vmatprep.mubr.f32.mxu1 %v4669_v37 }
 0x854   : > { %v4545_v56 = vadd.f32 %v16563_v24, %v4544_v53  ;;  %12822 = vmatmul.mubr.f32.gmra.mxu1 %v4670_v33  ;;  %v4672_v6 = vmax.f32 %v4550_v51, 0.0 }
 0x855   : > { %v12749_v49 = vpop.f32.mrf.mxu0 }
 0x856   : > { %v4671_v11 = vmax.f32 %v4545_v56, 0.0  ;;  %v4560_v44 = vadd.f32 %v12749_v49, %v16563_v24 }
 0x857   : > { %v4554_v30 = vpop.f32.mrf.mxu0 }
 0x858   : > { %v4555_v19 = vadd.f32 %v16563_v24, %v4554_v30  ;;  %12824 = vmatprep.mubr.f32.mxu1 %v4671_v11  ;;  %v4674_v28 = vmax.f32 %v4560_v44, 0.0 }
 0x859   : > { %v12752_v54 = vpop.f32.mrf.mxu0  ;;  %12825 = vmatmul.mubr.f32.gmra.mxu1 %v4672_v6 }
 0x85a   : > { %v4673_v7 = vmax.f32 %v4555_v19, 0.0  ;;  %v4570_v62 = vadd.f32 %v12752_v54, %v16563_v24 }
 0x85b   : > { %v4564_v23 = vpop.f32.mrf.mxu0 }
 0x85c   : > { %v4565_v34 = vadd.f32 %v16563_v24, %v4564_v23  ;;  %12827 = vmatprep.mubr.f32.mxu1 %v4673_v7  ;;  %v4676_v16 = vmax.f32 %v4570_v62, 0.0 }
 0x85d   : > { %v12755_v15 = vpop.f32.mrf.mxu0  ;;  %12828 = vmatmul.mubr.f32.gmra.mxu1 %v4674_v28 }
 0x85e   : > { %v4675_v35 = vmax.f32 %v4565_v34, 0.0  ;;  %v4580_v27 = vadd.f32 %v12755_v15, %v16563_v24 }
 0x85f   : > { %v4574_v59 = vpop.f32.mrf.mxu0 }
 0x860   : > { %v4575_v39 = vadd.f32 %v16563_v24, %v4574_v59  ;;  %12830 = vmatprep.mubr.f32.mxu1 %v4675_v35  ;;  %v4678_v10 = vmax.f32 %v4580_v27, 0.0 }
 0x861   : > { %v12758_v58 = vpop.f32.mrf.mxu0  ;;  %12831 = vmatmul.mubr.f32.gmra.mxu1 %v4676_v16 }
 0x862   : > { %v4677_v40 = vmax.f32 %v4575_v39, 0.0  ;;  %v4590_v17 = vadd.f32 %v12758_v58, %v16563_v24 }
 0x863   : > { %v4584_v42 = vpop.f32.mrf.mxu0 }
 0x864   : > { %v4585_v22 = vadd.f32 %v16563_v24, %v4584_v42  ;;  %12833 = vmatprep.mubr.f32.mxu1 %v4677_v40  ;;  %v4680_v4 = vmax.f32 %v4590_v17, 0.0 }
 0x865   : > { %v12761_v47 = vpop.f32.mrf.mxu0  ;;  %12834 = vmatmul.mubr.f32.gmra.mxu1 %v4678_v10 }
 0x866   : > { %v4679_v9 = vmax.f32 %v4585_v22, 0.0  ;;  %v4600_v37 = vadd.f32 %v12761_v47, %v16563_v24 }
 0x867   : > { %v4594_v13 = vpop.f32.mrf.mxu0 }
 0x868   : > { %v4595_v33 = vadd.f32 %v16563_v24, %v4594_v13  ;;  %12836 = vmatprep.mubr.f32.mxu1 %v4679_v9  ;;  %v4682_v56 = vmax.f32 %v4600_v37, 0.0 }
 0x869   : > { %v12764_v51 = vpop.f32.mrf.mxu0  ;;  %12837 = vmatmul.mubr.f32.gmra.mxu1 %v4680_v4 }
 0x86a   : > { %v4681_v53 = vmax.f32 %v4595_v33, 0.0  ;;  %v4610_v49 = vadd.f32 %v12764_v51, %v16563_v24 }
 0x86b   : > { %v4604_v11 = vpop.f32.mrf.mxu0 }
 0x86c   : > { %v4605_v6 = vadd.f32 %v16563_v24, %v4604_v11  ;;  %12839 = vmatprep.mubr.f32.mxu1 %v4681_v53  ;;  %v4684_v19 = vmax.f32 %v4610_v49, 0.0 }
 0x86d   : > { %v12767_v44 = vpop.f32.mrf.mxu0  ;;  %12840 = vmatmul.mubr.f32.gmra.mxu1 %v4682_v56 }
 0x86e   : > { %v4683_v30 = vmax.f32 %v4605_v6, 0.0  ;;  %v4620_v54 = vadd.f32 %v12767_v44, %v16563_v24  ;;  %v10792_v6 = vld [vmem:[%s20495_s3 + $0x18] sm:$0xff]  ;;  %v10791_v44 = vld [vmem:[%s20494_s2 + $0xc] sm:$0xf] }
 0x86f   : > { %v4614_v7 = vpop.f32.mrf.mxu0  ;;  %12860 = vmatprep.subr.mxu0 %v10792_v6  ;;  %12910 = vmatprep.subr.msk.mxu1 %vm907_vm0, %v10791_v44 }
 0x870   : > { %v4615_v28 = vadd.f32 %v16563_v24, %v4614_v7  ;;  %12842 = vmatprep.mubr.f32.mxu1 %v4683_v30  ;;  %v4686_v34 = vmax.f32 %v4620_v54, 0.0  ;;  %12861 = vmatpush3.msra.mxu0 %v10792_v6  ;;  %v14547_v30 = vld [vmem:[%s14740_s23 + $0x10] sm:$0xff]  ;;  %v14549_v54 = vld [vmem:[%s14740_s23 + $0x20] sm:$0xff]  ;;  %v14550_v7 = vld [vmem:[%s14740_s23 + $0x28] sm:$0xff] }
 0x871   : > { %v12770_v62 = vpop.f32.mrf.mxu0  ;;  %12843 = vmatmul.mubr.f32.gmra.mxu1 %v4684_v19  ;;  %v14548_v19 = vld [vmem:[%s14740_s23 + $0x18] sm:$0xff] }
 0x872   : > { %v4685_v23 = vmax.f32 %v4615_v28, 0.0  ;;  %v4630_v15 = vadd.f32 %v12770_v62, %v16563_v24  ;;  %12911 = vmatpush3.msk.msra.mxu1 %vm907_vm0, %v10791_v44  ;;  %v14551_v28 = vld [vmem:[%s14740_s23 + $0x30] sm:$0xff]  ;;  %v14552_v62 = vld [vmem:[%s14740_s23 + $0x38] sm:$0xff]  ;;  %v14573_v44 = vld [vmem:[%s14740_s23 + $0xe0] sm:$0xff] }
 0x873   : > { %v4624_v35 = vpop.f32.mrf.mxu0 }
 0x874   : > { %v4625_v16 = vadd.f32 %v16563_v24, %v4624_v35  ;;  %12845 = vmatprep.mubr.f32.mxu1 %v4685_v23  ;;  %v4688_v39 = vmax.f32 %v4630_v15, 0.0  ;;  %v14553_v23 = vld [vmem:[%s14740_s23 + $0x40] sm:$0xff]  ;;  %v14555_v15 = vld [vmem:[%s14740_s23 + $0x50] sm:$0xff]  ;;  %v14556_v35 = vld [vmem:[%s14740_s23 + $0x58] sm:$0xff] }
 0x875   : > { %v12773_v27 = vpop.f32.mrf.mxu0  ;;  %12846 = vmatmul.mubr.f32.gmra.mxu1 %v4686_v34  ;;  %v14554_v34 = vld [vmem:[%s14740_s23 + $0x48] sm:$0xff] }
 0x876   : > { %v4687_v59 = vmax.f32 %v4625_v16, 0.0  ;;  %v4640_v58 = vadd.f32 %v12773_v27, %v16563_v24  ;;  %v14557_v16 = vld [vmem:[%s14740_s23 + $0x60] sm:$0xff]  ;;  %v14558_v27 = vld [vmem:[%s14740_s23 + $0x68] sm:$0xff] }
 0x877   : > { %v4634_v40 = vpop.f32.mrf.mxu0 }
 0x878   : > { %v4635_v10 = vadd.f32 %v16563_v24, %v4634_v40  ;;  %12848 = vmatprep.mubr.f32.mxu1 %v4687_v59  ;;  %v4690_v22 = vmax.f32 %v4640_v58, 0.0  ;;  %v14559_v59 = vld [vmem:[%s14740_s23 + $0x70] sm:$0xff]  ;;  %v14561_v58 = vld [vmem:[%s14740_s23 + $0x80] sm:$0xff]  ;;  %v14562_v40 = vld [vmem:[%s14740_s23 + $0x88] sm:$0xff] }
 0x879   : > { %v12776_v17 = vpop.f32.mrf.mxu0  ;;  %12849 = vmatmul.mubr.f32.gmra.mxu1 %v4688_v39  ;;  %v14560_v39 = vld [vmem:[%s14740_s23 + $0x78] sm:$0xff] }
 0x87a   : > { %v4689_v42 = vmax.f32 %v4635_v10, 0.0  ;;  %v4650_v47 = vadd.f32 %v12776_v17, %v16563_v24  ;;  %v14563_v10 = vld [vmem:[%s14740_s23 + $0x90] sm:$0xff]  ;;  %v14564_v17 = vld [vmem:[%s14740_s23 + $0x98] sm:$0xff] }
 0x87b   : > { %v4644_v9 = vpop.f32.mrf.mxu0 }
 0x87c   : > { %v4645_v4 = vadd.f32 %v16563_v24, %v4644_v9  ;;  %12851 = vmatprep.mubr.f32.mxu1 %v4689_v42  ;;  %v4692_v33 = vmax.f32 %v4650_v47, 0.0  ;;  %v14565_v42 = vld [vmem:[%s14740_s23 + $0xa0] sm:$0xff]  ;;  %v14567_v47 = vld [vmem:[%s14740_s23 + $0xb0] sm:$0xff]  ;;  %v14568_v9 = vld [vmem:[%s14740_s23 + $0xb8] sm:$0xff] }
 0x87d   : > { %v12779_v37 = vpop.f32.mrf.mxu0  ;;  %12852 = vmatmul.mubr.f32.gmra.mxu1 %v4690_v22  ;;  %v14566_v22 = vld [vmem:[%s14740_s23 + $0xa8] sm:$0xff] }
 0x87e   : > { %v4691_v13 = vmax.f32 %v4645_v4, 0.0  ;;  %v4660_v51 = vadd.f32 %v12779_v37, %v16563_v24  ;;  %v14569_v4 = vld [vmem:[%s14740_s23 + $0xc0] sm:$0xff] }
 0x87f   : > { %v4654_v53 = vpop.f32.mrf.mxu0  ;;  %v16656_v37 = vld [vmem:[%s20500_s8 + $0x2] ss:$0 sm:$0xff] }
 0x880   : > { %v4655_v56 = vadd.f32 %v16563_v24, %v4654_v53  ;;  %12854 = vmatprep.mubr.f32.mxu1 %v4691_v13  ;;  %v4694_v11 = vmax.f32 %v4660_v51, 0.0  ;;  %v14546_v24 = vld [vmem:[%s14740_s23 + $0x8] sm:$0xff]  ;;  %v14571_v51 = vld [vmem:[%s14740_s23 + $0xd0] sm:$0xff] }
 0x881   : > { %12855 = vmatmul.mubr.f32.gmra.mxu1 %v4692_v33  ;;  %12863 = vmatmul.mubr.msk.f32.vlgmr.msra.gmra.mxu0 %vm424_vm1, %v14546_v24  ;;  %v14570_v13 = vld [vmem:[%s14740_s23 + $0xc8] sm:$0xff] }
 0x882   : > { %v4693_v49 = vmax.f32 %v4655_v56, 0.0  ;;  %12865 = vmatprep.mubr.msk.f32.mxu0 %vm424_vm1, %v14547_v30 }
 0x884   : > { %12857 = vmatprep.mubr.f32.mxu1 %v4693_v49 }
 0x885   : > { %12858 = vmatmul.mubr.f32.gmra.mxu1 %v4694_v11  ;;  %12866 = vmatmul.mubr.msk.f32.gmra.mxu0 %vm424_vm1, %v14548_v19  ;;  %v14572_v11 = vld [vmem:[%s14740_s23 + $0xd8] sm:$0xff] }
 0x886   : > { %12868 = vmatprep.mubr.msk.f32.mxu0 %vm424_vm1, %v14549_v54  ;;  %v14574_v54 = vld [vmem:[%s14740_s23 + $0xe8] sm:$0xff] }
 0x889   : > { %12869 = vmatmul.mubr.msk.f32.gmra.mxu0 %vm424_vm1, %v14550_v7 }
 0x88a   : > { %12871 = vmatprep.mubr.msk.f32.mxu0 %vm424_vm1, %v14551_v28  ;;  %v14575_v28 = vld [vmem:[%s14740_s23 + $0xf0] sm:$0xff] }
 0x88d   : > { %12872 = vmatmul.mubr.msk.f32.gmra.mxu0 %vm424_vm1, %v14552_v62 }
 0x88e   : > { %12874 = vmatprep.mubr.msk.f32.mxu0 %vm424_vm1, %v14553_v23 }
 0x891   : > { %12875 = vmatmul.mubr.msk.f32.gmra.mxu0 %vm424_vm1, %v14554_v34 }
 0x892   : > { %12877 = vmatprep.mubr.msk.f32.mxu0 %vm424_vm1, %v14555_v15  ;;  %v14576_v15 = vld [vmem:[%s14740_s23 + $0xf8] sm:$0xff] }
 0x895   : > { %12878 = vmatmul.mubr.msk.f32.gmra.mxu0 %vm424_vm1, %v14556_v35 }
 0x896   : > { %12880 = vmatprep.mubr.msk.f32.mxu0 %vm424_vm1, %v14557_v16 }
 0x899   : > { %12881 = vmatmul.mubr.msk.f32.gmra.mxu0 %vm424_vm1, %v14558_v27 }
 0x89a   : > { %12883 = vmatprep.mubr.msk.f32.mxu0 %vm424_vm1, %v14559_v59 }
 0x89d   : > { %12884 = vmatmul.mubr.msk.f32.gmra.mxu0 %vm424_vm1, %v14560_v39 }
 0x89e   : > { %12886 = vmatprep.mubr.msk.f32.mxu0 %vm424_vm1, %v14561_v58 }
 0x8a1   : > { %12887 = vmatmul.mubr.msk.f32.gmra.mxu0 %vm424_vm1, %v14562_v40 }
 0x8a2   : > { %12889 = vmatprep.mubr.msk.f32.mxu0 %vm424_vm1, %v14563_v10 }
 0x8a5   : > { %12890 = vmatmul.mubr.msk.f32.gmra.mxu0 %vm424_vm1, %v14564_v17 }
 0x8a6   : > { %12892 = vmatprep.mubr.msk.f32.mxu0 %vm424_vm1, %v14565_v42 }
 0x8a9   : > { %12893 = vmatmul.mubr.msk.f32.gmra.mxu0 %vm424_vm1, %v14566_v22 }
 0x8aa   : > { %12895 = vmatprep.mubr.msk.f32.mxu0 %vm424_vm1, %v14567_v47 }
 0x8ad   : > { %12896 = vmatmul.mubr.msk.f32.gmra.mxu0 %vm424_vm1, %v14568_v9 }
 0x8ae   : > { %12898 = vmatprep.mubr.msk.f32.mxu0 %vm424_vm1, %v14569_v4 }
 0x8b1   : > { %12899 = vmatmul.mubr.msk.f32.gmra.mxu0 %vm424_vm1, %v14570_v13 }
 0x8b2   : > { %12901 = vmatprep.mubr.msk.f32.mxu0 %vm424_vm1, %v14571_v51 }
 0x8b5   : > { %12902 = vmatmul.mubr.msk.f32.gmra.mxu0 %vm424_vm1, %v14572_v11 }
 0x8b6   : > { %12904 = vmatprep.mubr.msk.f32.mxu0 %vm424_vm1, %v14573_v44 }
 0x8b9   : > { %12905 = vmatmul.mubr.msk.f32.gmra.mxu0 %vm424_vm1, %v14574_v54 }
 0x8ba   : > { %12907 = vmatprep.mubr.msk.f32.mxu0 %vm424_vm1, %v14575_v28 }
 0x8bd   : > { %12908 = vmatmul.mubr.msk.f32.gmra.mxu0 %vm424_vm1, %v14576_v15 }
 0x908   : > { %v12814_v33 = vpop.f32.mrf.mxu1 }
 0x909   : > { %v16663_v53 = vadd.f32 %v12814_v33, %v16656_v37 }
 0x90a   : > { %v4786_v56 = vpop.f32.mrf.mxu1 }
 0x90b   : > { %v16666_v49 = vadd.f32 %v16656_v37, %v4786_v56  ;;  %5107 = vrot.lane.b32.xlu1 %v16663_v53, %s14650_s20  ;;  %13906 = vtanh.f32 %v16663_v53 }
 0x90c   : > { %v12817_v6 = vpop.f32.mrf.mxu1 }
 0x90d   : > { %v16675_v24 = vadd.f32 %v12817_v6, %v16656_v37  ;;  %5105 = vrot.lane.b32.xlu0 %v16666_v49, %s14650_s20  ;;  %13908 = vtanh.f32 %v16666_v49 }
 0x90e   : > { %v4796_v30 = vpop.f32.mrf.mxu1 }
 0x90f   : > { %v16680_v19 = vadd.f32 %v16656_v37, %v4796_v30  ;;  %5111 = vrot.lane.b32.xlu1 %v16675_v24, %s14650_s20 }
 0x910   : > { %v12820_v7 = vpop.f32.mrf.mxu1 }
 0x911   : > { %v16689_v62 = vadd.f32 %v12820_v7, %v16656_v37  ;;  %5109 = vrot.lane.b32.xlu0 %v16680_v19, %s14650_s20  ;;  %13910 = vtanh.f32 %v16680_v19 }
 0x912   : > { %v4806_v23 = vpop.f32.mrf.mxu1  ;;  %13912 = vtanh.f32 %v16675_v24 }
 0x913   : > { %v16694_v34 = vadd.f32 %v16656_v37, %v4806_v23  ;;  %5115 = vrot.lane.b32.xlu1 %v16689_v62, %s14650_s20 }
 0x914   : > { %v12823_v35 = vpop.f32.mrf.mxu1 }
 0x915   : > { %v16701_v16 = vadd.f32 %v12823_v35, %v16656_v37  ;;  %5113 = vrot.lane.b32.xlu0 %v16694_v34, %s14650_s20  ;;  %13914 = vtanh.f32 %v16694_v34 }
 0x916   : > { %v4816_v27 = vpop.f32.mrf.mxu1  ;;  %13916 = vtanh.f32 %v16689_v62 }
 0x917   : > { %v16706_v59 = vadd.f32 %v16656_v37, %v4816_v27  ;;  %5119 = vrot.lane.b32.xlu1 %v16701_v16, %s14650_s20 }
 0x918   : > { %v16879_v53 = vpop.eup %13906 }
 0x919   : > { %v12826_v39 = vpop.f32.mrf.mxu1  ;;  %5117 = vrot.lane.b32.xlu0 %v16706_v59, %s14650_s20  ;;  %13918 = vtanh.f32 %v16706_v59  ;;  %v4979_v49 = vmul.f32 1.442695, %v16879_v53 }
 0x91a   : > { %v16713_v58 = vadd.f32 %v12826_v39, %v16656_v37  ;;  %13920 = vtanh.f32 %v16701_v16 }
 0x91b   : > { %v4826_v40 = vpop.f32.mrf.mxu1  ;;  %13922 = vpow2.f32 %v4979_v49 }
 0x91c   : > { %v16716_v10 = vadd.f32 %v16656_v37, %v4826_v40  ;;  %5123 = vrot.lane.b32.xlu1 %v16713_v58, %s14650_s20 }
 0x91d   : > { %v12829_v17 = vpop.f32.mrf.mxu1 }
 0x91e   : > { %v16721_v42 = vadd.f32 %v12829_v17, %v16656_v37  ;;  %5121 = vrot.lane.b32.xlu0 %v16716_v10, %s14650_s20  ;;  %13924 = vtanh.f32 %v16716_v10 }
 0x91f   : > { %v4836_v22 = vpop.f32.mrf.mxu1  ;;  %13926 = vtanh.f32 %v16713_v58 }
 0x920   : > { %v16726_v47 = vadd.f32 %v16656_v37, %v4836_v22  ;;  %5127 = vrot.lane.b32.xlu1 %v16721_v42, %s14650_s20 }
 0x921   : > { %v12832_v9 = vpop.f32.mrf.mxu1 }
 0x922   : > { %v16731_v4 = vadd.f32 %v12832_v9, %v16656_v37  ;;  %5125 = vrot.lane.b32.xlu0 %v16726_v47, %s14650_s20 }
 0x923   : > { %v4846_v13 = vpop.f32.mrf.mxu1 }
 0x924   : > { %v16736_v33 = vadd.f32 %v16656_v37, %v4846_v13  ;;  %5131 = vrot.lane.b32.xlu1 %v16731_v4, %s14650_s20 }
 0x925   : > { %v12835_v51 = vpop.f32.mrf.mxu1 }
 0x926   : > { %v16741_v56 = vadd.f32 %v12835_v51, %v16656_v37  ;;  %5129 = vrot.lane.b32.xlu0 %v16736_v33, %s14650_s20 }
 0x927   : > { %v4856_v11 = vpop.f32.mrf.mxu1 }
 0x928   : > { %v16746_v6 = vadd.f32 %v16656_v37, %v4856_v11  ;;  %5135 = vrot.lane.b32.xlu1 %v16741_v56, %s14650_s20 }
 0x929   : > { %v12838_v44 = vpop.f32.mrf.mxu1 }
 0x92a   : > { %v16751_v30 = vadd.f32 %v12838_v44, %v16656_v37  ;;  %5133 = vrot.lane.b32.xlu0 %v16746_v6, %s14650_s20 }
 0x92b   : > { %v4866_v54 = vpop.f32.mrf.mxu1 }
 0x92c   : > { %v16756_v7 = vadd.f32 %v16656_v37, %v4866_v54  ;;  %5139 = vrot.lane.b32.xlu1 %v16751_v30, %s14650_s20 }
 0x92d   : > { %v12841_v28 = vpop.f32.mrf.mxu1 }
 0x92e   : > { %v16761_v23 = vadd.f32 %v12841_v28, %v16656_v37  ;;  %5137 = vrot.lane.b32.xlu0 %v16756_v7, %s14650_s20 }
 0x92f   : > { %v4876_v15 = vpop.f32.mrf.mxu1 }
 0x930   : > { %v16766_v35 = vadd.f32 %v16656_v37, %v4876_v15  ;;  %5143 = vrot.lane.b32.xlu1 %v16761_v23, %s14650_s20 }
 0x931   : > { %v12844_v27 = vpop.f32.mrf.mxu1 }
 0x932   : > { %v16771_v39 = vadd.f32 %v12844_v27, %v16656_v37  ;;  %5141 = vrot.lane.b32.xlu0 %v16766_v35, %s14650_s20 }
 0x933   : > { %v4886_v40 = vpop.f32.mrf.mxu1 }
 0x934   : > { %v16776_v17 = vadd.f32 %v16656_v37, %v4886_v40  ;;  %5147 = vrot.lane.b32.xlu1 %v16771_v39, %s14650_s20 }
 0x935   : > { %v12847_v22 = vpop.f32.mrf.mxu1 }
 0x936   : > { %v16781_v9 = vadd.f32 %v12847_v22, %v16656_v37  ;;  %5145 = vrot.lane.b32.xlu0 %v16776_v17, %s14650_s20 }
 0x937   : > { %v4896_v13 = vpop.f32.mrf.mxu1 }
 0x938   : > { %v16786_v51 = vadd.f32 %v16656_v37, %v4896_v13  ;;  %5151 = vrot.lane.b32.xlu1 %v16781_v9, %s14650_s20  ;;  %v10875_v13 = vld [vmem:[%s20497_s5 + $0x1f8] sm:$0xff] }
 0x939   : > { %v12850_v11 = vpop.f32.mrf.mxu1  ;;  %12960 = vmatprep.subr.mxu0 %v10875_v13 }
 0x93a   : > { %v16791_v44 = vadd.f32 %v12850_v11, %v16656_v37  ;;  %5149 = vrot.lane.b32.xlu0 %v16786_v51, %s14650_s20  ;;  %v10874_v11 = vld [vmem:[%s20497_s5 + $0x1f0] sm:$0xff]  ;;  %12961 = vmatpush3.msra.mxu0 %v10875_v13 }
 0x93b   : > { %v4906_v54 = vpop.f32.mrf.mxu1  ;;  %12962 = vmatprep.subr.mxu0 %v10874_v11 }
 0x93c   : > { %v16796_v28 = vadd.f32 %v16656_v37, %v4906_v54  ;;  %5155 = vrot.lane.b32.xlu1 %v16791_v44, %s14650_s20  ;;  %12963 = vmatpush3.msra.mxu0 %v10874_v11 }
 0x93d   : > { %v12853_v15 = vpop.f32.mrf.mxu1 }
 0x93e   : > { %v16801_v27 = vadd.f32 %v12853_v15, %v16656_v37  ;;  %5153 = vrot.lane.b32.xlu0 %v16796_v28, %s14650_s20 }
 0x93f   : > { %v4916_v40 = vpop.f32.mrf.mxu1 }
 0x940   : > { %v16806_v22 = vadd.f32 %v16656_v37, %v4916_v40  ;;  %5159 = vrot.lane.b32.xlu1 %v16801_v27, %s14650_s20  ;;  %v10873_v40 = vld [vmem:[%s20497_s5 + $0x1e8] sm:$0xff] }
 0x941   : > { %v12856_v54 = vpop.f32.mrf.mxu1  ;;  %12964 = vmatprep.subr.mxu0 %v10873_v40 }
 0x942   : > { %v16817_v15 = vadd.f32 %v12856_v54, %v16656_v37  ;;  %5157 = vrot.lane.b32.xlu0 %v16806_v22, %s14650_s20  ;;  %v10872_v54 = vld [vmem:[%s20497_s5 + $0x1e0] sm:$0xff]  ;;  %12965 = vmatpush3.msra.mxu0 %v10873_v40  ;;  %v10869_v40 = vld [vmem:[%s20497_s5 + $0x1c8] sm:$0xff] }
 0x943   : > { %v4926_v61 = vpop.f32.mrf.mxu1  ;;  %12966 = vmatprep.subr.mxu0 %v10872_v54 }
 0x944   : > { %v16825_v36 = vadd.f32 %v16656_v37, %v4926_v61  ;;  %5163 = vrot.lane.b32.xlu1 %v16817_v15, %s14650_s20  ;;  %v10871_v61 = vld [vmem:[%s20497_s5 + $0x1d8] sm:$0xff]  ;;  %12967 = vmatpush3.msra.mxu0 %v10872_v54  ;;  %v10866_v54 = vld [vmem:[%s20497_s5 + $0x1b0] sm:$0xff] }
 0x945   : > { %v12859_v14 = vpop.f32.mrf.mxu1  ;;  %12968 = vmatprep.subr.mxu0 %v10871_v61 }
 0x946   : > { %v16833_v13 = vadd.f32 %v12859_v14, %v16656_v37  ;;  %5161 = vrot.lane.b32.xlu0 %v16825_v36, %s14650_s20  ;;  %v10870_v14 = vld [vmem:[%s20497_s5 + $0x1d0] sm:$0xff]  ;;  %12969 = vmatpush3.msra.mxu0 %v10871_v61  ;;  %v10865_v61 = vld [vmem:[%s20497_s5 + $0x1a8] sm:$0xff] }
 0x947   : > { %v4936_v1 = vpop.f32.mrf.mxu1  ;;  %12970 = vmatprep.subr.mxu0 %v10870_v14 }
 0x948   : > { %v16841_v11 = vadd.f32 %v16656_v37, %v4936_v1  ;;  %5167 = vrot.lane.b32.xlu1 %v16833_v13, %s14650_s20  ;;  %12971 = vmatpush3.msra.mxu0 %v10870_v14  ;;  %v10868_v1 = vld [vmem:[%s20497_s5 + $0x1c0] sm:$0xff]  ;;  %v10867_v37 = vld [vmem:[%s20497_s5 + $0x1b8] sm:$0xff] }
 0x949   : > { %12972 = vmatprep.subr.mxu0 %v10869_v40  ;;  %v10864_v14 = vld [vmem:[%s20497_s5 + $0x1a0] sm:$0xff] }
 0x94a   : > { %5165 = vrot.lane.b32.xlu0 %v16841_v11, %s14650_s20  ;;  %12973 = vmatpush3.msra.mxu0 %v10869_v40  ;;  %v10863_v40 = vld [vmem:[%s20497_s5 + $0x198] sm:$0xff] }
 0x94b   : > { %12974 = vmatprep.subr.mxu0 %v10868_v1 }
 0x94c   : > { %12975 = vmatpush3.msra.mxu0 %v10868_v1  ;;  %v10862_v1 = vld [vmem:[%s20497_s5 + $0x190] sm:$0xff] }
 0x94d   : > { %12976 = vmatprep.subr.mxu0 %v10867_v37 }
 0x94e   : > { %12977 = vmatpush3.msra.mxu0 %v10867_v37  ;;  %v16883_v37 = vpop.eup %13908 }
 0x94f   : > { %12978 = vmatprep.subr.mxu0 %v10866_v54  ;;  %v4977_v19 = vmul.f32 1.442695, %v16883_v37 }
 0x950   : > { %12979 = vmatpush3.msra.mxu0 %v10866_v54  ;;  %v16887_v54 = vpop.eup %13910 }
 0x951   : > { %12980 = vmatprep.subr.mxu0 %v10865_v61  ;;  %v16891_v24 = vpop.eup %13912  ;;  %v4981_v34 = vmul.f32 1.442695, %v16887_v54  ;;  %13928 = vpow2.f32 %v4977_v19 }
 0x952   : > { %12981 = vmatpush3.msra.mxu0 %v10865_v61  ;;  %v16895_v62 = vpop.eup %13914  ;;  %13930 = vtanh.f32 %v16721_v42  ;;  %v4983_v16 = vmul.f32 1.442695, %v16891_v24 }
 0x953   : > { %12982 = vmatprep.subr.mxu0 %v10864_v14  ;;  %13932 = vtanh.f32 %v16726_v47  ;;  %v16900_v59 = vpop.eup %13916  ;;  %v4985_v61 = vmul.f32 1.442695, %v16895_v62 }
 0x954   : > { %12983 = vmatpush3.msra.mxu0 %v10864_v14  ;;  %20855 = vst [vmem:[#allocation104_spill] sm:$0xff] %v16900_v59  ;;  %13934 = vpow2.f32 %v4981_v34  ;;  %v16903_v10 = vpop.eup %13918  ;;  %v4987_v58 = vmul.f32 1.442695, %v16900_v59 }
 0x955   : > { %12984 = vmatprep.subr.mxu0 %v10863_v40  ;;  %13936 = vtanh.f32 %v16731_v4  ;;  %v16908_v14 = vpop.eup %13920  ;;  %v4989_v42 = vmul.f32 1.442695, %v16903_v10 }
 0x956   : > { %12985 = vmatpush3.msra.mxu0 %v10863_v40  ;;  %13938 = vtanh.f32 %v16736_v33  ;;  %20856 = vst [vmem:[#allocation105_spill] sm:$0xff] %v16908_v14  ;;  %v13923_v47 = vpop.eup %13922  ;;  %v4991_v40 = vmul.f32 1.442695, %v16908_v14 }
 0x957   : > { %12986 = vmatprep.subr.mxu0 %v10862_v1  ;;  %13940 = vpow2.f32 %v4983_v16 }
 0x958   : > { %12987 = vmatpush3.msra.mxu0 %v10862_v1  ;;  %13942 = vpow2.f32 %v4985_v61  ;;  %v16914_v1 = vpop.eup %13924 }
 0x959   : > { %13944 = vtanh.f32 %v16741_v56  ;;  %20857 = vst [vmem:[#allocation106_spill] sm:$0xff] %v16914_v1  ;;  %v16916_v4 = vpop.eup %13926  ;;  %v4993_v56 = vmul.f32 1.442695, %v16914_v1 }
 0x95a   : > { %13946 = vtanh.f32 %v16746_v6  ;;  %20858 = vst [vmem:[#allocation107_spill] sm:$0xff] %v16916_v4  ;;  %v4995_v19 = vmul.f32 1.442695, %v16916_v4 }
 0x95b   : > { %13948 = vpow2.f32 %v4987_v58 }
 0x95c   : > { %13950 = vpow2.f32 %v4989_v42  ;;  %v5042_v42 = vmul.f32 %v13923_v47, %v15456_v50 }
 0x95d   : > { %13952 = vtanh.f32 %v16751_v30 }
 0x95e   : > { %v13929_v33 = vpop.eup %13928  ;;  %13954 = vtanh.f32 %v16756_v7 }
 0x95f   : > { %v16920_v49 = vpop.eup %13930  ;;  %13956 = vpow2.f32 %v4991_v40  ;;  %v5041_v30 = vmul.f32 %v13929_v33, %v15450_v46 }
 0x960   : > { %v16923_v6 = vpop.eup %13932  ;;  %13958 = vtanh.f32 %v16761_v23  ;;  %v4999_v4 = vmul.f32 1.442695, %v16920_v49 }
 0x961   : > { %v13935_v34 = vpop.eup %13934  ;;  %13960 = vtanh.f32 %v16766_v35  ;;  %v4997_v58 = vmul.f32 1.442695, %v16923_v6 }
 0x962   : > { %v16927_v61 = vpop.eup %13936  ;;  %13962 = vpow2.f32 %v4993_v56  ;;  %v5043_v47 = vmul.f32 %v13935_v34, %v15467_v2 }
 0x963   : > { %v16931_v7 = vpop.eup %13938  ;;  %13964 = vpow2.f32 %v4995_v19  ;;  %v5003_v59 = vmul.f32 1.442695, %v16927_v61 }
 0x964   : > { %v13941_v14 = vpop.eup %13940  ;;  %13966 = vtanh.f32 %v16771_v39  ;;  %v5001_v50 = vmul.f32 1.442695, %v16931_v7 }
 0x965   : > { %v13943_v1 = vpop.eup %13942  ;;  %13968 = vtanh.f32 %v16776_v17  ;;  %v5044_v19 = vmul.f32 %v13941_v14, %v15472_v43 }
 0x966   : > { %v16942_v33 = vpop.eup %13944  ;;  %13970 = vpow2.f32 %v4997_v58  ;;  %v5045_v14 = vmul.f32 %v13943_v1, %v15485_v8 }
 0x967   : > { %v16949_v56 = vpop.eup %13946  ;;  %13972 = vpow2.f32 %v4999_v4  ;;  %v5007_v17 = vmul.f32 1.442695, %v16942_v33 }
 0x968   : > { %v13949_v39 = vpop.eup %13948  ;;  %13974 = vpow2.f32 %v5003_v59  ;;  %v5005_v43 = vmul.f32 1.442695, %v16949_v56 }
 0x969   : > { %13976 = vpow2.f32 %v5001_v50  ;;  %v5046_v59 = vmul.f32 %v13949_v39, %v15490_v31 }
 0x96a   : > { %13978 = vtanh.f32 %v16786_v51 }
 0x96b   : > { %13980 = vtanh.f32 %v16781_v9 }
 0x97d   : > { %v5108_v16 = vpop.permute.xlu1 %5107 }
 0x97e   : > { %v16940_v46 = vadd.f32 %v5108_v16, %v5042_v42  ;;  %v13951_v42 = vpop.eup %13950  ;;  %13982 = vpow2.f32 %v5007_v17 }
 0x97f   : > { %v5106_v40 = vpop.permute.xlu0 %5105  ;;  %v16959_v34 = vpop.eup %13952  ;;  %v5047_v31 = vmul.f32 %v13951_v42, %v15503_v25  ;;  %13984 = vpow2.f32 %v5005_v43 }
 0x980   : > { %v16936_v23 = vadd.f32 %v5106_v40, %v5041_v30  ;;  %20860 = vst [vmem:[#allocation109_spill] sm:$0xff] %v16940_v46  ;;  %v16965_v4 = vpop.eup %13954  ;;  %13986 = vtanh.f32 %v16796_v28 }
 0x981   : > { %v5112_v35 = vpop.permute.xlu1 %5111  ;;  %v5009_v51 = vmul.f32 1.442695, %v16965_v4 }
 0x982   : > { %20859 = vst [vmem:[#allocation108_spill] sm:$0xff] %v16936_v23  ;;  %12912 = vmatprep.mubr.msk.f32.mxu1 %vm842_vm2, %v16936_v23  ;;  %v16957_v40 = vadd.f32 %v5112_v35, %v5044_v19  ;;  %v13957_v35 = vpop.eup %13956  ;;  %v5011_v19 = vmul.f32 1.442695, %v16959_v34  ;;  %13988 = vtanh.f32 %v16791_v44 }
 0x983   : > { %v5110_v30 = vpop.permute.xlu0 %5109  ;;  %12913 = vmatmul.mubr.msk.f32.vlgmr.msra.gmra.mxu1 %vm842_vm2, %v16940_v46  ;;  %v16977_v50 = vpop.eup %13958  ;;  %v5048_v9 = vmul.f32 %v13957_v35, %v15508_v57 }
 0x984   : > { %v16954_v16 = vadd.f32 %v5110_v30, %v5043_v47  ;;  %20862 = vst [vmem:[#allocation111_spill] sm:$0xff] %v16957_v40  ;;  %20865 = vst [vmem:[#allocation114_spill] sm:$0xff] %v16977_v50  ;;  %v16983_v30 = vpop.eup %13960  ;;  %13990 = vpow2.f32 %v5011_v19  ;;  %v5015_v25 = vmul.f32 1.442695, %v16977_v50 }
 0x985   : > { %v5116_v2 = vpop.permute.xlu1 %5115  ;;  %v13963_v17 = vpop.eup %13962  ;;  %v5013_v28 = vmul.f32 1.442695, %v16983_v30  ;;  %13992 = vpow2.f32 %v5009_v51 }
 0x986   : > { %20861 = vst [vmem:[#allocation110_spill] sm:$0xff] %v16954_v16  ;;  %12915 = vmatprep.mubr.msk.f32.mxu1 %vm842_vm2, %v16954_v16  ;;  %v16975_v8 = vadd.f32 %v5116_v2, %v5046_v59  ;;  %13994 = vtanh.f32 %v16806_v22  ;;  %v5049_v44 = vmul.f32 %v13963_v17, %v15521_v20 }
 0x987   : > { %v5114_v58 = vpop.permute.xlu0 %5113  ;;  %12916 = vmatmul.mubr.msk.f32.gmra.mxu1 %vm842_vm2, %v16957_v40 }
 0x988   : > { %v16972_v47 = vadd.f32 %v5114_v58, %v5045_v14  ;;  %20864 = vst [vmem:[#allocation113_spill] sm:$0xff] %v16975_v8  ;;  %v13965_v14 = vpop.eup %13964  ;;  %13996 = vtanh.f32 %v16801_v27 }
 0x989   : > { %v5120_v1 = vpop.permute.xlu1 %5119  ;;  %v16995_v43 = vpop.eup %13966  ;;  %v5050_v35 = vmul.f32 %v13965_v14, %v15524_v3  ;;  %13998 = vpow2.f32 %v5015_v25 }
 0x98a   : > { %20863 = vst [vmem:[#allocation112_spill] sm:$0xff] %v16972_v47  ;;  %12918 = vmatprep.mubr.msk.f32.mxu1 %vm842_vm2, %v16972_v47  ;;  %v16993_v42 = vadd.f32 %v5120_v1, %v5048_v9  ;;  %20868 = vst [vmem:[#allocation117_spill] sm:$0xff] %v16995_v43  ;;  %v17000_v59 = vpop.eup %13968  ;;  %14000 = vpow2.f32 %v5013_v28 }
 0x98b   : > { %v5118_v39 = vpop.permute.xlu0 %5117  ;;  %12919 = vmatmul.mubr.msk.f32.gmra.mxu1 %vm842_vm2, %v16975_v8  ;;  %20869 = vst [vmem:[#allocation118_spill] sm:$0xff] %v17000_v59  ;;  %v13971_v58 = vpop.eup %13970  ;;  %v5017_v22 = vmul.f32 1.442695, %v17000_v59  ;;  %14002 = vtanh.f32 %v16825_v36 }
 0x98c   : > { %v16990_v2 = vadd.f32 %v5118_v39, %v5047_v31  ;;  %20867 = vst [vmem:[#allocation116_spill] sm:$0xff] %v16993_v42  ;;  %v13973_v1 = vpop.eup %13972  ;;  %v5019_v31 = vmul.f32 1.442695, %v16995_v43  ;;  %v5051_v3 = vmul.f32 %v13971_v58, %v15538_v48  ;;  %14004 = vtanh.f32 %v16817_v15 }
 0x98d   : > { %v13975_v9 = vpop.eup %13974  ;;  %v5052_v14 = vmul.f32 %v13973_v1, %v15540_v38 }
 0x98e   : > { %20866 = vst [vmem:[#allocation115_spill] sm:$0xff] %v16990_v2  ;;  %v5124_v57 = vpop.permute.xlu1 %5123  ;;  %12921 = vmatprep.mubr.msk.f32.mxu1 %vm842_vm2, %v16990_v2  ;;  %v13977_v17 = vpop.eup %13976  ;;  %14006 = vpow2.f32 %v5019_v31  ;;  %v5054_v1 = vmul.f32 %v13975_v9, %v15558_v29 }
 0x98f   : > { %12922 = vmatmul.mubr.msk.f32.gmra.mxu1 %vm842_vm2, %v16993_v42  ;;  %v17012_v39 = vadd.f32 %v5124_v57, %v5050_v35  ;;  %v17018_v27 = vpop.eup %13978  ;;  %14008 = vpow2.f32 %v5017_v22  ;;  %v5053_v38 = vmul.f32 %v13977_v17, %v15556_v60 }
 0x990   : > { %v5122_v19 = vpop.permute.xlu0 %5121  ;;  %20872 = vst [vmem:[#allocation121_spill] sm:$0xff] %v17018_v27  ;;  %v17024_v57 = vpop.eup %13980  ;;  %v5021_v58 = vmul.f32 1.442695, %v17018_v27  ;;  %14010 = vtanh.f32 %v16841_v11 }
 0x991   : > { %v17009_v51 = vadd.f32 %v5122_v19, %v5049_v44  ;;  %20871 = vst [vmem:[#allocation120_spill] sm:$0xff] %v17012_v39  ;;  %20873 = vst [vmem:[#allocation122_spill] sm:$0xff] %v17024_v57  ;;  %v13983_v36 = vpop.eup %13982  ;;  %v5023_v19 = vmul.f32 1.442695, %v17024_v57  ;;  %14012 = vtanh.f32 %v16833_v13 }
 0x992   : > { %v5128_v20 = vpop.permute.xlu1 %5127  ;;  %v13985_v48 = vpop.eup %13984  ;;  %14014 = vpow2.f32 %v5021_v58 }
 0x993   : > { %20870 = vst [vmem:[#allocation119_spill] sm:$0xff] %v17009_v51  ;;  %12924 = vmatprep.mubr.msk.f32.mxu1 %vm842_vm2, %v17009_v51  ;;  %v17028_v44 = vadd.f32 %v5128_v20, %v5052_v14  ;;  %v17035_v15 = vpop.eup %13986  ;;  %v5055_v29 = vmul.f32 %v13985_v48, %v15572_v12  ;;  %14016 = vpow2.f32 %v5023_v19 }
 0x994   : > { %v5126_v25 = vpop.permute.xlu0 %5125  ;;  %12925 = vmatmul.mubr.msk.f32.gmra.mxu1 %vm842_vm2, %v17012_v39  ;;  %20876 = vst [vmem:[#allocation125_spill] sm:$0xff] %v17035_v15  ;;  %v17042_v22 = vpop.eup %13988  ;;  %v5025_v14 = vmul.f32 1.442695, %v17035_v15  ;;  %v17226_v39 = vld [vmem:[%s20496_s4 + $0x3] ss:$0 sm:$0xff] }
 0x995   : > { %v17026_v28 = vadd.f32 %v5126_v25, %v5051_v3  ;;  %20875 = vst [vmem:[#allocation124_spill] sm:$0xff] %v17028_v44  ;;  %20877 = vst [vmem:[#allocation126_spill] sm:$0xff] %v17042_v22  ;;  %v13991_v20 = vpop.eup %13990  ;;  %v5027_v9 = vmul.f32 1.442695, %v17042_v22  ;;  %v5056_v25 = vmul.f32 %v13983_v36, %v15574_v41 }
 0x996   : > { %v5132_v35 = vpop.permute.xlu1 %5131  ;;  %v13993_v17 = vpop.eup %13992  ;;  %14018 = vpow2.f32 %v5025_v14 }
 0x997   : > { %20874 = vst [vmem:[#allocation123_spill] sm:$0xff] %v17026_v28  ;;  %12927 = vmatprep.mubr.msk.f32.mxu1 %vm842_vm2, %v17026_v28  ;;  %v17046_v3 = vadd.f32 %v5132_v35, %v5054_v1  ;;  %v17052_v13 = vpop.eup %13994  ;;  %v5057_v41 = vmul.f32 %v13993_v17, %v15588_v45  ;;  %14020 = vpow2.f32 %v5027_v9 }
 0x998   : > { %v5130_v31 = vpop.permute.xlu0 %5129  ;;  %12928 = vmatmul.mubr.msk.f32.gmra.mxu1 %vm842_vm2, %v17028_v44  ;;  %20880 = vst [vmem:[#allocation129_spill] sm:$0xff] %v17052_v13  ;;  %v17058_v35 = vpop.eup %13996  ;;  %v5029_v58 = vmul.f32 1.442695, %v17052_v13 }
 0x999   : > { %v17044_v11 = vadd.f32 %v5130_v31, %v5053_v38  ;;  %20879 = vst [vmem:[#allocation128_spill] sm:$0xff] %v17046_v3  ;;  %20881 = vst [vmem:[#allocation130_spill] sm:$0xff] %v17058_v35  ;;  %v13999_v31 = vpop.eup %13998  ;;  %v5031_v19 = vmul.f32 1.442695, %v17058_v35 }
 0x99a   : > { %v5136_v60 = vpop.permute.xlu1 %5135  ;;  %v14001_v48 = vpop.eup %14000  ;;  %14022 = vpow2.f32 %v5029_v58 }
 0x99b   : > { %20878 = vst [vmem:[#allocation127_spill] sm:$0xff] %v17044_v11  ;;  %12930 = vmatprep.mubr.msk.f32.mxu1 %vm842_vm2, %v17044_v11  ;;  %v17062_v11 = vadd.f32 %v5136_v60, %v5056_v25  ;;  %v17068_v36 = vpop.eup %14002  ;;  %14024 = vpow2.f32 %v5031_v19  ;;  %v20893_v19 = vld [vmem:[#allocation35_spill] sm:$0xff] }
 0x99c   : > { %v5134_v38 = vpop.permute.xlu0 %5133  ;;  %12931 = vmatmul.mubr.msk.f32.gmra.mxu1 %vm842_vm2, %v17046_v3  ;;  %20884 = vst [vmem:[#allocation133_spill] sm:$0xff] %v17068_v36  ;;  %v17074_v60 = vpop.eup %14004  ;;  %v5033_v14 = vmul.f32 1.442695, %v17068_v36 }
 0x99d   : > { %v17060_v1 = vadd.f32 %v5134_v38, %v5055_v29  ;;  %20883 = vst [vmem:[#allocation132_spill] sm:$0xff] %v17062_v11  ;;  %v5058_v29 = vmul.f32 %v13991_v20, %v15590_v5  ;;  %20885 = vst [vmem:[#allocation134_spill] sm:$0xff] %v17074_v60  ;;  %v14007_v3 = vpop.eup %14006  ;;  %v5059_v5 = vmul.f32 %v14001_v48, %v15604_v32  ;;  %v5035_v9 = vmul.f32 1.442695, %v17074_v60  ;;  %v20892_v48 = vld [vmem:[#allocation34_spill] sm:$0xff] }
 0x99e   : > { %v5140_v12 = vpop.permute.xlu1 %5139  ;;  %v14009_v17 = vpop.eup %14008  ;;  %14026 = vpow2.f32 %v5033_v14 }
 0x99f   : > { %20882 = vst [vmem:[#allocation131_spill] sm:$0xff] %v17060_v1  ;;  %12933 = vmatprep.mubr.msk.f32.mxu1 %vm842_vm2, %v17060_v1  ;;  %v17078_v1 = vadd.f32 %v5140_v12, %v5058_v29  ;;  %v17084_v20 = vpop.eup %14010  ;;  %v5061_v58 = vmul.f32 %v14009_v17, %v20892_v48  ;;  %14028 = vpow2.f32 %v5035_v9  ;;  %v20896_v17 = vld [vmem:[#allocation36_spill] sm:$0xff]  ;;  %v20897_v48 = vld [vmem:[#allocation37_spill] sm:$0xff] }
 0x9a0   : > { %v5138_v38 = vpop.permute.xlu0 %5137  ;;  %12934 = vmatmul.mubr.msk.f32.gmra.mxu1 %vm842_vm2, %v17062_v11  ;;  %20888 = vst [vmem:[#allocation137_spill] sm:$0xff] %v17084_v20  ;;  %v17090_v12 = vpop.eup %14012  ;;  %v5037_v32 = vmul.f32 1.442695, %v17084_v20 }
 0x9a1   : > { %v17076_v25 = vadd.f32 %v5138_v38, %v5057_v41  ;;  %20887 = vst [vmem:[#allocation136_spill] sm:$0xff] %v17078_v1  ;;  %v5060_v41 = vmul.f32 %v13999_v31, %v15606_v52  ;;  %20889 = vst [vmem:[#allocation138_spill] sm:$0xff] %v17090_v12  ;;  %v14015_v52 = vpop.eup %14014  ;;  %v5039_v31 = vmul.f32 1.442695, %v17090_v12 }
 0x9a2   : > { %v5144_v45 = vpop.permute.xlu1 %5143  ;;  %v5063_v14 = vmul.f32 %v14015_v52, %v20896_v17  ;;  %14030 = vpow2.f32 %v5037_v32  ;;  %v20901_v17 = vld [vmem:[#allocation39_spill] sm:$0xff] }
 0x9a3   : > { %20886 = vst [vmem:[#allocation135_spill] sm:$0xff] %v17076_v25  ;;  %12936 = vmatprep.mubr.msk.f32.mxu1 %vm842_vm2, %v17076_v25  ;;  %v17094_v11 = vadd.f32 %v5144_v45, %v5060_v41  ;;  %v14017_v45 = vpop.eup %14016  ;;  %14032 = vpow2.f32 %v5039_v31 }
 0x9a4   : > { %v5142_v38 = vpop.permute.xlu0 %5141  ;;  %12937 = vmatmul.mubr.msk.f32.gmra.mxu1 %vm842_vm2, %v17078_v1  ;;  %v5062_v1 = vmul.f32 %v14007_v3, %v20893_v19  ;;  %v14019_v9 = vpop.eup %14018  ;;  %v5064_v3 = vmul.f32 %v14017_v45, %v20897_v48 }
 0x9a5   : > { %v17092_v29 = vadd.f32 %v5142_v38, %v5059_v5  ;;  %20891 = vst [vmem:[#allocation140_spill] sm:$0xff] %v17094_v11 }
 0x9a6   : > { %v5148_v25 = vpop.permute.xlu1 %5147 }
 0x9a7   : > { %20890 = vst [vmem:[#allocation139_spill] sm:$0xff] %v17092_v29  ;;  %12939 = vmatprep.mubr.msk.f32.mxu1 %vm842_vm2, %v17092_v29  ;;  %v17106_v41 = vadd.f32 %v5148_v25, %v5062_v1 }
 0x9a8   : > { %v5146_v44 = vpop.permute.xlu0 %5145  ;;  %12940 = vmatmul.mubr.msk.f32.gmra.mxu1 %vm842_vm2, %v17094_v11  ;;  %v14021_v11 = vpop.eup %14020 }
 0x9a9   : > { %v17104_v5 = vadd.f32 %v5146_v44, %v5061_v58  ;;  %20895 = vst [vmem:[#allocation35_spill] sm:$0xff] %v17106_v41  ;;  %v20900_v58 = vld [vmem:[#allocation38_spill] sm:$0xff]  ;;  %v14023_v32 = vpop.eup %14022  ;;  %v5066_v31 = vmul.f32 %v14021_v11, %v20901_v17 }
 0x9aa   : > { %v5152_v38 = vpop.permute.xlu1 %5151  ;;  %v5065_v52 = vmul.f32 %v14019_v9, %v20900_v58  ;;  %v14025_v45 = vpop.eup %14024  ;;  %v20905_v9 = vld [vmem:[#allocation41_spill] sm:$0xff] }
 0x9ab   : > { %20894 = vst [vmem:[#allocation34_spill] sm:$0xff] %v17104_v5  ;;  %12942 = vmatprep.mubr.msk.f32.mxu1 %vm842_vm2, %v17104_v5  ;;  %v17116_v1 = vadd.f32 %v5152_v38, %v5064_v3  ;;  %v20904_v3 = vld [vmem:[#allocation40_spill] sm:$0xff]  ;;  %v5068_v58 = vmul.f32 %v14025_v45, %v20905_v9 }
 0x9ac   : > { %v5150_v19 = vpop.permute.xlu0 %5149  ;;  %12943 = vmatmul.mubr.msk.f32.gmra.mxu1 %vm842_vm2, %v17106_v41 }
 0x9ad   : > { %v17114_v44 = vadd.f32 %v5150_v19, %v5063_v14  ;;  %20899 = vst [vmem:[#allocation37_spill] sm:$0xff] %v17116_v1  ;;  %v5067_v19 = vmul.f32 %v14023_v32, %v20904_v3  ;;  %v20909_v32 = vld [vmem:[#allocation43_spill] sm:$0xff] }
 0x9ae   : > { %v5156_v25 = vpop.permute.xlu1 %5155 }
 0x9af   : > { %20898 = vst [vmem:[#allocation36_spill] sm:$0xff] %v17114_v44  ;;  %12945 = vmatprep.mubr.msk.f32.mxu1 %vm842_vm2, %v17114_v44  ;;  %v17126_v14 = vadd.f32 %v5156_v25, %v5066_v31  ;;  %v14027_v44 = vpop.eup %14026 }
 0x9b0   : > { %v5154_v5 = vpop.permute.xlu0 %5153  ;;  %12946 = vmatmul.mubr.msk.f32.gmra.mxu1 %vm842_vm2, %v17116_v1  ;;  %v14029_v11 = vpop.eup %14028 }
 0x9b1   : > { %v17124_v48 = vadd.f32 %v5154_v5, %v5065_v52  ;;  %20903 = vst [vmem:[#allocation39_spill] sm:$0xff] %v17126_v14  ;;  %v20908_v52 = vld [vmem:[#allocation42_spill] sm:$0xff]  ;;  %v5070_v3 = vmul.f32 %v14029_v11, %v20909_v32 }
 0x9b2   : > { %v5160_v38 = vpop.permute.xlu1 %5159  ;;  %v5069_v31 = vmul.f32 %v14027_v44, %v20908_v52 }
 0x9b3   : > { %20902 = vst [vmem:[#allocation38_spill] sm:$0xff] %v17124_v48  ;;  %12948 = vmatprep.mubr.msk.f32.mxu1 %vm842_vm2, %v17124_v48  ;;  %v17136_v5 = vadd.f32 %v5160_v38, %v5068_v58  ;;  %v14031_v48 = vpop.eup %14030 }
 0x9b4   : > { %v5158_v41 = vpop.permute.xlu0 %5157  ;;  %12949 = vmatmul.mubr.msk.f32.gmra.mxu1 %vm842_vm2, %v17126_v14  ;;  %v14033_v45 = vpop.eup %14032 }
 0x9b5   : > { %v17134_v17 = vadd.f32 %v5158_v41, %v5067_v19  ;;  %20907 = vst [vmem:[#allocation41_spill] sm:$0xff] %v17136_v5  ;;  %v20912_v19 = vld [vmem:[#allocation44_spill] sm:$0xff] }
 0x9b6   : > { %v5164_v25 = vpop.permute.xlu1 %5163  ;;  %v5071_v58 = vmul.f32 %v14031_v48, %v20912_v19  ;;  %v10860_v48 = vld [vmem:[%s20497_s5 + $0x180] sm:$0xff] }
 0x9b7   : > { %20906 = vst [vmem:[#allocation40_spill] sm:$0xff] %v17134_v17  ;;  %12951 = vmatprep.mubr.msk.f32.mxu1 %vm842_vm2, %v17134_v17  ;;  %v17146_v41 = vadd.f32 %v5164_v25, %v5070_v3  ;;  %v20913_v17 = vld [vmem:[#allocation45_spill] sm:$0xff]  ;;  %v10892_v3 = vld [vmem:[%s20499_s7 + $0x1f0] sm:$0xff]  ;;  %v10890_v19 = vld [vmem:[%s20499_s7 + $0x1e0] sm:$0xff] }
 0x9b8   : > { %v5162_v1 = vpop.permute.xlu0 %5161  ;;  %12952 = vmatmul.mubr.msk.f32.gmra.mxu1 %vm842_vm2, %v17136_v5  ;;  %v5072_v44 = vmul.f32 %v14033_v45, %v20913_v17  ;;  %v12864_v17 = vpop.f32.mrf.mxu0  ;;  %v10891_v45 = vld [vmem:[%s20499_s7 + $0x1e8] sm:$0xff] }
 0x9b9   : > { %v17144_v9 = vadd.f32 %v5162_v1, %v5069_v31  ;;  %20911 = vst [vmem:[#allocation43_spill] sm:$0xff] %v17146_v41  ;;  %v10861_v1 = vld [vmem:[%s20497_s5 + $0x188] sm:$0xff]  ;;  %v10893_v31 = vld [vmem:[%s20499_s7 + $0x1f8] sm:$0xff] }
 0x9ba   : > { %v5168_v38 = vpop.permute.xlu1 %5167  ;;  %12988 = vmatprep.subr.mxu0 %v10861_v1  ;;  %v17168_v25 = vpop.f32.mrf.mxu0  ;;  %13040 = vmatprep.subr.mxu1 %v10893_v31 }
 0x9bb   : > { %20910 = vst [vmem:[#allocation42_spill] sm:$0xff] %v17144_v9  ;;  %12954 = vmatprep.mubr.msk.f32.mxu1 %vm842_vm2, %v17144_v9  ;;  %v17156_v32 = vadd.f32 %v5168_v38, %v5072_v44  ;;  %12989 = vmatpush3.msra.mxu0 %v10861_v1  ;;  %v10887_v1 = vld [vmem:[%s20499_s7 + $0x1c8] sm:$0xff] }
 0x9bc   : > { %12955 = vmatmul.mubr.msk.f32.gmra.mxu1 %vm842_vm2, %v17146_v41  ;;  %v5166_v11 = vpop.permute.xlu0 %5165  ;;  %12990 = vmatprep.subr.mxu0 %v10860_v48  ;;  %v12867_v38 = vpop.f32.mrf.mxu0 }
 0x9bd   : > { %v17154_v52 = vadd.f32 %v5166_v11, %v5071_v58  ;;  %20915 = vst [vmem:[#allocation45_spill] sm:$0xff] %v17156_v32  ;;  %12991 = vmatpush3.msra.mxu0 %v10860_v48  ;;  %13041 = vmatpush3.msra.mxu1 %v10893_v31  ;;  %v10889_v58 = vld [vmem:[%s20499_s7 + $0x1d8] sm:$0xff]  ;;  %v10888_v11 = vld [vmem:[%s20499_s7 + $0x1d0] sm:$0xff]  ;;  %v10886_v31 = vld [vmem:[%s20499_s7 + $0x1c0] sm:$0xff] }
 0x9be   : > { %13042 = vmatprep.subr.mxu1 %v10892_v3  ;;  %v5441_v44 = vpop.f32.mrf.mxu0 }
 0x9bf   : > { %20914 = vst [vmem:[#allocation44_spill] sm:$0xff] %v17154_v52  ;;  %12957 = vmatprep.mubr.msk.f32.mxu1 %vm842_vm2, %v17154_v52  ;;  %13043 = vmatpush3.msra.mxu1 %v10892_v3  ;;  %v10885_v3 = vld [vmem:[%s20499_s7 + $0x1b8] sm:$0xff] }
 0x9c0   : > { %12958 = vmatmul.mubr.msk.f32.gmra.mxu1 %vm842_vm2, %v17156_v32  ;;  %13044 = vmatprep.subr.mxu1 %v10891_v45  ;;  %v12870_v48 = vpop.f32.mrf.mxu0 }
 0x9c1   : > { %13045 = vmatpush3.msra.mxu1 %v10891_v45 }
 0x9c2   : > { %13046 = vmatprep.subr.mxu1 %v10890_v19  ;;  %v5451_v45 = vpop.f32.mrf.mxu0 }
 0x9c3   : > { %13047 = vmatpush3.msra.mxu1 %v10890_v19  ;;  %v10884_v19 = vld [vmem:[%s20499_s7 + $0x1b0] sm:$0xff] }
 0x9c4   : > { %13048 = vmatprep.subr.mxu1 %v10889_v58 }
 0x9c5   : > { %13049 = vmatpush3.msra.mxu1 %v10889_v58  ;;  %v10883_v58 = vld [vmem:[%s20499_s7 + $0x1a8] sm:$0xff] }
 0x9c6   : > { %13050 = vmatprep.subr.mxu1 %v10888_v11 }
 0x9c7   : > { %13051 = vmatpush3.msra.mxu1 %v10888_v11  ;;  %v12873_v11 = vpop.f32.mrf.mxu0 }
 0x9c8   : > { %13052 = vmatprep.subr.mxu1 %v10887_v1 }
 0x9c9   : > { %13053 = vmatpush3.msra.mxu1 %v10887_v1  ;;  %v10882_v1 = vld [vmem:[%s20499_s7 + $0x1a0] sm:$0xff]  ;;  %v5461_v32 = vpop.f32.mrf.mxu0 }
 0x9ca   : > { %13054 = vmatprep.subr.mxu1 %v10886_v31 }
 0x9cb   : > { %13055 = vmatpush3.msra.mxu1 %v10886_v31  ;;  %v10881_v31 = vld [vmem:[%s20499_s7 + $0x198] sm:$0xff]  ;;  %v12876_v52 = vpop.f32.mrf.mxu0 }
 0x9cc   : > { %13056 = vmatprep.subr.mxu1 %v10885_v3 }
 0x9cd   : > { %13057 = vmatpush3.msra.mxu1 %v10885_v3  ;;  %v10880_v3 = vld [vmem:[%s20499_s7 + $0x190] sm:$0xff] }
 0x9ce   : > { %13058 = vmatprep.subr.mxu1 %v10884_v19 }
 0x9cf   : > { %13059 = vmatpush3.msra.mxu1 %v10884_v19  ;;  %v10879_v19 = vld [vmem:[%s20499_s7 + $0x188] sm:$0xff] }
 0x9d0   : > { %13060 = vmatprep.subr.mxu1 %v10883_v58 }
 0x9d1   : > { %13061 = vmatpush3.msra.mxu1 %v10883_v58  ;;  %v5471_v58 = vpop.f32.mrf.mxu0 }
 0x9d2   : > { %13062 = vmatprep.subr.mxu1 %v10882_v1 }
 0x9d3   : > { %13063 = vmatpush3.msra.mxu1 %v10882_v1  ;;  %v12879_v41 = vpop.f32.mrf.mxu0 }
 0x9d4   : > { %13064 = vmatprep.subr.mxu1 %v10881_v31 }
 0x9d5   : > { %13065 = vmatpush3.msra.mxu1 %v10881_v31  ;;  %v5481_v9 = vpop.f32.mrf.mxu0 }
 0x9d6   : > { %13066 = vmatprep.subr.mxu1 %v10880_v3 }
 0x9d7   : > { %13067 = vmatpush3.msra.mxu1 %v10880_v3  ;;  %v17215_v5 = vpop.f32.mrf.mxu0 }
 0x9d8   : > { %13068 = vmatprep.subr.mxu1 %v10879_v19 }
 0x9d9   : > { %13069 = vmatpush3.msra.mxu1 %v10879_v19  ;;  %v17217_v1 = vpop.f32.mrf.mxu0 }
 0x9db   : > { %v17219_v14 = vpop.f32.mrf.mxu0 }
 0x9dd   : > { %v17221_v29 = vpop.f32.mrf.mxu0 }
 0x9df   : > { %v17228_v3 = vpop.f32.mrf.mxu0 }
 0x9e1   : > { %v17233_v40 = vpop.f32.mrf.mxu0 }
 0xa43   : > { %v12914_v31 = vpop.f32.mrf.mxu1 }
 0xa44   : > { %v5761_v28 = vadd.f32 %v12914_v31, %v12864_v17 }
 0xa45   : > { %v5755_v19 = vpop.f32.mrf.mxu1 }
 0xa46   : > { %v5756_v51 = vadd.f32 %v5755_v19, %v17168_v25  ;;  %v5923_v42 = vadd.f32 %v17226_v39, %v5761_v28  ;;  %v17237_v25 = vpop.f32.mrf.mxu0 }
 0xa47   : > { %v12917_v2 = vpop.f32.mrf.mxu1 }
 0xa48   : > { %v5922_v8 = vadd.f32 %v17226_v39, %v5756_v51  ;;  %v5771_v47 = vadd.f32 %v12917_v2, %v12867_v38  ;;  %v5955_v46 = vmax.f32 %v5923_v42, 0.0 }
 0xa49   : > { %v5765_v16 = vpop.f32.mrf.mxu1 }
 0xa4a   : > { %v5766_v17 = vadd.f32 %v5765_v16, %v5441_v44  ;;  %v5954_v31 = vmax.f32 %v5922_v8, 0.0  ;;  %v5925_v23 = vadd.f32 %v17226_v39, %v5771_v47  ;;  %v17241_v47 = vpop.f32.mrf.mxu0 }
 0xa4b   : > { %v12920_v12 = vpop.f32.mrf.mxu1 }
 0xa4c   : > { %v5924_v60 = vadd.f32 %v17226_v39, %v5766_v17  ;;  %v5781_v20 = vadd.f32 %v12920_v12, %v12870_v48  ;;  %12992 = vmatprep.mubr.f32.mxu0 %v5954_v31  ;;  %v5957_v2 = vmax.f32 %v5925_v23, 0.0  ;;  %v17245_v23 = vpop.f32.mrf.mxu0 }
 0xa4d   : > { %v5775_v28 = vpop.f32.mrf.mxu1  ;;  %12993 = vmatmul.mubr.f32.vlgmr.msra.gmra.mxu0 %v5955_v46 }
 0xa4e   : > { %v5776_v19 = vadd.f32 %v5775_v28, %v5451_v45  ;;  %v5956_v51 = vmax.f32 %v5924_v60, 0.0  ;;  %v5927_v38 = vadd.f32 %v17226_v39, %v5781_v20 }
 0xa4f   : > { %v12923_v35 = vpop.f32.mrf.mxu1 }
 0xa50   : > { %v5926_v16 = vadd.f32 %v17226_v39, %v5776_v19  ;;  %v5791_v8 = vadd.f32 %v12923_v35, %v12873_v11  ;;  %12995 = vmatprep.mubr.f32.mxu0 %v5956_v51  ;;  %v5959_v48 = vmax.f32 %v5927_v38, 0.0 }
 0xa51   : > { %v5785_v42 = vpop.f32.mrf.mxu1  ;;  %12996 = vmatmul.mubr.f32.gmra.mxu0 %v5957_v2 }
 0xa52   : > { %v5786_v12 = vadd.f32 %v5785_v42, %v5461_v32  ;;  %v5958_v44 = vmax.f32 %v5926_v16, 0.0  ;;  %v5929_v17 = vadd.f32 %v17226_v39, %v5791_v8  ;;  %v5531_v32 = vpop.f32.mrf.mxu0 }
 0xa54   : > { %v5928_v46 = vadd.f32 %v17226_v39, %v5786_v12  ;;  %v12926_v60 = vpop.f32.mrf.mxu1  ;;  %12998 = vmatprep.mubr.f32.mxu0 %v5958_v44  ;;  %v5961_v11 = vmax.f32 %v5929_v17, 0.0  ;;  %v12897_v44 = vpop.f32.mrf.mxu0 }
 0xa55   : > { %v5801_v20 = vadd.f32 %v12926_v60, %v12876_v52  ;;  %12999 = vmatmul.mubr.f32.gmra.mxu0 %v5959_v48 }
 0xa56   : > { %v5795_v45 = vpop.f32.mrf.mxu1  ;;  %v5960_v35 = vmax.f32 %v5928_v46, 0.0 }
 0xa57   : > { %v5796_v31 = vadd.f32 %v5795_v45, %v5471_v58  ;;  %v5931_v28 = vadd.f32 %v17226_v39, %v5801_v20  ;;  %v5541_v45 = vpop.f32.mrf.mxu0 }
 0xa58   : > { %v12929_v19 = vpop.f32.mrf.mxu1  ;;  %13001 = vmatprep.mubr.f32.mxu0 %v5960_v35 }
 0xa59   : > { %v5930_v51 = vadd.f32 %v17226_v39, %v5796_v31  ;;  %v5811_v2 = vadd.f32 %v12929_v19, %v12879_v41  ;;  %13002 = vmatmul.mubr.f32.gmra.mxu0 %v5961_v11  ;;  %v5963_v42 = vmax.f32 %v5931_v28, 0.0 }
 0xa5a   : > { %v5805_v38 = vpop.f32.mrf.mxu1 }
 0xa5b   : > { %v5806_v16 = vadd.f32 %v5805_v38, %v5481_v9  ;;  %v5962_v8 = vmax.f32 %v5930_v51, 0.0  ;;  %v5933_v52 = vadd.f32 %v17226_v39, %v5811_v2  ;;  %v12900_v2 = vpop.f32.mrf.mxu0 }
 0xa5c   : > { %v12932_v12 = vpop.f32.mrf.mxu1 }
 0xa5d   : > { %v5932_v48 = vadd.f32 %v17226_v39, %v5806_v16  ;;  %v5821_v58 = vadd.f32 %v12932_v12, %v17215_v5  ;;  %13004 = vmatprep.mubr.f32.mxu0 %v5962_v8  ;;  %v5965_v41 = vmax.f32 %v5933_v52, 0.0 }
 0xa5e   : > { %v5815_v17 = vpop.f32.mrf.mxu1  ;;  %13005 = vmatmul.mubr.f32.gmra.mxu0 %v5963_v42 }
 0xa5f   : > { %v5816_v46 = vadd.f32 %v5815_v17, %v17217_v1  ;;  %v5964_v60 = vmax.f32 %v5932_v48, 0.0  ;;  %v5935_v20 = vadd.f32 %v17226_v39, %v5821_v58  ;;  %v5551_v48 = vpop.f32.mrf.mxu0 }
 0xa60   : > { %v12935_v9 = vpop.f32.mrf.mxu1 }
 0xa61   : > { %v5934_v35 = vadd.f32 %v17226_v39, %v5816_v46  ;;  %v5831_v11 = vadd.f32 %v12935_v9, %v17219_v14  ;;  %13007 = vmatprep.mubr.f32.mxu0 %v5964_v60  ;;  %v5967_v19 = vmax.f32 %v5935_v20, 0.0  ;;  %v12903_v9 = vpop.f32.mrf.mxu0 }
 0xa62   : > { %v5825_v31 = vpop.f32.mrf.mxu1  ;;  %13008 = vmatmul.mubr.f32.gmra.mxu0 %v5965_v41 }
 0xa63   : > { %v5826_v5 = vadd.f32 %v5825_v31, %v17221_v29  ;;  %v5966_v28 = vmax.f32 %v5934_v35, 0.0  ;;  %v5937_v51 = vadd.f32 %v17226_v39, %v5831_v11 }
 0xa64   : > { %v12938_v1 = vpop.f32.mrf.mxu1 }
 0xa65   : > { %v5936_v38 = vadd.f32 %v17226_v39, %v5826_v5  ;;  %v5841_v16 = vadd.f32 %v12938_v1, %v17228_v3  ;;  %13010 = vmatprep.mubr.f32.mxu0 %v5966_v28  ;;  %v5969_v52 = vmax.f32 %v5937_v51, 0.0 }
 0xa66   : > { %v5835_v8 = vpop.f32.mrf.mxu1  ;;  %13011 = vmatmul.mubr.f32.gmra.mxu0 %v5967_v19 }
 0xa67   : > { %v5836_v14 = vadd.f32 %v5835_v8, %v17233_v40  ;;  %v5968_v42 = vmax.f32 %v5936_v38, 0.0  ;;  %v5939_v12 = vadd.f32 %v17226_v39, %v5841_v16 }
 0xa68   : > { %v12941_v29 = vpop.f32.mrf.mxu1 }
 0xa69   : > { %v5938_v58 = vadd.f32 %v17226_v39, %v5836_v14  ;;  %v5851_v17 = vadd.f32 %v12941_v29, %v17237_v25  ;;  %13013 = vmatprep.mubr.f32.mxu0 %v5968_v42  ;;  %v5971_v41 = vmax.f32 %v5939_v12, 0.0 }
 0xa6a   : > { %v5845_v46 = vpop.f32.mrf.mxu1  ;;  %13014 = vmatmul.mubr.f32.gmra.mxu0 %v5969_v52 }
 0xa6b   : > { %v5846_v3 = vadd.f32 %v5845_v46, %v17241_v47  ;;  %v5970_v60 = vmax.f32 %v5938_v58, 0.0  ;;  %v5941_v20 = vadd.f32 %v17226_v39, %v5851_v17  ;;  %v5561_v47 = vpop.f32.mrf.mxu0 }
 0xa6c   : > { %v12944_v40 = vpop.f32.mrf.mxu1 }
 0xa6d   : > { %v5940_v35 = vadd.f32 %v17226_v39, %v5846_v3  ;;  %v5861_v11 = vadd.f32 %v12944_v40, %v17245_v23  ;;  %13016 = vmatprep.mubr.f32.mxu0 %v5970_v60  ;;  %v5973_v28 = vmax.f32 %v5941_v20, 0.0  ;;  %v12906_v12 = vpop.f32.mrf.mxu0 }
 0xa6e   : > { %v5855_v31 = vpop.f32.mrf.mxu1  ;;  %13017 = vmatmul.mubr.f32.gmra.mxu0 %v5971_v41 }
 0xa6f   : > { %v5856_v5 = vadd.f32 %v5855_v31, %v5531_v32  ;;  %v5972_v25 = vmax.f32 %v5940_v35, 0.0  ;;  %v5943_v19 = vadd.f32 %v17226_v39, %v5861_v11  ;;  %v5571_v41 = vpop.f32.mrf.mxu0 }
 0xa70   : > { %v12947_v51 = vpop.f32.mrf.mxu1 }
 0xa71   : > { %v5942_v1 = vadd.f32 %v17226_v39, %v5856_v5  ;;  %v5871_v38 = vadd.f32 %v12947_v51, %v12897_v44  ;;  %13019 = vmatprep.mubr.f32.mxu0 %v5972_v25  ;;  %v5975_v42 = vmax.f32 %v5943_v19, 0.0  ;;  %v12909_v25 = vpop.f32.mrf.mxu0 }
 0xa72   : > { %v5865_v16 = vpop.f32.mrf.mxu1  ;;  %13020 = vmatmul.mubr.f32.gmra.mxu0 %v5973_v28 }
 0xa73   : > { %v5866_v8 = vadd.f32 %v5865_v16, %v5541_v45  ;;  %v5974_v14 = vmax.f32 %v5942_v1, 0.0  ;;  %v5945_v23 = vadd.f32 %v17226_v39, %v5871_v38 }
 0xa74   : > { %v12950_v52 = vpop.f32.mrf.mxu1 }
 0xa75   : > { %v5944_v32 = vadd.f32 %v17226_v39, %v5866_v8  ;;  %v5881_v29 = vadd.f32 %v12950_v52, %v12900_v2  ;;  %13022 = vmatprep.mubr.f32.mxu0 %v5974_v14  ;;  %v5977_v3 = vmax.f32 %v5945_v23, 0.0  ;;  %v5581_v8 = vpop.f32.mrf.mxu0 }
 0xa76   : > { %v5875_v58 = vpop.f32.mrf.mxu1  ;;  %13023 = vmatmul.mubr.f32.gmra.mxu0 %v5975_v42 }
 0xa77   : > { %v5876_v17 = vadd.f32 %v5875_v58, %v5551_v48  ;;  %v5976_v46 = vmax.f32 %v5944_v32, 0.0  ;;  %v5947_v44 = vadd.f32 %v17226_v39, %v5881_v29 }
 0xa78   : > { %v12953_v60 = vpop.f32.mrf.mxu1 }
 0xa79   : > { %v5946_v45 = vadd.f32 %v17226_v39, %v5876_v17  ;;  %v5891_v20 = vadd.f32 %v12953_v60, %v12903_v9  ;;  %13025 = vmatprep.mubr.f32.mxu0 %v5976_v46  ;;  %v5979_v31 = vmax.f32 %v5947_v44, 0.0  ;;  %v14577_v46 = vld [vmem:[%s14740_s23] sm:$0xff] }
 0xa7a   : > { %v5885_v40 = vpop.f32.mrf.mxu1  ;;  %13026 = vmatmul.mubr.f32.gmra.mxu0 %v5977_v3  ;;  %v10878_v3 = vld [vmem:[%s20499_s7 + $0x180] sm:$0xff] }
 0xa7b   : > { %v5886_v35 = vadd.f32 %v5885_v40, %v5561_v47  ;;  %v5978_v11 = vmax.f32 %v5946_v45, 0.0  ;;  %v5949_v2 = vadd.f32 %v17226_v39, %v5891_v20  ;;  %13070 = vmatprep.subr.mxu1 %v10878_v3  ;;  %v17288_v44 = vld [vmem:[%s20498_s6 + $0x3] ss:$0 sm:$0xff] }
 0xa7c   : > { %v12956_v5 = vpop.f32.mrf.mxu1  ;;  %13071 = vmatpush3.msra.mxu1 %v10878_v3 }
 0xa7d   : > { %v5948_v48 = vadd.f32 %v17226_v39, %v5886_v35  ;;  %v5901_v28 = vadd.f32 %v12956_v5, %v12906_v12  ;;  %13028 = vmatprep.mubr.f32.mxu0 %v5978_v11  ;;  %v5981_v38 = vmax.f32 %v5949_v2, 0.0 }
 0xa7e   : > { %v5895_v19 = vpop.f32.mrf.mxu1  ;;  %13029 = vmatmul.mubr.f32.gmra.mxu0 %v5979_v31 }
 0xa7f   : > { %v5896_v51 = vadd.f32 %v5895_v19, %v5571_v41  ;;  %v5980_v1 = vmax.f32 %v5948_v48, 0.0  ;;  %v5951_v9 = vadd.f32 %v17226_v39, %v5901_v28 }
 0xa80   : > { %v12959_v16 = vpop.f32.mrf.mxu1 }
 0xa81   : > { %v5950_v47 = vadd.f32 %v17226_v39, %v5896_v51  ;;  %v5911_v14 = vadd.f32 %v12959_v16, %v12909_v25  ;;  %13031 = vmatprep.mubr.f32.mxu0 %v5980_v1  ;;  %v5983_v12 = vmax.f32 %v5951_v9, 0.0 }
 0xa82   : > { %v5905_v42 = vpop.f32.mrf.mxu1  ;;  %13032 = vmatmul.mubr.f32.gmra.mxu0 %v5981_v38 }
 0xa83   : > { %v5906_v23 = vadd.f32 %v5905_v42, %v5581_v8  ;;  %v5982_v52 = vmax.f32 %v5950_v47, 0.0  ;;  %v5953_v32 = vadd.f32 %v17226_v39, %v5911_v14 }
 0xa85   : > { %v5952_v29 = vadd.f32 %v17226_v39, %v5906_v23  ;;  %13034 = vmatprep.mubr.f32.mxu0 %v5982_v52  ;;  %v5985_v17 = vmax.f32 %v5953_v32, 0.0 }
 0xa86   : > { %13035 = vmatmul.mubr.f32.gmra.mxu0 %v5983_v12 }
 0xa87   : > { %v5984_v58 = vmax.f32 %v5952_v29, 0.0 }
 0xa89   : > { %13037 = vmatprep.mubr.f32.mxu0 %v5984_v58 }
 0xa8a   : > { %13038 = vmatmul.mubr.f32.gmra.mxu0 %v5985_v17 }
 0xa8b   : > { %13122 = vmatprep.mubr.msk.f32.mxu0 %vm424_vm1, %v14577_v46 }
 0xb0d   : > { %v12994_v39 = vpop.f32.mrf.mxu0 }
 0xb0e   : > { %v6083_v60 = vadd.f32 %v12994_v39, %v17288_v44 }
 0xb0f   : > { %v6077_v41 = vpop.f32.mrf.mxu0 }
 0xb10   : > { %v6078_v45 = vadd.f32 %v17288_v44, %v6077_v41  ;;  %v6237_v35 = vmax.f32 %v6083_v60, 0.0 }
 0xb11   : > { %v12997_v20 = vpop.f32.mrf.mxu0 }
 0xb12   : > { %v6236_v40 = vmax.f32 %v6078_v45, 0.0  ;;  %v6093_v11 = vadd.f32 %v12997_v20, %v17288_v44 }
 0xb13   : > { %v6087_v31 = vpop.f32.mrf.mxu0 }
 0xb14   : > { %v6088_v2 = vadd.f32 %v17288_v44, %v6087_v31  ;;  %13072 = vmatprep.mubr.f32.mxu1 %v6236_v40  ;;  %v6239_v48 = vmax.f32 %v6093_v11, 0.0 }
 0xb15   : > { %v13000_v5 = vpop.f32.mrf.mxu0  ;;  %13073 = vmatmul.mubr.f32.vlgmr.msra.gmra.mxu1 %v6237_v35 }
 0xb16   : > { %v6238_v25 = vmax.f32 %v6088_v2, 0.0  ;;  %v6103_v28 = vadd.f32 %v13000_v5, %v17288_v44 }
 0xb17   : > { %v6097_v19 = vpop.f32.mrf.mxu0 }
 0xb18   : > { %v6098_v51 = vadd.f32 %v17288_v44, %v6097_v19  ;;  %13075 = vmatprep.mubr.f32.mxu1 %v6238_v25  ;;  %v6241_v9 = vmax.f32 %v6103_v28, 0.0 }
 0xb19   : > { %v13003_v1 = vpop.f32.mrf.mxu0  ;;  %13076 = vmatmul.mubr.f32.gmra.mxu1 %v6239_v48 }
 0xb1a   : > { %v6240_v38 = vmax.f32 %v6098_v51, 0.0  ;;  %v6113_v16 = vadd.f32 %v13003_v1, %v17288_v44 }
 0xb1b   : > { %v6107_v8 = vpop.f32.mrf.mxu0 }
 0xb1c   : > { %v6108_v47 = vadd.f32 %v17288_v44, %v6107_v8  ;;  %13078 = vmatprep.mubr.f32.mxu1 %v6240_v38  ;;  %v6243_v23 = vmax.f32 %v6113_v16, 0.0 }
 0xb1d   : > { %13079 = vmatmul.mubr.f32.gmra.mxu1 %v6241_v9 }
 0xb1e   : > { %v6242_v14 = vmax.f32 %v6108_v47, 0.0  ;;  %v13006_v42 = vpop.f32.mrf.mxu0 }
 0xb1f   : > { %v6123_v52 = vadd.f32 %v13006_v42, %v17288_v44 }
 0xb20   : > { %v6117_v12 = vpop.f32.mrf.mxu0  ;;  %13081 = vmatprep.mubr.f32.mxu1 %v6242_v14 }
 0xb21   : > { %v6118_v32 = vadd.f32 %v17288_v44, %v6117_v12  ;;  %13082 = vmatmul.mubr.f32.gmra.mxu1 %v6243_v23  ;;  %v6245_v17 = vmax.f32 %v6123_v52, 0.0 }
 0xb22   : > { %v13009_v29 = vpop.f32.mrf.mxu0 }
 0xb23   : > { %v6244_v58 = vmax.f32 %v6118_v32, 0.0  ;;  %v6133_v46 = vadd.f32 %v13009_v29, %v17288_v44 }
 0xb24   : > { %v6127_v3 = vpop.f32.mrf.mxu0 }
 0xb25   : > { %v6128_v39 = vadd.f32 %v17288_v44, %v6127_v3  ;;  %13084 = vmatprep.mubr.f32.mxu1 %v6244_v58  ;;  %v6247_v45 = vmax.f32 %v6133_v46, 0.0 }
 0xb26   : > { %v13012_v60 = vpop.f32.mrf.mxu0  ;;  %13085 = vmatmul.mubr.f32.gmra.mxu1 %v6245_v17 }
 0xb27   : > { %v6246_v41 = vmax.f32 %v6128_v39, 0.0  ;;  %v6143_v20 = vadd.f32 %v13012_v60, %v17288_v44 }
 0xb28   : > { %v6137_v40 = vpop.f32.mrf.mxu0 }
 0xb29   : > { %v6138_v35 = vadd.f32 %v17288_v44, %v6137_v40  ;;  %13087 = vmatprep.mubr.f32.mxu1 %v6246_v41  ;;  %v6249_v2 = vmax.f32 %v6143_v20, 0.0 }
 0xb2a   : > { %v13015_v11 = vpop.f32.mrf.mxu0  ;;  %13088 = vmatmul.mubr.f32.gmra.mxu1 %v6247_v45 }
 0xb2b   : > { %v6248_v31 = vmax.f32 %v6138_v35, 0.0  ;;  %v6153_v5 = vadd.f32 %v13015_v11, %v17288_v44 }
 0xb2c   : > { %v6147_v25 = vpop.f32.mrf.mxu0 }
 0xb2d   : > { %v6148_v48 = vadd.f32 %v17288_v44, %v6147_v25  ;;  %13090 = vmatprep.mubr.f32.mxu1 %v6248_v31  ;;  %v6251_v51 = vmax.f32 %v6153_v5, 0.0 }
 0xb2e   : > { %v13018_v28 = vpop.f32.mrf.mxu0  ;;  %13091 = vmatmul.mubr.f32.gmra.mxu1 %v6249_v2 }
 0xb2f   : > { %v6250_v19 = vmax.f32 %v6148_v48, 0.0  ;;  %v6163_v1 = vadd.f32 %v13018_v28, %v17288_v44 }
 0xb30   : > { %v6157_v38 = vpop.f32.mrf.mxu0 }
 0xb31   : > { %v6158_v9 = vadd.f32 %v17288_v44, %v6157_v38  ;;  %13093 = vmatprep.mubr.f32.mxu1 %v6250_v19  ;;  %v6253_v47 = vmax.f32 %v6163_v1, 0.0 }
 0xb32   : > { %v13021_v16 = vpop.f32.mrf.mxu0  ;;  %13094 = vmatmul.mubr.f32.gmra.mxu1 %v6251_v51 }
 0xb33   : > { %v6252_v8 = vmax.f32 %v6158_v9, 0.0  ;;  %v6173_v14 = vadd.f32 %v13021_v16, %v17288_v44 }
 0xb34   : > { %v6167_v42 = vpop.f32.mrf.mxu0 }
 0xb35   : > { %v6168_v23 = vadd.f32 %v17288_v44, %v6167_v42  ;;  %13096 = vmatprep.mubr.f32.mxu1 %v6252_v8  ;;  %v6255_v32 = vmax.f32 %v6173_v14, 0.0 }
 0xb36   : > { %v13024_v52 = vpop.f32.mrf.mxu0  ;;  %13097 = vmatmul.mubr.f32.gmra.mxu1 %v6253_v47 }
 0xb37   : > { %v6254_v12 = vmax.f32 %v6168_v23, 0.0  ;;  %v6183_v29 = vadd.f32 %v13024_v52, %v17288_v44 }
 0xb38   : > { %v6177_v58 = vpop.f32.mrf.mxu0 }
 0xb39   : > { %v6178_v17 = vadd.f32 %v17288_v44, %v6177_v58  ;;  %13099 = vmatprep.mubr.f32.mxu1 %v6254_v12  ;;  %v6257_v39 = vmax.f32 %v6183_v29, 0.0 }
 0xb3a   : > { %v13027_v46 = vpop.f32.mrf.mxu0  ;;  %13100 = vmatmul.mubr.f32.gmra.mxu1 %v6255_v32 }
 0xb3b   : > { %v6256_v3 = vmax.f32 %v6178_v17, 0.0  ;;  %v6193_v60 = vadd.f32 %v13027_v46, %v17288_v44  ;;  %v17325_v17 = vld [vmem:[%s20500_s8 + $0x3] ss:$0 sm:$0xff] }
 0xb3c   : > { %v6187_v41 = vpop.f32.mrf.mxu0 }
 0xb3d   : > { %v6188_v45 = vadd.f32 %v17288_v44, %v6187_v41  ;;  %13102 = vmatprep.mubr.f32.mxu1 %v6256_v3  ;;  %v6259_v35 = vmax.f32 %v6193_v60, 0.0 }
 0xb3e   : > { %v13030_v20 = vpop.f32.mrf.mxu0  ;;  %13103 = vmatmul.mubr.f32.gmra.mxu1 %v6257_v39 }
 0xb3f   : > { %v6258_v40 = vmax.f32 %v6188_v45, 0.0  ;;  %v6203_v11 = vadd.f32 %v13030_v20, %v17288_v44 }
 0xb40   : > { %v6197_v31 = vpop.f32.mrf.mxu0 }
 0xb41   : > { %v6198_v2 = vadd.f32 %v17288_v44, %v6197_v31  ;;  %13105 = vmatprep.mubr.f32.mxu1 %v6258_v40  ;;  %v6261_v48 = vmax.f32 %v6203_v11, 0.0 }
 0xb42   : > { %v13033_v5 = vpop.f32.mrf.mxu0  ;;  %13106 = vmatmul.mubr.f32.gmra.mxu1 %v6259_v35 }
 0xb43   : > { %v6260_v25 = vmax.f32 %v6198_v2, 0.0  ;;  %v6213_v28 = vadd.f32 %v13033_v5, %v17288_v44 }
 0xb44   : > { %v6207_v19 = vpop.f32.mrf.mxu0 }
 0xb45   : > { %v6208_v51 = vadd.f32 %v17288_v44, %v6207_v19  ;;  %13108 = vmatprep.mubr.f32.mxu1 %v6260_v25  ;;  %v6263_v9 = vmax.f32 %v6213_v28, 0.0 }
 0xb46   : > { %v13036_v1 = vpop.f32.mrf.mxu0  ;;  %13109 = vmatmul.mubr.f32.gmra.mxu1 %v6261_v48 }
 0xb47   : > { %v6262_v38 = vmax.f32 %v6208_v51, 0.0  ;;  %v6223_v16 = vadd.f32 %v13036_v1, %v17288_v44 }
 0xb48   : > { %v6217_v8 = vpop.f32.mrf.mxu0 }
 0xb49   : > { %v6218_v47 = vadd.f32 %v17288_v44, %v6217_v8  ;;  %13111 = vmatprep.mubr.f32.mxu1 %v6262_v38  ;;  %v6265_v23 = vmax.f32 %v6223_v16, 0.0 }
 0xb4a   : > { %v13039_v14 = vpop.f32.mrf.mxu0  ;;  %13112 = vmatmul.mubr.f32.gmra.mxu1 %v6263_v9 }
 0xb4b   : > { %v6264_v42 = vmax.f32 %v6218_v47, 0.0  ;;  %v6233_v52 = vadd.f32 %v13039_v14, %v17288_v44 }
 0xb4c   : > { %v6227_v12 = vpop.f32.mrf.mxu0 }
 0xb4d   : > { %v6228_v32 = vadd.f32 %v17288_v44, %v6227_v12  ;;  %13114 = vmatprep.mubr.f32.mxu1 %v6264_v42  ;;  %v6267_v58 = vmax.f32 %v6233_v52, 0.0 }
 0xb4e   : > { %13115 = vmatmul.mubr.f32.gmra.mxu1 %v6265_v23 }
 0xb4f   : > { %v6266_v29 = vmax.f32 %v6228_v32, 0.0 }
 0xb51   : > { %13117 = vmatprep.mubr.f32.mxu1 %v6266_v29 }
 0xb52   : > { %13118 = vmatmul.mubr.f32.gmra.mxu1 %v6267_v58 }
 0xbd5   : > { %v13074_v46 = vpop.f32.mrf.mxu1 }
 0xbd6   : > { %v17328_v3 = vadd.f32 %v13074_v46, %v17325_v17 }
 0xbd7   : > { %v6359_v39 = vpop.f32.mrf.mxu1 }
 0xbd8   : > { %14034 = vtanh.f32 %v17328_v3  ;;  %v17332_v44 = vadd.f32 %v17325_v17, %v6359_v39 }
 0xbd9   : > { %v13077_v60 = vpop.f32.mrf.mxu1 }
 0xbda   : > { %14036 = vtanh.f32 %v17332_v44  ;;  %v17336_v41 = vadd.f32 %v13077_v60, %v17325_v17 }
 0xbdb   : > { %v6369_v45 = vpop.f32.mrf.mxu1 }
 0xbdc   : > { %14038 = vtanh.f32 %v17336_v41  ;;  %v17340_v20 = vadd.f32 %v17325_v17, %v6369_v45 }
 0xbdd   : > { %v13080_v40 = vpop.f32.mrf.mxu1 }
 0xbde   : > { %14040 = vtanh.f32 %v17340_v20  ;;  %v17344_v35 = vadd.f32 %v13080_v40, %v17325_v17 }
 0xbdf   : > { %v6379_v11 = vpop.f32.mrf.mxu1 }
 0xbe0   : > { %14042 = vtanh.f32 %v17344_v35  ;;  %v17348_v31 = vadd.f32 %v17325_v17, %v6379_v11 }
 0xbe1   : > { %v13083_v2 = vpop.f32.mrf.mxu1 }
 0xbe2   : > { %14044 = vtanh.f32 %v17348_v31  ;;  %v17352_v5 = vadd.f32 %v13083_v2, %v17325_v17 }
 0xbe3   : > { %v6389_v25 = vpop.f32.mrf.mxu1 }
 0xbe4   : > { %14046 = vtanh.f32 %v17352_v5  ;;  %v17356_v48 = vadd.f32 %v17325_v17, %v6389_v25 }
 0xbe5   : > { %v17358_v28 = vpop.eup %14034 }
 0xbe6   : > { %20916 = vst [vmem:[#allocation141_spill] sm:$0xff] %v17358_v28  ;;  %v6552_v19 = vmul.f32 1.442695, %v17358_v28  ;;  %14048 = vtanh.f32 %v17356_v48  ;;  %v13086_v51 = vpop.f32.mrf.mxu1 }
 0xbe7   : > { %v17362_v1 = vpop.eup %14036  ;;  %v17365_v38 = vadd.f32 %v13086_v51, %v17325_v17 }
 0xbe8   : > { %20917 = vst [vmem:[#allocation142_spill] sm:$0xff] %v17362_v1  ;;  %14050 = vpow2.f32 %v6552_v19  ;;  %v6550_v9 = vmul.f32 1.442695, %v17362_v1  ;;  %v6399_v16 = vpop.f32.mrf.mxu1 }
 0xbe9   : > { %v17368_v8 = vpop.eup %14038  ;;  %14052 = vtanh.f32 %v17365_v38  ;;  %v17372_v47 = vadd.f32 %v17325_v17, %v6399_v16 }
 0xbea   : > { %20918 = vst [vmem:[#allocation143_spill] sm:$0xff] %v17368_v8  ;;  %14054 = vpow2.f32 %v6550_v9  ;;  %v6556_v14 = vmul.f32 1.442695, %v17368_v8  ;;  %v13089_v42 = vpop.f32.mrf.mxu1 }
 0xbeb   : > { %v17375_v23 = vpop.eup %14040  ;;  %14056 = vtanh.f32 %v17372_v47  ;;  %v17379_v52 = vadd.f32 %v13089_v42, %v17325_v17 }
 0xbec   : > { %20919 = vst [vmem:[#allocation144_spill] sm:$0xff] %v17375_v23  ;;  %14058 = vpow2.f32 %v6556_v14  ;;  %v6554_v12 = vmul.f32 1.442695, %v17375_v23  ;;  %v6409_v32 = vpop.f32.mrf.mxu1 }
 0xbed   : > { %v17382_v29 = vpop.eup %14042  ;;  %14060 = vtanh.f32 %v17379_v52  ;;  %v17386_v58 = vadd.f32 %v17325_v17, %v6409_v32 }
 0xbee   : > { %20920 = vst [vmem:[#allocation145_spill] sm:$0xff] %v17382_v29  ;;  %14062 = vpow2.f32 %v6554_v12  ;;  %v6560_v46 = vmul.f32 1.442695, %v17382_v29  ;;  %v13092_v39 = vpop.f32.mrf.mxu1 }
 0xbef   : > { %v17389_v60 = vpop.eup %14044  ;;  %14064 = vtanh.f32 %v17386_v58  ;;  %v17393_v45 = vadd.f32 %v13092_v39, %v17325_v17 }
 0xbf0   : > { %20921 = vst [vmem:[#allocation146_spill] sm:$0xff] %v17389_v60  ;;  %14066 = vpow2.f32 %v6560_v46  ;;  %v6558_v40 = vmul.f32 1.442695, %v17389_v60  ;;  %v6419_v11 = vpop.f32.mrf.mxu1 }
 0xbf1   : > { %v17396_v2 = vpop.eup %14046  ;;  %14068 = vtanh.f32 %v17393_v45  ;;  %v17400_v25 = vadd.f32 %v17325_v17, %v6419_v11 }
 0xbf2   : > { %20922 = vst [vmem:[#allocation147_spill] sm:$0xff] %v17396_v2  ;;  %14070 = vpow2.f32 %v6558_v40  ;;  %v6564_v19 = vmul.f32 1.442695, %v17396_v2  ;;  %v13095_v51 = vpop.f32.mrf.mxu1 }
 0xbf3   : > { %v17403_v9 = vpop.eup %14048  ;;  %14072 = vtanh.f32 %v17400_v25  ;;  %v17407_v16 = vadd.f32 %v13095_v51, %v17325_v17 }
 0xbf4   : > { %20923 = vst [vmem:[#allocation148_spill] sm:$0xff] %v17403_v9  ;;  %14074 = vpow2.f32 %v6564_v19  ;;  %v6562_v14 = vmul.f32 1.442695, %v17403_v9  ;;  %v6429_v42 = vpop.f32.mrf.mxu1 }
 0xbf5   : > { %v14051_v12 = vpop.eup %14050  ;;  %14076 = vtanh.f32 %v17407_v16  ;;  %v17412_v32 = vadd.f32 %v17325_v17, %v6429_v42 }
 0xbf6   : > { %v17414_v46 = vpop.eup %14052  ;;  %14078 = vpow2.f32 %v6562_v14  ;;  %v13098_v39 = vpop.f32.mrf.mxu1  ;;  %6648 = vrot.lane.b32.xlu1 %v14051_v12, %s14651_s24 }
 0xbf7   : > { %20924 = vst [vmem:[#allocation149_spill] sm:$0xff] %v17414_v46  ;;  %v14055_v40 = vpop.eup %14054  ;;  %v6568_v11 = vmul.f32 1.442695, %v17414_v46  ;;  %14080 = vtanh.f32 %v17412_v32  ;;  %v17420_v19 = vadd.f32 %v13098_v39, %v17325_v17 }
 0xbf8   : > { %v17422_v51 = vpop.eup %14056  ;;  %v6439_v2 = vpop.f32.mrf.mxu1  ;;  %6646 = vrot.lane.b32.xlu0 %v14055_v40, %s14651_s24 }
 0xbf9   : > { %20925 = vst [vmem:[#allocation150_spill] sm:$0xff] %v17422_v51  ;;  %v14059_v42 = vpop.eup %14058  ;;  %14082 = vpow2.f32 %v6568_v11  ;;  %v6566_v14 = vmul.f32 1.442695, %v17422_v51  ;;  %v17427_v29 = vadd.f32 %v17325_v17, %v6439_v2 }
 0xbfa   : > { %v17429_v12 = vpop.eup %14060  ;;  %14084 = vtanh.f32 %v17420_v19  ;;  %v13101_v46 = vpop.f32.mrf.mxu1  ;;  %6652 = vrot.lane.b32.xlu1 %v14059_v42, %s14651_s24 }
 0xbfb   : > { %20926 = vst [vmem:[#allocation151_spill] sm:$0xff] %v17429_v12  ;;  %v14063_v39 = vpop.eup %14062  ;;  %14086 = vpow2.f32 %v6566_v14  ;;  %v6572_v9 = vmul.f32 1.442695, %v17429_v12  ;;  %v17435_v40 = vadd.f32 %v13101_v46, %v17325_v17 }
 0xbfc   : > { %v17437_v11 = vpop.eup %14064  ;;  %14088 = vtanh.f32 %v17427_v29  ;;  %v6449_v2 = vpop.f32.mrf.mxu1  ;;  %6650 = vrot.lane.b32.xlu0 %v14063_v39, %s14651_s24 }
 0xbfd   : > { %20927 = vst [vmem:[#allocation152_spill] sm:$0xff] %v17437_v11  ;;  %v14067_v51 = vpop.eup %14066  ;;  %14090 = vpow2.f32 %v6572_v9  ;;  %v6570_v8 = vmul.f32 1.442695, %v17437_v11  ;;  %v17443_v42 = vadd.f32 %v17325_v17, %v6449_v2 }
 0xbfe   : > { %v17445_v14 = vpop.eup %14068  ;;  %14092 = vtanh.f32 %v17435_v40  ;;  %v13104_v46 = vpop.f32.mrf.mxu1  ;;  %6656 = vrot.lane.b32.xlu1 %v14067_v51, %s14651_s24 }
 0xbff   : > { %20928 = vst [vmem:[#allocation153_spill] sm:$0xff] %v17445_v14  ;;  %v14071_v12 = vpop.eup %14070  ;;  %14094 = vpow2.f32 %v6570_v8  ;;  %v6576_v60 = vmul.f32 1.442695, %v17445_v14  ;;  %v17451_v39 = vadd.f32 %v13104_v46, %v17325_v17 }
 0xc00   : > { %v17453_v9 = vpop.eup %14072  ;;  %14096 = vtanh.f32 %v17443_v42  ;;  %v6459_v2 = vpop.f32.mrf.mxu1  ;;  %6654 = vrot.lane.b32.xlu0 %v14071_v12, %s14651_s24 }
 0xc01   : > { %20929 = vst [vmem:[#allocation154_spill] sm:$0xff] %v17453_v9  ;;  %v14075_v11 = vpop.eup %14074  ;;  %14098 = vpow2.f32 %v6576_v60  ;;  %v6574_v28 = vmul.f32 1.442695, %v17453_v9  ;;  %v17459_v51 = vadd.f32 %v17325_v17, %v6459_v2 }
 0xc02   : > { %v17461_v8 = vpop.eup %14076  ;;  %14100 = vtanh.f32 %v17451_v39  ;;  %v13107_v46 = vpop.f32.mrf.mxu1  ;;  %6660 = vrot.lane.b32.xlu1 %v14075_v11, %s14651_s24 }
 0xc03   : > { %20930 = vst [vmem:[#allocation155_spill] sm:$0xff] %v17461_v8  ;;  %v14079_v14 = vpop.eup %14078  ;;  %14102 = vpow2.f32 %v6574_v28  ;;  %v6580_v23 = vmul.f32 1.442695, %v17461_v8  ;;  %v17467_v12 = vadd.f32 %v13107_v46, %v17325_v17 }
 0xc04   : > { %v17469_v60 = vpop.eup %14080  ;;  %14104 = vtanh.f32 %v17459_v51  ;;  %v6469_v2 = vpop.f32.mrf.mxu1  ;;  %6658 = vrot.lane.b32.xlu0 %v14079_v14, %s14651_s24 }
 0xc05   : > { %20931 = vst [vmem:[#allocation156_spill] sm:$0xff] %v17469_v60  ;;  %14106 = vpow2.f32 %v6580_v23  ;;  %v6578_v9 = vmul.f32 1.442695, %v17469_v60  ;;  %v17475_v1 = vadd.f32 %v17325_v17, %v6469_v2 }
 0xc06   : > { %v14083_v11 = vpop.eup %14082  ;;  %14108 = vtanh.f32 %v17467_v12  ;;  %v13110_v28 = vpop.f32.mrf.mxu1 }
 0xc07   : > { %v17478_v8 = vpop.eup %14084  ;;  %14110 = vpow2.f32 %v6578_v9  ;;  %v17481_v46 = vadd.f32 %v13110_v28, %v17325_v17  ;;  %6664 = vrot.lane.b32.xlu1 %v14083_v11, %s14651_s24 }
 0xc08   : > { %20932 = vst [vmem:[#allocation157_spill] sm:$0xff] %v17478_v8  ;;  %v14087_v36 = vpop.eup %14086  ;;  %v6584_v23 = vmul.f32 1.442695, %v17478_v8  ;;  %14112 = vtanh.f32 %v17475_v1  ;;  %v6479_v14 = vpop.f32.mrf.mxu1 }
 0xc09   : > { %v17486_v2 = vpop.eup %14088  ;;  %14114 = vtanh.f32 %v17481_v46  ;;  %v17490_v60 = vadd.f32 %v17325_v17, %v6479_v14  ;;  %6662 = vrot.lane.b32.xlu0 %v14087_v36, %s14651_s24 }
 0xc0a   : > { %20933 = vst [vmem:[#allocation158_spill] sm:$0xff] %v17486_v2  ;;  %v14091_v9 = vpop.eup %14090  ;;  %14116 = vpow2.f32 %v6584_v23  ;;  %v6582_v28 = vmul.f32 1.442695, %v17486_v2  ;;  %v13113_v11 = vpop.f32.mrf.mxu1 }
 0xc0b   : > { %v17494_v22 = vpop.eup %14092  ;;  %14118 = vtanh.f32 %v17490_v60  ;;  %v17498_v8 = vadd.f32 %v13113_v11, %v17325_v17  ;;  %6668 = vrot.lane.b32.xlu1 %v14091_v9, %s14651_s24 }
 0xc0c   : > { %20934 = vst [vmem:[#allocation159_spill] sm:$0xff] %v17494_v22  ;;  %v14095_v13 = vpop.eup %14094  ;;  %14120 = vpow2.f32 %v6582_v28  ;;  %v6588_v14 = vmul.f32 1.442695, %v17494_v22  ;;  %v6489_v57 = vpop.f32.mrf.mxu1 }
 0xc0d   : > { %v17502_v36 = vpop.eup %14096  ;;  %14122 = vtanh.f32 %v17498_v8  ;;  %v17506_v23 = vadd.f32 %v17325_v17, %v6489_v57  ;;  %6666 = vrot.lane.b32.xlu0 %v14095_v13, %s14651_s24 }
 0xc0e   : > { %20935 = vst [vmem:[#allocation160_spill] sm:$0xff] %v17502_v36  ;;  %v14099_v2 = vpop.eup %14098  ;;  %14124 = vpow2.f32 %v6588_v14  ;;  %v6586_v11 = vmul.f32 1.442695, %v17502_v36  ;;  %v13116_v15 = vpop.f32.mrf.mxu1 }
 0xc0f   : > { %v17510_v9 = vpop.eup %14100  ;;  %14126 = vtanh.f32 %v17506_v23  ;;  %v17514_v28 = vadd.f32 %v13116_v15, %v17325_v17  ;;  %6672 = vrot.lane.b32.xlu1 %v14099_v2, %s14651_s24 }
 0xc10   : > { %20936 = vst [vmem:[#allocation161_spill] sm:$0xff] %v17510_v9  ;;  %v14103_v22 = vpop.eup %14102  ;;  %14128 = vpow2.f32 %v6586_v11  ;;  %v6592_v57 = vmul.f32 1.442695, %v17510_v9  ;;  %v6499_v43 = vpop.f32.mrf.mxu1 }
 0xc11   : > { %v17518_v13 = vpop.eup %14104  ;;  %14130 = vtanh.f32 %v17514_v28  ;;  %v17522_v14 = vadd.f32 %v17325_v17, %v6499_v43  ;;  %6670 = vrot.lane.b32.xlu0 %v14103_v22, %s14651_s24 }
 0xc12   : > { %20937 = vst [vmem:[#allocation162_spill] sm:$0xff] %v17518_v13  ;;  %v14107_v36 = vpop.eup %14106  ;;  %14132 = vpow2.f32 %v6592_v57  ;;  %v6590_v15 = vmul.f32 1.442695, %v17518_v13  ;;  %v13119_v27 = vpop.f32.mrf.mxu1 }
 0xc13   : > { %v17526_v2 = vpop.eup %14108  ;;  %14134 = vtanh.f32 %v17522_v14  ;;  %v17530_v11 = vadd.f32 %v13119_v27, %v17325_v17  ;;  %6676 = vrot.lane.b32.xlu1 %v14107_v36, %s14651_s24 }
 0xc14   : > { %20938 = vst [vmem:[#allocation163_spill] sm:$0xff] %v17526_v2  ;;  %v14111_v9 = vpop.eup %14110  ;;  %14136 = vpow2.f32 %v6590_v15  ;;  %v6596_v43 = vmul.f32 1.442695, %v17526_v2  ;;  %v6509_v50 = vpop.f32.mrf.mxu1 }
 0xc15   : > { %v17534_v22 = vpop.eup %14112  ;;  %14138 = vtanh.f32 %v17530_v11  ;;  %v17538_v57 = vadd.f32 %v17325_v17, %v6509_v50  ;;  %6674 = vrot.lane.b32.xlu0 %v14111_v9, %s14651_s24 }
 0xc16   : > { %20939 = vst [vmem:[#allocation164_spill] sm:$0xff] %v17534_v22  ;;  %v17541_v13 = vpop.eup %14114  ;;  %14140 = vpow2.f32 %v6596_v43  ;;  %v6594_v27 = vmul.f32 1.442695, %v17534_v22 }
 0xc17   : > { %20940 = vst [vmem:[#allocation165_spill] sm:$0xff] %v17541_v13  ;;  %v14117_v36 = vpop.eup %14116  ;;  %v6600_v15 = vmul.f32 1.442695, %v17541_v13  ;;  %14142 = vtanh.f32 %v17538_v57 }
 0xc18   : > { %v17546_v2 = vpop.eup %14118  ;;  %14144 = vpow2.f32 %v6594_v27  ;;  %6680 = vrot.lane.b32.xlu1 %v14117_v36, %s14651_s24 }
 0xc19   : > { %20941 = vst [vmem:[#allocation166_spill] sm:$0xff] %v17546_v2  ;;  %v14121_v59 = vpop.eup %14120  ;;  %14146 = vpow2.f32 %v6600_v15  ;;  %v6598_v50 = vmul.f32 1.442695, %v17546_v2 }
 0xc1a   : > { %v17550_v17 = vpop.eup %14122  ;;  %6678 = vrot.lane.b32.xlu0 %v14121_v59, %s14651_s24 }
 0xc1b   : > { %20942 = vst [vmem:[#allocation167_spill] sm:$0xff] %v17550_v17  ;;  %v14125_v9 = vpop.eup %14124  ;;  %14148 = vpow2.f32 %v6598_v50  ;;  %v6604_v43 = vmul.f32 1.442695, %v17550_v17 }
 0xc1c   : > { %v17554_v13 = vpop.eup %14126  ;;  %6684 = vrot.lane.b32.xlu1 %v14125_v9, %s14651_s24 }
 0xc1d   : > { %20943 = vst [vmem:[#allocation168_spill] sm:$0xff] %v17554_v13  ;;  %v14129_v22 = vpop.eup %14128  ;;  %14150 = vpow2.f32 %v6604_v43  ;;  %v6602_v27 = vmul.f32 1.442695, %v17554_v13 }
 0xc1e   : > { %v17558_v36 = vpop.eup %14130  ;;  %6682 = vrot.lane.b32.xlu0 %v14129_v22, %s14651_s24 }
 0xc1f   : > { %20944 = vst [vmem:[#allocation169_spill] sm:$0xff] %v17558_v36  ;;  %v14133_v15 = vpop.eup %14132  ;;  %14152 = vpow2.f32 %v6602_v27  ;;  %v6608_v59 = vmul.f32 1.442695, %v17558_v36 }
 0xc20   : > { %v17562_v2 = vpop.eup %14134  ;;  %6688 = vrot.lane.b32.xlu1 %v14133_v15, %s14651_s24 }
 0xc21   : > { %v14137_v50 = vpop.eup %14136  ;;  %14154 = vpow2.f32 %v6608_v59  ;;  %v6606_v9 = vmul.f32 1.442695, %v17562_v2  ;;  %v10897_v59 = vld [vmem:[%s20495_s3 + $0x20] sm:$0xff] }
 0xc22   : > { %v17566_v17 = vpop.eup %14138  ;;  %6686 = vrot.lane.b32.xlu0 %v14137_v50, %s14651_s24  ;;  %v10896_v50 = vld [vmem:[%s20494_s2 + $0x10] sm:$0xf]  ;;  %13120 = vmatprep.subr.mxu0 %v10897_v59 }
 0xc23   : > { %20945 = vst [vmem:[#allocation170_spill] sm:$0xff] %v17566_v17  ;;  %v14141_v43 = vpop.eup %14140  ;;  %14156 = vpow2.f32 %v6606_v9  ;;  %v6612_v22 = vmul.f32 1.442695, %v17566_v17  ;;  %13170 = vmatprep.subr.msk.mxu1 %vm907_vm0, %v10896_v50  ;;  %13121 = vmatpush3.msra.mxu0 %v10897_v59  ;;  %v14580_v59 = vld [vmem:[%s14740_s23 + $0x18] sm:$0xff] }
 0xc24   : > { %v17570_v13 = vpop.eup %14142  ;;  %6692 = vrot.lane.b32.xlu1 %v14141_v43, %s14651_s24  ;;  %13171 = vmatpush3.msk.msra.mxu1 %vm907_vm0, %v10896_v50  ;;  %v14581_v50 = vld [vmem:[%s14740_s23 + $0x20] sm:$0xff] }
 0xc25   : > { %20946 = vst [vmem:[#allocation171_spill] sm:$0xff] %v17570_v13  ;;  %v14145_v27 = vpop.eup %14144  ;;  %14158 = vpow2.f32 %v6612_v22  ;;  %v6610_v15 = vmul.f32 1.442695, %v17570_v13  ;;  %v14578_v22 = vld [vmem:[%s14740_s23 + $0x8] sm:$0xff] }
 0xc26   : > { %v14147_v9 = vpop.eup %14146  ;;  %6690 = vrot.lane.b32.xlu0 %v14145_v27, %s14651_s24  ;;  %13123 = vmatmul.mubr.msk.f32.vlgmr.msra.gmra.mxu0 %vm424_vm1, %v14578_v22  ;;  %v14579_v27 = vld [vmem:[%s14740_s23 + $0x10] sm:$0xff]  ;;  %v14582_v22 = vld [vmem:[%s14740_s23 + $0x28] sm:$0xff] }
 0xc27   : > { %14160 = vpow2.f32 %v6610_v15  ;;  %13125 = vmatprep.mubr.msk.f32.mxu0 %vm424_vm1, %v14579_v27  ;;  %v14583_v27 = vld [vmem:[%s14740_s23 + $0x30] sm:$0xff] }
 0xc28   : > { %v14149_v43 = vpop.eup %14148  ;;  %6696 = vrot.lane.b32.xlu1 %v14147_v9, %s14651_s24 }
 0xc2a   : > { %v14151_v17 = vpop.eup %14150  ;;  %6694 = vrot.lane.b32.xlu0 %v14149_v43, %s14651_s24  ;;  %13126 = vmatmul.mubr.msk.f32.gmra.mxu0 %vm424_vm1, %v14580_v59  ;;  %v14584_v59 = vld [vmem:[%s14740_s23 + $0x38] sm:$0xff] }
 0xc2b   : > { %13128 = vmatprep.mubr.msk.f32.mxu0 %vm424_vm1, %v14581_v50  ;;  %v14586_v50 = vld [vmem:[%s14740_s23 + $0x48] sm:$0xff] }
 0xc2c   : > { %v14153_v15 = vpop.eup %14152  ;;  %6700 = vrot.lane.b32.xlu1 %v14151_v17, %s14651_s24 }
 0xc2e   : > { %v14155_v9 = vpop.eup %14154  ;;  %6698 = vrot.lane.b32.xlu0 %v14153_v15, %s14651_s24  ;;  %13129 = vmatmul.mubr.msk.f32.gmra.mxu0 %vm424_vm1, %v14582_v22  ;;  %v14588_v22 = vld [vmem:[%s14740_s23 + $0x58] sm:$0xff] }
 0xc2f   : > { %13131 = vmatprep.mubr.msk.f32.mxu0 %vm424_vm1, %v14583_v27  ;;  %v14590_v27 = vld [vmem:[%s14740_s23 + $0x68] sm:$0xff] }
 0xc30   : > { %v14157_v43 = vpop.eup %14156  ;;  %6704 = vrot.lane.b32.xlu1 %v14155_v9, %s14651_s24  ;;  %v14585_v9 = vld [vmem:[%s14740_s23 + $0x40] sm:$0xff] }
 0xc32   : > { %v14159_v17 = vpop.eup %14158  ;;  %6702 = vrot.lane.b32.xlu0 %v14157_v43, %s14651_s24  ;;  %13132 = vmatmul.mubr.msk.f32.gmra.mxu0 %vm424_vm1, %v14584_v59  ;;  %v14587_v43 = vld [vmem:[%s14740_s23 + $0x50] sm:$0xff]  ;;  %v14592_v59 = vld [vmem:[%s14740_s23 + $0x78] sm:$0xff] }
 0xc33   : > { %13134 = vmatprep.mubr.msk.f32.mxu0 %vm424_vm1, %v14585_v9  ;;  %v14593_v9 = vld [vmem:[%s14740_s23 + $0x80] sm:$0xff] }
 0xc34   : > { %v14161_v15 = vpop.eup %14160  ;;  %6708 = vrot.lane.b32.xlu1 %v14159_v17, %s14651_s24  ;;  %v14589_v17 = vld [vmem:[%s14740_s23 + $0x60] sm:$0xff] }
 0xc36   : > { %6706 = vrot.lane.b32.xlu0 %v14161_v15, %s14651_s24  ;;  %13135 = vmatmul.mubr.msk.f32.gmra.mxu0 %vm424_vm1, %v14586_v50  ;;  %v14591_v15 = vld [vmem:[%s14740_s23 + $0x70] sm:$0xff]  ;;  %v14594_v50 = vld [vmem:[%s14740_s23 + $0x88] sm:$0xff] }
 0xc37   : > { %13137 = vmatprep.mubr.msk.f32.mxu0 %vm424_vm1, %v14587_v43  ;;  %v14595_v43 = vld [vmem:[%s14740_s23 + $0x90] sm:$0xff] }
 0xc3a   : > { %13138 = vmatmul.mubr.msk.f32.gmra.mxu0 %vm424_vm1, %v14588_v22  ;;  %v14596_v22 = vld [vmem:[%s14740_s23 + $0x98] sm:$0xff] }
 0xc3b   : > { %13140 = vmatprep.mubr.msk.f32.mxu0 %vm424_vm1, %v14589_v17  ;;  %v14597_v17 = vld [vmem:[%s14740_s23 + $0xa0] sm:$0xff] }
 0xc3e   : > { %13141 = vmatmul.mubr.msk.f32.gmra.mxu0 %vm424_vm1, %v14590_v27  ;;  %v14598_v27 = vld [vmem:[%s14740_s23 + $0xa8] sm:$0xff] }
 0xc3f   : > { %13143 = vmatprep.mubr.msk.f32.mxu0 %vm424_vm1, %v14591_v15  ;;  %v14599_v15 = vld [vmem:[%s14740_s23 + $0xb0] sm:$0xff] }
 0xc42   : > { %13144 = vmatmul.mubr.msk.f32.gmra.mxu0 %vm424_vm1, %v14592_v59  ;;  %v14600_v59 = vld [vmem:[%s14740_s23 + $0xb8] sm:$0xff] }
 0xc43   : > { %13146 = vmatprep.mubr.msk.f32.mxu0 %vm424_vm1, %v14593_v9  ;;  %v14601_v9 = vld [vmem:[%s14740_s23 + $0xc0] sm:$0xff] }
 0xc46   : > { %13147 = vmatmul.mubr.msk.f32.gmra.mxu0 %vm424_vm1, %v14594_v50  ;;  %v14602_v50 = vld [vmem:[%s14740_s23 + $0xc8] sm:$0xff] }
 0xc47   : > { %13149 = vmatprep.mubr.msk.f32.mxu0 %vm424_vm1, %v14595_v43  ;;  %v14603_v43 = vld [vmem:[%s14740_s23 + $0xd0] sm:$0xff] }
 0xc4a   : > { %13150 = vmatmul.mubr.msk.f32.gmra.mxu0 %vm424_vm1, %v14596_v22  ;;  %v14604_v22 = vld [vmem:[%s14740_s23 + $0xd8] sm:$0xff] }
 0xc4b   : > { %13152 = vmatprep.mubr.msk.f32.mxu0 %vm424_vm1, %v14597_v17  ;;  %v14605_v17 = vld [vmem:[%s14740_s23 + $0xe0] sm:$0xff] }
 0xc4e   : > { %13153 = vmatmul.mubr.msk.f32.gmra.mxu0 %vm424_vm1, %v14598_v27  ;;  %v14606_v27 = vld [vmem:[%s14740_s23 + $0xe8] sm:$0xff] }
 0xc4f   : > { %13155 = vmatprep.mubr.msk.f32.mxu0 %vm424_vm1, %v14599_v15  ;;  %v14607_v15 = vld [vmem:[%s14740_s23 + $0xf0] sm:$0xff] }
 0xc52   : > { %13156 = vmatmul.mubr.msk.f32.gmra.mxu0 %vm424_vm1, %v14600_v59  ;;  %v14608_v59 = vld [vmem:[%s14740_s23 + $0xf8] sm:$0xff] }
 0xc53   : > { %13158 = vmatprep.mubr.msk.f32.mxu0 %vm424_vm1, %v14601_v9 }
 0xc56   : > { %13159 = vmatmul.mubr.msk.f32.gmra.mxu0 %vm424_vm1, %v14602_v50 }
 0xc57   : > { %13161 = vmatprep.mubr.msk.f32.mxu0 %vm424_vm1, %v14603_v43 }
 0xc5a   : > { %13162 = vmatmul.mubr.msk.f32.gmra.mxu0 %vm424_vm1, %v14604_v22 }
 0xc5b   : > { %13164 = vmatprep.mubr.msk.f32.mxu0 %vm424_vm1, %v14605_v17 }
 0xc5e   : > { %13165 = vmatmul.mubr.msk.f32.gmra.mxu0 %vm424_vm1, %v14606_v27 }
 0xc5f   : > { %13167 = vmatprep.mubr.msk.f32.mxu0 %vm424_vm1, %v14607_v15 }
 0xc62   : > { %13168 = vmatmul.mubr.msk.f32.gmra.mxu0 %vm424_vm1, %v14608_v59 }
 0xc68   : > { %v6649_v9 = vpop.permute.xlu1 %6648 }
 0xc69   : > { %v6743_v50 = vmul.f32 %v6649_v9, %v16173_v0 }
 0xc6a   : > { %v6647_v36 = vpop.permute.xlu0 %6646 }
 0xc6b   : > { %v17655_v43 = vadd.f32 %v6743_v50, %v17328_v3  ;;  %v6742_v22 = vmul.f32 %v6647_v36, %v16177_v63 }
 0xc6c   : > { %v6653_v13 = vpop.permute.xlu1 %6652 }
 0xc6d   : > { %20947 = vst [vmem:[#allocation172_spill] sm:$0xff] %v17655_v43  ;;  %v17659_v17 = vadd.f32 %v6742_v22, %v17332_v44  ;;  %v6745_v27 = vmul.f32 %v6653_v13, %v16183_v21  ;;  %7197 = vrot.lane.b32.xlu1 %v17655_v43, %s14650_s20  ;;  %v21238_v43 = vld [vmem:[#allocation120_spill] sm:$0xff] }
 0xc6e   : > { %v6651_v15 = vpop.permute.xlu0 %6650 }
 0xc6f   : > { %20948 = vst [vmem:[#allocation173_spill] sm:$0xff] %v17659_v17  ;;  %v17665_v59 = vadd.f32 %v6745_v27, %v17336_v41  ;;  %v6744_v0 = vmul.f32 %v6651_v15, %v16189_v55  ;;  %7195 = vrot.lane.b32.xlu0 %v17659_v17, %s14650_s20 }
 0xc70   : > { %v6657_v3 = vpop.permute.xlu1 %6656 }
 0xc71   : > { %20949 = vst [vmem:[#allocation174_spill] sm:$0xff] %v17665_v59  ;;  %v17671_v63 = vadd.f32 %v6744_v0, %v17340_v20  ;;  %v6747_v44 = vmul.f32 %v6657_v3, %v16195_v18  ;;  %7201 = vrot.lane.b32.xlu1 %v17665_v59, %s14650_s20  ;;  %v20953_v20 = vld [vmem:[#allocation78_spill] sm:$0xff]  ;;  %v20959_v3 = vld [vmem:[#allocation81_spill] sm:$0xff] }
 0xc72   : > { %v6655_v21 = vpop.permute.xlu0 %6654 }
 0xc73   : > { %20950 = vst [vmem:[#allocation175_spill] sm:$0xff] %v17671_v63  ;;  %v17677_v13 = vadd.f32 %v6747_v44, %v17344_v35  ;;  %v6746_v41 = vmul.f32 %v6655_v21, %v16201_v26  ;;  %7199 = vrot.lane.b32.xlu0 %v17671_v63, %s14650_s20  ;;  %v20955_v35 = vld [vmem:[#allocation79_spill] sm:$0xff] }
 0xc74   : > { %v6661_v55 = vpop.permute.xlu1 %6660 }
 0xc75   : > { %20951 = vst [vmem:[#allocation176_spill] sm:$0xff] %v17677_v13  ;;  %v17683_v36 = vadd.f32 %v6746_v41, %v17348_v31  ;;  %v6749_v9 = vmul.f32 %v6661_v55, %v20953_v20  ;;  %7205 = vrot.lane.b32.xlu1 %v17677_v13, %s14650_s20  ;;  %v20957_v31 = vld [vmem:[#allocation80_spill] sm:$0xff] }
 0xc76   : > { %v6659_v18 = vpop.permute.xlu0 %6658 }
 0xc77   : > { %20952 = vst [vmem:[#allocation177_spill] sm:$0xff] %v17683_v36  ;;  %v17689_v50 = vadd.f32 %v6749_v9, %v17352_v5  ;;  %v6748_v22 = vmul.f32 %v6659_v18, %v20955_v35  ;;  %7203 = vrot.lane.b32.xlu0 %v17683_v36, %s14650_s20  ;;  %v20963_v18 = vld [vmem:[#allocation83_spill] sm:$0xff]  ;;  %v14640_v36 = vld [vmem:[%s14740_s23 + $0xf8] sm:$0xff] }
 0xc79   : > { %20954 = vst [vmem:[#allocation78_spill] sm:$0xff] %v17689_v50  ;;  %v17695_v26 = vadd.f32 %v6748_v22, %v17356_v48  ;;  %v6665_v27 = vpop.permute.xlu1 %6664  ;;  %7209 = vrot.lane.b32.xlu1 %v17689_v50, %s14650_s20  ;;  %v20961_v48 = vld [vmem:[#allocation82_spill] sm:$0xff] }
 0xc7a   : > { %v6751_v15 = vmul.f32 %v6665_v27, %v20957_v31 }
 0xc7b   : > { %20956 = vst [vmem:[#allocation79_spill] sm:$0xff] %v17695_v26  ;;  %v6663_v0 = vpop.permute.xlu0 %6662  ;;  %7207 = vrot.lane.b32.xlu0 %v17695_v26, %s14650_s20 }
 0xc7c   : > { %v17703_v5 = vadd.f32 %v6751_v15, %v17365_v38  ;;  %v6750_v44 = vmul.f32 %v6663_v0, %v20959_v3 }
 0xc7d   : > { %v6669_v21 = vpop.permute.xlu1 %6668 }
 0xc7e   : > { %20958 = vst [vmem:[#allocation80_spill] sm:$0xff] %v17703_v5  ;;  %v17707_v41 = vadd.f32 %v6750_v44, %v17372_v47  ;;  %v6753_v55 = vmul.f32 %v6669_v21, %v20961_v48  ;;  %7213 = vrot.lane.b32.xlu1 %v17703_v5, %s14650_s20  ;;  %v20965_v47 = vld [vmem:[#allocation84_spill] sm:$0xff]  ;;  %v14622_v5 = vld [vmem:[%s14740_s23 + $0x68] sm:$0xff] }
 0xc7f   : > { %v6667_v20 = vpop.permute.xlu0 %6666 }
 0xc80   : > { %20960 = vst [vmem:[#allocation81_spill] sm:$0xff] %v17707_v41  ;;  %v17713_v9 = vadd.f32 %v6753_v55, %v17379_v52  ;;  %v6752_v35 = vmul.f32 %v6667_v20, %v20963_v18  ;;  %7211 = vrot.lane.b32.xlu0 %v17707_v41, %s14650_s20  ;;  %v20967_v52 = vld [vmem:[#allocation85_spill] sm:$0xff]  ;;  %v14613_v41 = vld [vmem:[%s14740_s23 + $0x20] sm:$0xff] }
 0xc81   : > { %v6673_v38 = vpop.permute.xlu1 %6672 }
 0xc82   : > { %20962 = vst [vmem:[#allocation82_spill] sm:$0xff] %v17713_v9  ;;  %v17719_v22 = vadd.f32 %v6752_v35, %v17386_v58  ;;  %v6755_v27 = vmul.f32 %v6673_v38, %v20965_v47  ;;  %7217 = vrot.lane.b32.xlu1 %v17713_v9, %s14650_s20  ;;  %v20969_v58 = vld [vmem:[#allocation86_spill] sm:$0xff]  ;;  %v14612_v9 = vld [vmem:[%s14740_s23 + $0x18] sm:$0xff] }
 0xc83   : > { %v6671_v31 = vpop.permute.xlu0 %6670 }
 0xc84   : > { %20964 = vst [vmem:[#allocation83_spill] sm:$0xff] %v17719_v22  ;;  %v17725_v15 = vadd.f32 %v6755_v27, %v17393_v45  ;;  %v6754_v0 = vmul.f32 %v6671_v31, %v20967_v52  ;;  %7215 = vrot.lane.b32.xlu0 %v17719_v22, %s14650_s20  ;;  %v20971_v45 = vld [vmem:[#allocation87_spill] sm:$0xff]  ;;  %v20975_v27 = vld [vmem:[#allocation89_spill] sm:$0xff] }
 0xc85   : > { %v6677_v3 = vpop.permute.xlu1 %6676 }
 0xc86   : > { %20966 = vst [vmem:[#allocation84_spill] sm:$0xff] %v17725_v15  ;;  %v17731_v44 = vadd.f32 %v6754_v0, %v17400_v25  ;;  %v6757_v21 = vmul.f32 %v6677_v3, %v20969_v58  ;;  %7221 = vrot.lane.b32.xlu1 %v17725_v15, %s14650_s20  ;;  %v20973_v25 = vld [vmem:[#allocation88_spill] sm:$0xff] }
 0xc87   : > { %v6675_v48 = vpop.permute.xlu0 %6674 }
 0xc88   : > { %20968 = vst [vmem:[#allocation85_spill] sm:$0xff] %v17731_v44  ;;  %v17737_v55 = vadd.f32 %v6757_v21, %v17407_v16  ;;  %v6756_v20 = vmul.f32 %v6675_v48, %v20971_v45  ;;  %7219 = vrot.lane.b32.xlu0 %v17731_v44, %s14650_s20  ;;  %v20979_v48 = vld [vmem:[#allocation91_spill] sm:$0xff] }
 0xc89   : > { %v21114_v44 = vld [vmem:[#allocation155_spill] sm:$0xff] }
 0xc8a   : > { %20970 = vst [vmem:[#allocation86_spill] sm:$0xff] %v17737_v55  ;;  %v17743_v18 = vadd.f32 %v6756_v20, %v17412_v32  ;;  %v6681_v35 = vpop.permute.xlu1 %6680  ;;  %7225 = vrot.lane.b32.xlu1 %v17737_v55, %s14650_s20  ;;  %v20977_v32 = vld [vmem:[#allocation90_spill] sm:$0xff] }
 0xc8b   : > { %v6759_v38 = vmul.f32 %v6681_v35, %v20973_v25 }
 0xc8c   : > { %20972 = vst [vmem:[#allocation87_spill] sm:$0xff] %v17743_v18  ;;  %v6679_v47 = vpop.permute.xlu0 %6678  ;;  %7223 = vrot.lane.b32.xlu0 %v17743_v18, %s14650_s20 }
 0xc8d   : > { %v17751_v16 = vadd.f32 %v6759_v38, %v17420_v19  ;;  %v6758_v31 = vmul.f32 %v6679_v47, %v20975_v27 }
 0xc8e   : > { %v6685_v52 = vpop.permute.xlu1 %6684 }
 0xc8f   : > { %20974 = vst [vmem:[#allocation88_spill] sm:$0xff] %v17751_v16  ;;  %v17755_v0 = vadd.f32 %v6758_v31, %v17427_v29  ;;  %v6761_v3 = vmul.f32 %v6685_v52, %v20977_v32  ;;  %7229 = vrot.lane.b32.xlu1 %v17751_v16, %s14650_s20  ;;  %v20981_v29 = vld [vmem:[#allocation92_spill] sm:$0xff] }
 0xc90   : > { %v6683_v58 = vpop.permute.xlu0 %6682 }
 0xc91   : > { %20976 = vst [vmem:[#allocation89_spill] sm:$0xff] %v17755_v0  ;;  %v17761_v21 = vadd.f32 %v6761_v3, %v17435_v40  ;;  %v6760_v45 = vmul.f32 %v6683_v58, %v20979_v48  ;;  %7227 = vrot.lane.b32.xlu0 %v17755_v0, %s14650_s20  ;;  %v20983_v40 = vld [vmem:[#allocation93_spill] sm:$0xff] }
 0xc92   : > { %v6689_v19 = vpop.permute.xlu1 %6688 }
 0xc93   : > { %20978 = vst [vmem:[#allocation90_spill] sm:$0xff] %v17761_v21  ;;  %v17767_v20 = vadd.f32 %v6760_v45, %v17443_v42  ;;  %v6763_v35 = vmul.f32 %v6689_v19, %v20981_v29  ;;  %7233 = vrot.lane.b32.xlu1 %v17761_v21, %s14650_s20  ;;  %v20985_v42 = vld [vmem:[#allocation94_spill] sm:$0xff] }
 0xc94   : > { %v6687_v25 = vpop.permute.xlu0 %6686 }
 0xc95   : > { %20980 = vst [vmem:[#allocation91_spill] sm:$0xff] %v17767_v20  ;;  %v17773_v38 = vadd.f32 %v6763_v35, %v17451_v39  ;;  %v6762_v47 = vmul.f32 %v6687_v25, %v20983_v40  ;;  %7231 = vrot.lane.b32.xlu0 %v17767_v20, %s14650_s20  ;;  %v20987_v39 = vld [vmem:[#allocation95_spill] sm:$0xff] }
 0xc96   : > { %v6693_v27 = vpop.permute.xlu1 %6692 }
 0xc97   : > { %20982 = vst [vmem:[#allocation92_spill] sm:$0xff] %v17773_v38  ;;  %v17779_v31 = vadd.f32 %v6762_v47, %v17459_v51  ;;  %v6765_v52 = vmul.f32 %v6693_v27, %v20985_v42  ;;  %7237 = vrot.lane.b32.xlu1 %v17773_v38, %s14650_s20  ;;  %v20989_v51 = vld [vmem:[#allocation96_spill] sm:$0xff] }
 0xc98   : > { %v6691_v32 = vpop.permute.xlu0 %6690  ;;  %v21109_v38 = vld [vmem:[#allocation156_spill] sm:$0xff] }
 0xc99   : > { %20984 = vst [vmem:[#allocation93_spill] sm:$0xff] %v17779_v31  ;;  %v17785_v3 = vadd.f32 %v6765_v52, %v17467_v12  ;;  %v6764_v58 = vmul.f32 %v6691_v32, %v20987_v39  ;;  %7235 = vrot.lane.b32.xlu0 %v17779_v31, %s14650_s20  ;;  %v20991_v12 = vld [vmem:[#allocation97_spill] sm:$0xff] }
 0xc9a   : > { %v6697_v48 = vpop.permute.xlu1 %6696 }
 0xc9b   : > { %20986 = vst [vmem:[#allocation94_spill] sm:$0xff] %v17785_v3  ;;  %v17791_v45 = vadd.f32 %v6764_v58, %v17475_v1  ;;  %v6767_v19 = vmul.f32 %v6697_v48, %v20989_v51  ;;  %7241 = vrot.lane.b32.xlu1 %v17785_v3, %s14650_s20  ;;  %v20993_v1 = vld [vmem:[#allocation98_spill] sm:$0xff] }
 0xc9c   : > { %v6695_v29 = vpop.permute.xlu0 %6694 }
 0xc9d   : > { %20988 = vst [vmem:[#allocation95_spill] sm:$0xff] %v17791_v45  ;;  %v17797_v35 = vadd.f32 %v6767_v19, %v17481_v46  ;;  %v6766_v25 = vmul.f32 %v6695_v29, %v20991_v12  ;;  %7239 = vrot.lane.b32.xlu0 %v17791_v45, %s14650_s20  ;;  %v20995_v46 = vld [vmem:[#allocation99_spill] sm:$0xff] }
 0xc9e   : > { %v6701_v40 = vpop.permute.xlu1 %6700  ;;  %v21108_v45 = vld [vmem:[#allocation151_spill] sm:$0xff] }
 0xc9f   : > { %20990 = vst [vmem:[#allocation96_spill] sm:$0xff] %v17797_v35  ;;  %v17803_v47 = vadd.f32 %v6766_v25, %v17490_v60  ;;  %v6769_v27 = vmul.f32 %v6701_v40, %v20993_v1  ;;  %7245 = vrot.lane.b32.xlu1 %v17797_v35, %s14650_s20  ;;  %v20997_v60 = vld [vmem:[#allocation100_spill] sm:$0xff]  ;;  %v6839_v3 = vsel %vm842_vm2, %v21108_v45, 0.0  ;;  %v21110_v45 = vld [vmem:[#allocation153_spill] sm:$0xff] }
 0xca0   : > { %v6699_v42 = vpop.permute.xlu0 %6698 }
 0xca1   : > { %20992 = vst [vmem:[#allocation97_spill] sm:$0xff] %v17803_v47  ;;  %v17809_v52 = vadd.f32 %v6769_v27, %v17498_v8  ;;  %v6768_v32 = vmul.f32 %v6699_v42, %v20995_v46  ;;  %7243 = vrot.lane.b32.xlu0 %v17803_v47, %s14650_s20  ;;  %v20999_v8 = vld [vmem:[#allocation101_spill] sm:$0xff] }
 0xca2   : > { %v6705_v39 = vpop.permute.xlu1 %6704 }
 0xca3   : > { %20994 = vst [vmem:[#allocation98_spill] sm:$0xff] %v17809_v52  ;;  %v17815_v58 = vadd.f32 %v6768_v32, %v17506_v23  ;;  %v6771_v48 = vmul.f32 %v6705_v39, %v20997_v60  ;;  %7249 = vrot.lane.b32.xlu1 %v17809_v52, %s14650_s20  ;;  %v21001_v23 = vld [vmem:[#allocation102_spill] sm:$0xff]  ;;  %v21007_v60 = vld [vmem:[#allocation4_spill] sm:$0xff] }
 0xca4   : > { %v6703_v51 = vpop.permute.xlu0 %6702 }
 0xca5   : > { %20996 = vst [vmem:[#allocation99_spill] sm:$0xff] %v17815_v58  ;;  %v17821_v19 = vadd.f32 %v6771_v48, %v17514_v28  ;;  %v6770_v29 = vmul.f32 %v6703_v51, %v20999_v8  ;;  %7247 = vrot.lane.b32.xlu0 %v17815_v58, %s14650_s20  ;;  %v21003_v28 = vld [vmem:[#allocation103_spill] sm:$0xff]  ;;  %v2029_v48 = vsel %vm842_vm2, %v21007_v60, 0.0  ;;  %v21009_v8 = vld [vmem:[#allocation5_spill] sm:$0xff] }
 0xca6   : > { %v6709_v12 = vpop.permute.xlu1 %6708  ;;  %v21015_v60 = vld [vmem:[#allocation11_spill] sm:$0xff] }
 0xca7   : > { %20998 = vst [vmem:[#allocation100_spill] sm:$0xff] %v17821_v19  ;;  %v17827_v25 = vadd.f32 %v6770_v29, %v17522_v14  ;;  %v6773_v40 = vmul.f32 %v6709_v12, %v21001_v23  ;;  %7253 = vrot.lane.b32.xlu1 %v17821_v19, %s14650_s20  ;;  %v21005_v14 = vld [vmem:[#allocation3_spill] sm:$0xff]  ;;  %v2032_v29 = vsel %vm842_vm2, %v21009_v8, 0.0  ;;  %v21010_v12 = vld [vmem:[#allocation8_spill] sm:$0xff] }
 0xca8   : > { %v6707_v1 = vpop.permute.xlu0 %6706  ;;  %v2023_v32 = vsel %vm842_vm2, %v21005_v14, 0.0  ;;  %v2041_v23 = vsel %vm842_vm2, %v21010_v12, 0.0  ;;  %v21013_v14 = vld [vmem:[#allocation9_spill] sm:$0xff]  ;;  %v21016_v8 = vld [vmem:[#allocation15_spill] sm:$0xff] }
 0xca9   : > { %21000 = vst [vmem:[#allocation101_spill] sm:$0xff] %v17827_v25  ;;  %v17833_v27 = vadd.f32 %v6773_v40, %v17530_v11  ;;  %v6772_v42 = vmul.f32 %v6707_v1, %v21003_v28  ;;  %7251 = vrot.lane.b32.xlu0 %v17827_v25, %s14650_s20  ;;  %v21006_v11 = vld [vmem:[#allocation2_spill] sm:$0xff]  ;;  %v21011_v40 = vld [vmem:[#allocation7_spill] sm:$0xff]  ;;  %v21017_v12 = vld [vmem:[#allocation13_spill] sm:$0xff] }
 0xcaa   : > { %v2026_v39 = vsel %vm842_vm2, %v21006_v11, 0.0  ;;  %v2038_v1 = vsel %vm842_vm2, %v21011_v40, 0.0  ;;  %v21012_v28 = vld [vmem:[#allocation10_spill] sm:$0xff]  ;;  %v21014_v11 = vld [vmem:[#allocation12_spill] sm:$0xff] }
 0xcab   : > { %21002 = vst [vmem:[#allocation102_spill] sm:$0xff] %v17833_v27  ;;  %v17839_v46 = vadd.f32 %v6772_v42, %v17538_v57  ;;  %7257 = vrot.lane.b32.xlu1 %v17833_v27, %s14650_s20  ;;  %v21008_v57 = vld [vmem:[#allocation6_spill] sm:$0xff]  ;;  %v2047_v42 = vsel %vm842_vm2, %v21012_v28, 0.0  ;;  %v21018_v28 = vld [vmem:[#allocation17_spill] sm:$0xff] }
 0xcac   : > { %v2035_v51 = vsel %vm842_vm2, %v21008_v57, 0.0 }
 0xcad   : > { %21004 = vst [vmem:[#allocation103_spill] sm:$0xff] %v17839_v46  ;;  %7255 = vrot.lane.b32.xlu0 %v17839_v46, %s14650_s20  ;;  %v21098_v46 = vld [vmem:[#allocation145_spill] sm:$0xff] }
 0xcae   : > { %v6821_v19 = vsel %vm842_vm2, %v21098_v46, 0.0 }
 0xccc   : > { %2024 = vadd.xlane.f32.xlu0 %v2023_v32  ;;  %v2044_v32 = vsel %vm842_vm2, %v21013_v14, 0.0  ;;  %v21019_v14 = vld [vmem:[#allocation14_spill] sm:$0xff] }
 0xccf   : > { %2027 = vadd.xlane.f32.xlu1 %v2026_v39  ;;  %v2053_v39 = vsel %vm842_vm2, %v21014_v11, 0.0 }
 0xcd0   : > { %2030 = vadd.xlane.f32.xlu0 %v2029_v48  ;;  %v2050_v48 = vsel %vm842_vm2, %v21015_v60, 0.0  ;;  %v21020_v60 = vld [vmem:[#allocation19_spill] sm:$0xff] }
 0xcd3   : > { %2036 = vadd.xlane.f32.xlu1 %v2035_v51 }
 0xcd4   : > { %2033 = vadd.xlane.f32.xlu0 %v2032_v29  ;;  %v2059_v29 = vsel %vm842_vm2, %v21016_v8, 0.0 }
 0xcd7   : > { %2042 = vadd.xlane.f32.xlu1 %v2041_v23  ;;  %v2056_v23 = vsel %vm842_vm2, %v21017_v12, 0.0  ;;  %v10980_v12 = vld [vmem:[%s20497_s5 + $0x278] sm:$0xff] }
 0xcd8   : > { %2039 = vadd.xlane.f32.xlu0 %v2038_v1  ;;  %13220 = vmatprep.subr.mxu0 %v10980_v12 }
 0xcd9   : > { %13221 = vmatpush3.msra.mxu0 %v10980_v12 }
 0xcdb   : > { %2048 = vadd.xlane.f32.xlu1 %v2047_v42  ;;  %v2065_v42 = vsel %vm842_vm2, %v21018_v28, 0.0 }
 0xcdc   : > { %2045 = vadd.xlane.f32.xlu0 %v2044_v32  ;;  %v2062_v32 = vsel %vm842_vm2, %v21019_v14, 0.0  ;;  %v10979_v14 = vld [vmem:[%s20497_s5 + $0x270] sm:$0xff] }
 0xcdd   : > { %13222 = vmatprep.subr.mxu0 %v10979_v14 }
 0xcde   : > { %13223 = vmatpush3.msra.mxu0 %v10979_v14 }
 0xcdf   : > { %2054 = vadd.xlane.f32.xlu1 %v2053_v39  ;;  %v7198_v57 = vpop.permute.xlu1 %7197 }
 0xce0   : > { %2051 = vadd.xlane.f32.xlu0 %v2050_v48  ;;  %v2071_v48 = vsel %vm842_vm2, %v21020_v60, 0.0  ;;  %v21025_v60 = vld [vmem:[#allocation20_spill] sm:$0xff] }
 0xce1   : > { %v7196_v51 = vpop.permute.xlu0 %7195 }
 0xce2   : > { %13172 = vmatprep.mubr.msk.f32.mxu1 %vm842_vm2, %v7196_v51 }
 0xce3   : > { %2060 = vadd.xlane.f32.xlu1 %v2059_v29  ;;  %v7202_v40 = vpop.permute.xlu1 %7201  ;;  %13173 = vmatmul.mubr.msk.f32.vlgmr.msra.gmra.mxu1 %vm842_vm2, %v7198_v57  ;;  %v21021_v57 = vld [vmem:[#allocation16_spill] sm:$0xff] }
 0xce4   : > { %2057 = vadd.xlane.f32.xlu0 %v2056_v23  ;;  %v2068_v51 = vsel %vm842_vm2, %v21021_v57, 0.0  ;;  %v21022_v23 = vld [vmem:[#allocation21_spill] sm:$0xff] }
 0xce5   : > { %v7200_v1 = vpop.permute.xlu0 %7199 }
 0xce6   : > { %13175 = vmatprep.mubr.msk.f32.mxu1 %vm842_vm2, %v7200_v1  ;;  %v21023_v1 = vld [vmem:[#allocation18_spill] sm:$0xff] }
 0xce7   : > { %2066 = vadd.xlane.f32.xlu1 %v2065_v42  ;;  %v7206_v11 = vpop.permute.xlu1 %7205  ;;  %13176 = vmatmul.mubr.msk.f32.gmra.mxu1 %vm842_vm2, %v7202_v40  ;;  %v2077_v40 = vsel %vm842_vm2, %v21022_v23, 0.0  ;;  %v2074_v28 = vsel %vm842_vm2, %v21023_v1, 0.0  ;;  %v21027_v23 = vld [vmem:[#allocation22_spill] sm:$0xff] }
 0xce8   : > { %2063 = vadd.xlane.f32.xlu0 %v2062_v32  ;;  %v21024_v32 = vld [vmem:[#allocation23_spill] sm:$0xff] }
 0xce9   : > { %v7204_v39 = vpop.permute.xlu0 %7203 }
 0xcea   : > { %13178 = vmatprep.mubr.msk.f32.mxu1 %vm842_vm2, %v7204_v39 }
 0xceb   : > { %2072 = vadd.xlane.f32.xlu1 %v2071_v48  ;;  %v7210_v8 = vpop.permute.xlu1 %7209  ;;  %13179 = vmatmul.mubr.msk.f32.gmra.mxu1 %vm842_vm2, %v7206_v11  ;;  %v2083_v11 = vsel %vm842_vm2, %v21024_v32, 0.0  ;;  %v2080_v48 = vsel %vm842_vm2, %v21025_v60, 0.0 }
 0xcec   : > { %2069 = vadd.xlane.f32.xlu0 %v2068_v51  ;;  %v10978_v51 = vld [vmem:[%s20497_s5 + $0x268] sm:$0xff] }
 0xced   : > { %v7208_v29 = vpop.permute.xlu0 %7207  ;;  %13224 = vmatprep.subr.mxu0 %v10978_v51 }
 0xcee   : > { %13181 = vmatprep.mubr.msk.f32.mxu1 %vm842_vm2, %v7208_v29  ;;  %13225 = vmatpush3.msra.mxu0 %v10978_v51 }
 0xcef   : > { %2078 = vadd.xlane.f32.xlu1 %v2077_v40  ;;  %13182 = vmatmul.mubr.msk.f32.gmra.mxu1 %vm842_vm2, %v7210_v8  ;;  %v21026_v8 = vld [vmem:[#allocation24_spill] sm:$0xff]  ;;  %v2086_v40 = vsel %vm842_vm2, %v21027_v23, 0.0 }
 0xcf0   : > { %2075 = vadd.xlane.f32.xlu0 %v2074_v28  ;;  %v7214_v42 = vpop.permute.xlu1 %7213  ;;  %v2089_v29 = vsel %vm842_vm2, %v21026_v8, 0.0  ;;  %v10977_v28 = vld [vmem:[%s20497_s5 + $0x260] sm:$0xff] }
 0xcf1   : > { %13226 = vmatprep.subr.mxu0 %v10977_v28 }
 0xcf2   : > { %v7212_v39 = vpop.permute.xlu0 %7211  ;;  %13227 = vmatpush3.msra.mxu0 %v10977_v28 }
 0xcf3   : > { %2084 = vadd.xlane.f32.xlu1 %v2083_v11  ;;  %13184 = vmatprep.mubr.msk.f32.mxu1 %vm842_vm2, %v7212_v39  ;;  %v21029_v11 = vld [vmem:[#allocation25_spill] sm:$0xff] }
 0xcf4   : > { %2081 = vadd.xlane.f32.xlu0 %v2080_v48  ;;  %v7218_v57 = vpop.permute.xlu1 %7217  ;;  %13185 = vmatmul.mubr.msk.f32.gmra.mxu1 %vm842_vm2, %v7214_v42  ;;  %v21028_v42 = vld [vmem:[#allocation26_spill] sm:$0xff]  ;;  %v2092_v39 = vsel %vm842_vm2, %v21029_v11, 0.0  ;;  %v10976_v48 = vld [vmem:[%s20497_s5 + $0x258] sm:$0xff] }
 0xcf5   : > { %v2095_v14 = vsel %vm842_vm2, %v21028_v42, 0.0  ;;  %13228 = vmatprep.subr.mxu0 %v10976_v48 }
 0xcf6   : > { %v7216_v12 = vpop.permute.xlu0 %7215  ;;  %13229 = vmatpush3.msra.mxu0 %v10976_v48 }
 0xcf7   : > { %2090 = vadd.xlane.f32.xlu1 %v2089_v29  ;;  %13187 = vmatprep.mubr.msk.f32.mxu1 %vm842_vm2, %v7216_v12  ;;  %v21031_v29 = vld [vmem:[#allocation27_spill] sm:$0xff] }
 0xcf8   : > { %2087 = vadd.xlane.f32.xlu0 %v2086_v40  ;;  %v7222_v1 = vpop.permute.xlu1 %7221  ;;  %13188 = vmatmul.mubr.msk.f32.gmra.mxu1 %vm842_vm2, %v7218_v57  ;;  %v21030_v57 = vld [vmem:[#allocation28_spill] sm:$0xff]  ;;  %v2098_v12 = vsel %vm842_vm2, %v21031_v29, 0.0 }
 0xcf9   : > { %v2101_v51 = vsel %vm842_vm2, %v21030_v57, 0.0  ;;  %v10975_v40 = vld [vmem:[%s20497_s5 + $0x250] sm:$0xff] }
 0xcfa   : > { %v7220_v32 = vpop.permute.xlu0 %7219  ;;  %13230 = vmatprep.subr.mxu0 %v10975_v40 }
 0xcfb   : > { %2096 = vadd.xlane.f32.xlu1 %v2095_v14  ;;  %13190 = vmatprep.mubr.msk.f32.mxu1 %vm842_vm2, %v7220_v32  ;;  %v21033_v14 = vld [vmem:[#allocation29_spill] sm:$0xff] }
 0xcfc   : > { %2093 = vadd.xlane.f32.xlu0 %v2092_v39  ;;  %v7226_v60 = vpop.permute.xlu1 %7225  ;;  %13191 = vmatmul.mubr.msk.f32.gmra.mxu1 %vm842_vm2, %v7222_v1  ;;  %v21032_v1 = vld [vmem:[#allocation30_spill] sm:$0xff]  ;;  %v2104_v32 = vsel %vm842_vm2, %v21033_v14, 0.0  ;;  %v10974_v39 = vld [vmem:[%s20497_s5 + $0x248] sm:$0xff] }
 0xcfd   : > { %v2107_v28 = vsel %vm842_vm2, %v21032_v1, 0.0  ;;  %13231 = vmatpush3.msra.mxu0 %v10975_v40 }
 0xcfe   : > { %v7224_v8 = vpop.permute.xlu0 %7223  ;;  %13232 = vmatprep.subr.mxu0 %v10974_v39 }
 0xcff   : > { %2102 = vadd.xlane.f32.xlu1 %v2101_v51  ;;  %13193 = vmatprep.mubr.msk.f32.mxu1 %vm842_vm2, %v7224_v8  ;;  %v21035_v51 = vld [vmem:[#allocation31_spill] sm:$0xff] }
 0xd00   : > { %2099 = vadd.xlane.f32.xlu0 %v2098_v12  ;;  %13194 = vmatmul.mubr.msk.f32.gmra.mxu1 %vm842_vm2, %v7226_v60  ;;  %v21034_v60 = vld [vmem:[#allocation32_spill] sm:$0xff]  ;;  %v2110_v8 = vsel %vm842_vm2, %v21035_v51, 0.0  ;;  %v10973_v12 = vld [vmem:[%s20497_s5 + $0x240] sm:$0xff] }
 0xd01   : > { %v7230_v23 = vpop.permute.xlu1 %7229  ;;  %v2113_v48 = vsel %vm842_vm2, %v21034_v60, 0.0  ;;  %13233 = vmatpush3.msra.mxu0 %v10974_v39 }
 0xd02   : > { %13234 = vmatprep.subr.mxu0 %v10973_v12 }
 0xd03   : > { %2108 = vadd.xlane.f32.xlu1 %v2107_v28  ;;  %v7228_v42 = vpop.permute.xlu0 %7227  ;;  %v21037_v28 = vld [vmem:[#allocation33_spill] sm:$0xff]  ;;  %13235 = vmatpush3.msra.mxu0 %v10973_v12 }
 0xd04   : > { %2105 = vadd.xlane.f32.xlu0 %v2104_v32  ;;  %13196 = vmatprep.mubr.msk.f32.mxu1 %vm842_vm2, %v7228_v42  ;;  %v2116_v42 = vsel %vm842_vm2, %v21037_v28, 0.0  ;;  %v10972_v32 = vld [vmem:[%s20497_s5 + $0x238] sm:$0xff] }
 0xd05   : > { %v7234_v11 = vpop.permute.xlu1 %7233  ;;  %13197 = vmatmul.mubr.msk.f32.gmra.mxu1 %vm842_vm2, %v7230_v23  ;;  %v21036_v23 = vld [vmem:[#allocation47_spill] sm:$0xff]  ;;  %13236 = vmatprep.subr.mxu0 %v10972_v32 }
 0xd06   : > { %v3596_v40 = vsel %vm842_vm2, %v21036_v23, 0.0  ;;  %13237 = vmatpush3.msra.mxu0 %v10972_v32 }
 0xd07   : > { %2114 = vadd.xlane.f32.xlu1 %v2113_v48  ;;  %v7232_v57 = vpop.permute.xlu0 %7231  ;;  %v21039_v48 = vld [vmem:[#allocation46_spill] sm:$0xff] }
 0xd08   : > { %2111 = vadd.xlane.f32.xlu0 %v2110_v8  ;;  %13199 = vmatprep.mubr.msk.f32.mxu1 %vm842_vm2, %v7232_v57  ;;  %v3599_v57 = vsel %vm842_vm2, %v21039_v48, 0.0  ;;  %v10971_v8 = vld [vmem:[%s20497_s5 + $0x230] sm:$0xff] }
 0xd09   : > { %v7238_v29 = vpop.permute.xlu1 %7237  ;;  %13200 = vmatmul.mubr.msk.f32.gmra.mxu1 %vm842_vm2, %v7234_v11  ;;  %v21038_v11 = vld [vmem:[#allocation49_spill] sm:$0xff]  ;;  %13238 = vmatprep.subr.mxu0 %v10971_v8 }
 0xd0a   : > { %v3602_v39 = vsel %vm842_vm2, %v21038_v11, 0.0  ;;  %13239 = vmatpush3.msra.mxu0 %v10971_v8  ;;  %v10969_v8 = vld [vmem:[%s20497_s5 + $0x220] sm:$0xff] }
 0xd0b   : > { %3597 = vadd.xlane.f32.xlu1 %v3596_v40  ;;  %v7236_v1 = vpop.permute.xlu0 %7235  ;;  %v21041_v40 = vld [vmem:[#allocation48_spill] sm:$0xff] }
 0xd0c   : > { %2117 = vadd.xlane.f32.xlu0 %v2116_v42  ;;  %13202 = vmatprep.mubr.msk.f32.mxu1 %vm842_vm2, %v7236_v1  ;;  %v3605_v1 = vsel %vm842_vm2, %v21041_v40, 0.0  ;;  %v10970_v42 = vld [vmem:[%s20497_s5 + $0x228] sm:$0xff]  ;;  %v21046_v40 = vld [vmem:[#allocation57_spill] sm:$0xff] }
 0xd0d   : > { %v7242_v14 = vpop.permute.xlu1 %7241  ;;  %13203 = vmatmul.mubr.msk.f32.gmra.mxu1 %vm842_vm2, %v7238_v29  ;;  %v21040_v29 = vld [vmem:[#allocation51_spill] sm:$0xff]  ;;  %13240 = vmatprep.subr.mxu0 %v10970_v42 }
 0xd0e   : > { %v3608_v12 = vsel %vm842_vm2, %v21040_v29, 0.0  ;;  %13241 = vmatpush3.msra.mxu0 %v10970_v42 }
 0xd0f   : > { %3603 = vadd.xlane.f32.xlu1 %v3602_v39  ;;  %v7240_v60 = vpop.permute.xlu0 %7239  ;;  %v21043_v39 = vld [vmem:[#allocation50_spill] sm:$0xff]  ;;  %13242 = vmatprep.subr.mxu0 %v10969_v8 }
 0xd10   : > { %3600 = vadd.xlane.f32.xlu0 %v3599_v57  ;;  %13205 = vmatprep.mubr.msk.f32.mxu1 %vm842_vm2, %v7240_v60  ;;  %v3611_v60 = vsel %vm842_vm2, %v21043_v39, 0.0  ;;  %v21044_v57 = vld [vmem:[#allocation55_spill] sm:$0xff] }
 0xd11   : > { %v7246_v51 = vpop.permute.xlu1 %7245  ;;  %13206 = vmatmul.mubr.msk.f32.gmra.mxu1 %vm842_vm2, %v7242_v14  ;;  %v21042_v14 = vld [vmem:[#allocation53_spill] sm:$0xff]  ;;  %13243 = vmatpush3.msra.mxu0 %v10969_v8  ;;  %v21048_v39 = vld [vmem:[#allocation59_spill] sm:$0xff] }
 0xd12   : > { %v3614_v32 = vsel %vm842_vm2, %v21042_v14, 0.0  ;;  %v21047_v14 = vld [vmem:[#allocation54_spill] sm:$0xff]  ;;  %v21050_v8 = vld [vmem:[#allocation61_spill] sm:$0xff] }
 0xd13   : > { %3609 = vadd.xlane.f32.xlu1 %v3608_v12  ;;  %v7244_v23 = vpop.permute.xlu0 %7243  ;;  %v21045_v12 = vld [vmem:[#allocation52_spill] sm:$0xff] }
 0xd14   : > { %3606 = vadd.xlane.f32.xlu0 %v3605_v1  ;;  %13208 = vmatprep.mubr.msk.f32.mxu1 %vm842_vm2, %v7244_v23  ;;  %v3617_v23 = vsel %vm842_vm2, %v21045_v12, 0.0  ;;  %v3626_v1 = vsel %vm842_vm2, %v21046_v40, 0.0  ;;  %v21051_v12 = vld [vmem:[#allocation58_spill] sm:$0xff]  ;;  %v10966_v40 = vld [vmem:[%s20497_s5 + $0x208] sm:$0xff] }
 0xd15   : > { %v7250_v28 = vpop.permute.xlu1 %7249  ;;  %13209 = vmatmul.mubr.msk.f32.gmra.mxu1 %vm842_vm2, %v7246_v51  ;;  %v3620_v51 = vsel %vm842_vm2, %v21044_v57, 0.0  ;;  %v21049_v57 = vld [vmem:[#allocation56_spill] sm:$0xff] }
 0xd17   : > { %3615 = vadd.xlane.f32.xlu1 %v3614_v32  ;;  %v7248_v11 = vpop.permute.xlu0 %7247  ;;  %v3623_v32 = vsel %vm842_vm2, %v21047_v14, 0.0 }
 0xd18   : > { %3612 = vadd.xlane.f32.xlu0 %v3611_v60  ;;  %13211 = vmatprep.mubr.msk.f32.mxu1 %vm842_vm2, %v7248_v11  ;;  %v3632_v60 = vsel %vm842_vm2, %v21048_v39, 0.0 }
 0xd19   : > { %13212 = vmatmul.mubr.msk.f32.gmra.mxu1 %vm842_vm2, %v7250_v28  ;;  %v7254_v48 = vpop.permute.xlu1 %7253  ;;  %v10968_v28 = vld [vmem:[%s20497_s5 + $0x218] sm:$0xff] }
 0xd1a   : > { %13244 = vmatprep.subr.mxu0 %v10968_v28 }
 0xd1b   : > { %3621 = vadd.xlane.f32.xlu1 %v3620_v51  ;;  %v7252_v29 = vpop.permute.xlu0 %7251  ;;  %13245 = vmatpush3.msra.mxu0 %v10968_v28  ;;  %v3629_v51 = vsel %vm842_vm2, %v21049_v57, 0.0  ;;  %v21056_v57 = vld [vmem:[#allocation67_spill] sm:$0xff] }
 0xd1c   : > { %3618 = vadd.xlane.f32.xlu0 %v3617_v23  ;;  %13214 = vmatprep.mubr.msk.f32.mxu1 %vm842_vm2, %v7252_v29  ;;  %v3638_v29 = vsel %vm842_vm2, %v21050_v8, 0.0  ;;  %v3635_v23 = vsel %vm842_vm2, %v21051_v12, 0.0  ;;  %v21057_v8 = vld [vmem:[#allocation64_spill] sm:$0xff]  ;;  %v21058_v12 = vld [vmem:[#allocation69_spill] sm:$0xff] }
 0xd1d   : > { %13215 = vmatmul.mubr.msk.f32.gmra.mxu1 %vm842_vm2, %v7254_v48  ;;  %v7258_v11 = vpop.permute.xlu1 %7257  ;;  %v10967_v48 = vld [vmem:[%s20497_s5 + $0x210] sm:$0xff] }
 0xd1e   : > { %13246 = vmatprep.subr.mxu0 %v10967_v48 }
 0xd1f   : > { %3627 = vadd.xlane.f32.xlu1 %v3626_v1  ;;  %v7256_v42 = vpop.permute.xlu0 %7255  ;;  %13247 = vmatpush3.msra.mxu0 %v10967_v48  ;;  %v21052_v1 = vld [vmem:[#allocation63_spill] sm:$0xff] }
 0xd20   : > { %3624 = vadd.xlane.f32.xlu0 %v3623_v32  ;;  %13217 = vmatprep.mubr.msk.f32.mxu1 %vm842_vm2, %v7256_v42  ;;  %v3644_v28 = vsel %vm842_vm2, %v21052_v1, 0.0  ;;  %v21053_v42 = vld [vmem:[#allocation60_spill] sm:$0xff]  ;;  %v10965_v32 = vld [vmem:[%s20497_s5 + $0x200] sm:$0xff] }
 0xd21   : > { %13218 = vmatmul.mubr.msk.f32.gmra.mxu1 %vm842_vm2, %v7258_v11  ;;  %13248 = vmatprep.subr.mxu0 %v10966_v40  ;;  %v3641_v14 = vsel %vm842_vm2, %v21053_v42, 0.0  ;;  %v21054_v11 = vld [vmem:[#allocation65_spill] sm:$0xff] }
 0xd22   : > { %13249 = vmatpush3.msra.mxu0 %v10966_v40  ;;  %v3650_v39 = vsel %vm842_vm2, %v21054_v11, 0.0  ;;  %v21059_v40 = vld [vmem:[#allocation66_spill] sm:$0xff]  ;;  %v21062_v11 = vld [vmem:[#allocation73_spill] sm:$0xff] }
 0xd23   : > { %3633 = vadd.xlane.f32.xlu1 %v3632_v60  ;;  %13250 = vmatprep.subr.mxu0 %v10965_v32  ;;  %v21055_v60 = vld [vmem:[#allocation62_spill] sm:$0xff]  ;;  %v3659_v1 = vsel %vm842_vm2, %v21059_v40, 0.0 }
 0xd24   : > { %3630 = vadd.xlane.f32.xlu0 %v3629_v51  ;;  %13251 = vmatpush3.msra.mxu0 %v10965_v32  ;;  %v3647_v48 = vsel %vm842_vm2, %v21055_v60, 0.0  ;;  %v3656_v51 = vsel %vm842_vm2, %v21056_v57, 0.0  ;;  %v21063_v60 = vld [vmem:[#allocation70_spill] sm:$0xff]  ;;  %v21064_v57 = vld [vmem:[#allocation75_spill] sm:$0xff] }
 0xd25   : > { %v21067_v40 = vld [vmem:[#allocation74_spill] sm:$0xff] }
 0xd27   : > { %3639 = vadd.xlane.f32.xlu1 %v3638_v29  ;;  %v3653_v29 = vsel %vm842_vm2, %v21057_v8, 0.0  ;;  %v21065_v8 = vld [vmem:[#allocation72_spill] sm:$0xff] }
 0xd28   : > { %3636 = vadd.xlane.f32.xlu0 %v3635_v23  ;;  %v3662_v23 = vsel %vm842_vm2, %v21058_v12, 0.0  ;;  %v21066_v12 = vld [vmem:[#allocation77_spill] sm:$0xff] }
 0xd2b   : > { %3645 = vadd.xlane.f32.xlu1 %v3644_v28  ;;  %v21060_v28 = vld [vmem:[#allocation71_spill] sm:$0xff] }
 0xd2c   : > { %3642 = vadd.xlane.f32.xlu0 %v3641_v14  ;;  %v3668_v42 = vsel %vm842_vm2, %v21060_v28, 0.0  ;;  %v21061_v14 = vld [vmem:[#allocation68_spill] sm:$0xff]  ;;  %v5233_v28 = vsel %vm842_vm2, %v16883_v37, 0.0  ;;  %v5242_v37 = vsel %vm842_vm2, %v16891_v24, 0.0  ;;  %v5263_v24 = vsel %vm842_vm2, %v16923_v6, 0.0 }
 0xd2d   : > { %v3665_v32 = vsel %vm842_vm2, %v21061_v14, 0.0  ;;  %v5272_v6 = vsel %vm842_vm2, %v16927_v61, 0.0  ;;  %v5284_v61 = vsel %vm842_vm2, %v16959_v34, 0.0  ;;  %v21076_v34 = vld [vmem:[#allocation117_spill] sm:$0xff] }
 0xd2f   : > { %3651 = vadd.xlane.f32.xlu1 %v3650_v39  ;;  %v3674_v39 = vsel %vm842_vm2, %v21062_v11, 0.0  ;;  %v5236_v11 = vsel %vm842_vm2, %v16879_v53, 0.0 }
 0xd30   : > { %3648 = vadd.xlane.f32.xlu0 %v3647_v48  ;;  %v3671_v48 = vsel %vm842_vm2, %v21063_v60, 0.0  ;;  %v5251_v60 = vsel %vm842_vm2, %v16903_v10, 0.0 }
 0xd33   : > { %3657 = vadd.xlane.f32.xlu1 %v3656_v51  ;;  %v3680_v51 = vsel %vm842_vm2, %v21064_v57, 0.0  ;;  %v21070_v57 = vld [vmem:[#allocation106_spill] sm:$0xff] }
 0xd34   : > { %3654 = vadd.xlane.f32.xlu0 %v3653_v29  ;;  %v3677_v29 = vsel %vm842_vm2, %v21065_v8, 0.0  ;;  %v5257_v53 = vsel %vm842_vm2, %v21070_v57, 0.0  ;;  %v21072_v8 = vld [vmem:[#allocation107_spill] sm:$0xff]  ;;  %v21077_v57 = vld [vmem:[#allocation125_spill] sm:$0xff] }
 0xd35   : > { %v5260_v10 = vsel %vm842_vm2, %v21072_v8, 0.0 }
 0xd37   : > { %3663 = vadd.xlane.f32.xlu1 %v3662_v23  ;;  %v3686_v23 = vsel %vm842_vm2, %v21066_v12, 0.0  ;;  %v5266_v12 = vsel %vm842_vm2, %v16920_v49, 0.0  ;;  %v5278_v49 = vsel %vm842_vm2, %v16942_v33, 0.0  ;;  %v21074_v33 = vld [vmem:[#allocation114_spill] sm:$0xff] }
 0xd38   : > { %3660 = vadd.xlane.f32.xlu0 %v3659_v1  ;;  %v3683_v1 = vsel %vm842_vm2, %v21067_v40, 0.0  ;;  %v18081_v40 = vpop.f32.mrf.mxu0 }
 0xd3b   : > { %3669 = vadd.xlane.f32.xlu1 %v3668_v42  ;;  %v21068_v42 = vld [vmem:[#allocation76_spill] sm:$0xff] }
 0xd3c   : > { %3666 = vadd.xlane.f32.xlu0 %v3665_v32  ;;  %v3689_v14 = vsel %vm842_vm2, %v21068_v42, 0.0  ;;  %v5239_v32 = vsel %vm842_vm2, %v16887_v54, 0.0 }
 0xd3f   : > { %3675 = vadd.xlane.f32.xlu1 %v3674_v39  ;;  %v5245_v39 = vsel %vm842_vm2, %v16895_v62, 0.0 }
 0xd40   : > { %3672 = vadd.xlane.f32.xlu0 %v3671_v48  ;;  %v21069_v48 = vld [vmem:[#allocation104_spill] sm:$0xff] }
 0xd41   : > { %v5248_v54 = vsel %vm842_vm2, %v21069_v48, 0.0 }
 0xd43   : > { %3681 = vadd.xlane.f32.xlu1 %v3680_v51  ;;  %v21071_v51 = vld [vmem:[#allocation105_spill] sm:$0xff] }
 0xd44   : > { %3678 = vadd.xlane.f32.xlu0 %v3677_v29  ;;  %v5254_v62 = vsel %vm842_vm2, %v21071_v51, 0.0  ;;  %v5269_v29 = vsel %vm842_vm2, %v16931_v7, 0.0  ;;  %v5287_v7 = vsel %vm842_vm2, %v16983_v30, 0.0  ;;  %v21075_v30 = vld [vmem:[#allocation121_spill] sm:$0xff] }
 0xd47   : > { %3687 = vadd.xlane.f32.xlu1 %v3686_v23  ;;  %v5275_v23 = vsel %vm842_vm2, %v16949_v56, 0.0 }
 0xd48   : > { %3684 = vadd.xlane.f32.xlu0 %v3683_v1  ;;  %v5281_v1 = vsel %vm842_vm2, %v16965_v4, 0.0  ;;  %v21073_v4 = vld [vmem:[#allocation118_spill] sm:$0xff] }
 0xd4b   : > { %5234 = vadd.xlane.f32.xlu1 %v5233_v28  ;;  %v18087_v28 = vpop.f32.mrf.mxu0 }
 0xd4c   : > { %3690 = vadd.xlane.f32.xlu0 %v3689_v14  ;;  %v5293_v14 = vsel %vm842_vm2, %v21073_v4, 0.0  ;;  %v21082_v4 = vld [vmem:[#allocation130_spill] sm:$0xff] }
 0xd4d   : > { %v18093_v56 = vpop.f32.mrf.mxu0 }
 0xd4f   : > { %5240 = vadd.xlane.f32.xlu1 %v5239_v32  ;;  %v18101_v32 = vpop.f32.mrf.mxu0 }
 0xd50   : > { %5237 = vadd.xlane.f32.xlu0 %v5236_v11  ;;  %v5290_v11 = vsel %vm842_vm2, %v21074_v33, 0.0 }
 0xd53   : > { %5246 = vadd.xlane.f32.xlu1 %v5245_v39  ;;  %v5299_v39 = vsel %vm842_vm2, %v21075_v30, 0.0 }
 0xd54   : > { %5243 = vadd.xlane.f32.xlu0 %v5242_v37  ;;  %v18107_v37 = vpop.f32.mrf.mxu0 }
 0xd55   : > { %v18097_v42 = vpop.xlane.xlu0 %2024 }
 0xd56   : > { %v18117_v51 = vpop.f32.mrf.mxu0 }
 0xd57   : > { %5252 = vadd.xlane.f32.xlu1 %v5251_v60  ;;  %v5296_v60 = vsel %vm842_vm2, %v21076_v34, 0.0 }
 0xd58   : > { %5249 = vadd.xlane.f32.xlu0 %v5248_v54  ;;  %v18113_v54 = vpop.xlane.xlu1 %2027 }
 0xd59   : > { %v18111_v48 = vpop.xlane.xlu0 %2030 }
 0xd5b   : > { %5258 = vadd.xlane.f32.xlu1 %v5257_v53  ;;  %v5305_v53 = vsel %vm842_vm2, %v21077_v57, 0.0 }
 0xd5c   : > { %5255 = vadd.xlane.f32.xlu0 %v5254_v62  ;;  %v21078_v62 = vld [vmem:[#allocation122_spill] sm:$0xff] }
 0xd5d   : > { %v18121_v8 = vpop.xlane.xlu0 %2033 }
 0xd5f   : > { %5264 = vadd.xlane.f32.xlu1 %v5263_v24  ;;  %v5302_v24 = vsel %vm842_vm2, %v21078_v62, 0.0 }
 0xd60   : > { %5261 = vadd.xlane.f32.xlu0 %v5260_v10  ;;  %v21079_v10 = vld [vmem:[#allocation129_spill] sm:$0xff] }
 0xd61   : > { %v18137_v33 = vpop.xlane.xlu0 %2039 }
 0xd63   : > { %5270 = vadd.xlane.f32.xlu1 %v5269_v29  ;;  %v5311_v29 = vsel %vm842_vm2, %v21079_v10, 0.0 }
 0xd64   : > { %5267 = vadd.xlane.f32.xlu0 %v5266_v12  ;;  %v18125_v12 = vpop.f32.mrf.mxu0 }
 0xd65   : > { %v18149_v62 = vpop.xlane.xlu0 %2045 }
 0xd66   : > { %21085 = vst [vmem:[#allocation3_spill] sm:$0xff] %v18149_v62 }
 0xd67   : > { %5276 = vadd.xlane.f32.xlu1 %v5275_v23  ;;  %v18127_v23 = vpop.xlane.xlu1 %2036 }
 0xd68   : > { %5273 = vadd.xlane.f32.xlu0 %v5272_v6  ;;  %v21080_v6 = vld [vmem:[#allocation126_spill] sm:$0xff] }
 0xd6b   : > { %5282 = vadd.xlane.f32.xlu1 %v5281_v1  ;;  %v5308_v1 = vsel %vm842_vm2, %v21080_v6, 0.0  ;;  %v18141_v30 = vpop.xlane.xlu1 %2042  ;;  %v21088_v6 = vld [vmem:[#allocation138_spill] sm:$0xff] }
 0xd6c   : > { %5279 = vadd.xlane.f32.xlu0 %v5278_v49  ;;  %v21081_v49 = vld [vmem:[#allocation133_spill] sm:$0xff] }
 0xd6f   : > { %5288 = vadd.xlane.f32.xlu1 %v5287_v7  ;;  %v5317_v7 = vsel %vm842_vm2, %v21081_v49, 0.0 }
 0xd70   : > { %5285 = vadd.xlane.f32.xlu0 %v5284_v61  ;;  %v18133_v61 = vpop.f32.mrf.mxu0 }
 0xd73   : > { %5294 = vadd.xlane.f32.xlu1 %v5293_v14  ;;  %v5314_v14 = vsel %vm842_vm2, %v21082_v4, 0.0 }
 0xd74   : > { %5291 = vadd.xlane.f32.xlu0 %v5290_v11  ;;  %v18139_v11 = vpop.f32.mrf.mxu0 }
 0xd77   : > { %5300 = vadd.xlane.f32.xlu1 %v5299_v39  ;;  %v21083_v39 = vld [vmem:[#allocation137_spill] sm:$0xff] }
 0xd78   : > { %5297 = vadd.xlane.f32.xlu0 %v5296_v60  ;;  %v5323_v34 = vsel %vm842_vm2, %v21083_v39, 0.0  ;;  %v21084_v60 = vld [vmem:[#allocation134_spill] sm:$0xff] }
 0xd79   : > { %v5320_v57 = vsel %vm842_vm2, %v21084_v60, 0.0 }
 0xd7b   : > { %5306 = vadd.xlane.f32.xlu1 %v5305_v53  ;;  %v18147_v53 = vpop.f32.mrf.mxu0 }
 0xd7c   : > { %5303 = vadd.xlane.f32.xlu0 %v5302_v24  ;;  %v21086_v24 = vld [vmem:[#allocation142_spill] sm:$0xff] }
 0xd7d   : > { %v6806_v10 = vsel %vm842_vm2, %v21086_v24, 0.0  ;;  %v18157_v49 = vpop.f32.mrf.mxu0  ;;  %v21093_v24 = vld [vmem:[#allocation146_spill] sm:$0xff] }
 0xd7f   : > { %5312 = vadd.xlane.f32.xlu1 %v5311_v29  ;;  %v18153_v29 = vpop.xlane.xlu1 %2048  ;;  %v18165_v60 = vpop.f32.mrf.mxu0 }
 0xd80   : > { %5309 = vadd.xlane.f32.xlu0 %v5308_v1  ;;  %21087 = vst [vmem:[#allocation2_spill] sm:$0xff] %v18153_v29  ;;  %v5326_v1 = vsel %vm842_vm2, %v21088_v6, 0.0  ;;  %v21094_v6 = vld [vmem:[#allocation143_spill] sm:$0xff] }
 0xd81   : > { %v21233_v29 = vld [vmem:[#allocation115_spill] sm:$0xff] }
 0xd83   : > { %5318 = vadd.xlane.f32.xlu1 %v5317_v7  ;;  %v21089_v7 = vld [vmem:[#allocation144_spill] sm:$0xff] }
 0xd84   : > { %5315 = vadd.xlane.f32.xlu0 %v5314_v14  ;;  %v6812_v4 = vsel %vm842_vm2, %v21089_v7, 0.0  ;;  %v21090_v14 = vld [vmem:[#allocation141_spill] sm:$0xff]  ;;  %v18173_v7 = vpop.f32.mrf.mxu0 }
 0xd85   : > { %v6809_v39 = vsel %vm842_vm2, %v21090_v14, 0.0  ;;  %v21096_v14 = vld [vmem:[#allocation148_spill] sm:$0xff] }
 0xd86   : > { %v6824_v27 = vsel %vm842_vm2, %v21096_v14, 0.0 }
 0xd87   : > { %5324 = vadd.xlane.f32.xlu1 %v5323_v34  ;;  %v18163_v34 = vpop.xlane.xlu0 %2051 }
 0xd88   : > { %5321 = vadd.xlane.f32.xlu0 %v5320_v57  ;;  %21091 = vst [vmem:[#allocation4_spill] sm:$0xff] %v18163_v34  ;;  %v18167_v57 = vpop.xlane.xlu1 %2054 }
 0xd89   : > { %21092 = vst [vmem:[#allocation6_spill] sm:$0xff] %v18167_v57 }
 0xd8b   : > { %6807 = vadd.xlane.f32.xlu1 %v6806_v10  ;;  %v6818_v10 = vsel %vm842_vm2, %v21093_v24, 0.0  ;;  %v18183_v24 = vpop.f32.mrf.mxu0 }
 0xd8c   : > { %5327 = vadd.xlane.f32.xlu0 %v5326_v1  ;;  %v6815_v1 = vsel %vm842_vm2, %v21094_v6, 0.0 }
 0xd8d   : > { %v18191_v14 = vpop.f32.mrf.mxu0 }
 0xd8f   : > { %6813 = vadd.xlane.f32.xlu1 %v6812_v4  ;;  %v18175_v4 = vpop.xlane.xlu0 %2057 }
 0xd90   : > { %6810 = vadd.xlane.f32.xlu0 %v6809_v39  ;;  %21095 = vst [vmem:[#allocation5_spill] sm:$0xff] %v18175_v4  ;;  %v18179_v39 = vpop.xlane.xlu1 %2060 }
 0xd91   : > { %21097 = vst [vmem:[#allocation8_spill] sm:$0xff] %v18179_v39 }
 0xd93   : > { %6819 = vadd.xlane.f32.xlu1 %v6818_v10  ;;  %v21099_v10 = vld [vmem:[#allocation150_spill] sm:$0xff]  ;;  %v18189_v52 = vpop.xlane.xlu0 %2063 }
 0xd94   : > { %6816 = vadd.xlane.f32.xlu0 %v6815_v1  ;;  %v6830_v6 = vsel %vm842_vm2, %v21099_v10, 0.0  ;;  %v21100_v1 = vld [vmem:[#allocation147_spill] sm:$0xff]  ;;  %21101 = vst [vmem:[#allocation7_spill] sm:$0xff] %v18189_v52  ;;  %v18193_v58 = vpop.xlane.xlu1 %2066  ;;  %v18199_v10 = vpop.f32.mrf.mxu0 }
 0xd95   : > { %v6827_v25 = vsel %vm842_vm2, %v21100_v1, 0.0  ;;  %21102 = vst [vmem:[#allocation10_spill] sm:$0xff] %v18193_v58  ;;  %v21106_v1 = vld [vmem:[#allocation154_spill] sm:$0xff] }
 0xd96   : > { %v6842_v47 = vsel %vm842_vm2, %v21106_v1, 0.0  ;;  %v6848_v1 = vsel %vm842_vm2, %v21109_v38, 0.0 }
 0xd97   : > { %6825 = vadd.xlane.f32.xlu1 %v6824_v27  ;;  %v21103_v27 = vld [vmem:[#allocation152_spill] sm:$0xff] }
 0xd98   : > { %6822 = vadd.xlane.f32.xlu0 %v6821_v19  ;;  %v6836_v46 = vsel %vm842_vm2, %v21103_v27, 0.0  ;;  %v21104_v19 = vld [vmem:[#allocation149_spill] sm:$0xff] }
 0xd99   : > { %v6833_v35 = vsel %vm842_vm2, %v21104_v19, 0.0 }
 0xd9b   : > { %6831 = vadd.xlane.f32.xlu1 %v6830_v6  ;;  %v18201_v6 = vpop.xlane.xlu0 %2069 }
 0xd9c   : > { %6828 = vadd.xlane.f32.xlu0 %v6827_v25  ;;  %21105 = vst [vmem:[#allocation9_spill] sm:$0xff] %v18201_v6  ;;  %v18205_v25 = vpop.xlane.xlu1 %2072  ;;  %v14638_v6 = vld [vmem:[%s14740_s23 + $0xe8] sm:$0xff] }
 0xd9d   : > { %21107 = vst [vmem:[#allocation12_spill] sm:$0xff] %v18205_v25  ;;  %v14616_v25 = vld [vmem:[%s14740_s23 + $0x38] sm:$0xff] }
 0xd9f   : > { %6837 = vadd.xlane.f32.xlu1 %v6836_v46  ;;  %v18215_v46 = vpop.f32.mrf.mxu0 }
 0xda0   : > { %6834 = vadd.xlane.f32.xlu0 %v6833_v35  ;;  %v18213_v35 = vld [vmem:[%s20496_s4 + $0x4] ss:$0 sm:$0xff]  ;;  %v18229_v18 = vpop.xlane.xlu1 %2078 }
 0xda1   : > { %v18227_v16 = vpop.f32.mrf.mxu0  ;;  %21112 = vst [vmem:[#allocation15_spill] sm:$0xff] %v18229_v18  ;;  %v14610_v18 = vld [vmem:[%s14740_s23 + $0x8] sm:$0xff] }
 0xda3   : > { %6843 = vadd.xlane.f32.xlu1 %v6842_v47  ;;  %v13174_v31 = vpop.f32.mrf.mxu1 }
 0xda4   : > { %6840 = vadd.xlane.f32.xlu0 %v6839_v3  ;;  %v7398_v27 = vadd.f32 %v13174_v31, %v18081_v40  ;;  %v6845_v3 = vsel %vm842_vm2, %v21110_v45, 0.0  ;;  %v18223_v40 = vpop.xlane.xlu0 %2075 }
 0xda5   : > { %v7392_v19 = vpop.f32.mrf.mxu1  ;;  %21111 = vst [vmem:[#allocation11_spill] sm:$0xff] %v18223_v40  ;;  %v14620_v40 = vld [vmem:[%s14740_s23 + $0x58] sm:$0xff] }
 0xda6   : > { %v7393_v47 = vadd.f32 %v7392_v19, %v18087_v28  ;;  %v7560_v20 = vadd.f32 %v18213_v35, %v7398_v27  ;;  %v21113_v28 = vld [vmem:[#allocation158_spill] sm:$0xff] }
 0xda7   : > { %6849 = vadd.xlane.f32.xlu1 %v6848_v1  ;;  %v13177_v31 = vpop.f32.mrf.mxu1  ;;  %v6854_v27 = vsel %vm842_vm2, %v21113_v28, 0.0  ;;  %v18239_v28 = vpop.f32.mrf.mxu0 }
 0xda8   : > { %v7559_v21 = vadd.f32 %v18213_v35, %v7393_v47  ;;  %6846 = vadd.xlane.f32.xlu0 %v6845_v3  ;;  %v7408_v0 = vadd.f32 %v13177_v31, %v18093_v56  ;;  %v7592_v45 = vmax.f32 %v7560_v20, 0.0  ;;  %v6851_v47 = vsel %vm842_vm2, %v21114_v44, 0.0  ;;  %v18246_v44 = vpop.xlane.xlu1 %2084 }
 0xda9   : > { %v7402_v38 = vpop.f32.mrf.mxu1  ;;  %21117 = vst [vmem:[#allocation17_spill] sm:$0xff] %v18246_v44  ;;  %v21120_v44 = vld [vmem:[#allocation159_spill] sm:$0xff] }
 0xdaa   : > { %v7403_v19 = vadd.f32 %v7402_v38, %v18101_v32  ;;  %v7591_v1 = vmax.f32 %v7559_v21, 0.0  ;;  %v7562_v55 = vadd.f32 %v18213_v35, %v7408_v0  ;;  %v18241_v32 = vpop.xlane.xlu0 %2081  ;;  %v21116_v21 = vld [vmem:[#allocation160_spill] sm:$0xff] }
 0xdab   : > { %6855 = vadd.xlane.f32.xlu1 %v6854_v27  ;;  %v13180_v3 = vpop.f32.mrf.mxu1  ;;  %21115 = vst [vmem:[#allocation13_spill] sm:$0xff] %v18241_v32  ;;  %v6860_v0 = vsel %vm842_vm2, %v21116_v21, 0.0 }
 0xdac   : > { %v7561_v56 = vadd.f32 %v18213_v35, %v7403_v19  ;;  %6852 = vadd.xlane.f32.xlu0 %v6851_v47  ;;  %v7418_v31 = vadd.f32 %v13180_v3, %v18107_v37  ;;  %13252 = vmatprep.mubr.f32.mxu0 %v7591_v1  ;;  %v7594_v27 = vmax.f32 %v7562_v55, 0.0  ;;  %v21118_v37 = vld [vmem:[#allocation157_spill] sm:$0xff] }
 0xdad   : > { %v7412_v15 = vpop.f32.mrf.mxu1  ;;  %13253 = vmatmul.mubr.f32.vlgmr.msra.gmra.mxu0 %v7592_v45  ;;  %v6857_v1 = vsel %vm842_vm2, %v21118_v37, 0.0 }
 0xdae   : > { %v7413_v20 = vadd.f32 %v7412_v15, %v18117_v51  ;;  %v7593_v38 = vmax.f32 %v7561_v56, 0.0  ;;  %v7564_v19 = vadd.f32 %v18213_v35, %v7418_v31  ;;  %v18253_v15 = vpop.f32.mrf.mxu0  ;;  %v21119_v51 = vld [vmem:[#allocation162_spill] sm:$0xff] }
 0xdaf   : > { %6861 = vadd.xlane.f32.xlu1 %v6860_v0  ;;  %v13183_v45 = vpop.f32.mrf.mxu1  ;;  %v6866_v55 = vsel %vm842_vm2, %v21119_v51, 0.0 }
 0xdb0   : > { %v7563_v47 = vadd.f32 %v18213_v35, %v7413_v20  ;;  %6858 = vadd.xlane.f32.xlu0 %v6857_v1  ;;  %v7428_v3 = vadd.f32 %v13183_v45, %v18125_v12  ;;  %13255 = vmatprep.mubr.f32.mxu0 %v7593_v38  ;;  %v7596_v0 = vmax.f32 %v7564_v19, 0.0  ;;  %v6863_v20 = vsel %vm842_vm2, %v21120_v44, 0.0  ;;  %v18261_v1 = vpop.xlane.xlu0 %2087  ;;  %v21123_v19 = vld [vmem:[#allocation164_spill] sm:$0xff]  ;;  %v10998_v44 = vld [vmem:[%s20499_s7 + $0x278] sm:$0xff] }
 0xdb1   : > { %v7422_v21 = vpop.f32.mrf.mxu1  ;;  %13256 = vmatmul.mubr.f32.gmra.mxu0 %v7594_v27  ;;  %21121 = vst [vmem:[#allocation14_spill] sm:$0xff] %v18261_v1  ;;  %v18264_v27 = vpop.xlane.xlu1 %2090  ;;  %13300 = vmatprep.subr.mxu1 %v10998_v44  ;;  %v11001_v1 = vld [vmem:[%s20494_s2 + $0x14] sm:$0xf] }
 0xdb2   : > { %v7423_v56 = vadd.f32 %v7422_v21, %v18133_v61  ;;  %v7595_v31 = vmax.f32 %v7563_v47, 0.0  ;;  %v7566_v37 = vadd.f32 %v18213_v35, %v7428_v3  ;;  %21122 = vst [vmem:[#allocation19_spill] sm:$0xff] %v18264_v27  ;;  %v18267_v61 = vpop.f32.mrf.mxu0  ;;  %v6872_v47 = vsel %vm842_vm2, %v21123_v19, 0.0  ;;  %13301 = vmatpush3.msra.mxu1 %v10998_v44 }
 0xdb3   : > { %6867 = vadd.xlane.f32.xlu1 %v6866_v55 }
 0xdb4   : > { %v7565_v12 = vadd.f32 %v18213_v35, %v7423_v56  ;;  %6864 = vadd.xlane.f32.xlu0 %v6863_v20  ;;  %v13186_v38 = vpop.f32.mrf.mxu1  ;;  %13258 = vmatprep.mubr.f32.mxu0 %v7595_v31  ;;  %v7598_v51 = vmax.f32 %v7566_v37, 0.0  ;;  %v21124_v56 = vld [vmem:[#allocation161_spill] sm:$0xff]  ;;  %v18282_v37 = vpop.xlane.xlu0 %2093 }
 0xdb5   : > { %v7438_v45 = vadd.f32 %v13186_v38, %v18139_v11  ;;  %13259 = vmatmul.mubr.f32.gmra.mxu0 %v7596_v0  ;;  %v6869_v31 = vsel %vm842_vm2, %v21124_v56, 0.0  ;;  %v18280_v38 = vpop.f32.mrf.mxu0  ;;  %21125 = vst [vmem:[#allocation16_spill] sm:$0xff] %v18282_v37 }
 0xdb6   : > { %v7432_v3 = vpop.f32.mrf.mxu1  ;;  %v7597_v21 = vmax.f32 %v7565_v12, 0.0 }
 0xdb7   : > { %6873 = vadd.xlane.f32.xlu1 %v6872_v47  ;;  %v7433_v55 = vadd.f32 %v7432_v3, %v18147_v53  ;;  %v7568_v11 = vadd.f32 %v18213_v35, %v7438_v45  ;;  %v21126_v53 = vld [vmem:[#allocation166_spill] sm:$0xff]  ;;  %v10997_v45 = vld [vmem:[%s20499_s7 + $0x270] sm:$0xff]  ;;  %v18289_v3 = vpop.xlane.xlu1 %2096 }
 0xdb8   : > { %6870 = vadd.xlane.f32.xlu0 %v6869_v31  ;;  %v13189_v0 = vpop.f32.mrf.mxu1  ;;  %13261 = vmatprep.mubr.f32.mxu0 %v7597_v21  ;;  %v6878_v19 = vsel %vm842_vm2, %v21126_v53, 0.0  ;;  %21127 = vst [vmem:[#allocation21_spill] sm:$0xff] %v18289_v3  ;;  %v18297_v3 = vpop.f32.mrf.mxu0 }
 0xdb9   : > { %v7567_v20 = vadd.f32 %v18213_v35, %v7433_v55  ;;  %v7448_v12 = vadd.f32 %v13189_v0, %v18157_v49  ;;  %13262 = vmatmul.mubr.f32.gmra.mxu0 %v7598_v51  ;;  %v21128_v49 = vld [vmem:[#allocation163_spill] sm:$0xff]  ;;  %13302 = vmatprep.subr.mxu1 %v10997_v45  ;;  %v7600_v44 = vmax.f32 %v7568_v11, 0.0 }
 0xdba   : > { %v7442_v47 = vpop.f32.mrf.mxu1  ;;  %v6875_v51 = vsel %vm842_vm2, %v21128_v49, 0.0  ;;  %13303 = vmatpush3.msra.mxu1 %v10997_v45  ;;  %v10996_v11 = vld [vmem:[%s20499_s7 + $0x268] sm:$0xff] }
 0xdbb   : > { %6879 = vadd.xlane.f32.xlu1 %v6878_v19  ;;  %v7443_v21 = vadd.f32 %v7442_v47, %v18165_v60  ;;  %v7599_v55 = vmax.f32 %v7567_v20, 0.0  ;;  %v7570_v56 = vadd.f32 %v18213_v35, %v7448_v12  ;;  %v21129_v19 = vld [vmem:[#allocation168_spill] sm:$0xff]  ;;  %v21130_v12 = vld [vmem:[#allocation165_spill] sm:$0xff]  ;;  %13304 = vmatprep.subr.mxu1 %v10996_v11 }
 0xdbc   : > { %6876 = vadd.xlane.f32.xlu0 %v6875_v51  ;;  %v13192_v31 = vpop.f32.mrf.mxu1  ;;  %v6884_v60 = vsel %vm842_vm2, %v21129_v19, 0.0  ;;  %v6881_v45 = vsel %vm842_vm2, %v21130_v12, 0.0  ;;  %13305 = vmatpush3.msra.mxu1 %v10996_v11 }
 0xdbd   : > { %v7569_v0 = vadd.f32 %v18213_v35, %v7443_v21  ;;  %v7458_v53 = vadd.f32 %v13192_v31, %v18173_v7  ;;  %13264 = vmatprep.mubr.f32.mxu0 %v7599_v55  ;;  %v18307_v7 = vpop.xlane.xlu0 %2099  ;;  %v7602_v49 = vmax.f32 %v7570_v56, 0.0  ;;  %v10995_v56 = vld [vmem:[%s20499_s7 + $0x260] sm:$0xff] }
 0xdbe   : > { %v7452_v47 = vpop.f32.mrf.mxu1  ;;  %13265 = vmatmul.mubr.f32.gmra.mxu0 %v7600_v44  ;;  %21131 = vst [vmem:[#allocation18_spill] sm:$0xff] %v18307_v7  ;;  %v18310_v44 = vpop.xlane.xlu1 %2102  ;;  %13306 = vmatprep.subr.mxu1 %v10995_v56 }
 0xdbf   : > { %6885 = vadd.xlane.f32.xlu1 %v6884_v60  ;;  %v7453_v20 = vadd.f32 %v7452_v47, %v18183_v24  ;;  %v7601_v21 = vmax.f32 %v7569_v0, 0.0  ;;  %v7572_v51 = vadd.f32 %v18213_v35, %v7458_v53  ;;  %21132 = vst [vmem:[#allocation23_spill] sm:$0xff] %v18310_v44  ;;  %v18314_v24 = vpop.f32.mrf.mxu0  ;;  %v6890_v0 = vsel %vm842_vm2, %v17562_v2, 0.0  ;;  %v21133_v47 = vld [vmem:[#allocation167_spill] sm:$0xff]  ;;  %13307 = vmatpush3.msra.mxu1 %v10995_v56 }
 0xdc0   : > { %6882 = vadd.xlane.f32.xlu0 %v6881_v45  ;;  %v13195_v55 = vpop.f32.mrf.mxu1  ;;  %v6887_v11 = vsel %vm842_vm2, %v21133_v47, 0.0 }
 0xdc1   : > { %v7571_v31 = vadd.f32 %v18213_v35, %v7453_v20  ;;  %v7468_v19 = vadd.f32 %v13195_v55, %v18191_v14  ;;  %13267 = vmatprep.mubr.f32.mxu0 %v7601_v21  ;;  %v7604_v14 = vmax.f32 %v7572_v51, 0.0  ;;  %v18326_v21 = vpop.f32.mrf.mxu0  ;;  %v21135_v55 = vld [vmem:[#allocation171_spill] sm:$0xff]  ;;  %v10994_v51 = vld [vmem:[%s20499_s7 + $0x258] sm:$0xff] }
 0xdc2   : > { %v7462_v60 = vpop.f32.mrf.mxu1  ;;  %13268 = vmatmul.mubr.f32.gmra.mxu0 %v7602_v49  ;;  %v18328_v49 = vpop.xlane.xlu0 %2105  ;;  %13308 = vmatprep.subr.mxu1 %v10994_v51 }
 0xdc3   : > { %6891 = vadd.xlane.f32.xlu1 %v6890_v0  ;;  %v7463_v53 = vadd.f32 %v7462_v60, %v18199_v10  ;;  %v7603_v20 = vmax.f32 %v7571_v31, 0.0  ;;  %v7574_v12 = vadd.f32 %v18213_v35, %v7468_v19  ;;  %21134 = vst [vmem:[#allocation20_spill] sm:$0xff] %v18328_v49  ;;  %v6896_v0 = vsel %vm842_vm2, %v21135_v55, 0.0  ;;  %v18336_v31 = vpop.xlane.xlu1 %2108  ;;  %v21137_v60 = vld [vmem:[#allocation169_spill] sm:$0xff]  ;;  %13309 = vmatpush3.msra.mxu1 %v10994_v51 }
 0xdc4   : > { %6888 = vadd.xlane.f32.xlu0 %v6887_v11  ;;  %21136 = vst [vmem:[#allocation24_spill] sm:$0xff] %v18336_v31  ;;  %v6893_v56 = vsel %vm842_vm2, %v21137_v60, 0.0 }
 0xdc5   : > { %v7573_v2 = vadd.f32 %v18213_v35, %v7463_v53  ;;  %v13198_v45 = vpop.f32.mrf.mxu1  ;;  %13270 = vmatprep.mubr.f32.mxu0 %v7603_v20  ;;  %v7606_v47 = vmax.f32 %v7574_v12, 0.0  ;;  %v21138_v12 = vld [vmem:[#allocation170_spill] sm:$0xff] }
 0xdc6   : > { %v7478_v10 = vadd.f32 %v13198_v45, %v18215_v46  ;;  %13271 = vmatmul.mubr.f32.gmra.mxu0 %v7604_v14  ;;  %v7124_v14 = vpop.f32.mrf.mxu0  ;;  %v18349_v51 = vpop.xlane.xlu0 %2111 }
 0xdc7   : > { %6897 = vadd.xlane.f32.xlu1 %v6896_v0  ;;  %v7472_v19 = vpop.f32.mrf.mxu1  ;;  %v7605_v53 = vmax.f32 %v7573_v2, 0.0  ;;  %v10993_v2 = vld [vmem:[%s20499_s7 + $0x250] sm:$0xff]  ;;  %21139 = vst [vmem:[#allocation22_spill] sm:$0xff] %v18349_v51 }
 0xdc8   : > { %v7473_v46 = vadd.f32 %v7472_v19, %v18227_v16  ;;  %6894 = vadd.xlane.f32.xlu0 %v6893_v56  ;;  %v7576_v11 = vadd.f32 %v18213_v35, %v7478_v10  ;;  %v6899_v16 = vsel %vm842_vm2, %v21138_v12, 0.0  ;;  %13310 = vmatprep.subr.mxu1 %v10993_v2 }
 0xdc9   : > { %v13201_v20 = vpop.f32.mrf.mxu1  ;;  %13273 = vmatprep.mubr.f32.mxu0 %v7605_v53  ;;  %13311 = vmatpush3.msra.mxu1 %v10993_v2  ;;  %v13163_v53 = vpop.f32.mrf.mxu0 }
 0xdca   : > { %v7575_v45 = vadd.f32 %v18213_v35, %v7473_v46  ;;  %v7488_v55 = vadd.f32 %v13201_v20, %v18239_v28  ;;  %13274 = vmatmul.mubr.f32.gmra.mxu0 %v7606_v47  ;;  %v7608_v60 = vmax.f32 %v7576_v11, 0.0  ;;  %v10992_v20 = vld [vmem:[%s20499_s7 + $0x248] sm:$0xff] }
 0xdcb   : > { %v7482_v0 = vpop.f32.mrf.mxu1  ;;  %13312 = vmatprep.subr.mxu1 %v10992_v20 }
 0xdcc   : > { %v7607_v10 = vmax.f32 %v7575_v45, 0.0  ;;  %v7483_v19 = vadd.f32 %v7482_v0, %v18253_v15  ;;  %6900 = vadd.xlane.f32.xlu0 %v6899_v16  ;;  %v7578_v28 = vadd.f32 %v18213_v35, %v7488_v55  ;;  %13313 = vmatpush3.msra.mxu1 %v10992_v20  ;;  %v7134_v0 = vpop.f32.mrf.mxu0 }
 0xdcd   : > { %v13204_v56 = vpop.f32.mrf.mxu1 }
 0xdce   : > { %v7577_v47 = vadd.f32 %v18213_v35, %v7483_v19  ;;  %v7498_v46 = vadd.f32 %v13204_v56, %v18267_v61  ;;  %13276 = vmatprep.mubr.f32.mxu0 %v7607_v10  ;;  %v7610_v11 = vmax.f32 %v7578_v28, 0.0  ;;  %v10991_v10 = vld [vmem:[%s20499_s7 + $0x240] sm:$0xff] }
 0xdcf   : > { %v7492_v12 = vpop.f32.mrf.mxu1  ;;  %13277 = vmatmul.mubr.f32.gmra.mxu0 %v7608_v60  ;;  %13314 = vmatprep.subr.mxu1 %v10991_v10 }
 0xdd0   : > { %v7609_v15 = vmax.f32 %v7577_v47, 0.0  ;;  %v7493_v45 = vadd.f32 %v7492_v12, %v18280_v38  ;;  %v7580_v55 = vadd.f32 %v18213_v35, %v7498_v46  ;;  %13315 = vmatpush3.msra.mxu1 %v10991_v10  ;;  %v13166_v46 = vpop.f32.mrf.mxu0  ;;  %v10990_v12 = vld [vmem:[%s20499_s7 + $0x238] sm:$0xff] }
 0xdd1   : > { %v13207_v2 = vpop.f32.mrf.mxu1  ;;  %13316 = vmatprep.subr.mxu1 %v10990_v12 }
 0xdd2   : > { %v7579_v16 = vadd.f32 %v18213_v35, %v7493_v45  ;;  %v7508_v61 = vadd.f32 %v13207_v2, %v18297_v3  ;;  %13279 = vmatprep.mubr.f32.mxu0 %v7609_v15  ;;  %v7612_v28 = vmax.f32 %v7580_v55, 0.0  ;;  %v10989_v15 = vld [vmem:[%s20499_s7 + $0x230] sm:$0xff]  ;;  %13317 = vmatpush3.msra.mxu1 %v10990_v12  ;;  %v10988_v55 = vld [vmem:[%s20499_s7 + $0x228] sm:$0xff] }
 0xdd3   : > { %v7502_v19 = vpop.f32.mrf.mxu1  ;;  %13280 = vmatmul.mubr.f32.gmra.mxu0 %v7610_v11  ;;  %13318 = vmatprep.subr.mxu1 %v10989_v15 }
 0xdd4   : > { %v7611_v60 = vmax.f32 %v7579_v16, 0.0  ;;  %v7503_v38 = vadd.f32 %v7502_v19, %v18314_v24  ;;  %v7582_v56 = vadd.f32 %v18213_v35, %v7508_v61  ;;  %v7144_v61 = vpop.f32.mrf.mxu0  ;;  %13319 = vmatpush3.msra.mxu1 %v10989_v15 }
 0xdd5   : > { %v13210_v47 = vpop.f32.mrf.mxu1  ;;  %13320 = vmatprep.subr.mxu1 %v10988_v55 }
 0xdd6   : > { %v7581_v20 = vadd.f32 %v18213_v35, %v7503_v38  ;;  %v7518_v3 = vadd.f32 %v13210_v47, %v18326_v21  ;;  %13282 = vmatprep.mubr.f32.mxu0 %v7611_v60  ;;  %v7614_v21 = vmax.f32 %v7582_v56, 0.0  ;;  %13321 = vmatpush3.msra.mxu1 %v10988_v55  ;;  %v10986_v56 = vld [vmem:[%s20499_s7 + $0x218] sm:$0xff]  ;;  %v10984_v55 = vld [vmem:[%s20499_s7 + $0x208] sm:$0xff] }
 0xdd7   : > { %v7512_v24 = vpop.f32.mrf.mxu1  ;;  %13283 = vmatmul.mubr.f32.gmra.mxu0 %v7612_v28 }
 0xdd8   : > { %v7613_v45 = vmax.f32 %v7581_v20, 0.0  ;;  %v7513_v11 = vadd.f32 %v7512_v24, %v7124_v14  ;;  %v7584_v2 = vadd.f32 %v18213_v35, %v7518_v3  ;;  %v10987_v14 = vld [vmem:[%s20499_s7 + $0x220] sm:$0xff]  ;;  %v13169_v3 = vpop.f32.mrf.mxu0 }
 0xdd9   : > { %v13213_v16 = vpop.f32.mrf.mxu1  ;;  %13322 = vmatprep.subr.mxu1 %v10987_v14 }
 0xdda   : > { %v7583_v10 = vadd.f32 %v18213_v35, %v7513_v11  ;;  %v7528_v19 = vadd.f32 %v13213_v16, %v13163_v53  ;;  %13285 = vmatprep.mubr.f32.mxu0 %v7613_v45  ;;  %v7616_v47 = vmax.f32 %v7584_v2, 0.0  ;;  %13323 = vmatpush3.msra.mxu1 %v10987_v14  ;;  %v7154_v16 = vpop.f32.mrf.mxu0 }
 0xddb   : > { %v7522_v60 = vpop.f32.mrf.mxu1  ;;  %13286 = vmatmul.mubr.f32.gmra.mxu0 %v7614_v21  ;;  %13324 = vmatprep.subr.mxu1 %v10986_v56 }
 0xddc   : > { %v7615_v38 = vmax.f32 %v7583_v10, 0.0  ;;  %v7523_v28 = vadd.f32 %v7522_v60, %v7134_v0  ;;  %v7586_v20 = vadd.f32 %v18213_v35, %v7528_v19  ;;  %v10985_v0 = vld [vmem:[%s20499_s7 + $0x210] sm:$0xff]  ;;  %13325 = vmatpush3.msra.mxu1 %v10986_v56 }
 0xddd   : > { %v13216_v53 = vpop.f32.mrf.mxu1  ;;  %13326 = vmatprep.subr.mxu1 %v10985_v0 }
 0xdde   : > { %v7585_v12 = vadd.f32 %v18213_v35, %v7523_v28  ;;  %v7538_v15 = vadd.f32 %v13216_v53, %v13166_v46  ;;  %13288 = vmatprep.mubr.f32.mxu0 %v7615_v38  ;;  %v7618_v21 = vmax.f32 %v7586_v20, 0.0  ;;  %13327 = vmatpush3.msra.mxu1 %v10985_v0  ;;  %v14609_v53 = vld [vmem:[%s14740_s23] sm:$0xff] }
 0xddf   : > { %v7532_v24 = vpop.f32.mrf.mxu1  ;;  %13289 = vmatmul.mubr.f32.gmra.mxu0 %v7616_v47  ;;  %13328 = vmatprep.subr.mxu1 %v10984_v55 }
 0xde0   : > { %v7617_v45 = vmax.f32 %v7585_v12, 0.0  ;;  %v7533_v11 = vadd.f32 %v7532_v24, %v7144_v61  ;;  %v7588_v2 = vadd.f32 %v18213_v35, %v7538_v15  ;;  %13329 = vmatpush3.msra.mxu1 %v10984_v55  ;;  %v18406_v12 = vld [vmem:[%s20498_s6 + $0x4] ss:$0 sm:$0xff] }
 0xde1   : > { %v13219_v46 = vpop.f32.mrf.mxu1 }
 0xde2   : > { %v7587_v10 = vadd.f32 %v18213_v35, %v7533_v11  ;;  %v7548_v19 = vadd.f32 %v13219_v46, %v13169_v3  ;;  %13291 = vmatprep.mubr.f32.mxu0 %v7617_v45  ;;  %v7620_v38 = vmax.f32 %v7588_v2, 0.0  ;;  %v10983_v3 = vld [vmem:[%s20499_s7 + $0x200] sm:$0xff] }
 0xde3   : > { %v7542_v14 = vpop.f32.mrf.mxu1  ;;  %13292 = vmatmul.mubr.f32.gmra.mxu0 %v7618_v21  ;;  %13330 = vmatprep.subr.mxu1 %v10983_v3 }
 0xde4   : > { %v7619_v61 = vmax.f32 %v7587_v10, 0.0  ;;  %v7543_v60 = vadd.f32 %v7542_v14, %v7154_v16  ;;  %v7590_v28 = vadd.f32 %v18213_v35, %v7548_v19  ;;  %13331 = vmatpush3.msra.mxu1 %v10983_v3 }
 0xde5   : > { %13430 = vmatprep.subr.msk.mxu1 %vm907_vm0, %v11001_v1 }
 0xde6   : > { %v7589_v56 = vadd.f32 %v18213_v35, %v7543_v60  ;;  %13294 = vmatprep.mubr.f32.mxu0 %v7619_v61  ;;  %v7622_v20 = vmax.f32 %v7590_v28, 0.0 }
 0xde7   : > { %13295 = vmatmul.mubr.f32.gmra.mxu0 %v7620_v38 }
 0xde8   : > { %v7621_v47 = vmax.f32 %v7589_v56, 0.0 }
 0xdea   : > { %13297 = vmatprep.mubr.f32.mxu0 %v7621_v47 }
 0xdeb   : > { %13298 = vmatmul.mubr.f32.gmra.mxu0 %v7622_v20 }
 0xdec   : > { %13382 = vmatprep.mubr.msk.f32.mxu0 %vm424_vm1, %v14609_v53 }
 0xe6d   : > { %v13254_v35 = vpop.f32.mrf.mxu0 }
 0xe6e   : > { %v7720_v15 = vadd.f32 %v13254_v35, %v18406_v12 }
 0xe6f   : > { %v7714_v0 = vpop.f32.mrf.mxu0 }
 0xe70   : > { %v7715_v24 = vadd.f32 %v18406_v12, %v7714_v0  ;;  %v7874_v55 = vmax.f32 %v7720_v15, 0.0 }
 0xe71   : > { %v13257_v45 = vpop.f32.mrf.mxu0 }
 0xe72   : > { %v7873_v11 = vmax.f32 %v7715_v24, 0.0  ;;  %v7730_v21 = vadd.f32 %v13257_v45, %v18406_v12 }
 0xe73   : > { %v7724_v2 = vpop.f32.mrf.mxu0 }
 0xe74   : > { %v7725_v46 = vadd.f32 %v18406_v12, %v7724_v2  ;;  %13332 = vmatprep.mubr.f32.mxu1 %v7873_v11  ;;  %v7876_v19 = vmax.f32 %v7730_v21, 0.0 }
 0xe75   : > { %v13260_v16 = vpop.f32.mrf.mxu0  ;;  %13333 = vmatmul.mubr.f32.vlgmr.msra.gmra.mxu1 %v7874_v55 }
 0xe76   : > { %v7875_v10 = vmax.f32 %v7725_v46, 0.0  ;;  %v7740_v14 = vadd.f32 %v13260_v16, %v18406_v12  ;;  %13431 = vmatpush3.msk.msra.mxu1 %vm907_vm0, %v11001_v1 }
 0xe77   : > { %v7734_v61 = vpop.f32.mrf.mxu0 }
 0xe78   : > { %v7735_v60 = vadd.f32 %v18406_v12, %v7734_v61  ;;  %13335 = vmatprep.mubr.f32.mxu1 %v7875_v10  ;;  %v7878_v56 = vmax.f32 %v7740_v14, 0.0  ;;  %v18420_v10 = vpop.xlane.xlu1 %2114  ;;  %v18422_v61 = vpop.xlane.xlu0 %2117 }
 0xe79   : > { %v13263_v38 = vpop.f32.mrf.mxu0  ;;  %13336 = vmatmul.mubr.f32.gmra.mxu1 %v7876_v19  ;;  %21140 = vst [vmem:[#allocation26_spill] sm:$0xff] %v18420_v10  ;;  %21141 = vst [vmem:[#allocation25_spill] sm:$0xff] %v18422_v61 }
 0xe7a   : > { %v7877_v28 = vmax.f32 %v7735_v60, 0.0  ;;  %v7750_v47 = vadd.f32 %v13263_v38, %v18406_v12 }
 0xe7b   : > { %v7744_v20 = vpop.f32.mrf.mxu0 }
 0xe7c   : > { %v7745_v53 = vadd.f32 %v18406_v12, %v7744_v20  ;;  %13338 = vmatprep.mubr.f32.mxu1 %v7877_v28  ;;  %v7880_v15 = vmax.f32 %v7750_v47, 0.0 }
 0xe7d   : > { %13339 = vmatmul.mubr.f32.gmra.mxu1 %v7878_v56 }
 0xe7e   : > { %v7879_v3 = vmax.f32 %v7745_v53, 0.0  ;;  %v13266_v35 = vpop.f32.mrf.mxu0  ;;  %v18426_v53 = vpop.xlane.xlu1 %3597 }
 0xe7f   : > { %v7760_v0 = vadd.f32 %v13266_v35, %v18406_v12 }
 0xe80   : > { %v7754_v24 = vpop.f32.mrf.mxu0  ;;  %13341 = vmatprep.mubr.f32.mxu1 %v7879_v3 }
 0xe81   : > { %v7755_v45 = vadd.f32 %v18406_v12, %v7754_v24  ;;  %13342 = vmatmul.mubr.f32.gmra.mxu1 %v7880_v15  ;;  %v7882_v21 = vmax.f32 %v7760_v0, 0.0  ;;  %v18430_v24 = vpop.xlane.xlu0 %3600 }
 0xe82   : > { %v13269_v11 = vpop.f32.mrf.mxu0 }
 0xe83   : > { %v7881_v55 = vmax.f32 %v7755_v45, 0.0  ;;  %v7770_v2 = vadd.f32 %v13269_v11, %v18406_v12 }
 0xe84   : > { %v7764_v46 = vpop.f32.mrf.mxu0 }
 0xe85   : > { %v7765_v16 = vadd.f32 %v18406_v12, %v7764_v46  ;;  %13344 = vmatprep.mubr.f32.mxu1 %v7881_v55  ;;  %v7884_v60 = vmax.f32 %v7770_v2, 0.0  ;;  %v18433_v46 = vpop.xlane.xlu1 %3603 }
 0xe86   : > { %v13272_v19 = vpop.f32.mrf.mxu0  ;;  %13345 = vmatmul.mubr.f32.gmra.mxu1 %v7882_v21 }
 0xe87   : > { %v7883_v14 = vmax.f32 %v7765_v16, 0.0  ;;  %v7780_v38 = vadd.f32 %v13272_v19, %v18406_v12 }
 0xe88   : > { %v7774_v28 = vpop.f32.mrf.mxu0 }
 0xe89   : > { %v7775_v56 = vadd.f32 %v18406_v12, %v7774_v28  ;;  %13347 = vmatprep.mubr.f32.mxu1 %v7883_v14  ;;  %v7886_v3 = vmax.f32 %v7780_v38, 0.0  ;;  %v18436_v14 = vpop.xlane.xlu0 %3606 }
 0xe8a   : > { %v13275_v47 = vpop.f32.mrf.mxu0  ;;  %13348 = vmatmul.mubr.f32.gmra.mxu1 %v7884_v60 }
 0xe8b   : > { %v7885_v20 = vmax.f32 %v7775_v56, 0.0  ;;  %v7790_v35 = vadd.f32 %v13275_v47, %v18406_v12 }
 0xe8c   : > { %v7784_v15 = vpop.f32.mrf.mxu0 }
 0xe8d   : > { %v7785_v0 = vadd.f32 %v18406_v12, %v7784_v15  ;;  %13350 = vmatprep.mubr.f32.mxu1 %v7885_v20  ;;  %v7888_v55 = vmax.f32 %v7790_v35, 0.0 }
 0xe8e   : > { %13351 = vmatmul.mubr.f32.gmra.mxu1 %v7886_v3  ;;  %v18440_v3 = vpop.xlane.xlu1 %3609 }
 0xe8f   : > { %v7887_v45 = vmax.f32 %v7785_v0, 0.0  ;;  %v13278_v11 = vpop.f32.mrf.mxu0 }
 0xe90   : > { %v7800_v21 = vadd.f32 %v13278_v11, %v18406_v12  ;;  %v18443_v11 = vpop.xlane.xlu0 %3612 }
 0xe91   : > { %v7794_v2 = vpop.f32.mrf.mxu0  ;;  %13353 = vmatprep.mubr.f32.mxu1 %v7887_v45 }
 0xe92   : > { %v7795_v16 = vadd.f32 %v18406_v12, %v7794_v2  ;;  %13354 = vmatmul.mubr.f32.gmra.mxu1 %v7888_v55  ;;  %v7890_v38 = vmax.f32 %v7800_v21, 0.0 }
 0xe93   : > { %v13281_v19 = vpop.f32.mrf.mxu0 }
 0xe94   : > { %v7889_v60 = vmax.f32 %v7795_v16, 0.0  ;;  %v7810_v28 = vadd.f32 %v13281_v19, %v18406_v12 }
 0xe95   : > { %v7804_v56 = vpop.f32.mrf.mxu0 }
 0xe96   : > { %v7805_v47 = vadd.f32 %v18406_v12, %v7804_v56  ;;  %13356 = vmatprep.mubr.f32.mxu1 %v7889_v60  ;;  %v7892_v15 = vmax.f32 %v7810_v28, 0.0 }
 0xe97   : > { %v13284_v20 = vpop.f32.mrf.mxu0  ;;  %13357 = vmatmul.mubr.f32.gmra.mxu1 %v7890_v38  ;;  %v18447_v38 = vpop.xlane.xlu1 %3615 }
 0xe98   : > { %v7891_v35 = vmax.f32 %v7805_v47, 0.0  ;;  %v7820_v0 = vadd.f32 %v13284_v20, %v18406_v12  ;;  %v18450_v47 = vpop.xlane.xlu0 %3618 }
 0xe99   : > { %v7814_v45 = vpop.f32.mrf.mxu0  ;;  %21142 = vst [vmem:[#allocation28_spill] sm:$0xff] %v18450_v47  ;;  %v21242_v47 = vld [vmem:[#allocation124_spill] sm:$0xff] }
 0xe9a   : > { %v7815_v55 = vadd.f32 %v18406_v12, %v7814_v45  ;;  %13359 = vmatprep.mubr.f32.mxu1 %v7891_v35  ;;  %v7894_v16 = vmax.f32 %v7820_v0, 0.0 }
 0xe9b   : > { %v13287_v21 = vpop.f32.mrf.mxu0  ;;  %13360 = vmatmul.mubr.f32.gmra.mxu1 %v7892_v15 }
 0xe9c   : > { %v7893_v2 = vmax.f32 %v7815_v55, 0.0  ;;  %v7830_v19 = vadd.f32 %v13287_v21, %v18406_v12  ;;  %v18454_v55 = vpop.xlane.xlu1 %3621 }
 0xe9d   : > { %v7824_v60 = vpop.f32.mrf.mxu0  ;;  %21143 = vst [vmem:[#allocation27_spill] sm:$0xff] %v18454_v55 }
 0xe9e   : > { %v7825_v56 = vadd.f32 %v18406_v12, %v7824_v60  ;;  %13362 = vmatprep.mubr.f32.mxu1 %v7893_v2  ;;  %v7896_v61 = vmax.f32 %v7830_v19, 0.0 }
 0xe9f   : > { %v13290_v28 = vpop.f32.mrf.mxu0  ;;  %13363 = vmatmul.mubr.f32.gmra.mxu1 %v7894_v16  ;;  %v18457_v16 = vpop.xlane.xlu0 %3624 }
 0xea0   : > { %v7895_v20 = vmax.f32 %v7825_v56, 0.0  ;;  %v7840_v35 = vadd.f32 %v13290_v28, %v18406_v12  ;;  %21144 = vst [vmem:[#allocation30_spill] sm:$0xff] %v18457_v16  ;;  %v21234_v16 = vld [vmem:[#allocation116_spill] sm:$0xff] }
 0xea1   : > { %v7834_v45 = vpop.f32.mrf.mxu0 }
 0xea2   : > { %v7835_v15 = vadd.f32 %v18406_v12, %v7834_v45  ;;  %13365 = vmatprep.mubr.f32.mxu1 %v7895_v20  ;;  %v7898_v10 = vmax.f32 %v7840_v35, 0.0 }
 0xea3   : > { %v13293_v0 = vpop.f32.mrf.mxu0  ;;  %13366 = vmatmul.mubr.f32.gmra.mxu1 %v7896_v61  ;;  %v18461_v61 = vpop.xlane.xlu1 %3627 }
 0xea4   : > { %v7897_v21 = vmax.f32 %v7835_v15, 0.0  ;;  %v7850_v2 = vadd.f32 %v13293_v0, %v18406_v12  ;;  %21145 = vst [vmem:[#allocation29_spill] sm:$0xff] %v18461_v61  ;;  %v18464_v0 = vpop.xlane.xlu0 %3630 }
 0xea5   : > { %v7844_v60 = vpop.f32.mrf.mxu0  ;;  %21146 = vst [vmem:[#allocation32_spill] sm:$0xff] %v18464_v0 }
 0xea6   : > { %v7845_v56 = vadd.f32 %v18406_v12, %v7844_v60  ;;  %13368 = vmatprep.mubr.f32.mxu1 %v7897_v21  ;;  %v7900_v31 = vmax.f32 %v7850_v2, 0.0 }
 0xea7   : > { %v13296_v19 = vpop.f32.mrf.mxu0  ;;  %13369 = vmatmul.mubr.f32.gmra.mxu1 %v7898_v10  ;;  %v18468_v2 = vpop.xlane.xlu1 %3633 }
 0xea8   : > { %v7899_v28 = vmax.f32 %v7845_v56, 0.0  ;;  %v7860_v20 = vadd.f32 %v13296_v19, %v18406_v12  ;;  %21147 = vst [vmem:[#allocation31_spill] sm:$0xff] %v18468_v2  ;;  %v18470_v49 = vpop.xlane.xlu0 %3636 }
 0xea9   : > { %v7854_v45 = vpop.f32.mrf.mxu0  ;;  %21148 = vst [vmem:[#allocation47_spill] sm:$0xff] %v18470_v49 }
 0xeaa   : > { %v7855_v15 = vadd.f32 %v18406_v12, %v7854_v45  ;;  %13371 = vmatprep.mubr.f32.mxu1 %v7899_v28  ;;  %v7902_v44 = vmax.f32 %v7860_v20, 0.0 }
 0xeab   : > { %v13299_v35 = vpop.f32.mrf.mxu0  ;;  %13372 = vmatmul.mubr.f32.gmra.mxu1 %v7900_v31  ;;  %v18472_v31 = vpop.xlane.xlu1 %3639 }
 0xeac   : > { %v7901_v51 = vmax.f32 %v7855_v15, 0.0  ;;  %v7870_v21 = vadd.f32 %v13299_v35, %v18406_v12  ;;  %21149 = vst [vmem:[#allocation33_spill] sm:$0xff] %v18472_v31  ;;  %v18474_v28 = vpop.xlane.xlu0 %3642 }
 0xead   : > { %v7864_v60 = vpop.f32.mrf.mxu0  ;;  %21150 = vst [vmem:[#allocation49_spill] sm:$0xff] %v18474_v28 }
 0xeae   : > { %v7865_v10 = vadd.f32 %v18406_v12, %v7864_v60  ;;  %13374 = vmatprep.mubr.f32.mxu1 %v7901_v51  ;;  %v7904_v19 = vmax.f32 %v7870_v21, 0.0 }
 0xeaf   : > { %13375 = vmatmul.mubr.f32.gmra.mxu1 %v7902_v44  ;;  %v18476_v20 = vpop.xlane.xlu1 %3645 }
 0xeb0   : > { %v7903_v56 = vmax.f32 %v7865_v10, 0.0  ;;  %21151 = vst [vmem:[#allocation46_spill] sm:$0xff] %v18476_v20  ;;  %v18478_v45 = vpop.xlane.xlu0 %3648 }
 0xeb1   : > { %21152 = vst [vmem:[#allocation51_spill] sm:$0xff] %v18478_v45  ;;  %v14618_v45 = vld [vmem:[%s14740_s23 + $0x48] sm:$0xff] }
 0xeb2   : > { %13377 = vmatprep.mubr.f32.mxu1 %v7903_v56 }
 0xeb3   : > { %13378 = vmatmul.mubr.f32.gmra.mxu1 %v7904_v19  ;;  %v18480_v15 = vpop.xlane.xlu1 %3651 }
 0xeb4   : > { %21153 = vst [vmem:[#allocation48_spill] sm:$0xff] %v18480_v15  ;;  %v18482_v51 = vpop.xlane.xlu0 %3654 }
 0xeb5   : > { %21154 = vst [vmem:[#allocation53_spill] sm:$0xff] %v18482_v51  ;;  %v14611_v51 = vld [vmem:[%s14740_s23 + $0x10] sm:$0xff] }
 0xeb7   : > { %v18484_v44 = vpop.xlane.xlu1 %3657 }
 0xeb8   : > { %21155 = vst [vmem:[#allocation50_spill] sm:$0xff] %v18484_v44  ;;  %v18486_v12 = vpop.xlane.xlu0 %3660 }
 0xeb9   : > { %21156 = vst [vmem:[#allocation55_spill] sm:$0xff] %v18486_v12 }
 0xebb   : > { %v18488_v35 = vpop.xlane.xlu1 %3663 }
 0xebc   : > { %21157 = vst [vmem:[#allocation52_spill] sm:$0xff] %v18488_v35  ;;  %v18490_v21 = vpop.xlane.xlu0 %3666 }
 0xebd   : > { %21158 = vst [vmem:[#allocation57_spill] sm:$0xff] %v18490_v21 }
 0xebf   : > { %v18492_v60 = vpop.xlane.xlu1 %3669 }
 0xec0   : > { %21159 = vst [vmem:[#allocation54_spill] sm:$0xff] %v18492_v60  ;;  %v18494_v10 = vpop.xlane.xlu0 %3672 }
 0xec1   : > { %21160 = vst [vmem:[#allocation59_spill] sm:$0xff] %v18494_v10  ;;  %v11002_v10 = vld [vmem:[%s20495_s3 + $0x28] sm:$0xff] }
 0xec2   : > { %13380 = vmatprep.subr.mxu0 %v11002_v10 }
 0xec3   : > { %v18496_v56 = vpop.xlane.xlu1 %3675  ;;  %13381 = vmatpush3.msra.mxu0 %v11002_v10  ;;  %v14614_v10 = vld [vmem:[%s14740_s23 + $0x28] sm:$0xff] }
 0xec4   : > { %21161 = vst [vmem:[#allocation56_spill] sm:$0xff] %v18496_v56  ;;  %v18498_v19 = vpop.xlane.xlu0 %3678  ;;  %13383 = vmatmul.mubr.msk.f32.vlgmr.msra.gmra.mxu0 %vm424_vm1, %v14610_v18  ;;  %v14615_v18 = vld [vmem:[%s14740_s23 + $0x30] sm:$0xff] }
 0xec5   : > { %21162 = vst [vmem:[#allocation61_spill] sm:$0xff] %v18498_v19  ;;  %13385 = vmatprep.mubr.msk.f32.mxu0 %vm424_vm1, %v14611_v51 }
 0xec7   : > { %v18500_v7 = vpop.xlane.xlu1 %3681 }
 0xec8   : > { %21163 = vst [vmem:[#allocation58_spill] sm:$0xff] %v18500_v7  ;;  %v18502_v27 = vpop.xlane.xlu0 %3684  ;;  %13386 = vmatmul.mubr.msk.f32.gmra.mxu0 %vm424_vm1, %v14612_v9  ;;  %v14617_v9 = vld [vmem:[%s14740_s23 + $0x40] sm:$0xff] }
 0xec9   : > { %21164 = vst [vmem:[#allocation63_spill] sm:$0xff] %v18502_v27  ;;  %13388 = vmatprep.mubr.msk.f32.mxu0 %vm424_vm1, %v14613_v41 }
 0xecb   : > { %v18504_v37 = vpop.xlane.xlu1 %3687 }
 0xecc   : > { %21165 = vst [vmem:[#allocation60_spill] sm:$0xff] %v18504_v37  ;;  %v18506_v44 = vpop.xlane.xlu0 %3690  ;;  %13389 = vmatmul.mubr.msk.f32.gmra.mxu0 %vm424_vm1, %v14614_v10  ;;  %v14619_v10 = vld [vmem:[%s14740_s23 + $0x50] sm:$0xff] }
 0xecd   : > { %21166 = vst [vmem:[#allocation65_spill] sm:$0xff] %v18506_v44  ;;  %13391 = vmatprep.mubr.msk.f32.mxu0 %vm424_vm1, %v14615_v18 }
 0xecf   : > { %v18508_v12 = vpop.xlane.xlu1 %5234 }
 0xed0   : > { %v18510_v35 = vpop.xlane.xlu0 %5237  ;;  %13392 = vmatmul.mubr.msk.f32.gmra.mxu0 %vm424_vm1, %v14616_v25  ;;  %v14621_v25 = vld [vmem:[%s14740_s23 + $0x60] sm:$0xff] }
 0xed1   : > { %13394 = vmatprep.mubr.msk.f32.mxu0 %vm424_vm1, %v14617_v9 }
 0xed3   : > { %v18512_v21 = vpop.xlane.xlu1 %5240 }
 0xed4   : > { %v18514_v60 = vpop.xlane.xlu0 %5243  ;;  %13395 = vmatmul.mubr.msk.f32.gmra.mxu0 %vm424_vm1, %v14618_v45  ;;  %v14623_v45 = vld [vmem:[%s14740_s23 + $0x70] sm:$0xff] }
 0xed5   : > { %13397 = vmatprep.mubr.msk.f32.mxu0 %vm424_vm1, %v14619_v10 }
 0xed7   : > { %v18516_v56 = vpop.xlane.xlu1 %5246 }
 0xed8   : > { %v18518_v19 = vpop.xlane.xlu0 %5249  ;;  %13398 = vmatmul.mubr.msk.f32.gmra.mxu0 %vm424_vm1, %v14620_v40  ;;  %v14625_v40 = vld [vmem:[%s14740_s23 + $0x80] sm:$0xff] }
 0xed9   : > { %21167 = vst [vmem:[#allocation62_spill] sm:$0xff] %v18518_v19  ;;  %13400 = vmatprep.mubr.msk.f32.mxu0 %vm424_vm1, %v14621_v25 }
 0xedb   : > { %v18520_v7 = vpop.xlane.xlu1 %5252 }
 0xedc   : > { %21168 = vst [vmem:[#allocation67_spill] sm:$0xff] %v18520_v7  ;;  %v18522_v27 = vpop.xlane.xlu0 %5255  ;;  %13401 = vmatmul.mubr.msk.f32.gmra.mxu0 %vm424_vm1, %v14622_v5  ;;  %v14627_v5 = vld [vmem:[%s14740_s23 + $0x90] sm:$0xff] }
 0xedd   : > { %21169 = vst [vmem:[#allocation64_spill] sm:$0xff] %v18522_v27  ;;  %13403 = vmatprep.mubr.msk.f32.mxu0 %vm424_vm1, %v14623_v45 }
 0xedf   : > { %v18524_v44 = vpop.xlane.xlu1 %5258 }
 0xee0   : > { %21170 = vst [vmem:[#allocation69_spill] sm:$0xff] %v18524_v44  ;;  %v18526_v37 = vpop.xlane.xlu0 %5261 }
 0xee1   : > { %21171 = vst [vmem:[#allocation66_spill] sm:$0xff] %v18526_v37 }
 0xee3   : > { %v18534_v22 = vpop.xlane.xlu1 %5264 }
 0xee4   : > { %21172 = vst [vmem:[#allocation71_spill] sm:$0xff] %v18534_v22  ;;  %v18538_v15 = vpop.xlane.xlu0 %5267 }
 0xee5   : > { %21173 = vst [vmem:[#allocation68_spill] sm:$0xff] %v18538_v15 }
 0xee7   : > { %v18544_v32 = vpop.xlane.xlu1 %5270 }
 0xee8   : > { %21174 = vst [vmem:[#allocation73_spill] sm:$0xff] %v18544_v32  ;;  %v18550_v1 = vpop.xlane.xlu0 %5273 }
 0xee9   : > { %21175 = vst [vmem:[#allocation70_spill] sm:$0xff] %v18550_v1 }
 0xeeb   : > { %v18556_v51 = vpop.xlane.xlu1 %5276 }
 0xeec   : > { %21176 = vst [vmem:[#allocation75_spill] sm:$0xff] %v18556_v51  ;;  %v18558_v20 = vpop.xlane.xlu0 %5279  ;;  %v14632_v51 = vld [vmem:[%s14740_s23 + $0xb8] sm:$0xff] }
 0xeed   : > { %21177 = vst [vmem:[#allocation72_spill] sm:$0xff] %v18558_v20 }
 0xeef   : > { %v18564_v41 = vpop.xlane.xlu1 %5282 }
 0xef0   : > { %21178 = vst [vmem:[#allocation77_spill] sm:$0xff] %v18564_v41  ;;  %v18570_v18 = vpop.xlane.xlu0 %5285 }
 0xef1   : > { %21179 = vst [vmem:[#allocation74_spill] sm:$0xff] %v18570_v18  ;;  %v14624_v18 = vld [vmem:[%s14740_s23 + $0x78] sm:$0xff] }
 0xef2   : > { %13404 = vmatmul.mubr.msk.f32.gmra.mxu0 %vm424_vm1, %v14624_v18  ;;  %v14629_v18 = vld [vmem:[%s14740_s23 + $0xa0] sm:$0xff] }
 0xef3   : > { %v18576_v9 = vpop.xlane.xlu1 %5288  ;;  %13406 = vmatprep.mubr.msk.f32.mxu0 %vm424_vm1, %v14625_v40  ;;  %v18607_v40 = vld [vmem:[%s20500_s8 + $0x4] ss:$0 sm:$0xff] }
 0xef4   : > { %21180 = vst [vmem:[#allocation76_spill] sm:$0xff] %v18576_v9  ;;  %v18578_v41 = vpop.xlane.xlu0 %5291  ;;  %v14626_v9 = vld [vmem:[%s14740_s23 + $0x88] sm:$0xff] }
 0xef5   : > { %21181 = vst [vmem:[#allocation104_spill] sm:$0xff] %v18578_v41 }
 0xef6   : > { %13407 = vmatmul.mubr.msk.f32.gmra.mxu0 %vm424_vm1, %v14626_v9 }
 0xef7   : > { %v18584_v10 = vpop.xlane.xlu1 %5294  ;;  %13409 = vmatprep.mubr.msk.f32.mxu0 %vm424_vm1, %v14627_v5  ;;  %v14630_v5 = vld [vmem:[%s14740_s23 + $0xa8] sm:$0xff] }
 0xef8   : > { %21182 = vst [vmem:[#allocation106_spill] sm:$0xff] %v18584_v10  ;;  %v18590_v25 = vpop.xlane.xlu0 %5297  ;;  %v14628_v10 = vld [vmem:[%s14740_s23 + $0x98] sm:$0xff] }
 0xef9   : > { %21183 = vst [vmem:[#allocation105_spill] sm:$0xff] %v18590_v25 }
 0xefa   : > { %13410 = vmatmul.mubr.msk.f32.gmra.mxu0 %vm424_vm1, %v14628_v10 }
 0xefb   : > { %v18596_v41 = vpop.xlane.xlu1 %5300  ;;  %13412 = vmatprep.mubr.msk.f32.mxu0 %vm424_vm1, %v14629_v18 }
 0xefc   : > { %21184 = vst [vmem:[#allocation107_spill] sm:$0xff] %v18596_v41  ;;  %v18598_v45 = vpop.xlane.xlu0 %5303 }
 0xefd   : > { %21185 = vst [vmem:[#allocation118_spill] sm:$0xff] %v18598_v45  ;;  %v14631_v45 = vld [vmem:[%s14740_s23 + $0xb0] sm:$0xff] }
 0xefe   : > { %13413 = vmatmul.mubr.msk.f32.gmra.mxu0 %vm424_vm1, %v14630_v5  ;;  %v14633_v5 = vld [vmem:[%s14740_s23 + $0xc0] sm:$0xff] }
 0xeff   : > { %v18609_v9 = vpop.xlane.xlu1 %5306  ;;  %13415 = vmatprep.mubr.msk.f32.mxu0 %vm424_vm1, %v14631_v45 }
 0xf00   : > { %21186 = vst [vmem:[#allocation114_spill] sm:$0xff] %v18609_v9  ;;  %v18615_v25 = vpop.xlane.xlu0 %5309 }
 0xf01   : > { %21187 = vst [vmem:[#allocation121_spill] sm:$0xff] %v18615_v25 }
 0xf02   : > { %13416 = vmatmul.mubr.msk.f32.gmra.mxu0 %vm424_vm1, %v14632_v51  ;;  %v14634_v51 = vld [vmem:[%s14740_s23 + $0xc8] sm:$0xff] }
 0xf03   : > { %13418 = vmatprep.mubr.msk.f32.mxu0 %vm424_vm1, %v14633_v5  ;;  %v18624_v31 = vpop.xlane.xlu1 %5312 }
 0xf04   : > { %21188 = vst [vmem:[#allocation117_spill] sm:$0xff] %v18624_v31  ;;  %v14635_v31 = vld [vmem:[%s14740_s23 + $0xd0] sm:$0xff] }
 0xf06   : > { %13419 = vmatmul.mubr.msk.f32.gmra.mxu0 %vm424_vm1, %v14634_v51  ;;  %v14636_v51 = vld [vmem:[%s14740_s23 + $0xd8] sm:$0xff] }
 0xf07   : > { %13421 = vmatprep.mubr.msk.f32.mxu0 %vm424_vm1, %v14635_v31 }
 0xf0a   : > { %13422 = vmatmul.mubr.msk.f32.gmra.mxu0 %vm424_vm1, %v14636_v51  ;;  %v14639_v51 = vld [vmem:[%s14740_s23 + $0xf0] sm:$0xff] }
 0xf35   : > { %v13334_v41 = vpop.f32.mrf.mxu1 }
 0xf36   : > { %v8002_v10 = vadd.f32 %v13334_v41, %v18607_v40 }
 0xf37   : > { %v7996_v18 = vpop.f32.mrf.mxu1 }
 0xf38   : > { %v7997_v26 = vadd.f32 %v18607_v40, %v7996_v18  ;;  %8317 = vrot.lane.b32.xlu1 %v8002_v10, %s14650_s20  ;;  %v18630_v18 = vpop.xlane.xlu0 %5315  ;;  %14162 = vtanh.f32 %v8002_v10 }
 0xf39   : > { %v13337_v9 = vpop.f32.mrf.mxu1  ;;  %21189 = vst [vmem:[#allocation125_spill] sm:$0xff] %v18630_v18  ;;  %v18646_v18 = vpop.xlane.xlu1 %5318 }
 0xf3a   : > { %v18627_v45 = vadd.f32 %v13337_v9, %v18607_v40  ;;  %8315 = vrot.lane.b32.xlu0 %v7997_v26, %s14650_s20  ;;  %21190 = vst [vmem:[#allocation122_spill] sm:$0xff] %v18646_v18  ;;  %14164 = vtanh.f32 %v7997_v26 }
 0xf3b   : > { %v8006_v41 = vpop.f32.mrf.mxu1 }
 0xf3c   : > { %v18633_v25 = vadd.f32 %v18607_v40, %v8006_v41  ;;  %8321 = vrot.lane.b32.xlu1 %v18627_v45, %s14650_s20  ;;  %v18657_v20 = vpop.xlane.xlu0 %5321  ;;  %14166 = vtanh.f32 %v18627_v45 }
 0xf3d   : > { %v13340_v5 = vpop.f32.mrf.mxu1  ;;  %21191 = vst [vmem:[#allocation129_spill] sm:$0xff] %v18657_v20 }
 0xf3e   : > { %v18642_v9 = vadd.f32 %v13340_v5, %v18607_v40  ;;  %8319 = vrot.lane.b32.xlu0 %v18633_v25, %s14650_s20  ;;  %v14637_v5 = vld [vmem:[%s14740_s23 + $0xe0] sm:$0xff]  ;;  %14168 = vtanh.f32 %v18633_v25 }
 0xf3f   : > { %v8016_v41 = vpop.f32.mrf.mxu1  ;;  %13424 = vmatprep.mubr.msk.f32.mxu0 %vm424_vm1, %v14637_v5  ;;  %v18668_v5 = vpop.xlane.xlu1 %5324 }
 0xf40   : > { %v18649_v58 = vadd.f32 %v18607_v40, %v8016_v41  ;;  %8325 = vrot.lane.b32.xlu1 %v18642_v9, %s14650_s20  ;;  %13425 = vmatmul.mubr.msk.f32.gmra.mxu0 %vm424_vm1, %v14638_v6  ;;  %21192 = vst [vmem:[#allocation126_spill] sm:$0xff] %v18668_v5  ;;  %v18674_v20 = vpop.xlane.xlu0 %5327 }
 0xf41   : > { %v13343_v31 = vpop.f32.mrf.mxu1  ;;  %13427 = vmatprep.mubr.msk.f32.mxu0 %vm424_vm1, %v14639_v51  ;;  %21193 = vst [vmem:[#allocation133_spill] sm:$0xff] %v18674_v20 }
 0xf42   : > { %v8032_v28 = vadd.f32 %v13343_v31, %v18607_v40  ;;  %8323 = vrot.lane.b32.xlu0 %v18649_v58, %s14650_s20  ;;  %14170 = vtanh.f32 %v18649_v58 }
 0xf43   : > { %v8026_v41 = vpop.f32.mrf.mxu1  ;;  %v18680_v6 = vpop.xlane.xlu1 %6807  ;;  %14172 = vtanh.f32 %v18642_v9 }
 0xf44   : > { %v8027_v18 = vadd.f32 %v18607_v40, %v8026_v41  ;;  %8329 = vrot.lane.b32.xlu1 %v8032_v28, %s14650_s20  ;;  %13428 = vmatmul.mubr.msk.f32.gmra.mxu0 %vm424_vm1, %v14640_v36  ;;  %v18682_v41 = vpop.xlane.xlu0 %6810 }
 0xf45   : > { %v14163_v2 = vpop.eup %14162 }
 0xf46   : > { %v13346_v50 = vpop.f32.mrf.mxu1  ;;  %8327 = vrot.lane.b32.xlu0 %v8027_v18, %s14650_s20  ;;  %v8446_v1 = vsel %vm842_vm2, %v14163_v2, 0.0  ;;  %14174 = vtanh.f32 %v8027_v18 }
 0xf47   : > { %v18672_v31 = vadd.f32 %v13346_v50, %v18607_v40  ;;  %v18684_v51 = vpop.xlane.xlu1 %6813  ;;  %v14165_v52 = vpop.eup %14164  ;;  %14176 = vtanh.f32 %v8032_v28 }
 0xf48   : > { %v18686_v5 = vpop.xlane.xlu0 %6816  ;;  %v8443_v22 = vsel %vm842_vm2, %v14165_v52, 0.0  ;;  %v8036_v57 = vpop.f32.mrf.mxu1  ;;  %v8187_v45 = vmul.f32 1.442695, %v14165_v52 }
 0xf49   : > { %8333 = vrot.lane.b32.xlu1 %v18672_v31, %s14650_s20 }
 0xf4a   : > { %v13349_v4 = vpop.f32.mrf.mxu1  ;;  %14178 = vpow2.f32 %v8187_v45 }
 0xf4b   : > { %v18688_v32 = vpop.xlane.xlu1 %6819 }
 0xf4c   : > { %v18690_v50 = vpop.xlane.xlu0 %6822 }
 0xf4d   : > { %21194 = vst [vmem:[#allocation130_spill] sm:$0xff] %v18690_v50 }
 0xf4f   : > { %v18692_v20 = vpop.xlane.xlu1 %6825 }
 0xf50   : > { %21195 = vst [vmem:[#allocation137_spill] sm:$0xff] %v18692_v20  ;;  %v18694_v36 = vpop.xlane.xlu0 %6828 }
 0xf51   : > { %21196 = vst [vmem:[#allocation134_spill] sm:$0xff] %v18694_v36 }
 0xf53   : > { %v18696_v39 = vpop.xlane.xlu1 %6831 }
 0xf54   : > { %21197 = vst [vmem:[#allocation142_spill] sm:$0xff] %v18696_v39  ;;  %v18699_v49 = vpop.xlane.xlu0 %6834 }
 0xf55   : > { %21198 = vst [vmem:[#allocation138_spill] sm:$0xff] %v18699_v49 }
 0xf57   : > { %v18701_v13 = vpop.xlane.xlu1 %6837 }
 0xf58   : > { %21199 = vst [vmem:[#allocation144_spill] sm:$0xff] %v18701_v13  ;;  %v18703_v10 = vpop.xlane.xlu0 %6840 }
 0xf59   : > { %21200 = vst [vmem:[#allocation141_spill] sm:$0xff] %v18703_v10 }
 0xf5b   : > { %v18706_v26 = vpop.xlane.xlu1 %6843 }
 0xf5c   : > { %21201 = vst [vmem:[#allocation146_spill] sm:$0xff] %v18706_v26  ;;  %v18708_v61 = vpop.xlane.xlu0 %6846 }
 0xf5d   : > { %21202 = vst [vmem:[#allocation143_spill] sm:$0xff] %v18708_v61 }
 0xf5f   : > { %v18710_v15 = vpop.xlane.xlu1 %6849 }
 0xf60   : > { %21203 = vst [vmem:[#allocation148_spill] sm:$0xff] %v18710_v15  ;;  %v18712_v0 = vpop.xlane.xlu0 %6852 }
 0xf61   : > { %21204 = vst [vmem:[#allocation145_spill] sm:$0xff] %v18712_v0 }
 0xf63   : > { %v18719_v13 = vpop.xlane.xlu1 %6855 }
 0xf64   : > { %21205 = vst [vmem:[#allocation150_spill] sm:$0xff] %v18719_v13  ;;  %v18724_v26 = vpop.xlane.xlu0 %6858 }
 0xf65   : > { %8447 = vadd.xlane.f32.xlu0 %v8446_v1  ;;  %v18715_v1 = vadd.f32 %v18607_v40, %v8036_v57  ;;  %21206 = vst [vmem:[#allocation147_spill] sm:$0xff] %v18724_v26 }
 0xf67   : > { %v18728_v15 = vpop.xlane.xlu1 %6861 }
 0xf68   : > { %21207 = vst [vmem:[#allocation152_spill] sm:$0xff] %v18728_v15  ;;  %v18730_v0 = vpop.xlane.xlu0 %6864 }
 0xf69   : > { %21208 = vst [vmem:[#allocation149_spill] sm:$0xff] %v18730_v0  ;;  %v14167_v0 = vpop.eup %14166 }
 0xf6a   : > { %v14169_v26 = vpop.eup %14168  ;;  %v8452_v25 = vsel %vm842_vm2, %v14167_v0, 0.0  ;;  %v8193_v18 = vmul.f32 1.442695, %v14167_v0 }
 0xf6b   : > { %v18732_v57 = vpop.xlane.xlu1 %6867  ;;  %v8191_v58 = vmul.f32 1.442695, %v14169_v26 }
 0xf6c   : > { %21209 = vst [vmem:[#allocation154_spill] sm:$0xff] %v18732_v57  ;;  %v18735_v61 = vpop.xlane.xlu0 %6870 }
 0xf6d   : > { %8444 = vadd.xlane.f32.xlu1 %v8443_v22  ;;  %v18722_v22 = vadd.f32 %v13349_v4, %v18607_v40  ;;  %21210 = vst [vmem:[#allocation151_spill] sm:$0xff] %v18735_v61  ;;  %v8189_v61 = vmul.f32 1.442695, %v14163_v2 }
 0xf6f   : > { %v18738_v13 = vpop.xlane.xlu1 %6873  ;;  %14180 = vpow2.f32 %v8189_v61 }
 0xf70   : > { %21211 = vst [vmem:[#allocation156_spill] sm:$0xff] %v18738_v13  ;;  %v18741_v4 = vpop.xlane.xlu0 %6876  ;;  %v18751_v13 = vpop.eup %14170  ;;  %14182 = vpow2.f32 %v8191_v58 }
 0xf71   : > { %21212 = vst [vmem:[#allocation153_spill] sm:$0xff] %v18741_v4  ;;  %v18755_v28 = vpop.eup %14172  ;;  %v8195_v52 = vmul.f32 1.442695, %v18751_v13  ;;  %14184 = vpow2.f32 %v8193_v18  ;;  %v8046_v4 = vpop.f32.mrf.mxu1 }
 0xf72   : > { %v18779_v44 = vadd.f32 %v18607_v40, %v8046_v4 }
 0xf73   : > { %v18744_v15 = vpop.xlane.xlu1 %6879  ;;  %14186 = vpow2.f32 %v8195_v52 }
 0xf74   : > { %21213 = vst [vmem:[#allocation158_spill] sm:$0xff] %v18744_v15  ;;  %v18746_v57 = vpop.xlane.xlu0 %6882  ;;  %v18758_v15 = vpop.eup %14174 }
 0xf75   : > { %21214 = vst [vmem:[#allocation155_spill] sm:$0xff] %v18746_v57  ;;  %v18763_v45 = vpop.eup %14176  ;;  %v8199_v61 = vmul.f32 1.442695, %v18758_v15 }
 0xf76   : > { %v8201_v0 = vmul.f32 1.442695, %v18763_v45 }
 0xf77   : > { %v18749_v10 = vpop.xlane.xlu1 %6885 }
 0xf78   : > { %21215 = vst [vmem:[#allocation160_spill] sm:$0xff] %v18749_v10  ;;  %v18753_v9 = vpop.xlane.xlu0 %6888  ;;  %v8449_v10 = vsel %vm842_vm2, %v14169_v26, 0.0  ;;  %v21221_v26 = vld [vmem:[#allocation108_spill] sm:$0xff] }
 0xf79   : > { %21216 = vst [vmem:[#allocation157_spill] sm:$0xff] %v18753_v9 }
 0xf7b   : > { %8331 = vrot.lane.b32.xlu0 %v18715_v1, %s14650_s20  ;;  %v18760_v2 = vpop.xlane.xlu1 %6891 }
 0xf7c   : > { %21217 = vst [vmem:[#allocation162_spill] sm:$0xff] %v18760_v2  ;;  %v18766_v57 = vpop.xlane.xlu0 %6894  ;;  %v14179_v2 = vpop.eup %14178 }
 0xf7d   : > { %21218 = vst [vmem:[#allocation159_spill] sm:$0xff] %v18766_v57  ;;  %v14181_v9 = vpop.eup %14180  ;;  %v8251_v59 = vmul.f32 %v14179_v2, %v21221_v26  ;;  %v21226_v26 = vld [vmem:[#allocation111_spill] sm:$0xff] }
 0xf7e   : > { %8337 = vrot.lane.b32.xlu1 %v18722_v22, %s14650_s20  ;;  %v14183_v57 = vpop.eup %14182 }
 0xf7f   : > { %v18770_v58 = vpop.xlane.xlu1 %6897  ;;  %v14185_v49 = vpop.eup %14184 }
 0xf80   : > { %21219 = vst [vmem:[#allocation164_spill] sm:$0xff] %v18770_v58  ;;  %v18772_v18 = vpop.xlane.xlu0 %6900  ;;  %v14187_v2 = vpop.eup %14186  ;;  %v8254_v55 = vmul.f32 %v14185_v49, %v21226_v26  ;;  %v21229_v49 = vld [vmem:[#allocation112_spill] sm:$0xff] }
 0xf81   : > { %21220 = vst [vmem:[#allocation161_spill] sm:$0xff] %v18772_v18 }
 0xf9a   : > { %8453 = vadd.xlane.f32.xlu0 %v8452_v25  ;;  %v8197_v25 = vmul.f32 1.442695, %v18755_v28 }
 0xf9c   : > { %14188 = vpow2.f32 %v8197_v25 }
 0xf9d   : > { %14190 = vpow2.f32 %v8199_v61  ;;  %v13352_v61 = vpop.f32.mrf.mxu1 }
 0xf9e   : > { %14192 = vpow2.f32 %v8201_v0  ;;  %v21225_v0 = vld [vmem:[#allocation110_spill] sm:$0xff] }
 0xf9f   : > { %v8253_v37 = vmul.f32 %v14183_v57, %v21225_v0  ;;  %v8255_v57 = vmul.f32 %v14187_v2, %v21229_v49  ;;  %v21230_v0 = vld [vmem:[#allocation113_spill] sm:$0xff]  ;;  %14194 = vtanh.f32 %v18715_v1  ;;  %v11079_v1 = vld [vmem:[%s20497_s5 + $0x2c8] sm:$0xff] }
 0xfa0   : > { %14196 = vtanh.f32 %v18672_v31  ;;  %v8455_v31 = vsel %vm842_vm2, %v18751_v13, 0.0  ;;  %v11077_v13 = vld [vmem:[%s20497_s5 + $0x2b8] sm:$0xff] }
 0xfa2   : > { %8450 = vadd.xlane.f32.xlu1 %v8449_v10  ;;  %v21222_v10 = vld [vmem:[#allocation109_spill] sm:$0xff] }
 0xfa3   : > { %v8252_v52 = vmul.f32 %v14181_v9, %v21222_v10 }
 0xfaa   : > { %v8318_v63 = vpop.permute.xlu1 %8317 }
 0xfab   : > { %v18781_v58 = vadd.f32 %v8318_v63, %v8252_v52  ;;  %v18792_v63 = vadd.f32 %v13352_v61, %v18607_v40 }
 0xfac   : > { %v8316_v39 = vpop.permute.xlu0 %8315 }
 0xfad   : > { %v18776_v25 = vadd.f32 %v8316_v39, %v8251_v59  ;;  %21224 = vst [vmem:[#allocation163_spill] sm:$0xff] %v18781_v58  ;;  %v14189_v39 = vpop.eup %14188 }
 0xfae   : > { %v8322_v18 = vpop.permute.xlu1 %8321  ;;  %v14191_v52 = vpop.eup %14190  ;;  %v8256_v26 = vmul.f32 %v14189_v39, %v21230_v0 }
 0xfaf   : > { %21223 = vst [vmem:[#allocation166_spill] sm:$0xff] %v18776_v25  ;;  %13432 = vmatprep.mubr.msk.f32.mxu1 %vm842_vm2, %v18776_v25  ;;  %v18796_v9 = vadd.f32 %v8322_v18, %v8254_v55 }
 0xfb0   : > { %8335 = vrot.lane.b32.xlu0 %v18779_v44, %s14650_s20  ;;  %13433 = vmatmul.mubr.msk.f32.vlgmr.msra.gmra.mxu1 %vm842_vm2, %v18781_v58  ;;  %v8320_v59 = vpop.permute.xlu0 %8319  ;;  %v21237_v58 = vld [vmem:[#allocation119_spill] sm:$0xff] }
 0xfb1   : > { %v18794_v4 = vadd.f32 %v8320_v59, %v8253_v37  ;;  %21228 = vst [vmem:[#allocation165_spill] sm:$0xff] %v18796_v9  ;;  %v14193_v37 = vpop.eup %14192 }
 0xfb2   : > { %v8326_v10 = vpop.permute.xlu1 %8325  ;;  %v8258_v2 = vmul.f32 %v14193_v37, %v21234_v16 }
 0xfb3   : > { %21227 = vst [vmem:[#allocation168_spill] sm:$0xff] %v18794_v4  ;;  %8341 = vrot.lane.b32.xlu1 %v18792_v63, %s14650_s20  ;;  %13435 = vmatprep.mubr.msk.f32.mxu1 %vm842_vm2, %v18794_v4  ;;  %v18808_v55 = vadd.f32 %v8326_v10, %v8256_v26  ;;  %v8257_v4 = vmul.f32 %v14191_v52, %v21233_v29  ;;  %v8056_v10 = vpop.f32.mrf.mxu1  ;;  %v11085_v29 = vld [vmem:[%s20497_s5 + $0x2f8] sm:$0xff]  ;;  %v11083_v52 = vld [vmem:[%s20497_s5 + $0x2e8] sm:$0xff] }
 0xfb4   : > { %13436 = vmatmul.mubr.msk.f32.gmra.mxu1 %vm842_vm2, %v18796_v9  ;;  %v8324_v61 = vpop.permute.xlu0 %8323  ;;  %13480 = vmatprep.subr.mxu0 %v11085_v29 }
 0xfb5   : > { %v18806_v59 = vadd.f32 %v8324_v61, %v8255_v57  ;;  %21232 = vst [vmem:[#allocation171_spill] sm:$0xff] %v18808_v55  ;;  %13481 = vmatpush3.msra.mxu0 %v11085_v29  ;;  %v13355_v16 = vpop.f32.mrf.mxu1  ;;  %v11082_v61 = vld [vmem:[%s20497_s5 + $0x2e0] sm:$0xff]  ;;  %v11080_v29 = vld [vmem:[%s20497_s5 + $0x2d0] sm:$0xff] }
 0xfb6   : > { %v8330_v18 = vpop.permute.xlu1 %8329 }
 0xfb7   : > { %21231 = vst [vmem:[#allocation167_spill] sm:$0xff] %v18806_v59  ;;  %13438 = vmatprep.mubr.msk.f32.mxu1 %vm842_vm2, %v18806_v59  ;;  %v18818_v0 = vadd.f32 %v8330_v18, %v8258_v2  ;;  %v8066_v57 = vpop.f32.mrf.mxu1  ;;  %v11081_v18 = vld [vmem:[%s20497_s5 + $0x2d8] sm:$0xff]  ;;  %v8458_v2 = vsel %vm842_vm2, %v18755_v28, 0.0  ;;  %v18880_v59 = vadd.f32 %v13355_v16, %v18607_v40 }
 0xfb8   : > { %13439 = vmatmul.mubr.msk.f32.gmra.mxu1 %vm842_vm2, %v18808_v55  ;;  %v8328_v39 = vpop.permute.xlu0 %8327 }
 0xfb9   : > { %v18816_v49 = vadd.f32 %v8328_v39, %v8257_v4  ;;  %21236 = vst [vmem:[#allocation170_spill] sm:$0xff] %v18818_v0  ;;  %v11084_v4 = vld [vmem:[%s20497_s5 + $0x2f0] sm:$0xff]  ;;  %v18833_v26 = vpop.f32.mrf.mxu1 }
 0xfba   : > { %13482 = vmatprep.subr.mxu0 %v11084_v4 }
 0xfbb   : > { %21235 = vst [vmem:[#allocation169_spill] sm:$0xff] %v18816_v49  ;;  %13441 = vmatprep.mubr.msk.f32.mxu1 %vm842_vm2, %v18816_v49  ;;  %13483 = vmatpush3.msra.mxu0 %v11084_v4  ;;  %v8076_v37 = vpop.f32.mrf.mxu1  ;;  %v11076_v49 = vld [vmem:[%s20497_s5 + $0x2b0] sm:$0xff] }
 0xfbc   : > { %13442 = vmatmul.mubr.msk.f32.gmra.mxu1 %vm842_vm2, %v18818_v0  ;;  %13484 = vmatprep.subr.mxu0 %v11083_v52 }
 0xfbd   : > { %13485 = vmatpush3.msra.mxu0 %v11083_v52  ;;  %v18845_v39 = vpop.f32.mrf.mxu1  ;;  %v11078_v52 = vld [vmem:[%s20497_s5 + $0x2c0] sm:$0xff] }
 0xfbe   : > { %13486 = vmatprep.subr.mxu0 %v11082_v61 }
 0xfbf   : > { %13487 = vmatpush3.msra.mxu0 %v11082_v61  ;;  %v8086_v4 = vpop.f32.mrf.mxu1  ;;  %v18860_v61 = vpop.eup %14194 }
 0xfc0   : > { %13488 = vmatprep.subr.mxu0 %v11081_v18  ;;  %v18908_v34 = vadd.f32 %v18607_v40, %v8086_v4 }
 0xfc1   : > { %13489 = vmatpush3.msra.mxu0 %v11081_v18  ;;  %v18855_v28 = vpop.f32.mrf.mxu1  ;;  %v18862_v18 = vpop.eup %14196 }
 0xfc2   : > { %13490 = vmatprep.subr.mxu0 %v11080_v29 }
 0xfc3   : > { %13491 = vmatpush3.msra.mxu0 %v11080_v29  ;;  %v8203_v29 = vmul.f32 1.442695, %v18860_v61 }
 0xfc4   : > { %13492 = vmatprep.subr.mxu0 %v11079_v1 }
 0xfc5   : > { %13493 = vmatpush3.msra.mxu0 %v11079_v1  ;;  %v8205_v1 = vmul.f32 1.442695, %v18862_v18  ;;  %14198 = vpow2.f32 %v8203_v29  ;;  %v11075_v29 = vld [vmem:[%s20497_s5 + $0x2a8] sm:$0xff] }
 0xfc6   : > { %13494 = vmatprep.subr.mxu0 %v11078_v52 }
 0xfc7   : > { %13495 = vmatpush3.msra.mxu0 %v11078_v52  ;;  %14200 = vpow2.f32 %v8205_v1  ;;  %v18875_v52 = vadd.f32 %v18607_v40, %v8056_v10  ;;  %v18898_v10 = vadd.f32 %v18607_v40, %v8076_v37 }
 0xfc8   : > { %13496 = vmatprep.subr.mxu0 %v11077_v13  ;;  %14202 = vtanh.f32 %v18779_v44 }
 0xfc9   : > { %13497 = vmatpush3.msra.mxu0 %v11077_v13  ;;  %v18883_v13 = vadd.f32 %v18607_v40, %v8066_v57  ;;  %v11073_v57 = vld [vmem:[%s20497_s5 + $0x298] sm:$0xff]  ;;  %14204 = vtanh.f32 %v18722_v22 }
 0xfca   : > { %13498 = vmatprep.subr.mxu0 %v11076_v49 }
 0xfcb   : > { %13499 = vmatpush3.msra.mxu0 %v11076_v49  ;;  %v11074_v49 = vld [vmem:[%s20497_s5 + $0x2a0] sm:$0xff] }
 0xfcc   : > { %13500 = vmatprep.subr.mxu0 %v11075_v29 }
 0xfcd   : > { %13501 = vmatpush3.msra.mxu0 %v11075_v29 }
 0xfce   : > { %13502 = vmatprep.subr.mxu0 %v11074_v49 }
 0xfcf   : > { %8459 = vadd.xlane.f32.xlu0 %v8458_v2  ;;  %v8096_v2 = vpop.f32.mrf.mxu1  ;;  %13503 = vmatpush3.msra.mxu0 %v11074_v49  ;;  %v8334_v49 = vpop.permute.xlu1 %8333 }
 0xfd0   : > { %13504 = vmatprep.subr.mxu0 %v11073_v57  ;;  %v18917_v27 = vadd.f32 %v18607_v40, %v8096_v2 }
 0xfd1   : > { %13505 = vmatpush3.msra.mxu0 %v11073_v57 }
 0xfd2   : > { %v14199_v55 = vpop.eup %14198 }
 0xfd3   : > { %v8259_v25 = vmul.f32 %v14199_v55, %v21237_v58 }
 0xfd4   : > { %v14201_v29 = vpop.eup %14200 }
 0xfd5   : > { %v8260_v17 = vmul.f32 %v14201_v29, %v21238_v43  ;;  %v11072_v43 = vld [vmem:[%s20497_s5 + $0x290] sm:$0xff]  ;;  %v18969_v44 = vpop.eup %14202 }
 0xfd6   : > { %13506 = vmatprep.subr.mxu0 %v11072_v43  ;;  %v14205_v22 = vpop.eup %14204 }
 0xfd7   : > { %8456 = vadd.xlane.f32.xlu1 %v8455_v31  ;;  %v18869_v31 = vpop.f32.mrf.mxu1  ;;  %v18921_v4 = vadd.f32 %v8334_v49, %v8260_v17  ;;  %13507 = vmatpush3.msra.mxu0 %v11072_v43  ;;  %v11071_v17 = vld [vmem:[%s20497_s5 + $0x288] sm:$0xff]  ;;  %v8207_v43 = vmul.f32 1.442695, %v18969_v44 }
 0xfd8   : > { %13508 = vmatprep.subr.mxu0 %v11071_v17 }
 0xfd9   : > { %v8106_v0 = vpop.f32.mrf.mxu1  ;;  %21240 = vst [vmem:[#allocation109_spill] sm:$0xff] %v18921_v4  ;;  %13509 = vmatpush3.msra.mxu0 %v11071_v17  ;;  %v8209_v17 = vmul.f32 1.442695, %v14205_v22  ;;  %14206 = vpow2.f32 %v8207_v43 }
 0xfda   : > { %v18933_v58 = vadd.f32 %v18607_v40, %v8106_v0 }
 0xfdb   : > { %v18888_v1 = vpop.f32.mrf.mxu1  ;;  %14208 = vpow2.f32 %v8209_v17 }
 0xfdc   : > { %14210 = vtanh.f32 %v18792_v63  ;;  %v8464_v63 = vsel %vm842_vm2, %v18763_v45, 0.0 }
 0xfdd   : > { %v8116_v16 = vpop.f32.mrf.mxu1  ;;  %14212 = vtanh.f32 %v18880_v59 }
 0xfde   : > { %v18946_v55 = vadd.f32 %v18607_v40, %v8116_v16 }
 0xfdf   : > { %v18910_v37 = vpop.f32.mrf.mxu1 }
 0xfe1   : > { %v8126_v20 = vpop.f32.mrf.mxu1 }
 0xfe2   : > { %v18951_v2 = vadd.f32 %v18607_v40, %v8126_v20  ;;  %v8461_v20 = vsel %vm842_vm2, %v18758_v15, 0.0 }
 0xfe5   : > { %8339 = vrot.lane.b32.xlu0 %v18875_v52, %s14650_s20 }
 0xfe6   : > { %v14207_v15 = vpop.eup %14206 }
 0xfe8   : > { %8345 = vrot.lane.b32.xlu1 %v18880_v59, %s14650_s20  ;;  %v14209_v17 = vpop.eup %14208 }
 0xfe9   : > { %8343 = vrot.lane.b32.xlu0 %v18883_v13, %s14650_s20  ;;  %v8262_v62 = vmul.f32 %v14209_v17, %v21242_v47  ;;  %v8470_v47 = vsel %vm842_vm2, %v18862_v18, 0.0  ;;  %v14211_v45 = vpop.eup %14210 }
 0xfea   : > { %v14213_v18 = vpop.eup %14212  ;;  %v8213_v17 = vmul.f32 1.442695, %v14211_v45 }
 0xfed   : > { %8347 = vrot.lane.b32.xlu0 %v18898_v10, %s14650_s20 }
 0xfee   : > { %v18905_v9 = vpop.xlane.xlu0 %8447 }
 0xff1   : > { %8351 = vrot.lane.b32.xlu0 %v18908_v34, %s14650_s20 }
 0xff2   : > { %v8332_v36 = vpop.permute.xlu0 %8331 }
 0xff3   : > { %v18919_v50 = vadd.f32 %v8332_v36, %v8259_v25  ;;  %v18935_v36 = vpop.f32.mrf.mxu1  ;;  %v11070_v25 = vld [vmem:[%s20497_s5 + $0x280] sm:$0xff] }
 0xff4   : > { %13510 = vmatprep.subr.mxu0 %v11070_v25  ;;  %v8142_v59 = vadd.f32 %v18935_v36, %v18607_v40 }
 0xff5   : > { %21239 = vst [vmem:[#allocation108_spill] sm:$0xff] %v18919_v50  ;;  %8355 = vrot.lane.b32.xlu0 %v18917_v27, %s14650_s20  ;;  %13444 = vmatprep.mubr.msk.f32.mxu1 %vm842_vm2, %v18919_v50  ;;  %v8136_v0 = vpop.f32.mrf.mxu1  ;;  %v21241_v50 = vld [vmem:[#allocation123_spill] sm:$0xff] }
 0xff6   : > { %13445 = vmatmul.mubr.msk.f32.gmra.mxu1 %vm842_vm2, %v18921_v4  ;;  %13511 = vmatpush3.msra.mxu0 %v11070_v25  ;;  %v18958_v16 = vadd.f32 %v18607_v40, %v8136_v0  ;;  %v8082_v25 = vadd.f32 %v18833_v26, %v18607_v40  ;;  %v8092_v0 = vadd.f32 %v18845_v39, %v18607_v40 }
 0xff7   : > { %v13379_v57 = vpop.f32.mrf.mxu1  ;;  %v8261_v4 = vmul.f32 %v14207_v15, %v21241_v50  ;;  %v8112_v39 = vadd.f32 %v18869_v31, %v18607_v40  ;;  %v8122_v50 = vadd.f32 %v18888_v1, %v18607_v40  ;;  %v8482_v31 = vsel %vm842_vm2, %v14211_v45, 0.0 }
 0xff8   : > { %14214 = vtanh.f32 %v8082_v25  ;;  %v8152_v1 = vadd.f32 %v13379_v57, %v18607_v40 }
 0xff9   : > { %8359 = vrot.lane.b32.xlu0 %v18933_v58, %s14650_s20  ;;  %v8146_v29 = vpop.f32.mrf.mxu1  ;;  %14216 = vtanh.f32 %v8092_v0 }
 0xffa   : > { %v18963_v49 = vadd.f32 %v18607_v40, %v8146_v29  ;;  %v18977_v29 = vpop.xlane.xlu1 %8444 }
 0xffd   : > { %8363 = vrot.lane.b32.xlu0 %v18946_v55, %s14650_s20 }
 0xffe   : > { %v8338_v26 = vpop.permute.xlu1 %8337 }
 0xfff   : > { %v18995_v7 = vadd.f32 %v8338_v26, %v8262_v62  ;;  %v8132_v62 = vadd.f32 %v18910_v37, %v18607_v40  ;;  %v8488_v37 = vsel %vm842_vm2, %v14213_v18, 0.0 }
0x1001   : > { %8367 = vrot.lane.b32.xlu0 %v18951_v2, %s14650_s20  ;;  %21244 = vst [vmem:[#allocation111_spill] sm:$0xff] %v18995_v7 }
0x1005   : > { %8371 = vrot.lane.b32.xlu0 %v18958_v16, %s14650_s20 }
0x1009   : > { %8375 = vrot.lane.b32.xlu0 %v18963_v49, %s14650_s20 }
0x100c   : > { %8462 = vadd.xlane.f32.xlu1 %v8461_v20  ;;  %v8102_v20 = vadd.f32 %v18855_v28, %v18607_v40 }
0x100e   : > { %14218 = vtanh.f32 %v8102_v20 }
0x100f   : > { %14220 = vtanh.f32 %v18875_v52 }
0x1010   : > { %14222 = vtanh.f32 %v8112_v39 }
0x1011   : > { %14224 = vtanh.f32 %v18883_v13 }
0x1012   : > { %14226 = vtanh.f32 %v8122_v50 }
0x1013   : > { %14228 = vtanh.f32 %v18898_v10 }
0x1014   : > { %14230 = vtanh.f32 %v8132_v62 }
0x1015   : > { %14232 = vtanh.f32 %v8142_v59 }
0x1016   : > { %14234 = vtanh.f32 %v8152_v1 }
0x101d   : > { %8349 = vrot.lane.b32.xlu1 %v8082_v25, %s14650_s20 }
0x1021   : > { %8353 = vrot.lane.b32.xlu1 %v8092_v0, %s14650_s20 }
0x1023   : > { %v18983_v43 = vpop.xlane.xlu0 %8453 }
0x1025   : > { %8357 = vrot.lane.b32.xlu1 %v8102_v20, %s14650_s20 }
0x1027   : > { %v8336_v19 = vpop.permute.xlu0 %8335 }
0x1028   : > { %v18993_v28 = vadd.f32 %v8336_v19, %v8261_v4  ;;  %8465 = vadd.xlane.f32.xlu0 %v8464_v63  ;;  %v8476_v19 = vsel %vm842_vm2, %v14205_v22, 0.0  ;;  %v19018_v4 = vpop.eup %14214 }
0x1029   : > { %8361 = vrot.lane.b32.xlu1 %v8112_v39, %s14650_s20  ;;  %v8494_v36 = vsel %vm842_vm2, %v19018_v4, 0.0  ;;  %v19024_v22 = vpop.eup %14216 }
0x102a   : > { %21243 = vst [vmem:[#allocation110_spill] sm:$0xff] %v18993_v28  ;;  %13447 = vmatprep.mubr.msk.f32.mxu1 %vm842_vm2, %v18993_v28  ;;  %v8500_v40 = vsel %vm842_vm2, %v19024_v22, 0.0  ;;  %v19029_v52 = vpop.eup %14218 }
0x102b   : > { %13448 = vmatmul.mubr.msk.f32.gmra.mxu1 %vm842_vm2, %v18995_v7  ;;  %v19031_v57 = vpop.eup %14220  ;;  %v8506_v13 = vsel %vm842_vm2, %v19029_v52, 0.0 }
0x102c   : > { %8471 = vadd.xlane.f32.xlu0 %v8470_v47  ;;  %v19035_v25 = vpop.eup %14222  ;;  %v8211_v10 = vmul.f32 1.442695, %v19031_v57  ;;  %v8217_v47 = vmul.f32 1.442695, %v14213_v18 }
0x102d   : > { %8365 = vrot.lane.b32.xlu1 %v8122_v50, %s14650_s20  ;;  %v19037_v0 = vpop.eup %14224  ;;  %v8512_v15 = vsel %vm842_vm2, %v19035_v25, 0.0 }
0x102e   : > { %v19042_v20 = vpop.eup %14226  ;;  %14236 = vpow2.f32 %v8211_v10  ;;  %v8215_v39 = vmul.f32 1.442695, %v19037_v0  ;;  %v21246_v10 = vld [vmem:[#allocation127_spill] sm:$0xff] }
0x102f   : > { %v19044_v26 = vpop.eup %14228  ;;  %v8518_v63 = vsel %vm842_vm2, %v19042_v20, 0.0  ;;  %14238 = vpow2.f32 %v8213_v17 }
0x1030   : > { %8477 = vadd.xlane.f32.xlu0 %v8476_v19  ;;  %v19049_v50 = vpop.eup %14230  ;;  %14240 = vpow2.f32 %v8215_v39  ;;  %v21247_v39 = vld [vmem:[#allocation128_spill] sm:$0xff] }
0x1031   : > { %8369 = vrot.lane.b32.xlu1 %v8132_v62, %s14650_s20  ;;  %v8219_v62 = vmul.f32 1.442695, %v19044_v26  ;;  %v8524_v19 = vsel %vm842_vm2, %v19049_v50, 0.0  ;;  %v19054_v45 = vpop.eup %14232  ;;  %14242 = vpow2.f32 %v8217_v47  ;;  %v8467_v47 = vsel %vm842_vm2, %v18860_v61, 0.0 }
0x1032   : > { %v8473_v61 = vsel %vm842_vm2, %v18969_v44, 0.0  ;;  %v8479_v44 = vsel %vm842_vm2, %v19031_v57, 0.0  ;;  %v8491_v57 = vsel %vm842_vm2, %v19044_v26, 0.0 }
0x1033   : > { %14244 = vpow2.f32 %v8219_v62 }
0x1034   : > { %8483 = vadd.xlane.f32.xlu0 %v8482_v31  ;;  %v19058_v31 = vpop.eup %14234  ;;  %14246 = vtanh.f32 %v18908_v34 }
0x1035   : > { %8373 = vrot.lane.b32.xlu1 %v8142_v59, %s14650_s20  ;;  %v8530_v59 = vsel %vm842_vm2, %v19054_v45, 0.0  ;;  %v8536_v18 = vsel %vm842_vm2, %v19058_v31, 0.0  ;;  %14248 = vtanh.f32 %v18917_v27  ;;  %v8485_v27 = vsel %vm842_vm2, %v19037_v0, 0.0 }
0x1036   : > { %14250 = vtanh.f32 %v18933_v58 }
0x1037   : > { %14252 = vtanh.f32 %v18946_v55  ;;  %v19117_v55 = vld [vmem:[%s20496_s4 + $0x5] ss:$0 sm:$0xff] }
0x1038   : > { %8489 = vadd.xlane.f32.xlu0 %v8488_v37  ;;  %14254 = vtanh.f32 %v18951_v2 }
0x1039   : > { %8377 = vrot.lane.b32.xlu1 %v8152_v1, %s14650_s20  ;;  %v19060_v1 = vpop.xlane.xlu1 %8450  ;;  %14256 = vtanh.f32 %v18958_v16 }
0x103a   : > { %14258 = vtanh.f32 %v18963_v49 }
0x103b   : > { %v14237_v37 = vpop.eup %14236 }
0x103c   : > { %8495 = vadd.xlane.f32.xlu0 %v8494_v36 }
0x1040   : > { %8501 = vadd.xlane.f32.xlu0 %v8500_v40  ;;  %v14239_v40 = vpop.eup %14238 }
0x1041   : > { %v14241_v17 = vpop.eup %14240 }
0x1042   : > { %v14243_v28 = vpop.eup %14242 }
0x1044   : > { %8507 = vadd.xlane.f32.xlu0 %v8506_v13  ;;  %v8342_v13 = vpop.permute.xlu1 %8341 }
0x1048   : > { %8513 = vadd.xlane.f32.xlu0 %v8512_v15  ;;  %v8263_v15 = vmul.f32 %v14237_v37, %v21246_v10  ;;  %v14245_v37 = vpop.eup %14244 }
0x104c   : > { %8519 = vadd.xlane.f32.xlu0 %v8518_v63  ;;  %v8264_v63 = vmul.f32 %v14239_v40, %v21247_v39 }
0x1050   : > { %8525 = vadd.xlane.f32.xlu0 %v8524_v19 }
0x1054   : > { %8531 = vadd.xlane.f32.xlu0 %v8530_v59  ;;  %v19072_v59 = vadd.f32 %v8342_v13, %v8264_v63 }
0x1056   : > { %21249 = vst [vmem:[#allocation115_spill] sm:$0xff] %v19072_v59 }
0x1058   : > { %8537 = vadd.xlane.f32.xlu0 %v8536_v18  ;;  %v19064_v36 = vpop.xlane.xlu0 %8459  ;;  %v21250_v18 = vld [vmem:[#allocation131_spill] sm:$0xff] }
0x1059   : > { %21245 = vst [vmem:[#allocation112_spill] sm:$0xff] %v19064_v36  ;;  %v8265_v7 = vmul.f32 %v14241_v17, %v21250_v18  ;;  %v13384_v36 = vpop.f32.mrf.mxu0  ;;  %v21253_v17 = vld [vmem:[#allocation135_spill] sm:$0xff] }
0x105a   : > { %v8267_v63 = vmul.f32 %v14245_v37, %v21253_v17 }
0x105b   : > { %v8641_v34 = vpop.f32.mrf.mxu0 }
0x105c   : > { %v8340_v62 = vpop.permute.xlu0 %8339 }
0x105d   : > { %8468 = vadd.xlane.f32.xlu1 %v8467_v47  ;;  %v19070_v19 = vadd.f32 %v8340_v62, %v8263_v15  ;;  %v21252_v15 = vld [vmem:[#allocation132_spill] sm:$0xff] }
0x105e   : > { %v8266_v39 = vmul.f32 %v14243_v28, %v21252_v15  ;;  %v13387_v28 = vpop.f32.mrf.mxu0 }
0x105f   : > { %21248 = vst [vmem:[#allocation113_spill] sm:$0xff] %v19070_v19  ;;  %13450 = vmatprep.mubr.msk.f32.mxu1 %vm842_vm2, %v19070_v19 }
0x1060   : > { %v19078_v40 = vpop.xlane.xlu1 %8456  ;;  %13451 = vmatmul.mubr.msk.f32.gmra.mxu1 %vm842_vm2, %v19072_v59  ;;  %v8344_v13 = vpop.permute.xlu0 %8343 }
0x1061   : > { %8474 = vadd.xlane.f32.xlu1 %v8473_v61  ;;  %v19084_v10 = vadd.f32 %v8344_v13, %v8265_v7  ;;  %v8651_v37 = vpop.f32.mrf.mxu0  ;;  %v19107_v61 = vpop.eup %14246 }
0x1062   : > { %v8497_v58 = vsel %vm842_vm2, %v19107_v61, 0.0 }
0x1063   : > { %21251 = vst [vmem:[#allocation116_spill] sm:$0xff] %v19084_v10  ;;  %13453 = vmatprep.mubr.msk.f32.mxu1 %vm842_vm2, %v19084_v10  ;;  %v13390_v15 = vpop.f32.mrf.mxu0 }
0x1064   : > { %v8346_v47 = vpop.permute.xlu1 %8345  ;;  %v8348_v62 = vpop.permute.xlu0 %8347 }
0x1065   : > { %v19093_v18 = vadd.f32 %v8346_v47, %v8266_v39  ;;  %8480 = vadd.xlane.f32.xlu1 %v8479_v44  ;;  %v19095_v7 = vadd.f32 %v8348_v62, %v8267_v63  ;;  %v19112_v39 = vpop.eup %14248  ;;  %v8661_v44 = vpop.f32.mrf.mxu0 }
0x1066   : > { %v8503_v63 = vsel %vm842_vm2, %v19112_v39, 0.0  ;;  %v19123_v62 = vpop.eup %14250 }
0x1067   : > { %21254 = vst [vmem:[#allocation119_spill] sm:$0xff] %v19093_v18  ;;  %21255 = vst [vmem:[#allocation120_spill] sm:$0xff] %v19095_v7  ;;  %13454 = vmatmul.mubr.msk.f32.gmra.mxu1 %vm842_vm2, %v19093_v18  ;;  %v14253_v10 = vpop.eup %14252 }
0x1068   : > { %13456 = vmatprep.mubr.msk.f32.mxu1 %vm842_vm2, %v19095_v7  ;;  %v13393_v7 = vpop.f32.mrf.mxu0 }
0x1069   : > { %8486 = vadd.xlane.f32.xlu1 %v8485_v27 }
0x106d   : > { %8492 = vadd.xlane.f32.xlu1 %v8491_v57 }
0x1070   : > { %v13434_v13 = vpop.f32.mrf.mxu1 }
0x1071   : > { %8498 = vadd.xlane.f32.xlu1 %v8497_v58  ;;  %v8971_v0 = vadd.f32 %v13434_v13, %v13384_v36 }
0x1072   : > { %v8965_v26 = vpop.f32.mrf.mxu1 }
0x1073   : > { %v8966_v17 = vadd.f32 %v8965_v26, %v8641_v34  ;;  %v9133_v2 = vadd.f32 %v19117_v55, %v8971_v0  ;;  %v8509_v0 = vsel %vm842_vm2, %v19123_v62, 0.0 }
0x1074   : > { %v13437_v47 = vpop.f32.mrf.mxu1 }
0x1075   : > { %v9132_v36 = vadd.f32 %v19117_v55, %v8966_v17  ;;  %8504 = vadd.xlane.f32.xlu1 %v8503_v63  ;;  %v8981_v27 = vadd.f32 %v13437_v47, %v13387_v28  ;;  %v9165_v34 = vmax.f32 %v9133_v2, 0.0  ;;  %v8515_v2 = vsel %vm842_vm2, %v14253_v10, 0.0 }
0x1076   : > { %v8975_v57 = vpop.f32.mrf.mxu1 }
0x1077   : > { %v9164_v58 = vmax.f32 %v9132_v36, 0.0  ;;  %v8976_v13 = vadd.f32 %v8975_v57, %v8651_v37  ;;  %v9135_v16 = vadd.f32 %v19117_v55, %v8981_v27  ;;  %v8671_v27 = vpop.f32.mrf.mxu0  ;;  %v14255_v57 = vpop.eup %14254 }
0x1078   : > { %v13440_v26 = vpop.f32.mrf.mxu1 }
0x1079   : > { %v9134_v18 = vadd.f32 %v19117_v55, %v8976_v13  ;;  %8510 = vadd.xlane.f32.xlu1 %v8509_v0  ;;  %v8991_v17 = vadd.f32 %v13440_v26, %v13390_v15  ;;  %13512 = vmatprep.mubr.f32.mxu0 %v9164_v58  ;;  %v9167_v47 = vmax.f32 %v9135_v16, 0.0  ;;  %v14257_v16 = vpop.eup %14256 }
0x107a   : > { %v8985_v28 = vpop.f32.mrf.mxu1  ;;  %13513 = vmatmul.mubr.f32.vlgmr.msra.gmra.mxu0 %v9165_v34 }
0x107b   : > { %v9166_v63 = vmax.f32 %v9134_v18, 0.0  ;;  %v8986_v37 = vadd.f32 %v8985_v28, %v8661_v44  ;;  %v9137_v49 = vadd.f32 %v19117_v55, %v8991_v17  ;;  %v8521_v44 = vsel %vm842_vm2, %v14255_v57, 0.0 }
0x107c   : > { %v13443_v36 = vpop.f32.mrf.mxu1  ;;  %v8221_v17 = vmul.f32 1.442695, %v19018_v4  ;;  %v8527_v28 = vsel %vm842_vm2, %v14257_v16, 0.0 }
0x107d   : > { %v9136_v19 = vadd.f32 %v19117_v55, %v8986_v37  ;;  %8516 = vadd.xlane.f32.xlu1 %v8515_v2  ;;  %v9001_v59 = vadd.f32 %v13443_v36, %v13393_v7  ;;  %13515 = vmatprep.mubr.f32.mxu0 %v9166_v63  ;;  %v9169_v34 = vmax.f32 %v9137_v49, 0.0  ;;  %v19139_v63 = vpop.eup %14258  ;;  %v8225_v37 = vmul.f32 1.442695, %v19024_v22  ;;  %v8352_v2 = vpop.permute.xlu0 %8351  ;;  %v11101_v36 = vld [vmem:[%s20499_s7 + $0x2e8] sm:$0xff] }
0x107e   : > { %v8995_v13 = vpop.f32.mrf.mxu1  ;;  %13516 = vmatmul.mubr.f32.gmra.mxu0 %v9167_v47  ;;  %14260 = vpow2.f32 %v8221_v17  ;;  %v8533_v4 = vsel %vm842_vm2, %v19139_v63, 0.0  ;;  %v8227_v47 = vmul.f32 1.442695, %v19112_v39  ;;  %v8229_v49 = vmul.f32 1.442695, %v19029_v52  ;;  %v11100_v52 = vld [vmem:[%s20499_s7 + $0x2e0] sm:$0xff] }
0x107f   : > { %v9168_v15 = vmax.f32 %v9136_v19, 0.0  ;;  %v8996_v58 = vadd.f32 %v8995_v13, %v8671_v27  ;;  %v9139_v18 = vadd.f32 %v19117_v55, %v9001_v59  ;;  %v8223_v19 = vmul.f32 1.442695, %v19107_v61  ;;  %v11103_v59 = vld [vmem:[%s20499_s7 + $0x2f8] sm:$0xff]  ;;  %v11102_v61 = vld [vmem:[%s20499_s7 + $0x2f0] sm:$0xff] }
0x1080   : > { %13560 = vmatprep.subr.mxu1 %v11103_v59  ;;  %v8231_v22 = vmul.f32 1.442695, %v19123_v62  ;;  %v8233_v39 = vmul.f32 1.442695, %v19035_v25  ;;  %v8235_v27 = vmul.f32 1.442695, %v14253_v10 }
0x1081   : > { %v9138_v0 = vadd.f32 %v19117_v55, %v8996_v58  ;;  %8522 = vadd.xlane.f32.xlu1 %v8521_v44  ;;  %13518 = vmatprep.mubr.f32.mxu0 %v9168_v15  ;;  %v9171_v7 = vmax.f32 %v9139_v18, 0.0  ;;  %14262 = vpow2.f32 %v8223_v19  ;;  %v8356_v13 = vpop.permute.xlu0 %8355  ;;  %v11099_v62 = vld [vmem:[%s20499_s7 + $0x2d8] sm:$0xff]  ;;  %v8237_v15 = vmul.f32 1.442695, %v19042_v20  ;;  %v11098_v10 = vld [vmem:[%s20499_s7 + $0x2d0] sm:$0xff]  ;;  %v11097_v44 = vld [vmem:[%s20499_s7 + $0x2c8] sm:$0xff] }
0x1082   : > { %13519 = vmatmul.mubr.f32.gmra.mxu0 %v9169_v34  ;;  %13561 = vmatpush3.msra.mxu1 %v11103_v59  ;;  %14264 = vpow2.f32 %v8225_v37  ;;  %v8239_v25 = vmul.f32 1.442695, %v14255_v57  ;;  %v8241_v20 = vmul.f32 1.442695, %v19049_v50  ;;  %v8245_v50 = vmul.f32 1.442695, %v19054_v45 }
0x1083   : > { %v9170_v26 = vmax.f32 %v9138_v0, 0.0  ;;  %13562 = vmatprep.subr.mxu1 %v11102_v61  ;;  %14266 = vpow2.f32 %v8227_v47 }
0x1084   : > { %13563 = vmatpush3.msra.mxu1 %v11102_v61  ;;  %14268 = vpow2.f32 %v8229_v49  ;;  %v21260_v61 = vld [vmem:[#allocation140_spill] sm:$0xff] }
0x1085   : > { %8528 = vadd.xlane.f32.xlu1 %v8527_v28  ;;  %13521 = vmatprep.mubr.f32.mxu0 %v9170_v26  ;;  %14270 = vpow2.f32 %v8231_v22  ;;  %v8360_v0 = vpop.permute.xlu0 %8359  ;;  %v21256_v26 = vld [vmem:[#allocation136_spill] sm:$0xff]  ;;  %v21257_v28 = vld [vmem:[#allocation139_spill] sm:$0xff]  ;;  %v8247_v22 = vmul.f32 1.442695, %v19139_v63 }
0x1086   : > { %13522 = vmatmul.mubr.f32.gmra.mxu0 %v9171_v7  ;;  %13564 = vmatprep.subr.mxu1 %v11101_v36  ;;  %14272 = vpow2.f32 %v8233_v39  ;;  %v8243_v7 = vmul.f32 1.442695, %v14257_v16 }
0x1087   : > { %13565 = vmatpush3.msra.mxu1 %v11101_v36  ;;  %14274 = vpow2.f32 %v8235_v27  ;;  %v21261_v36 = vld [vmem:[#allocation34_spill] sm:$0xff] }
0x1088   : > { %13566 = vmatprep.subr.mxu1 %v11100_v52  ;;  %14276 = vpow2.f32 %v8237_v15  ;;  %v8249_v15 = vmul.f32 1.442695, %v19058_v31 }
0x1089   : > { %8534 = vadd.xlane.f32.xlu1 %v8533_v4  ;;  %13567 = vmatpush3.msra.mxu1 %v11100_v52  ;;  %14278 = vpow2.f32 %v8239_v25  ;;  %v8364_v52 = vpop.permute.xlu0 %8363 }
0x108a   : > { %13568 = vmatprep.subr.mxu1 %v11099_v62  ;;  %14280 = vpow2.f32 %v8241_v20 }
0x108b   : > { %v14261_v58 = vpop.eup %14260  ;;  %13569 = vmatpush3.msra.mxu1 %v11099_v62  ;;  %14282 = vpow2.f32 %v8243_v7 }
0x108c   : > { %v8268_v57 = vmul.f32 %v14261_v58, %v21256_v26  ;;  %13570 = vmatprep.subr.mxu1 %v11098_v10  ;;  %14284 = vpow2.f32 %v8245_v50  ;;  %v21264_v58 = vld [vmem:[#allocation35_spill] sm:$0xff] }
0x108d   : > { %13571 = vmatpush3.msra.mxu1 %v11098_v10  ;;  %14286 = vpow2.f32 %v8247_v22  ;;  %v21265_v10 = vld [vmem:[#allocation36_spill] sm:$0xff]  ;;  %v8368_v31 = vpop.permute.xlu0 %8367 }
0x108e   : > { %v14263_v18 = vpop.eup %14262  ;;  %13572 = vmatprep.subr.mxu1 %v11097_v44  ;;  %14288 = vpow2.f32 %v8249_v15 }
0x108f   : > { %v14265_v17 = vpop.eup %14264  ;;  %v8269_v19 = vmul.f32 %v14263_v18, %v21257_v28  ;;  %13573 = vmatpush3.msra.mxu1 %v11097_v44  ;;  %v21269_v28 = vld [vmem:[#allocation38_spill] sm:$0xff] }
0x1090   : > { %v14267_v37 = vpop.eup %14266  ;;  %v8270_v49 = vmul.f32 %v14265_v17, %v21260_v61 }
0x1091   : > { %v19178_v47 = vadd.f32 %v8352_v2, %v8269_v19  ;;  %v14269_v16 = vpop.eup %14268  ;;  %v8271_v39 = vmul.f32 %v14267_v37, %v21261_v36  ;;  %v21273_v36 = vld [vmem:[#allocation40_spill] sm:$0xff] }
0x1092   : > { %v14271_v2 = vpop.eup %14270  ;;  %v8272_v63 = vmul.f32 %v14269_v16, %v21264_v58 }
0x1093   : > { %21259 = vst [vmem:[#allocation124_spill] sm:$0xff] %v19178_v47  ;;  %v19190_v45 = vadd.f32 %v8356_v13, %v8271_v39  ;;  %v14273_v25 = vpop.eup %14272  ;;  %v8273_v18 = vmul.f32 %v14271_v2, %v21265_v10  ;;  %v11095_v10 = vld [vmem:[%s20499_s7 + $0x2b8] sm:$0xff] }
0x1094   : > { %v14275_v20 = vpop.eup %14274 }
0x1095   : > { %v19165_v34 = vpop.xlane.xlu1 %8462  ;;  %21263 = vst [vmem:[#allocation128_spill] sm:$0xff] %v19190_v45  ;;  %v19201_v13 = vadd.f32 %v8360_v0, %v8273_v18  ;;  %v14277_v7 = vpop.eup %14276  ;;  %v8275_v19 = vmul.f32 %v14275_v20, %v21269_v28  ;;  %v11096_v0 = vld [vmem:[%s20499_s7 + $0x2c0] sm:$0xff] }
0x1096   : > { %v14279_v37 = vpop.eup %14278  ;;  %13574 = vmatprep.subr.mxu1 %v11096_v0 }
0x1097   : > { %21267 = vst [vmem:[#allocation132_spill] sm:$0xff] %v19201_v13  ;;  %v19211_v61 = vadd.f32 %v8364_v52, %v8275_v19  ;;  %v14281_v22 = vpop.eup %14280  ;;  %v8277_v39 = vmul.f32 %v14279_v37, %v21273_v36  ;;  %13575 = vmatpush3.msra.mxu1 %v11096_v0  ;;  %v8372_v52 = vpop.permute.xlu0 %8371  ;;  %v11093_v19 = vld [vmem:[%s20499_s7 + $0x2a8] sm:$0xff] }
0x1098   : > { %v14283_v2 = vpop.eup %14282  ;;  %13576 = vmatprep.subr.mxu1 %v11095_v10  ;;  %v21280_v37 = vld [vmem:[#allocation43_spill] sm:$0xff] }
0x1099   : > { %v8350_v59 = vpop.permute.xlu1 %8349  ;;  %21271 = vst [vmem:[#allocation136_spill] sm:$0xff] %v19211_v61  ;;  %v19224_v58 = vadd.f32 %v8368_v31, %v8277_v39  ;;  %v14285_v18 = vpop.eup %14284  ;;  %13577 = vmatpush3.msra.mxu1 %v11095_v10  ;;  %v11092_v39 = vld [vmem:[%s20499_s7 + $0x2a0] sm:$0xff] }
0x109a   : > { %v19176_v4 = vadd.f32 %v8350_v59, %v8268_v57  ;;  %v21268_v57 = vld [vmem:[#allocation37_spill] sm:$0xff]  ;;  %v8280_v0 = vmul.f32 %v14285_v18, %v21280_v37 }
0x109b   : > { %v8274_v17 = vmul.f32 %v14273_v25, %v21268_v57  ;;  %21275 = vst [vmem:[#allocation140_spill] sm:$0xff] %v19224_v58 }
0x109c   : > { %21258 = vst [vmem:[#allocation123_spill] sm:$0xff] %v19176_v4  ;;  %13457 = vmatmul.mubr.msk.f32.gmra.mxu1 %vm842_vm2, %v19176_v4 }
0x109d   : > { %v8354_v27 = vpop.permute.xlu1 %8353  ;;  %13459 = vmatprep.mubr.msk.f32.mxu1 %vm842_vm2, %v19178_v47 }
0x109e   : > { %v19188_v62 = vadd.f32 %v8354_v27, %v8270_v49  ;;  %v21272_v49 = vld [vmem:[#allocation39_spill] sm:$0xff] }
0x109f   : > { %v8276_v16 = vmul.f32 %v14277_v7, %v21272_v49  ;;  %v11094_v7 = vld [vmem:[%s20499_s7 + $0x2b0] sm:$0xff] }
0x10a0   : > { %21262 = vst [vmem:[#allocation127_spill] sm:$0xff] %v19188_v62  ;;  %13460 = vmatmul.mubr.msk.f32.gmra.mxu1 %vm842_vm2, %v19188_v62  ;;  %13578 = vmatprep.subr.mxu1 %v11094_v7 }
0x10a1   : > { %v8358_v44 = vpop.permute.xlu1 %8357  ;;  %13462 = vmatprep.mubr.msk.f32.mxu1 %vm842_vm2, %v19190_v45  ;;  %13579 = vmatpush3.msra.mxu1 %v11094_v7 }
0x10a2   : > { %v19199_v26 = vadd.f32 %v8358_v44, %v8272_v63  ;;  %v21276_v63 = vld [vmem:[#allocation41_spill] sm:$0xff]  ;;  %v21277_v44 = vld [vmem:[#allocation42_spill] sm:$0xff]  ;;  %13580 = vmatprep.subr.mxu1 %v11093_v19 }
0x10a3   : > { %v8278_v25 = vmul.f32 %v14281_v22, %v21276_v63  ;;  %v8279_v20 = vmul.f32 %v14283_v2, %v21277_v44  ;;  %13581 = vmatpush3.msra.mxu1 %v11093_v19  ;;  %v13396_v63 = vpop.f32.mrf.mxu0 }
0x10a4   : > { %21266 = vst [vmem:[#allocation131_spill] sm:$0xff] %v19199_v26  ;;  %13463 = vmatmul.mubr.msk.f32.gmra.mxu1 %vm842_vm2, %v19199_v26  ;;  %13582 = vmatprep.subr.mxu1 %v11092_v39 }
0x10a5   : > { %v8362_v59 = vpop.permute.xlu1 %8361  ;;  %13465 = vmatprep.mubr.msk.f32.mxu1 %vm842_vm2, %v19201_v13  ;;  %v19240_v28 = vadd.f32 %v8372_v52, %v8279_v20  ;;  %v11091_v52 = vld [vmem:[%s20499_s7 + $0x298] sm:$0xff]  ;;  %13583 = vmatpush3.msra.mxu1 %v11092_v39 }
0x10a6   : > { %v19209_v50 = vadd.f32 %v8362_v59, %v8274_v17  ;;  %v14287_v17 = vpop.eup %14286  ;;  %v8376_v59 = vpop.permute.xlu0 %8375  ;;  %13584 = vmatprep.subr.mxu1 %v11091_v52 }
0x10a7   : > { %21279 = vst [vmem:[#allocation35_spill] sm:$0xff] %v19240_v28  ;;  %v14289_v49 = vpop.eup %14288  ;;  %13585 = vmatpush3.msra.mxu1 %v11091_v52 }
0x10a8   : > { %21270 = vst [vmem:[#allocation135_spill] sm:$0xff] %v19209_v50  ;;  %13466 = vmatmul.mubr.msk.f32.gmra.mxu1 %vm842_vm2, %v19209_v50 }
0x10a9   : > { %v8366_v27 = vpop.permute.xlu1 %8365  ;;  %13468 = vmatprep.mubr.msk.f32.mxu1 %vm842_vm2, %v19211_v61 }
0x10aa   : > { %v19222_v15 = vadd.f32 %v8366_v27, %v8276_v16  ;;  %v21281_v16 = vld [vmem:[#allocation44_spill] sm:$0xff] }
0x10ab   : > { %v8281_v22 = vmul.f32 %v14287_v17, %v21281_v16  ;;  %v8681_v17 = vpop.f32.mrf.mxu0 }
0x10ac   : > { %21274 = vst [vmem:[#allocation139_spill] sm:$0xff] %v19222_v15  ;;  %13469 = vmatmul.mubr.msk.f32.gmra.mxu1 %vm842_vm2, %v19222_v15 }
0x10ad   : > { %v8370_v57 = vpop.permute.xlu1 %8369  ;;  %13471 = vmatprep.mubr.msk.f32.mxu1 %vm842_vm2, %v19224_v58  ;;  %v19256_v2 = vadd.f32 %v8376_v59, %v8281_v22  ;;  %v11089_v22 = vld [vmem:[%s20499_s7 + $0x288] sm:$0xff]  ;;  %v13399_v39 = vpop.f32.mrf.mxu0 }
0x10ae   : > { %v19235_v31 = vadd.f32 %v8370_v57, %v8278_v25  ;;  %v21284_v25 = vld [vmem:[#allocation45_spill] sm:$0xff] }
0x10af   : > { %21283 = vst [vmem:[#allocation37_spill] sm:$0xff] %v19256_v2  ;;  %v8282_v10 = vmul.f32 %v14289_v49, %v21284_v25  ;;  %v11090_v49 = vld [vmem:[%s20499_s7 + $0x290] sm:$0xff]  ;;  %v8691_v52 = vpop.f32.mrf.mxu0 }
0x10b0   : > { %21278 = vst [vmem:[#allocation34_spill] sm:$0xff] %v19235_v31  ;;  %13472 = vmatmul.mubr.msk.f32.gmra.mxu1 %vm842_vm2, %v19235_v31  ;;  %13586 = vmatprep.subr.mxu1 %v11090_v49 }
0x10b1   : > { %v8374_v36 = vpop.permute.xlu1 %8373  ;;  %13474 = vmatprep.mubr.msk.f32.mxu1 %vm842_vm2, %v19240_v28  ;;  %13587 = vmatpush3.msra.mxu1 %v11090_v49 }
0x10b2   : > { %v19254_v27 = vadd.f32 %v8374_v36, %v8280_v0  ;;  %13588 = vmatprep.subr.mxu1 %v11089_v22  ;;  %v11088_v36 = vld [vmem:[%s20499_s7 + $0x280] sm:$0xff] }
0x10b3   : > { %13589 = vmatpush3.msra.mxu1 %v11089_v22 }
0x10b4   : > { %21282 = vst [vmem:[#allocation36_spill] sm:$0xff] %v19254_v27  ;;  %13475 = vmatmul.mubr.msk.f32.gmra.mxu1 %vm842_vm2, %v19254_v27  ;;  %13590 = vmatprep.subr.mxu1 %v11088_v36 }
0x10b5   : > { %v8378_v18 = vpop.permute.xlu1 %8377  ;;  %13477 = vmatprep.mubr.msk.f32.mxu1 %vm842_vm2, %v19256_v2  ;;  %13591 = vmatpush3.msra.mxu1 %v11088_v36 }
0x10b6   : > { %v19266_v44 = vadd.f32 %v8378_v18, %v8282_v10  ;;  %v13446_v20 = vpop.f32.mrf.mxu1 }
0x10b7   : > { %v9011_v57 = vadd.f32 %v13446_v20, %v13396_v63  ;;  %v13402_v63 = vpop.f32.mrf.mxu0 }
0x10b8   : > { %21285 = vst [vmem:[#allocation38_spill] sm:$0xff] %v19266_v44  ;;  %13478 = vmatmul.mubr.msk.f32.gmra.mxu1 %vm842_vm2, %v19266_v44  ;;  %v9005_v7 = vpop.f32.mrf.mxu1 }
0x10b9   : > { %v9006_v19 = vadd.f32 %v9005_v7, %v8681_v17  ;;  %v9141_v59 = vadd.f32 %v19117_v55, %v9011_v57  ;;  %v8701_v57 = vpop.f32.mrf.mxu0 }
0x10bb   : > { %v9140_v37 = vadd.f32 %v19117_v55, %v9006_v19  ;;  %v9173_v16 = vmax.f32 %v9141_v59, 0.0  ;;  %v13405_v59 = vpop.f32.mrf.mxu0 }
0x10bd   : > { %v9172_v0 = vmax.f32 %v9140_v37, 0.0 }
0x10bf   : > { %13524 = vmatprep.mubr.f32.mxu0 %v9172_v0  ;;  %v8711_v0 = vpop.f32.mrf.mxu0 }
0x10c0   : > { %13525 = vmatmul.mubr.f32.gmra.mxu0 %v9173_v16 }
0x10c1   : > { %v19283_v49 = vpop.f32.mrf.mxu0 }
0x10c3   : > { %v19285_v16 = vpop.f32.mrf.mxu0 }
0x10c5   : > { %v19287_v22 = vpop.f32.mrf.mxu0 }
0x10c7   : > { %v19289_v36 = vpop.f32.mrf.mxu0 }
0x10eb   : > { %v13449_v25 = vpop.f32.mrf.mxu1 }
0x10ec   : > { %v9021_v10 = vadd.f32 %v13449_v25, %v13399_v39  ;;  %v19291_v39 = vpop.f32.mrf.mxu0 }
0x10ed   : > { %v9015_v18 = vpop.f32.mrf.mxu1 }
0x10ee   : > { %v9016_v20 = vadd.f32 %v9015_v18, %v8691_v52  ;;  %v9143_v17 = vadd.f32 %v19117_v55, %v9021_v10  ;;  %v19293_v52 = vpop.f32.mrf.mxu0 }
0x10f0   : > { %v9142_v7 = vadd.f32 %v19117_v55, %v9016_v20  ;;  %v9175_v37 = vmax.f32 %v9143_v17, 0.0  ;;  %v19295_v25 = vpop.f32.mrf.mxu0 }
0x10f2   : > { %v9174_v19 = vmax.f32 %v9142_v7, 0.0  ;;  %v19297_v10 = vpop.f32.mrf.mxu0 }
0x10f4   : > { %13527 = vmatprep.mubr.f32.mxu0 %v9174_v19  ;;  %v19299_v18 = vpop.f32.mrf.mxu0 }
0x10f5   : > { %13528 = vmatmul.mubr.f32.gmra.mxu0 %v9175_v37 }
0x10f6   : > { %v19301_v20 = vpop.f32.mrf.mxu0 }
0x10f8   : > { %v19303_v37 = vpop.f32.mrf.mxu0 }
0x10fa   : > { %v19307_v28 = vpop.f32.mrf.mxu0 }
0x10fc   : > { %v19309_v45 = vpop.f32.mrf.mxu0 }
0x1120   : > { %v13452_v17 = vpop.f32.mrf.mxu1 }
0x1121   : > { %v9031_v7 = vadd.f32 %v13452_v17, %v13402_v63 }
0x1122   : > { %v9025_v19 = vpop.f32.mrf.mxu1 }
0x1123   : > { %v9026_v44 = vadd.f32 %v9025_v19, %v8701_v57  ;;  %v9145_v2 = vadd.f32 %v19117_v55, %v9031_v7  ;;  %v19313_v7 = vpop.f32.mrf.mxu0 }
0x1125   : > { %v9144_v27 = vadd.f32 %v19117_v55, %v9026_v44  ;;  %v9177_v15 = vmax.f32 %v9145_v2, 0.0 }
0x1127   : > { %v9176_v31 = vmax.f32 %v9144_v27, 0.0  ;;  %v13455_v58 = vpop.f32.mrf.mxu1  ;;  %v19315_v27 = vpop.f32.mrf.mxu0 }
0x1128   : > { %v9041_v61 = vadd.f32 %v13455_v58, %v13405_v59 }
0x1129   : > { %v9035_v13 = vpop.f32.mrf.mxu1  ;;  %13530 = vmatprep.mubr.f32.mxu0 %v9176_v31  ;;  %v19317_v2 = vpop.f32.mrf.mxu0 }
0x112a   : > { %v9036_v50 = vadd.f32 %v9035_v13, %v8711_v0  ;;  %13531 = vmatmul.mubr.f32.gmra.mxu0 %v9177_v15  ;;  %v9147_v63 = vadd.f32 %v19117_v55, %v9041_v61  ;;  %v19322_v13 = vld [vmem:[%s20498_s6 + $0x5] ss:$0 sm:$0xff] }
0x112c   : > { %v9146_v57 = vadd.f32 %v19117_v55, %v9036_v50  ;;  %v9179_v44 = vmax.f32 %v9147_v63, 0.0 }
0x112e   : > { %v9178_v17 = vmax.f32 %v9146_v57, 0.0 }
0x1130   : > { %13533 = vmatprep.mubr.f32.mxu0 %v9178_v17 }
0x1131   : > { %13534 = vmatmul.mubr.f32.gmra.mxu0 %v9179_v44 }
0x113a   : > { %v13514_v15 = vpop.f32.mrf.mxu0 }
0x113b   : > { %v9293_v61 = vadd.f32 %v13514_v15, %v19322_v13 }
0x113c   : > { %v9287_v58 = vpop.f32.mrf.mxu0 }
0x113d   : > { %v9288_v50 = vadd.f32 %v19322_v13, %v9287_v58  ;;  %v9447_v0 = vmax.f32 %v9293_v61, 0.0 }
0x113e   : > { %v13517_v31 = vpop.f32.mrf.mxu0 }
0x113f   : > { %v9446_v59 = vmax.f32 %v9288_v50, 0.0  ;;  %v9303_v19 = vadd.f32 %v13517_v31, %v19322_v13 }
0x1140   : > { %v9297_v63 = vpop.f32.mrf.mxu0 }
0x1141   : > { %v9298_v57 = vadd.f32 %v19322_v13, %v9297_v63  ;;  %13592 = vmatprep.mubr.f32.mxu1 %v9446_v59  ;;  %v9449_v26 = vmax.f32 %v9303_v19, 0.0 }
0x1142   : > { %v13520_v17 = vpop.f32.mrf.mxu0  ;;  %13593 = vmatmul.mubr.f32.vlgmr.msra.gmra.mxu1 %v9447_v0 }
0x1143   : > { %v9448_v44 = vmax.f32 %v9298_v57, 0.0  ;;  %v9313_v47 = vadd.f32 %v13520_v17, %v19322_v13 }
0x1144   : > { %v9307_v62 = vpop.f32.mrf.mxu0 }
0x1145   : > { %v9308_v15 = vadd.f32 %v19322_v13, %v9307_v62  ;;  %13595 = vmatprep.mubr.f32.mxu1 %v9448_v44  ;;  %v9451_v61 = vmax.f32 %v9313_v47, 0.0 }
0x1146   : > { %v13523_v58 = vpop.f32.mrf.mxu0  ;;  %13596 = vmatmul.mubr.f32.gmra.mxu1 %v9449_v26 }
0x1147   : > { %v9450_v50 = vmax.f32 %v9308_v15, 0.0  ;;  %v9323_v31 = vadd.f32 %v13523_v58, %v19322_v13 }
0x1148   : > { %v9317_v4 = vpop.f32.mrf.mxu0 }
0x1149   : > { %v9318_v63 = vadd.f32 %v19322_v13, %v9317_v4  ;;  %13598 = vmatprep.mubr.f32.mxu1 %v9450_v50  ;;  %v9453_v0 = vmax.f32 %v9323_v31, 0.0 }
0x114a   : > { %13599 = vmatmul.mubr.f32.gmra.mxu1 %v9451_v61 }
0x114b   : > { %v9452_v59 = vmax.f32 %v9318_v63, 0.0 }
0x114d   : > { %13601 = vmatprep.mubr.f32.mxu1 %v9452_v59 }
0x114e   : > { %13602 = vmatmul.mubr.f32.gmra.mxu1 %v9453_v0 }
0x115c   : > { %v13458_v19 = vpop.f32.mrf.mxu1 }
0x115d   : > { %v9051_v57 = vadd.f32 %v13458_v19, %v19283_v49 }
0x115e   : > { %v9045_v62 = vpop.f32.mrf.mxu1 }
0x115f   : > { %v9046_v17 = vadd.f32 %v9045_v62, %v19285_v16  ;;  %v9149_v26 = vadd.f32 %v19117_v55, %v9051_v57 }
0x1160   : > { %v13461_v47 = vpop.f32.mrf.mxu1 }
0x1161   : > { %v9148_v44 = vadd.f32 %v19117_v55, %v9046_v17  ;;  %v9061_v15 = vadd.f32 %v13461_v47, %v19287_v22  ;;  %v9181_v61 = vmax.f32 %v9149_v26, 0.0 }
0x1162   : > { %v9055_v4 = vpop.f32.mrf.mxu1 }
0x1163   : > { %v9180_v58 = vmax.f32 %v9148_v44, 0.0  ;;  %v9056_v50 = vadd.f32 %v9055_v4, %v19289_v36  ;;  %v9151_v31 = vadd.f32 %v19117_v55, %v9061_v15 }
0x1164   : > { %v13464_v63 = vpop.f32.mrf.mxu1 }
0x1165   : > { %v9150_v49 = vadd.f32 %v19117_v55, %v9056_v50  ;;  %v9071_v59 = vadd.f32 %v13464_v63, %v19291_v39  ;;  %13536 = vmatprep.mubr.f32.mxu0 %v9180_v58  ;;  %v9183_v57 = vmax.f32 %v9151_v31, 0.0 }
0x1166   : > { %v9065_v16 = vpop.f32.mrf.mxu1  ;;  %13537 = vmatmul.mubr.f32.gmra.mxu0 %v9181_v61 }
0x1167   : > { %v9182_v0 = vmax.f32 %v9150_v49, 0.0  ;;  %v9066_v19 = vadd.f32 %v9065_v16, %v19293_v52  ;;  %v9153_v22 = vadd.f32 %v19117_v55, %v9071_v59 }
0x1168   : > { %v13467_v62 = vpop.f32.mrf.mxu1 }
0x1169   : > { %v9152_v36 = vadd.f32 %v19117_v55, %v9066_v19  ;;  %v9081_v17 = vadd.f32 %v13467_v62, %v19295_v25  ;;  %13539 = vmatprep.mubr.f32.mxu0 %v9182_v0  ;;  %v9185_v44 = vmax.f32 %v9153_v22, 0.0 }
0x116a   : > { %v9075_v26 = vpop.f32.mrf.mxu1  ;;  %13540 = vmatmul.mubr.f32.gmra.mxu0 %v9183_v57 }
0x116b   : > { %v9184_v47 = vmax.f32 %v9152_v36, 0.0  ;;  %v9076_v39 = vadd.f32 %v9075_v26, %v19297_v10  ;;  %v9155_v15 = vadd.f32 %v19117_v55, %v9081_v17 }
0x116c   : > { %v13470_v4 = vpop.f32.mrf.mxu1 }
0x116d   : > { %v9154_v52 = vadd.f32 %v19117_v55, %v9076_v39  ;;  %v9091_v58 = vadd.f32 %v13470_v4, %v19299_v18  ;;  %13542 = vmatprep.mubr.f32.mxu0 %v9184_v47  ;;  %v9187_v31 = vmax.f32 %v9155_v15, 0.0 }
0x116e   : > { %v9085_v50 = vpop.f32.mrf.mxu1  ;;  %13543 = vmatmul.mubr.f32.gmra.mxu0 %v9185_v44 }
0x116f   : > { %v9186_v61 = vmax.f32 %v9154_v52, 0.0  ;;  %v9086_v25 = vadd.f32 %v9085_v50, %v19301_v20  ;;  %v9157_v63 = vadd.f32 %v19117_v55, %v9091_v58 }
0x1170   : > { %v13473_v49 = vpop.f32.mrf.mxu1 }
0x1171   : > { %v9156_v10 = vadd.f32 %v19117_v55, %v9086_v25  ;;  %v9101_v59 = vadd.f32 %v13473_v49, %v19303_v37  ;;  %13545 = vmatprep.mubr.f32.mxu0 %v9186_v61  ;;  %v9189_v19 = vmax.f32 %v9157_v63, 0.0 }
0x1172   : > { %v9095_v16 = vpop.f32.mrf.mxu1  ;;  %13546 = vmatmul.mubr.f32.gmra.mxu0 %v9187_v31 }
0x1173   : > { %v9188_v0 = vmax.f32 %v9156_v10, 0.0  ;;  %v9096_v18 = vadd.f32 %v9095_v16, %v19307_v28  ;;  %v9159_v57 = vadd.f32 %v19117_v55, %v9101_v59 }
0x1174   : > { %v13476_v22 = vpop.f32.mrf.mxu1 }
0x1175   : > { %v9158_v20 = vadd.f32 %v19117_v55, %v9096_v18  ;;  %v9111_v62 = vadd.f32 %v13476_v22, %v19309_v45  ;;  %13548 = vmatprep.mubr.f32.mxu0 %v9188_v0  ;;  %v9191_v26 = vmax.f32 %v9159_v57, 0.0 }
0x1176   : > { %v9105_v36 = vpop.f32.mrf.mxu1  ;;  %13549 = vmatmul.mubr.f32.gmra.mxu0 %v9189_v19 }
0x1177   : > { %v9190_v17 = vmax.f32 %v9158_v20, 0.0  ;;  %v9106_v37 = vadd.f32 %v9105_v36, %v19313_v7  ;;  %v9161_v47 = vadd.f32 %v19117_v55, %v9111_v62 }
0x1178   : > { %v13479_v39 = vpop.f32.mrf.mxu1 }
0x1179   : > { %v9160_v28 = vadd.f32 %v19117_v55, %v9106_v37  ;;  %v9121_v44 = vadd.f32 %v13479_v39, %v19315_v27  ;;  %13551 = vmatprep.mubr.f32.mxu0 %v9190_v17  ;;  %v9193_v52 = vmax.f32 %v9161_v47, 0.0 }
0x117a   : > { %v9115_v15 = vpop.f32.mrf.mxu1  ;;  %13552 = vmatmul.mubr.f32.gmra.mxu0 %v9191_v26 }
0x117b   : > { %v9192_v4 = vmax.f32 %v9160_v28, 0.0  ;;  %v9116_v45 = vadd.f32 %v9115_v15, %v19317_v2  ;;  %v9163_v58 = vadd.f32 %v19117_v55, %v9121_v44  ;;  %v19375_v44 = vld [vmem:[%s20500_s8 + $0x5] ss:$0 sm:$0xff] }
0x117d   : > { %v9162_v50 = vadd.f32 %v19117_v55, %v9116_v45  ;;  %13554 = vmatprep.mubr.f32.mxu0 %v9192_v4  ;;  %v9195_v61 = vmax.f32 %v9163_v58, 0.0 }
0x117e   : > { %13555 = vmatmul.mubr.f32.gmra.mxu0 %v9193_v52 }
0x117f   : > { %v9194_v7 = vmax.f32 %v9162_v50, 0.0 }
0x1180   : > { %v13526_v25 = vpop.f32.mrf.mxu0 }
0x1181   : > { %13557 = vmatprep.mubr.f32.mxu0 %v9194_v7  ;;  %v9333_v31 = vadd.f32 %v13526_v25, %v19322_v13 }
0x1182   : > { %13558 = vmatmul.mubr.f32.gmra.mxu0 %v9195_v61  ;;  %v9327_v27 = vpop.f32.mrf.mxu0 }
0x1183   : > { %v9328_v63 = vadd.f32 %v19322_v13, %v9327_v27  ;;  %v9455_v10 = vmax.f32 %v9333_v31, 0.0 }
0x1185   : > { %v9454_v49 = vmax.f32 %v9328_v63, 0.0 }
0x1187   : > { %13604 = vmatprep.mubr.f32.mxu1 %v9454_v49 }
0x1188   : > { %13605 = vmatmul.mubr.f32.gmra.mxu1 %v9455_v10 }
0x11b5   : > { %v13529_v2 = vpop.f32.mrf.mxu0 }
0x11b6   : > { %v9343_v59 = vadd.f32 %v13529_v2, %v19322_v13 }
0x11b7   : > { %v9337_v55 = vpop.f32.mrf.mxu0 }
0x11b8   : > { %v9338_v16 = vadd.f32 %v19322_v13, %v9337_v55  ;;  %v9457_v18 = vmax.f32 %v9343_v59, 0.0 }
0x11ba   : > { %v9456_v0 = vmax.f32 %v9338_v16, 0.0 }
0x11bc   : > { %13607 = vmatprep.mubr.f32.mxu1 %v9456_v0 }
0x11bd   : > { %13608 = vmatmul.mubr.f32.gmra.mxu1 %v9457_v18 }
0x11ea   : > { %v13532_v19 = vpop.f32.mrf.mxu0 }
0x11eb   : > { %v9353_v57 = vadd.f32 %v13532_v19, %v19322_v13 }
0x11ec   : > { %v9347_v22 = vpop.f32.mrf.mxu0 }
0x11ed   : > { %v9348_v20 = vadd.f32 %v19322_v13, %v9347_v22  ;;  %v9459_v36 = vmax.f32 %v9353_v57, 0.0 }
0x11ef   : > { %v9458_v62 = vmax.f32 %v9348_v20, 0.0 }
0x11f1   : > { %v13535_v17 = vpop.f32.mrf.mxu0  ;;  %13610 = vmatprep.mubr.f32.mxu1 %v9458_v62 }
0x11f2   : > { %13611 = vmatmul.mubr.f32.gmra.mxu1 %v9459_v36  ;;  %v9363_v37 = vadd.f32 %v13535_v17, %v19322_v13 }
0x11f3   : > { %v9357_v26 = vpop.f32.mrf.mxu0 }
0x11f4   : > { %v9358_v47 = vadd.f32 %v19322_v13, %v9357_v26  ;;  %v9461_v28 = vmax.f32 %v9363_v37, 0.0 }
0x11f6   : > { %v9460_v39 = vmax.f32 %v9358_v47, 0.0 }
0x11f8   : > { %13613 = vmatprep.mubr.f32.mxu1 %v9460_v39 }
0x11f9   : > { %13614 = vmatmul.mubr.f32.gmra.mxu1 %v9461_v28 }
0x1202   : > { %v13594_v15 = vpop.f32.mrf.mxu1 }
0x1203   : > { %v19378_v4 = vadd.f32 %v13594_v15, %v19375_v44 }
0x1204   : > { %v9569_v45 = vpop.f32.mrf.mxu1 }
0x1205   : > { %14290 = vtanh.f32 %v19378_v4  ;;  %v19382_v52 = vadd.f32 %v19375_v44, %v9569_v45 }
0x1206   : > { %v13597_v58 = vpop.f32.mrf.mxu1 }
0x1207   : > { %14292 = vtanh.f32 %v19382_v52  ;;  %v19386_v50 = vadd.f32 %v13597_v58, %v19375_v44 }
0x1208   : > { %v9579_v7 = vpop.f32.mrf.mxu1 }
0x1209   : > { %14294 = vtanh.f32 %v19386_v50  ;;  %v19390_v61 = vadd.f32 %v19375_v44, %v9579_v7 }
0x120a   : > { %v13600_v25 = vpop.f32.mrf.mxu1 }
0x120b   : > { %14296 = vtanh.f32 %v19390_v61  ;;  %v19394_v27 = vadd.f32 %v13600_v25, %v19375_v44 }
0x120c   : > { %v9589_v31 = vpop.f32.mrf.mxu1 }
0x120d   : > { %v19397_v63 = vadd.f32 %v19375_v44, %v9589_v31 }
0x120e   : > { %v13603_v49 = vpop.f32.mrf.mxu1 }
0x120f   : > { %14298 = vtanh.f32 %v19397_v63  ;;  %v19402_v2 = vadd.f32 %v13603_v49, %v19375_v44 }
0x1210   : > { %v9599_v10 = vpop.f32.mrf.mxu1  ;;  %14300 = vtanh.f32 %v19394_v27 }
0x1211   : > { %v19405_v59 = vadd.f32 %v19375_v44, %v9599_v10 }
0x1212   : > { %v14291_v55 = vpop.eup %14290 }
0x1213   : > { %21286 = vst [vmem:[#allocation39_spill] sm:$0xff] %v19405_v59  ;;  %14302 = vtanh.f32 %v19405_v59  ;;  %v10019_v16 = vsel %vm842_vm2, %v14291_v55, 0.0  ;;  %v9762_v31 = vmul.f32 1.442695, %v14291_v55 }
0x1214   : > { %v14293_v0 = vpop.eup %14292  ;;  %10020 = vadd.xlane.f32.xlu1 %v10019_v16  ;;  %14304 = vtanh.f32 %v19402_v2 }
0x1215   : > { %v10016_v18 = vsel %vm842_vm2, %v14293_v0, 0.0  ;;  %v9760_v26 = vmul.f32 1.442695, %v14293_v0 }
0x1216   : > { %v19411_v19 = vpop.eup %14294  ;;  %10017 = vadd.xlane.f32.xlu0 %v10016_v18 }
0x1217   : > { %v10025_v57 = vsel %vm842_vm2, %v19411_v19, 0.0  ;;  %14306 = vpow2.f32 %v9760_v26 }
0x1218   : > { %v19415_v22 = vpop.eup %14296  ;;  %14308 = vpow2.f32 %v9762_v31 }
0x1219   : > { %v10022_v36 = vsel %vm842_vm2, %v19415_v22, 0.0 }
0x121a   : > { %10026 = vadd.xlane.f32.xlu0 %v10025_v57 }
0x121c   : > { %v19417_v20 = vpop.eup %14298 }
0x121d   : > { %v10028_v62 = vsel %vm842_vm2, %v19417_v20, 0.0  ;;  %v19423_v17 = vpop.eup %14300 }
0x121e   : > { %10029 = vadd.xlane.f32.xlu1 %v10028_v62  ;;  %10023 = vadd.xlane.f32.xlu0 %v10022_v36  ;;  %v10031_v39 = vsel %vm842_vm2, %v19423_v17, 0.0 }
0x1220   : > { %v19425_v37 = vpop.eup %14302 }
0x1221   : > { %v10034_v47 = vsel %vm842_vm2, %v19425_v37, 0.0  ;;  %v19431_v28 = vpop.eup %14304 }
0x1222   : > { %10035 = vadd.xlane.f32.xlu1 %v10034_v47  ;;  %10032 = vadd.xlane.f32.xlu0 %v10031_v39  ;;  %v10037_v15 = vsel %vm842_vm2, %v19431_v28, 0.0 }
0x1224   : > { %v14307_v55 = vpop.eup %14306 }
0x1226   : > { %v13538_v45 = vpop.f32.mrf.mxu0  ;;  %10038 = vadd.xlane.f32.xlu0 %v10037_v15 }
0x1227   : > { %v9373_v58 = vadd.f32 %v13538_v45, %v19322_v13 }
0x1228   : > { %v9367_v7 = vpop.f32.mrf.mxu0 }
0x1229   : > { %v9368_v25 = vadd.f32 %v19322_v13, %v9367_v7  ;;  %v9463_v16 = vmax.f32 %v9373_v58, 0.0 }
0x122a   : > { %v13541_v49 = vpop.f32.mrf.mxu0 }
0x122b   : > { %v9462_v10 = vmax.f32 %v9368_v25, 0.0  ;;  %v9383_v0 = vadd.f32 %v13541_v49, %v19322_v13 }
0x122c   : > { %v9377_v18 = vpop.f32.mrf.mxu0 }
0x122d   : > { %v9378_v57 = vadd.f32 %v19322_v13, %v9377_v18  ;;  %13616 = vmatprep.mubr.f32.mxu1 %v9462_v10  ;;  %v9465_v26 = vmax.f32 %v9383_v0, 0.0 }
0x122e   : > { %v13544_v62 = vpop.f32.mrf.mxu0  ;;  %13617 = vmatmul.mubr.f32.gmra.mxu1 %v9463_v16 }
0x122f   : > { %v9464_v36 = vmax.f32 %v9378_v57, 0.0  ;;  %v9393_v47 = vadd.f32 %v13544_v62, %v19322_v13 }
0x1230   : > { %v9387_v39 = vpop.f32.mrf.mxu0 }
0x1231   : > { %v9388_v15 = vadd.f32 %v19322_v13, %v9387_v39  ;;  %13619 = vmatprep.mubr.f32.mxu1 %v9464_v36  ;;  %v9467_v7 = vmax.f32 %v9393_v47, 0.0 }
0x1232   : > { %v13547_v45 = vpop.f32.mrf.mxu0  ;;  %13620 = vmatmul.mubr.f32.gmra.mxu1 %v9465_v26  ;;  %v14309_v26 = vpop.eup %14308 }
0x1233   : > { %v9466_v58 = vmax.f32 %v9388_v15, 0.0  ;;  %9856 = vrot.lane.b32.xlu1 %v14307_v55, %s14651_s24  ;;  %v9403_v25 = vadd.f32 %v13547_v45, %v19322_v13 }
0x1234   : > { %v9397_v31 = vpop.f32.mrf.mxu0 }
0x1235   : > { %v9398_v49 = vadd.f32 %v19322_v13, %v9397_v31  ;;  %13622 = vmatprep.mubr.f32.mxu1 %v9466_v58  ;;  %v9469_v0 = vmax.f32 %v9403_v25, 0.0 }
0x1236   : > { %v13550_v10 = vpop.f32.mrf.mxu0  ;;  %13623 = vmatmul.mubr.f32.gmra.mxu1 %v9467_v7 }
0x1237   : > { %v9468_v16 = vmax.f32 %v9398_v49, 0.0  ;;  %v9413_v18 = vadd.f32 %v13550_v10, %v19322_v13 }
0x1238   : > { %v9407_v57 = vpop.f32.mrf.mxu0 }
0x1239   : > { %v9408_v62 = vadd.f32 %v19322_v13, %v9407_v57  ;;  %13625 = vmatprep.mubr.f32.mxu1 %v9468_v16  ;;  %v9471_v39 = vmax.f32 %v9413_v18, 0.0 }
0x123a   : > { %v13553_v36 = vpop.f32.mrf.mxu0  ;;  %13626 = vmatmul.mubr.f32.gmra.mxu1 %v9469_v0 }
0x123b   : > { %v9470_v47 = vmax.f32 %v9408_v62, 0.0  ;;  %v9423_v15 = vadd.f32 %v13553_v36, %v19322_v13 }
0x123c   : > { %v9417_v55 = vpop.f32.mrf.mxu0  ;;  %9858 = vrot.lane.b32.xlu0 %v14309_v26, %s14651_s24 }
0x123d   : > { %v9418_v45 = vadd.f32 %v19322_v13, %v9417_v55  ;;  %13628 = vmatprep.mubr.f32.mxu1 %v9470_v47  ;;  %v9473_v25 = vmax.f32 %v9423_v15, 0.0 }
0x123e   : > { %v13556_v58 = vpop.f32.mrf.mxu0  ;;  %13629 = vmatmul.mubr.f32.gmra.mxu1 %v9471_v39 }
0x123f   : > { %v9472_v7 = vmax.f32 %v9418_v45, 0.0  ;;  %v9433_v31 = vadd.f32 %v13556_v58, %v19322_v13  ;;  %v19461_v58 = vpop.xlane.xlu0 %8465 }
0x1240   : > { %v9427_v49 = vpop.f32.mrf.mxu0 }
0x1241   : > { %v9428_v10 = vadd.f32 %v19322_v13, %v9427_v49  ;;  %13631 = vmatprep.mubr.f32.mxu1 %v9472_v7  ;;  %v9475_v18 = vmax.f32 %v9433_v31, 0.0 }
0x1242   : > { %v13559_v16 = vpop.f32.mrf.mxu0  ;;  %13632 = vmatmul.mubr.f32.gmra.mxu1 %v9473_v25 }
0x1243   : > { %v9474_v0 = vmax.f32 %v9428_v10, 0.0  ;;  %v9443_v57 = vadd.f32 %v13559_v16, %v19322_v13  ;;  %v19467_v25 = vpop.xlane.xlu0 %8471  ;;  %v9766_v10 = vmul.f32 1.442695, %v19411_v19 }
0x1244   : > { %v9437_v62 = vpop.f32.mrf.mxu0 }
0x1245   : > { %v9438_v36 = vadd.f32 %v19322_v13, %v9437_v62  ;;  %13634 = vmatprep.mubr.f32.mxu1 %v9474_v0  ;;  %v9477_v47 = vmax.f32 %v9443_v57, 0.0  ;;  %v19463_v13 = vpop.xlane.xlu1 %8468  ;;  %v9764_v57 = vmul.f32 1.442695, %v19415_v22 }
0x1246   : > { %13635 = vmatmul.mubr.f32.gmra.mxu1 %v9475_v18 }
0x1247   : > { %v9476_v26 = vmax.f32 %v9438_v36, 0.0  ;;  %v19478_v18 = vpop.xlane.xlu0 %8477 }
0x1248   : > { %v13606_v39 = vpop.f32.mrf.mxu1 }
0x1249   : > { %v19454_v15 = vadd.f32 %v13606_v39, %v19375_v44  ;;  %13637 = vmatprep.mubr.f32.mxu1 %v9476_v26  ;;  %v19476_v0 = vpop.xlane.xlu1 %8474 }
0x124a   : > { %13638 = vmatmul.mubr.f32.gmra.mxu1 %v9477_v47  ;;  %v9609_v55 = vpop.f32.mrf.mxu1 }
0x124b   : > { %21287 = vst [vmem:[#allocation40_spill] sm:$0xff] %v19454_v15  ;;  %14310 = vtanh.f32 %v19454_v15  ;;  %v19458_v45 = vadd.f32 %v19375_v44, %v9609_v55  ;;  %v19483_v36 = vpop.xlane.xlu0 %8483 }
0x124d   : > { %21288 = vst [vmem:[#allocation41_spill] sm:$0xff] %v19458_v45  ;;  %14312 = vtanh.f32 %v19458_v45  ;;  %v19481_v62 = vpop.xlane.xlu1 %8480 }
0x124e   : > { %14314 = vpow2.f32 %v9766_v10 }
0x124f   : > { %14316 = vpow2.f32 %v9764_v57  ;;  %v19487_v19 = vpop.xlane.xlu0 %8489 }
0x1251   : > { %v19485_v26 = vpop.xlane.xlu1 %8486 }
0x1255   : > { %v19490_v39 = vpop.xlane.xlu1 %8492 }
0x1256   : > { %21289 = vst [vmem:[#allocation42_spill] sm:$0xff] %v19490_v39 }
0x1258   : > { %v19465_v7 = vpop.eup %14310 }
0x1259   : > { %v10043_v31 = vsel %vm842_vm2, %v19465_v7, 0.0  ;;  %v19495_v22 = vpop.xlane.xlu1 %8498 }
0x125a   : > { %v19471_v49 = vpop.eup %14312  ;;  %21291 = vst [vmem:[#allocation44_spill] sm:$0xff] %v19495_v22 }
0x125b   : > { %10044 = vadd.xlane.f32.xlu0 %v10043_v31  ;;  %v10040_v16 = vsel %vm842_vm2, %v19471_v49, 0.0  ;;  %v14315_v47 = vpop.eup %14314  ;;  %v19492_v31 = vpop.xlane.xlu0 %8495 }
0x125c   : > { %10041 = vadd.xlane.f32.xlu1 %v10040_v16  ;;  %v14317_v55 = vpop.eup %14316  ;;  %21290 = vst [vmem:[#allocation43_spill] sm:$0xff] %v19492_v31 }
0x125d   : > { %v19499_v16 = vpop.xlane.xlu1 %8504 }
0x125e   : > { %21293 = vst [vmem:[#allocation178_spill] sm:$0xff] %v19499_v16 }
0x125f   : > { %v19497_v10 = vpop.xlane.xlu0 %8501 }
0x1260   : > { %21292 = vst [vmem:[#allocation45_spill] sm:$0xff] %v19497_v10 }
0x1261   : > { %v19510_v31 = vpop.xlane.xlu1 %8510 }
0x1262   : > { %21297 = vst [vmem:[#allocation182_spill] sm:$0xff] %v19510_v31 }
0x1263   : > { %v19501_v57 = vpop.xlane.xlu0 %8507 }
0x1264   : > { %21294 = vst [vmem:[#allocation179_spill] sm:$0xff] %v19501_v57 }
0x1265   : > { %v19515_v22 = vpop.xlane.xlu1 %8516 }
0x1266   : > { %21299 = vst [vmem:[#allocation184_spill] sm:$0xff] %v19515_v22 }
0x126d   : > { %9862 = vrot.lane.b32.xlu1 %v14315_v47, %s14651_s24 }
0x1271   : > { %9860 = vrot.lane.b32.xlu1 %v14317_v55, %s14651_s24  ;;  %v19512_v55 = vpop.xlane.xlu0 %8513 }
0x1272   : > { %21298 = vst [vmem:[#allocation183_spill] sm:$0xff] %v19512_v55  ;;  %v9770_v55 = vmul.f32 1.442695, %v19423_v17 }
0x1275   : > { %v19517_v16 = vpop.xlane.xlu0 %8519 }
0x1276   : > { %21300 = vst [vmem:[#allocation185_spill] sm:$0xff] %v19517_v16 }
0x127d   : > { %v13609_v45 = vpop.f32.mrf.mxu1 }
0x127e   : > { %v19504_v15 = vadd.f32 %v13609_v45, %v19375_v44  ;;  %v19521_v45 = vpop.xlane.xlu1 %8522 }
0x127f   : > { %v9619_v47 = vpop.f32.mrf.mxu1  ;;  %21301 = vst [vmem:[#allocation186_spill] sm:$0xff] %v19521_v45  ;;  %v3693_v45 = vadd.f32 %v18430_v24, %v18113_v54 }
0x1280   : > { %21295 = vst [vmem:[#allocation180_spill] sm:$0xff] %v19504_v15  ;;  %14318 = vtanh.f32 %v19504_v15  ;;  %v19508_v39 = vadd.f32 %v19375_v44, %v9619_v47  ;;  %v19525_v15 = vpop.xlane.xlu0 %8525 }
0x1281   : > { %21302 = vst [vmem:[#allocation187_spill] sm:$0xff] %v19525_v15 }
0x1282   : > { %21296 = vst [vmem:[#allocation181_spill] sm:$0xff] %v19508_v39  ;;  %14320 = vtanh.f32 %v19508_v39  ;;  %v19529_v31 = vpop.xlane.xlu1 %8528  ;;  %v3692_v39 = vadd.f32 %v18426_v53, %v18097_v42 }
0x1283   : > { %21303 = vst [vmem:[#allocation188_spill] sm:$0xff] %v19529_v31  ;;  %14322 = vpow2.f32 %v9770_v55 }
0x1284   : > { %v19534_v16 = vpop.xlane.xlu0 %8531  ;;  %v5329_v31 = vadd.f32 %v18508_v12, %v3692_v39  ;;  %v3694_v12 = vadd.f32 %v18433_v46, %v18111_v48 }
0x1285   : > { %21304 = vst [vmem:[#allocation189_spill] sm:$0xff] %v19534_v16 }
0x1286   : > { %v19541_v15 = vpop.xlane.xlu1 %8534  ;;  %v6902_v16 = vadd.f32 %v18680_v6, %v5329_v31  ;;  %v3697_v31 = vadd.f32 %v18443_v11, %v18137_v33 }
0x1287   : > { %21305 = vst [vmem:[#allocation190_spill] sm:$0xff] %v19541_v15  ;;  %v21452_v15 = vld [vmem:[#allocation158_spill] sm:$0xff] }
0x1288   : > { %v19545_v59 = vpop.xlane.xlu0 %8537  ;;  %v8539_v53 = vadd.f32 %v18977_v29, %v6902_v16  ;;  %v21308_v16 = vld [vmem:[#allocation62_spill] sm:$0xff] }
0x1289   : > { %21306 = vst [vmem:[#allocation191_spill] sm:$0xff] %v19545_v59 }
0x128d   : > { %v19519_v57 = vpop.eup %14318 }
0x128e   : > { %v10049_v10 = vsel %vm842_vm2, %v19519_v57, 0.0 }
0x128f   : > { %10050 = vadd.xlane.f32.xlu0 %v10049_v10  ;;  %v19527_v47 = vpop.eup %14320  ;;  %v5330_v10 = vadd.f32 %v18510_v35, %v3693_v45 }
0x1290   : > { %v10046_v22 = vsel %vm842_vm2, %v19527_v47, 0.0 }
0x1291   : > { %v6903_v17 = vadd.f32 %v18682_v41, %v5330_v10  ;;  %v3696_v41 = vadd.f32 %v18440_v3, %v18127_v23  ;;  %v14323_v3 = vpop.eup %14322  ;;  %v21311_v10 = vld [vmem:[#allocation137_spill] sm:$0xff] }
0x1293   : > { %v8540_v54 = vadd.f32 %v18905_v9, %v6903_v17  ;;  %v5333_v6 = vadd.f32 %v18516_v56, %v3696_v41  ;;  %v5334_v56 = vadd.f32 %v21308_v16, %v3697_v31  ;;  %v21312_v17 = vld [vmem:[#allocation130_spill] sm:$0xff] }
0x1295   : > { %10047 = vadd.xlane.f32.xlu1 %v10046_v22  ;;  %v3695_v22 = vadd.f32 %v18436_v14, %v18121_v8  ;;  %v5331_v14 = vadd.f32 %v18512_v21, %v3694_v12  ;;  %v6906_v23 = vadd.f32 %v18688_v32, %v5333_v6 }
0x1297   : > { %v5332_v42 = vadd.f32 %v18514_v60, %v3695_v22  ;;  %v3698_v60 = vadd.f32 %v18447_v38, %v18141_v30  ;;  %v6904_v48 = vadd.f32 %v18684_v51, %v5331_v14  ;;  %v8543_v45 = vadd.f32 %v19078_v40, %v6906_v23  ;;  %v21309_v30 = vld [vmem:[#allocation3_spill] sm:$0xff]  ;;  %v21310_v38 = vld [vmem:[#allocation28_spill] sm:$0xff] }
0x1298   : > { %v3699_v33 = vadd.f32 %v21310_v38, %v21309_v30  ;;  %v6907_v22 = vadd.f32 %v21312_v17, %v5334_v56  ;;  %v21317_v56 = vld [vmem:[#allocation172_spill] sm:$0xff]  ;;  %v21318_v30 = vld [vmem:[#allocation166_spill] sm:$0xff] }
0x1299   : > { %v6905_v39 = vadd.f32 %v18686_v5, %v5332_v42  ;;  %v21307_v5 = vld [vmem:[#allocation67_spill] sm:$0xff]  ;;  %v21313_v42 = vld [vmem:[#allocation64_spill] sm:$0xff] }
0x129a   : > { %v5335_v21 = vadd.f32 %v21307_v5, %v3698_v60 }
0x129b   : > { %v8542_v9 = vadd.f32 %v18983_v43, %v6905_v39  ;;  %v8541_v43 = vadd.f32 %v19060_v1, %v6904_v48  ;;  %v21314_v1 = vld [vmem:[#allocation112_spill] sm:$0xff]  ;;  %v21315_v39 = vld [vmem:[#allocation134_spill] sm:$0xff]  ;;  %v21316_v48 = vld [vmem:[#allocation173_spill] sm:$0xff] }
0x129c   : > { %v6908_v32 = vadd.f32 %v21311_v10, %v5335_v21 }
0x129d   : > { %v10021_v24 = vpop.xlane.xlu1 %10020 }
0x129e   : > { %v10113_v35 = vadd.f32 %v10021_v24, %v8540_v54  ;;  %v8545_v40 = vadd.f32 %v19165_v34, %v6908_v32 }
0x129f   : > { %v10018_v55 = vpop.xlane.xlu0 %10017 }
0x12a0   : > { %v10112_v8 = vadd.f32 %v10018_v55, %v8539_v53  ;;  %v5336_v53 = vadd.f32 %v21313_v42, %v3699_v33  ;;  %v8544_v55 = vadd.f32 %v21314_v1, %v6907_v22  ;;  %v9774_v22 = vmul.f32 1.442695, %v19431_v28  ;;  %v21322_v1 = vld [vmem:[#allocation4_spill] sm:$0xff] }
0x12a2   : > { %v6909_v14 = vadd.f32 %v21315_v39, %v5336_v53  ;;  %v21326_v39 = vld [vmem:[#allocation66_spill] sm:$0xff] }
0x12a3   : > { %v10027_v29 = vpop.xlane.xlu0 %10026 }
0x12a4   : > { %v19567_v46 = vadd.f32 %v10027_v29, %v8542_v9  ;;  %v8546_v60 = vadd.f32 %v19461_v58, %v6909_v14  ;;  %v21327_v14 = vld [vmem:[#allocation69_spill] sm:$0xff] }
0x12a6   : > { %9866 = vrot.lane.b32.xlu1 %v14323_v3, %s14651_s24 }
0x12a7   : > { %v10030_v11 = vpop.xlane.xlu1 %10029  ;;  %v10024_v51 = vpop.xlane.xlu0 %10023 }
0x12a8   : > { %v19578_v54 = vadd.f32 %v10030_v11, %v8543_v45  ;;  %v19580_v24 = vadd.f32 %v10024_v51, %v8541_v43  ;;  %v21320_v11 = vld [vmem:[#allocation163_spill] sm:$0xff] }
0x12ab   : > { %v10036_v12 = vpop.xlane.xlu1 %10035  ;;  %v10033_v41 = vpop.xlane.xlu0 %10032 }
0x12ac   : > { %v19586_v6 = vadd.f32 %v10036_v12, %v8545_v40  ;;  %v19588_v9 = vadd.f32 %v10033_v41, %v8544_v55  ;;  %v21323_v55 = vld [vmem:[#allocation30_spill] sm:$0xff]  ;;  %v21325_v41 = vld [vmem:[#allocation27_spill] sm:$0xff] }
0x12ad   : > { %v3701_v40 = vadd.f32 %v21323_v55, %v21322_v1  ;;  %v21324_v12 = vld [vmem:[#allocation2_spill] sm:$0xff]  ;;  %v21332_v1 = vld [vmem:[#allocation165_spill] sm:$0xff] }
0x12af   : > { %v9857_v29 = vpop.permute.xlu1 %9856  ;;  %v10039_v31 = vpop.xlane.xlu0 %10038  ;;  %v5338_v28 = vadd.f32 %v21326_v39, %v3701_v40 }
0x12b0   : > { %v9952_v23 = vmul.f32 %v9857_v29, %v21316_v48  ;;  %v19592_v3 = vadd.f32 %v10039_v31, %v8546_v60  ;;  %v21328_v29 = vld [vmem:[#allocation138_spill] sm:$0xff] }
0x12b1   : > { %v6911_v31 = vadd.f32 %v21328_v29, %v5338_v28 }
0x12b2   : > { %v9984_v5 = vadd.f32 %v9952_v23, %v19382_v52  ;;  %v13612_v21 = vpop.f32.mrf.mxu1  ;;  %v21329_v23 = vld [vmem:[#allocation142_spill] sm:$0xff] }
0x12b3   : > { %v19596_v34 = vadd.f32 %v13612_v21, %v19375_v44  ;;  %v9859_v16 = vpop.permute.xlu0 %9858  ;;  %v8548_v21 = vadd.f32 %v19467_v25, %v6911_v31  ;;  %v21336_v31 = vld [vmem:[#allocation5_spill] sm:$0xff] }
0x12b4   : > { %v9953_v43 = vmul.f32 %v9859_v16, %v21317_v56  ;;  %v9629_v45 = vpop.f32.mrf.mxu1  ;;  %v19601_v38 = vsel %vm842_vm2, %v21318_v30, %v9984_v5 }
0x12b5   : > { %14324 = vtanh.f32 %v19596_v34  ;;  %v19605_v58 = vadd.f32 %v19375_v44, %v9629_v45  ;;  %v19609_v52 = vsel %vm424_vm1, %v19601_v38, %v10112_v8 }
0x12b6   : > { %21319 = vst [vmem:[#allocation67_spill] sm:$0xff] %v19609_v52  ;;  %v9985_v33 = vadd.f32 %v9953_v43, %v19378_v4  ;;  %v9768_v4 = vmul.f32 1.442695, %v19417_v20  ;;  %v3700_v20 = vadd.f32 %v21325_v41, %v21324_v12  ;;  %v21334_v41 = vld [vmem:[#allocation168_spill] sm:$0xff] }
0x12b7   : > { %14326 = vtanh.f32 %v19605_v58 }
0x12b8   : > { %v19614_v51 = vsel %vm842_vm2, %v21320_v11, %v9985_v33  ;;  %14328 = vpow2.f32 %v9768_v4  ;;  %v5337_v60 = vadd.f32 %v21327_v14, %v3700_v20 }
0x12b9   : > { %v19619_v10 = vsel %vm424_vm1, %v19614_v51, %v10113_v35  ;;  %14330 = vpow2.f32 %v9774_v22  ;;  %v13615_v48 = vpop.f32.mrf.mxu1  ;;  %v21330_v22 = vld [vmem:[#allocation174_spill] sm:$0xff] }
0x12ba   : > { %21321 = vst [vmem:[#allocation62_spill] sm:$0xff] %v19619_v10  ;;  %v6910_v5 = vadd.f32 %v21329_v23, %v5337_v60  ;;  %v19644_v56 = vadd.f32 %v13615_v48, %v19375_v44  ;;  %v21337_v48 = vld [vmem:[#allocation32_spill] sm:$0xff] }
0x12bb   : > { %v9639_v11 = vpop.f32.mrf.mxu1  ;;  %v3703_v23 = vadd.f32 %v21337_v48, %v21336_v31  ;;  %v21345_v31 = vld [vmem:[#allocation171_spill] sm:$0xff]  ;;  %v21436_v10 = vld [vmem:[#allocation156_spill] sm:$0xff] }
0x12bc   : > { %v8547_v16 = vadd.f32 %v19463_v13, %v6910_v5  ;;  %14332 = vtanh.f32 %v19644_v56  ;;  %v19652_v4 = vadd.f32 %v19375_v44, %v9639_v11  ;;  %v21338_v5 = vld [vmem:[#allocation68_spill] sm:$0xff] }
0x12be   : > { %14334 = vtanh.f32 %v19652_v4 }
0x12c2   : > { %v19621_v32 = vpop.eup %14324 }
0x12c3   : > { %v10055_v17 = vsel %vm842_vm2, %v19621_v32, 0.0 }
0x12c4   : > { %10056 = vadd.xlane.f32.xlu0 %v10055_v17  ;;  %v19625_v8 = vpop.eup %14326 }
0x12c5   : > { %v10052_v42 = vsel %vm842_vm2, %v19625_v8, 0.0  ;;  %v14329_v35 = vpop.eup %14328 }
0x12c6   : > { %v14331_v53 = vpop.eup %14330 }
0x12c9   : > { %v19677_v39 = vpop.eup %14332 }
0x12ca   : > { %10053 = vadd.xlane.f32.xlu1 %v10052_v42  ;;  %v10061_v28 = vsel %vm842_vm2, %v19677_v39, 0.0 }
0x12cb   : > { %v19681_v14 = vpop.eup %14334 }
0x12cc   : > { %v10058_v60 = vsel %vm842_vm2, %v19681_v14, 0.0 }
0x12da   : > { %9864 = vrot.lane.b32.xlu0 %v14329_v35, %s14651_s24  ;;  %v21331_v35 = vld [vmem:[#allocation175_spill] sm:$0xff] }
0x12db   : > { %9870 = vrot.lane.b32.xlu1 %v14331_v53, %s14651_s24 }
0x12e4   : > { %v10045_v43 = vpop.xlane.xlu0 %10044 }
0x12e5   : > { %v19646_v45 = vadd.f32 %v10045_v43, %v8548_v21  ;;  %v10042_v30 = vpop.xlane.xlu1 %10041  ;;  %v5340_v21 = vadd.f32 %v21338_v5, %v3703_v23  ;;  %v21340_v43 = vld [vmem:[#allocation6_spill] sm:$0xff] }
0x12e6   : > { %v19648_v33 = vadd.f32 %v10042_v30, %v8547_v16  ;;  %v21341_v30 = vld [vmem:[#allocation29_spill] sm:$0xff] }
0x12e7   : > { %v3702_v11 = vadd.f32 %v21341_v30, %v21340_v43  ;;  %v21347_v43 = vld [vmem:[#allocation7_spill] sm:$0xff] }
0x12e8   : > { %v21348_v30 = vld [vmem:[#allocation47_spill] sm:$0xff] }
0x12e9   : > { %v9863_v17 = vpop.permute.xlu1 %9862 }
0x12ea   : > { %v9955_v25 = vmul.f32 %v9863_v17, %v21330_v22 }
0x12ec   : > { %v9987_v13 = vadd.f32 %v9955_v25, %v19386_v50  ;;  %v21342_v25 = vld [vmem:[#allocation71_spill] sm:$0xff] }
0x12ed   : > { %v9861_v42 = vpop.permute.xlu1 %9860 }
0x12ee   : > { %v9954_v53 = vmul.f32 %v9861_v42, %v21331_v35  ;;  %v19660_v55 = vsel %vm842_vm2, %v21332_v1, %v9987_v13  ;;  %v5339_v13 = vadd.f32 %v21342_v25, %v3702_v11  ;;  %v3705_v11 = vadd.f32 %v21348_v30, %v21347_v43 }
0x12ef   : > { %v19665_v40 = vsel %vm424_vm1, %v19660_v55, %v19567_v46  ;;  %v9772_v46 = vmul.f32 1.442695, %v19425_v37  ;;  %v21339_v37 = vld [vmem:[#allocation141_spill] sm:$0xff] }
0x12f0   : > { %21333 = vst [vmem:[#allocation3_spill] sm:$0xff] %v19665_v40  ;;  %v9986_v12 = vadd.f32 %v9954_v53, %v19390_v61  ;;  %v9778_v61 = vmul.f32 1.442695, %v19465_v7  ;;  %v6913_v16 = vadd.f32 %v21339_v37, %v5340_v21  ;;  %v13618_v7 = vpop.f32.mrf.mxu1  ;;  %v21343_v53 = vld [vmem:[#allocation144_spill] sm:$0xff]  ;;  %v9776_v37 = vmul.f32 1.442695, %v19471_v49 }
0x12f1   : > { %14336 = vpow2.f32 %v9772_v46  ;;  %v19698_v42 = vadd.f32 %v13618_v7, %v19375_v44  ;;  %v6912_v1 = vadd.f32 %v21343_v53, %v5339_v13  ;;  %v21350_v49 = vld [vmem:[#allocation143_spill] sm:$0xff]  ;;  %v21351_v13 = vld [vmem:[#allocation8_spill] sm:$0xff] }
0x12f2   : > { %v19670_v20 = vsel %vm842_vm2, %v21334_v41, %v9986_v12  ;;  %14338 = vpow2.f32 %v9778_v61  ;;  %v8550_v17 = vadd.f32 %v19478_v18, %v6913_v16  ;;  %v9649_v12 = vpop.f32.mrf.mxu1  ;;  %v21352_v53 = vld [vmem:[#allocation31_spill] sm:$0xff] }
0x12f3   : > { %v19675_v50 = vsel %vm424_vm1, %v19670_v20, %v19580_v24  ;;  %v8549_v41 = vadd.f32 %v19476_v0, %v6912_v1  ;;  %14340 = vtanh.f32 %v19698_v42  ;;  %v19706_v46 = vadd.f32 %v19375_v44, %v9649_v12  ;;  %v21435_v40 = vld [vmem:[#allocation107_spill] sm:$0xff] }
0x12f4   : > { %21335 = vst [vmem:[#allocation28_spill] sm:$0xff] %v19675_v50  ;;  %v3704_v1 = vadd.f32 %v21352_v53, %v21351_v13  ;;  %v21359_v13 = vld [vmem:[#allocation170_spill] sm:$0xff] }
0x12f5   : > { %14342 = vtanh.f32 %v19706_v46 }
0x12f6   : > { %14344 = vpow2.f32 %v9776_v37 }
0x12f9   : > { %10062 = vadd.xlane.f32.xlu0 %v10061_v28 }
0x12fe   : > { %v14337_v24 = vpop.eup %14336 }
0x12ff   : > { %10059 = vadd.xlane.f32.xlu1 %v10058_v60  ;;  %v14339_v29 = vpop.eup %14338  ;;  %v21344_v60 = vld [vmem:[#allocation176_spill] sm:$0xff] }
0x1300   : > { %v19722_v23 = vpop.eup %14340 }
0x1301   : > { %v10067_v5 = vsel %vm842_vm2, %v19722_v23, 0.0 }
0x1302   : > { %v19726_v21 = vpop.eup %14342 }
0x1303   : > { %v10064_v16 = vsel %vm842_vm2, %v19726_v21, 0.0 }
0x130f   : > { %9868 = vrot.lane.b32.xlu0 %v14337_v24, %s14651_s24 }
0x1310   : > { %9874 = vrot.lane.b32.xlu1 %v14339_v29, %s14651_s24 }
0x1318   : > { %v10051_v22 = vpop.xlane.xlu0 %10050 }
0x1319   : > { %v19700_v35 = vadd.f32 %v10051_v22, %v8550_v17  ;;  %v21349_v17 = vld [vmem:[#allocation70_spill] sm:$0xff] }
0x131a   : > { %v5342_v22 = vadd.f32 %v21349_v17, %v3705_v11  ;;  %v21356_v11 = vld [vmem:[#allocation167_spill] sm:$0xff] }
0x131c   : > { %v6915_v25 = vadd.f32 %v21350_v49, %v5342_v22  ;;  %v21358_v49 = vld [vmem:[#allocation78_spill] sm:$0xff] }
0x131e   : > { %v10048_v28 = vpop.xlane.xlu1 %10047  ;;  %v8552_v12 = vadd.f32 %v19483_v36, %v6915_v25 }
0x131f   : > { %v19708_v18 = vadd.f32 %v10048_v28, %v8549_v41  ;;  %v21353_v28 = vld [vmem:[#allocation73_spill] sm:$0xff] }
0x1322   : > { %v9867_v61 = vpop.permute.xlu1 %9866 }
0x1323   : > { %v9957_v24 = vmul.f32 %v9867_v61, %v21344_v60  ;;  %v5341_v61 = vadd.f32 %v21353_v28, %v3704_v1 }
0x1325   : > { %v9989_v29 = vadd.f32 %v9957_v24, %v19394_v27  ;;  %v9782_v27 = vmul.f32 1.442695, %v19519_v57  ;;  %v13621_v57 = vpop.f32.mrf.mxu1 }
0x1326   : > { %v19743_v60 = vadd.f32 %v13621_v57, %v19375_v44 }
0x1327   : > { %v19715_v48 = vsel %vm842_vm2, %v21345_v31, %v9989_v29  ;;  %14346 = vpow2.f32 %v9782_v27  ;;  %v21354_v29 = vld [vmem:[#allocation146_spill] sm:$0xff] }
0x1328   : > { %v19720_v0 = vsel %vm424_vm1, %v19715_v48, %v19588_v9  ;;  %v14345_v9 = vpop.eup %14344  ;;  %v6914_v31 = vadd.f32 %v21354_v29, %v5341_v61  ;;  %14348 = vtanh.f32 %v19743_v60  ;;  %v21361_v29 = vld [vmem:[#allocation9_spill] sm:$0xff] }
0x1329   : > { %21346 = vst [vmem:[#allocation137_spill] sm:$0xff] %v19720_v0 }
0x132a   : > { %v8551_v27 = vadd.f32 %v19481_v62, %v6914_v31  ;;  %v21362_v31 = vld [vmem:[#allocation49_spill] sm:$0xff] }
0x132e   : > { %10068 = vadd.xlane.f32.xlu0 %v10067_v5  ;;  %v9659_v5 = vpop.f32.mrf.mxu1 }
0x132f   : > { %v19752_v36 = vadd.f32 %v19375_v44, %v9659_v5  ;;  %v3707_v5 = vadd.f32 %v21362_v31, %v21361_v29 }
0x1331   : > { %14350 = vtanh.f32 %v19752_v36 }
0x1334   : > { %10065 = vadd.xlane.f32.xlu1 %v10064_v16  ;;  %v14347_v7 = vpop.eup %14346  ;;  %v21355_v16 = vld [vmem:[#allocation177_spill] sm:$0xff] }
0x1335   : > { %v19778_v1 = vpop.eup %14348 }
0x1344   : > { %9872 = vrot.lane.b32.xlu0 %v14345_v9, %s14651_s24 }
0x1345   : > { %9878 = vrot.lane.b32.xlu1 %v14347_v7, %s14651_s24 }
0x134d   : > { %v10057_v41 = vpop.xlane.xlu0 %10056 }
0x134e   : > { %v19745_v24 = vadd.f32 %v10057_v41, %v8552_v12  ;;  %v19782_v12 = vpop.eup %14350  ;;  %v9780_v41 = vmul.f32 1.442695, %v19527_v47  ;;  %v21364_v47 = vld [vmem:[#allocation145_spill] sm:$0xff] }
0x134f   : > { %v10070_v28 = vsel %vm842_vm2, %v19782_v12, 0.0 }
0x1350   : > { %14352 = vpow2.f32 %v9780_v41 }
0x1351   : > { %v9865_v37 = vpop.permute.xlu0 %9864 }
0x1352   : > { %v9956_v9 = vmul.f32 %v9865_v37, %v21355_v16  ;;  %v21363_v37 = vld [vmem:[#allocation72_spill] sm:$0xff] }
0x1353   : > { %v10054_v7 = vpop.xlane.xlu1 %10053 }
0x1354   : > { %v9988_v43 = vadd.f32 %v9956_v9, %v19397_v63  ;;  %v19755_v30 = vadd.f32 %v10054_v7, %v8551_v27  ;;  %v5344_v27 = vadd.f32 %v21363_v37, %v3707_v5  ;;  %v21365_v9 = vld [vmem:[#allocation10_spill] sm:$0xff]  ;;  %v21366_v7 = vld [vmem:[#allocation33_spill] sm:$0xff]  ;;  %v21370_v5 = vld [vmem:[#allocation39_spill] sm:$0xff] }
0x1356   : > { %v19759_v17 = vsel %vm842_vm2, %v21356_v11, %v9988_v43  ;;  %v6917_v16 = vadd.f32 %v21364_v47, %v5344_v27  ;;  %v3706_v43 = vadd.f32 %v21366_v7, %v21365_v9  ;;  %v21371_v47 = vld [vmem:[#allocation169_spill] sm:$0xff]  ;;  %v21373_v9 = vld [vmem:[#allocation80_spill] sm:$0xff] }
0x1357   : > { %v9871_v22 = vpop.permute.xlu1 %9870  ;;  %v19764_v62 = vsel %vm424_vm1, %v19759_v17, %v19578_v54  ;;  %v10073_v54 = vsel %vm842_vm2, %v19778_v1, 0.0 }
0x1358   : > { %21357 = vst [vmem:[#allocation130_spill] sm:$0xff] %v19764_v62  ;;  %v9959_v25 = vmul.f32 %v9871_v22, %v21358_v49  ;;  %v8554_v11 = vadd.f32 %v19487_v19, %v6917_v16  ;;  %v21367_v49 = vld [vmem:[#allocation75_spill] sm:$0xff]  ;;  %v21403_v62 = vld [vmem:[#allocation152_spill] sm:$0xff] }
0x135a   : > { %v9991_v57 = vadd.f32 %v9959_v25, %v19402_v2  ;;  %v9786_v2 = vmul.f32 1.442695, %v19621_v32  ;;  %v13624_v32 = vpop.f32.mrf.mxu1  ;;  %v5343_v25 = vadd.f32 %v21367_v49, %v3706_v43  ;;  %v21374_v43 = vld [vmem:[#allocation40_spill] sm:$0xff] }
0x135c   : > { %v19771_v63 = vsel %vm842_vm2, %v21359_v13, %v9991_v57  ;;  %14354 = vpow2.f32 %v9786_v2  ;;  %v19799_v57 = vadd.f32 %v13624_v32, %v19375_v44  ;;  %v9669_v2 = vpop.f32.mrf.mxu1 }
0x135d   : > { %v19776_v53 = vsel %vm424_vm1, %v19771_v63, %v19592_v3  ;;  %v14353_v3 = vpop.eup %14352  ;;  %v19808_v19 = vadd.f32 %v19375_v44, %v9669_v2  ;;  %v9784_v2 = vmul.f32 1.442695, %v19625_v8  ;;  %v21380_v8 = vld [vmem:[#allocation147_spill] sm:$0xff] }
0x135e   : > { %21360 = vst [vmem:[#allocation64_spill] sm:$0xff] %v19776_v53  ;;  %14356 = vtanh.f32 %v19799_v57 }
0x135f   : > { %14358 = vtanh.f32 %v19808_v19 }
0x1360   : > { %14360 = vpow2.f32 %v9784_v2  ;;  %v21384_v2 = vld [vmem:[#allocation77_spill] sm:$0xff] }
0x1363   : > { %10074 = vadd.xlane.f32.xlu0 %v10073_v54  ;;  %v21368_v54 = vld [vmem:[#allocation148_spill] sm:$0xff] }
0x1364   : > { %v6916_v41 = vadd.f32 %v21368_v54, %v5343_v25 }
0x1369   : > { %10071 = vadd.xlane.f32.xlu1 %v10070_v28  ;;  %v14355_v61 = vpop.eup %14354 }
0x136b   : > { %v19834_v54 = vpop.eup %14356 }
0x1379   : > { %9876 = vrot.lane.b32.xlu0 %v14353_v3, %s14651_s24  ;;  %v8553_v3 = vadd.f32 %v19485_v26, %v6916_v41  ;;  %v19838_v41 = vpop.eup %14358 }
0x137a   : > { %9882 = vrot.lane.b32.xlu1 %v14355_v61, %s14651_s24  ;;  %v21369_v61 = vld [vmem:[#allocation79_spill] sm:$0xff] }
0x1382   : > { %v10063_v22 = vpop.xlane.xlu0 %10062 }
0x1383   : > { %v19801_v13 = vadd.f32 %v10063_v22, %v8554_v11  ;;  %v21375_v22 = vld [vmem:[#allocation109_spill] sm:$0xff] }
0x1386   : > { %v9869_v28 = vpop.permute.xlu0 %9868 }
0x1387   : > { %v9958_v29 = vmul.f32 %v9869_v28, %v21369_v61  ;;  %v9790_v28 = vmul.f32 1.442695, %v19677_v39  ;;  %v13627_v39 = vpop.f32.mrf.mxu1 }
0x1388   : > { %v10060_v31 = vpop.xlane.xlu1 %10059 }
0x1389   : > { %v9990_v37 = vadd.f32 %v9958_v29, %v21370_v5  ;;  %v19811_v27 = vadd.f32 %v10060_v31, %v8553_v3  ;;  %v10076_v3 = vsel %vm842_vm2, %v19838_v41, 0.0  ;;  %14362 = vpow2.f32 %v9790_v28  ;;  %v21377_v29 = vld [vmem:[#allocation11_spill] sm:$0xff] }
0x138a   : > { %v21378_v31 = vld [vmem:[#allocation51_spill] sm:$0xff] }
0x138b   : > { %v19815_v16 = vsel %vm842_vm2, %v21371_v47, %v9990_v37  ;;  %v3709_v5 = vadd.f32 %v21378_v31, %v21377_v29  ;;  %v21379_v37 = vld [vmem:[#allocation74_spill] sm:$0xff]  ;;  %v9679_v31 = vpop.f32.mrf.mxu1 }
0x138c   : > { %v9875_v32 = vpop.permute.xlu1 %9874  ;;  %v19820_v26 = vsel %vm424_vm1, %v19815_v16, %v19586_v6  ;;  %v10079_v6 = vsel %vm842_vm2, %v19834_v54, 0.0 }
0x138d   : > { %21372 = vst [vmem:[#allocation112_spill] sm:$0xff] %v19820_v26  ;;  %v9961_v7 = vmul.f32 %v9875_v32, %v21373_v9  ;;  %v5346_v47 = vadd.f32 %v21379_v37, %v3709_v5  ;;  %v21381_v9 = vld [vmem:[#allocation12_spill] sm:$0xff]  ;;  %v21386_v37 = vld [vmem:[#allocation42_spill] sm:$0xff] }
0x138e   : > { %v21402_v26 = vld [vmem:[#allocation76_spill] sm:$0xff] }
0x138f   : > { %v9993_v11 = vadd.f32 %v9961_v7, %v21374_v43  ;;  %v6919_v32 = vadd.f32 %v21380_v8, %v5346_v47  ;;  %v21382_v7 = vld [vmem:[#allocation46_spill] sm:$0xff]  ;;  %v21387_v8 = vld [vmem:[#allocation81_spill] sm:$0xff] }
0x1390   : > { %v3708_v43 = vadd.f32 %v21382_v7, %v21381_v9 }
0x1391   : > { %v19827_v49 = vsel %vm842_vm2, %v21375_v22, %v9993_v11  ;;  %v21383_v11 = vld [vmem:[#allocation43_spill] sm:$0xff] }
0x1392   : > { %v19832_v25 = vsel %vm424_vm1, %v19827_v49, %v19646_v45  ;;  %v14361_v45 = vpop.eup %14360  ;;  %v8556_v22 = vadd.f32 %v21383_v11, %v6919_v32  ;;  %v5345_v28 = vadd.f32 %v21384_v2, %v3708_v43  ;;  %v19864_v32 = vadd.f32 %v19375_v44, %v9679_v31  ;;  %v21388_v43 = vld [vmem:[#allocation41_spill] sm:$0xff]  ;;  %v21392_v31 = vld [vmem:[#allocation180_spill] sm:$0xff] }
0x1393   : > { %21376 = vst [vmem:[#allocation134_spill] sm:$0xff] %v19832_v25 }
0x1396   : > { %v14363_v61 = vpop.eup %14362 }
0x1398   : > { %10080 = vadd.xlane.f32.xlu0 %v10079_v6 }
0x139e   : > { %10077 = vadd.xlane.f32.xlu1 %v10076_v3  ;;  %v19855_v3 = vadd.f32 %v13627_v39, %v19375_v44 }
0x13a0   : > { %14364 = vtanh.f32 %v19855_v3 }
0x13a1   : > { %14366 = vtanh.f32 %v19864_v32 }
0x13ae   : > { %9880 = vrot.lane.b32.xlu0 %v14361_v45, %s14651_s24 }
0x13af   : > { %9886 = vrot.lane.b32.xlu1 %v14363_v61, %s14651_s24  ;;  %v21385_v61 = vld [vmem:[#allocation150_spill] sm:$0xff] }
0x13b0   : > { %v6918_v29 = vadd.f32 %v21385_v61, %v5345_v28  ;;  %v21391_v61 = vld [vmem:[#allocation82_spill] sm:$0xff] }
0x13b2   : > { %v8555_v47 = vadd.f32 %v21386_v37, %v6918_v29  ;;  %v21393_v37 = vld [vmem:[#allocation111_spill] sm:$0xff] }
0x13b7   : > { %v10069_v6 = vpop.xlane.xlu0 %10068 }
0x13b8   : > { %v19857_v45 = vadd.f32 %v10069_v6, %v8556_v22  ;;  %v21389_v22 = vld [vmem:[#allocation108_spill] sm:$0xff] }
0x13bb   : > { %v9873_v5 = vpop.permute.xlu0 %9872 }
0x13bc   : > { %v9960_v9 = vmul.f32 %v9873_v5, %v21387_v8 }
0x13bd   : > { %v10066_v7 = vpop.xlane.xlu1 %10065 }
0x13be   : > { %v9992_v11 = vadd.f32 %v9960_v9, %v21388_v43  ;;  %v19867_v39 = vadd.f32 %v10066_v7, %v8555_v47  ;;  %v19890_v9 = vpop.eup %14364  ;;  %v9788_v43 = vmul.f32 1.442695, %v19681_v14  ;;  %v21398_v14 = vld [vmem:[#allocation149_spill] sm:$0xff] }
0x13bf   : > { %v19894_v7 = vpop.eup %14366 }
0x13c0   : > { %v19871_v6 = vsel %vm842_vm2, %v21389_v22, %v9992_v11  ;;  %v9794_v11 = vmul.f32 1.442695, %v19722_v23  ;;  %v10082_v22 = vsel %vm842_vm2, %v19894_v7, 0.0  ;;  %14368 = vpow2.f32 %v9788_v43  ;;  %v13630_v23 = vpop.f32.mrf.mxu1 }
0x13c1   : > { %v9879_v2 = vpop.permute.xlu1 %9878  ;;  %v19876_v28 = vsel %vm424_vm1, %v19871_v6, %v19648_v33  ;;  %v10085_v33 = vsel %vm842_vm2, %v19890_v9, 0.0 }
0x13c2   : > { %21390 = vst [vmem:[#allocation173_spill] sm:$0xff] %v19876_v28  ;;  %v9963_v29 = vmul.f32 %v9879_v2, %v21391_v61  ;;  %14370 = vpow2.f32 %v9794_v11  ;;  %v21395_v61 = vld [vmem:[#allocation13_spill] sm:$0xff]  ;;  %v21400_v28 = vld [vmem:[#allocation48_spill] sm:$0xff] }
0x13c4   : > { %v9995_v5 = vadd.f32 %v9963_v29, %v21392_v31  ;;  %v21396_v29 = vld [vmem:[#allocation53_spill] sm:$0xff] }
0x13c5   : > { %v3711_v31 = vadd.f32 %v21396_v29, %v21395_v61  ;;  %v9689_v29 = vpop.f32.mrf.mxu1 }
0x13c6   : > { %v19883_v47 = vsel %vm842_vm2, %v21393_v37, %v9995_v5  ;;  %v21397_v5 = vld [vmem:[#allocation104_spill] sm:$0xff] }
0x13c7   : > { %v19888_v8 = vsel %vm424_vm1, %v19883_v47, %v19700_v35  ;;  %v5348_v37 = vadd.f32 %v21397_v5, %v3711_v31  ;;  %v21404_v5 = vld [vmem:[#allocation44_spill] sm:$0xff] }
0x13c8   : > { %21394 = vst [vmem:[#allocation172_spill] sm:$0xff] %v19888_v8  ;;  %v21399_v8 = vld [vmem:[#allocation15_spill] sm:$0xff] }
0x13c9   : > { %v3710_v25 = vadd.f32 %v21400_v28, %v21399_v8 }
0x13cb   : > { %v5347_v53 = vadd.f32 %v21402_v26, %v3710_v25  ;;  %v21406_v26 = vld [vmem:[#allocation181_spill] sm:$0xff] }
0x13cd   : > { %10086 = vadd.xlane.f32.xlu0 %v10085_v33  ;;  %v14369_v35 = vpop.eup %14368  ;;  %v6921_v33 = vadd.f32 %v21398_v14, %v5348_v37  ;;  %v6920_v61 = vadd.f32 %v21403_v62, %v5347_v53  ;;  %v21405_v14 = vld [vmem:[#allocation83_spill] sm:$0xff] }
0x13cf   : > { %v14371_v2 = vpop.eup %14370  ;;  %v8557_v37 = vadd.f32 %v21404_v5, %v6920_v61 }
0x13d3   : > { %10083 = vadd.xlane.f32.xlu1 %v10082_v22  ;;  %v21401_v22 = vld [vmem:[#allocation45_spill] sm:$0xff] }
0x13d4   : > { %v8558_v43 = vadd.f32 %v21401_v22, %v6921_v33  ;;  %v19920_v33 = vadd.f32 %v19375_v44, %v9689_v29  ;;  %v21407_v22 = vld [vmem:[#allocation110_spill] sm:$0xff]  ;;  %v21410_v29 = vld [vmem:[#allocation115_spill] sm:$0xff] }
0x13e3   : > { %9884 = vrot.lane.b32.xlu0 %v14369_v35, %s14651_s24  ;;  %v19911_v35 = vadd.f32 %v13630_v23, %v19375_v44 }
0x13e4   : > { %9890 = vrot.lane.b32.xlu1 %v14371_v2, %s14651_s24 }
0x13e5   : > { %14372 = vtanh.f32 %v19911_v35 }
0x13e6   : > { %14374 = vtanh.f32 %v19920_v33 }
0x13ec   : > { %v10075_v11 = vpop.xlane.xlu0 %10074 }
0x13ed   : > { %v19913_v2 = vadd.f32 %v10075_v11, %v8558_v43  ;;  %v21409_v11 = vld [vmem:[#allocation84_spill] sm:$0xff] }
0x13f0   : > { %v9877_v31 = vpop.permute.xlu0 %9876 }
0x13f1   : > { %v9962_v28 = vmul.f32 %v9877_v31, %v21405_v14 }
0x13f2   : > { %v10072_v8 = vpop.xlane.xlu1 %10071 }
0x13f3   : > { %v9994_v25 = vadd.f32 %v9962_v28, %v21406_v26  ;;  %v19923_v23 = vadd.f32 %v10072_v8, %v8557_v37  ;;  %v19946_v37 = vpop.eup %14372  ;;  %v9792_v28 = vmul.f32 1.442695, %v19726_v21  ;;  %v21415_v21 = vld [vmem:[#allocation151_spill] sm:$0xff] }
0x13f4   : > { %v19950_v14 = vpop.eup %14374 }
0x13f5   : > { %v19927_v43 = vsel %vm842_vm2, %v21407_v22, %v9994_v25  ;;  %v10088_v8 = vsel %vm842_vm2, %v19950_v14, 0.0  ;;  %14376 = vpow2.f32 %v9792_v28  ;;  %v21412_v25 = vld [vmem:[#allocation14_spill] sm:$0xff]  ;;  %v21413_v22 = vld [vmem:[#allocation55_spill] sm:$0xff] }
0x13f6   : > { %v9883_v62 = vpop.permute.xlu1 %9882  ;;  %v19932_v53 = vsel %vm424_vm1, %v19927_v43, %v19708_v18  ;;  %v10091_v18 = vsel %vm842_vm2, %v19946_v37, 0.0 }
0x13f7   : > { %21408 = vst [vmem:[#allocation166_spill] sm:$0xff] %v19932_v53  ;;  %v9965_v61 = vmul.f32 %v9883_v62, %v21409_v11  ;;  %v3713_v62 = vadd.f32 %v21413_v22, %v21412_v25  ;;  %v21414_v11 = vld [vmem:[#allocation105_spill] sm:$0xff]  ;;  %v21419_v53 = vld [vmem:[#allocation106_spill] sm:$0xff] }
0x13f8   : > { %v21420_v22 = vld [vmem:[#allocation154_spill] sm:$0xff] }
0x13f9   : > { %v9997_v44 = vadd.f32 %v9965_v61, %v19596_v34  ;;  %v9798_v34 = vmul.f32 1.442695, %v19778_v1  ;;  %v5350_v61 = vadd.f32 %v21414_v11, %v3713_v62  ;;  %v13633_v1 = vpop.f32.mrf.mxu1 }
0x13fb   : > { %v19939_v31 = vsel %vm842_vm2, %v21410_v29, %v9997_v44  ;;  %14378 = vpow2.f32 %v9798_v34  ;;  %v6923_v44 = vadd.f32 %v21415_v21, %v5350_v61  ;;  %v21416_v29 = vld [vmem:[#allocation17_spill] sm:$0xff]  ;;  %v9699_v11 = vpop.f32.mrf.mxu1  ;;  %v21421_v21 = vld [vmem:[#allocation178_spill] sm:$0xff] }
0x13fc   : > { %v19944_v5 = vsel %vm424_vm1, %v19939_v31, %v19745_v24 }
0x13fd   : > { %21411 = vst [vmem:[#allocation163_spill] sm:$0xff] %v19944_v5 }
0x1402   : > { %10092 = vadd.xlane.f32.xlu0 %v10091_v18  ;;  %v14377_v24 = vpop.eup %14376  ;;  %v21417_v18 = vld [vmem:[#allocation50_spill] sm:$0xff] }
0x1403   : > { %v3712_v5 = vadd.f32 %v21417_v18, %v21416_v29 }
0x1405   : > { %v5349_v0 = vadd.f32 %v21419_v53, %v3712_v5 }
0x1407   : > { %v6922_v62 = vadd.f32 %v21420_v22, %v5349_v0 }
0x1408   : > { %10089 = vadd.xlane.f32.xlu1 %v10088_v8  ;;  %v14379_v26 = vpop.eup %14378  ;;  %v21418_v8 = vld [vmem:[#allocation179_spill] sm:$0xff] }
0x1409   : > { %v8560_v28 = vadd.f32 %v21418_v8, %v6923_v44  ;;  %v8559_v29 = vadd.f32 %v21421_v21, %v6922_v62  ;;  %v21422_v44 = vld [vmem:[#allocation85_spill] sm:$0xff]  ;;  %v21425_v62 = vld [vmem:[#allocation86_spill] sm:$0xff]  ;;  %v21426_v21 = vld [vmem:[#allocation119_spill] sm:$0xff] }
0x1418   : > { %9888 = vrot.lane.b32.xlu0 %v14377_v24, %s14651_s24  ;;  %v19969_v24 = vld [vmem:[%s20500_s8 + $0x5] ss:$0 sm:$0xff] }
0x1419   : > { %9894 = vrot.lane.b32.xlu1 %v14379_v26, %s14651_s24  ;;  %v19972_v26 = vadd.f32 %v19969_v24, %v13633_v1  ;;  %v19981_v18 = vadd.f32 %v19969_v24, %v9699_v11 }
0x141b   : > { %14380 = vtanh.f32 %v19972_v26 }
0x141c   : > { %14382 = vtanh.f32 %v19981_v18 }
0x1421   : > { %v10081_v34 = vpop.xlane.xlu0 %10080 }
0x1422   : > { %v19974_v25 = vadd.f32 %v10081_v34, %v8560_v28  ;;  %v21423_v28 = vld [vmem:[#allocation113_spill] sm:$0xff] }
0x1425   : > { %v9881_v61 = vpop.permute.xlu0 %9880 }
0x1426   : > { %v9964_v53 = vmul.f32 %v9881_v61, %v21422_v44 }
0x1427   : > { %v10078_v5 = vpop.xlane.xlu1 %10077 }
0x1428   : > { %v9996_v8 = vadd.f32 %v9964_v53, %v19605_v58  ;;  %v19984_v1 = vadd.f32 %v10078_v5, %v8559_v29  ;;  %v20007_v44 = vpop.eup %14380  ;;  %v9796_v5 = vmul.f32 1.442695, %v19782_v12  ;;  %v21431_v12 = vld [vmem:[#allocation153_spill] sm:$0xff] }
0x1429   : > { %v20011_v53 = vpop.eup %14382 }
0x142a   : > { %v19988_v34 = vsel %vm842_vm2, %v21423_v28, %v9996_v8  ;;  %v10094_v8 = vsel %vm842_vm2, %v20011_v53, 0.0  ;;  %14384 = vpow2.f32 %v9796_v5 }
0x142b   : > { %v9887_v0 = vpop.permute.xlu1 %9886  ;;  %v19993_v22 = vsel %vm424_vm1, %v19988_v34, %v19755_v30  ;;  %v10097_v30 = vsel %vm842_vm2, %v20007_v44, 0.0 }
0x142c   : > { %21424 = vst [vmem:[#allocation4_spill] sm:$0xff] %v19993_v22  ;;  %v9967_v61 = vmul.f32 %v9887_v0, %v21425_v62  ;;  %v21428_v0 = vld [vmem:[#allocation16_spill] sm:$0xff]  ;;  %v21429_v62 = vld [vmem:[#allocation57_spill] sm:$0xff] }
0x142d   : > { %v21433_v22 = vld [vmem:[#allocation52_spill] sm:$0xff] }
0x142e   : > { %v9999_v11 = vadd.f32 %v9967_v61, %v19644_v56  ;;  %v9802_v56 = vmul.f32 1.442695, %v19834_v54  ;;  %v3715_v61 = vadd.f32 %v21429_v62, %v21428_v0  ;;  %v13636_v54 = vpop.f32.mrf.mxu1 }
0x1430   : > { %v20000_v58 = vsel %vm842_vm2, %v21426_v21, %v9999_v11  ;;  %14386 = vpow2.f32 %v9802_v56  ;;  %v21430_v11 = vld [vmem:[#allocation118_spill] sm:$0xff]  ;;  %v9709_v62 = vpop.f32.mrf.mxu1 }
0x1431   : > { %v20005_v29 = vsel %vm424_vm1, %v20000_v58, %v19801_v13  ;;  %v5352_v21 = vadd.f32 %v21430_v11, %v3715_v61  ;;  %v21437_v11 = vld [vmem:[#allocation182_spill] sm:$0xff] }
0x1432   : > { %21427 = vst [vmem:[#allocation30_spill] sm:$0xff] %v20005_v29  ;;  %v21432_v29 = vld [vmem:[#allocation19_spill] sm:$0xff] }
0x1433   : > { %v3714_v50 = vadd.f32 %v21433_v22, %v21432_v29 }
0x1435   : > { %v5351_v52 = vadd.f32 %v21435_v40, %v3714_v50 }
0x1437   : > { %10098 = vadd.xlane.f32.xlu0 %v10097_v30  ;;  %v14385_v13 = vpop.eup %14384  ;;  %v6925_v30 = vadd.f32 %v21431_v12, %v5352_v21  ;;  %v6924_v0 = vadd.f32 %v21436_v10, %v5351_v52  ;;  %v21438_v12 = vld [vmem:[#allocation87_spill] sm:$0xff] }
0x1439   : > { %v8561_v21 = vadd.f32 %v21437_v11, %v6924_v0 }
0x143d   : > { %10095 = vadd.xlane.f32.xlu1 %v10094_v8  ;;  %v14387_v28 = vpop.eup %14386  ;;  %v21434_v8 = vld [vmem:[#allocation183_spill] sm:$0xff] }
0x143e   : > { %v8562_v5 = vadd.f32 %v21434_v8, %v6925_v30  ;;  %v20037_v30 = vadd.f32 %v19969_v24, %v9709_v62  ;;  %v21442_v62 = vld [vmem:[#allocation123_spill] sm:$0xff] }
0x144d   : > { %9892 = vrot.lane.b32.xlu0 %v14385_v13, %s14651_s24  ;;  %v20028_v13 = vadd.f32 %v19969_v24, %v13636_v54  ;;  %v21439_v54 = vld [vmem:[#allocation116_spill] sm:$0xff] }
0x144e   : > { %9898 = vrot.lane.b32.xlu1 %v14387_v28, %s14651_s24 }
0x144f   : > { %14388 = vtanh.f32 %v20028_v13 }
0x1450   : > { %14390 = vtanh.f32 %v20037_v30 }
0x1456   : > { %v10087_v56 = vpop.xlane.xlu0 %10086 }
0x1457   : > { %v20030_v28 = vadd.f32 %v10087_v56, %v8562_v5  ;;  %v21441_v5 = vld [vmem:[#allocation88_spill] sm:$0xff] }
0x145a   : > { %v9885_v61 = vpop.permute.xlu0 %9884 }
0x145b   : > { %v9966_v22 = vmul.f32 %v9885_v61, %v21438_v12  ;;  %v9800_v12 = vmul.f32 1.442695, %v19838_v41 }
0x145c   : > { %v10084_v29 = vpop.xlane.xlu1 %10083  ;;  %v14389_v11 = vpop.eup %14388 }
0x145d   : > { %v9998_v40 = vadd.f32 %v9966_v22, %v19652_v4  ;;  %v20040_v50 = vadd.f32 %v10084_v29, %v8561_v21  ;;  %v10103_v21 = vsel %vm842_vm2, %v14389_v11, 0.0  ;;  %v9806_v22 = vmul.f32 1.442695, %v19890_v9  ;;  %v21448_v9 = vld [vmem:[#allocation21_spill] sm:$0xff] }
0x145e   : > { %14392 = vpow2.f32 %v9800_v12 }
0x145f   : > { %v20044_v8 = vsel %vm842_vm2, %v21439_v54, %v9998_v40  ;;  %14394 = vpow2.f32 %v9806_v22  ;;  %v21445_v54 = vld [vmem:[#allocation59_spill] sm:$0xff] }
0x1460   : > { %v9891_v52 = vpop.permute.xlu1 %9890  ;;  %v20049_v10 = vsel %vm424_vm1, %v20044_v8, %v19811_v27  ;;  %v14391_v27 = vpop.eup %14390 }
0x1461   : > { %21440 = vst [vmem:[#allocation2_spill] sm:$0xff] %v20049_v10  ;;  %v9969_v56 = vmul.f32 %v9891_v52, %v21441_v5  ;;  %v21446_v5 = vld [vmem:[#allocation121_spill] sm:$0xff]  ;;  %v21451_v10 = vld [vmem:[#allocation114_spill] sm:$0xff] }
0x1463   : > { %v10001_v0 = vadd.f32 %v9969_v56, %v19698_v42  ;;  %v10100_v42 = vsel %vm842_vm2, %v14391_v27, 0.0 }
0x1465   : > { %v20056_v4 = vsel %vm842_vm2, %v21442_v62, %v10001_v0  ;;  %v21447_v0 = vld [vmem:[#allocation155_spill] sm:$0xff]  ;;  %v13639_v62 = vpop.f32.mrf.mxu1 }
0x1466   : > { %v20061_v61 = vsel %vm424_vm1, %v20056_v4, %v19857_v45  ;;  %v21444_v45 = vld [vmem:[#allocation18_spill] sm:$0xff] }
0x1467   : > { %21443 = vst [vmem:[#allocation27_spill] sm:$0xff] %v20061_v61  ;;  %v3717_v52 = vadd.f32 %v21445_v54, %v21444_v45  ;;  %v9719_v54 = vpop.f32.mrf.mxu1 }
0x1469   : > { %v5354_v56 = vadd.f32 %v21446_v5, %v3717_v52  ;;  %v21453_v5 = vld [vmem:[#allocation184_spill] sm:$0xff] }
0x146b   : > { %v14393_v29 = vpop.eup %14392  ;;  %v6927_v41 = vadd.f32 %v21447_v0, %v5354_v56  ;;  %v21454_v0 = vld [vmem:[#allocation89_spill] sm:$0xff] }
0x146c   : > { %10104 = vadd.xlane.f32.xlu0 %v10103_v21  ;;  %v14395_v40 = vpop.eup %14394  ;;  %v21449_v21 = vld [vmem:[#allocation54_spill] sm:$0xff] }
0x146d   : > { %v3716_v61 = vadd.f32 %v21449_v21, %v21448_v9 }
0x146f   : > { %v5353_v59 = vadd.f32 %v21451_v10, %v3716_v61 }
0x1471   : > { %v6926_v45 = vadd.f32 %v21452_v15, %v5353_v59 }
0x1472   : > { %10101 = vadd.xlane.f32.xlu1 %v10100_v42  ;;  %v21450_v42 = vld [vmem:[#allocation185_spill] sm:$0xff] }
0x1473   : > { %v8564_v12 = vadd.f32 %v21450_v42, %v6927_v41  ;;  %v8563_v56 = vadd.f32 %v21453_v5, %v6926_v45  ;;  %v20087_v41 = vadd.f32 %v19969_v24, %v9719_v54  ;;  %v21457_v45 = vld [vmem:[#allocation127_spill] sm:$0xff] }
0x1482   : > { %9896 = vrot.lane.b32.xlu0 %v14393_v29, %s14651_s24  ;;  %v20078_v29 = vadd.f32 %v19969_v24, %v13639_v62  ;;  %v21455_v62 = vld [vmem:[#allocation120_spill] sm:$0xff] }
0x1483   : > { %9902 = vrot.lane.b32.xlu1 %v14395_v40, %s14651_s24 }
0x1484   : > { %14396 = vtanh.f32 %v20078_v29 }
0x1485   : > { %14398 = vtanh.f32 %v20087_v41 }
0x148b   : > { %v10093_v22 = vpop.xlane.xlu0 %10092 }
0x148c   : > { %v20080_v40 = vadd.f32 %v10093_v22, %v8564_v12  ;;  %v21456_v12 = vld [vmem:[#allocation90_spill] sm:$0xff] }
0x148f   : > { %v9889_v52 = vpop.permute.xlu0 %9888 }
0x1490   : > { %v9968_v9 = vmul.f32 %v9889_v52, %v21454_v0  ;;  %v9810_v0 = vmul.f32 1.442695, %v19946_v37 }
0x1491   : > { %v10090_v21 = vpop.xlane.xlu1 %10089  ;;  %v14397_v52 = vpop.eup %14396 }
0x1492   : > { %v10000_v10 = vadd.f32 %v9968_v9, %v19706_v46  ;;  %v20090_v61 = vadd.f32 %v10090_v21, %v8563_v56  ;;  %v10109_v5 = vsel %vm842_vm2, %v14397_v52, 0.0  ;;  %v9804_v56 = vmul.f32 1.442695, %v19894_v7 }
0x1493   : > { %v9808_v9 = vmul.f32 1.442695, %v19950_v14  ;;  %v9814_v21 = vmul.f32 1.442695, %v20007_v44  ;;  %v9822_v7 = vmul.f32 1.442695, %v14397_v52 }
0x1494   : > { %v20094_v42 = vsel %vm842_vm2, %v21455_v62, %v10000_v10  ;;  %14400 = vpow2.f32 %v9804_v56  ;;  %v9818_v10 = vmul.f32 1.442695, %v14389_v11  ;;  %v9816_v62 = vmul.f32 1.442695, %v14391_v27  ;;  %v21458_v14 = vld [vmem:[#allocation20_spill] sm:$0xff]  ;;  %v21459_v44 = vld [vmem:[#allocation61_spill] sm:$0xff] }
0x1495   : > { %v9895_v59 = vpop.permute.xlu1 %9894  ;;  %v20099_v15 = vsel %vm424_vm1, %v20094_v42, %v19867_v39  ;;  %v14399_v39 = vpop.eup %14398  ;;  %14402 = vpow2.f32 %v9810_v0  ;;  %v21460_v11 = vld [vmem:[#allocation125_spill] sm:$0xff]  ;;  %v21462_v56 = vld [vmem:[#allocation23_spill] sm:$0xff]  ;;  %v21463_v0 = vld [vmem:[#allocation56_spill] sm:$0xff] }
0x1496   : > { %v9971_v22 = vmul.f32 %v9895_v59, %v21456_v12  ;;  %14404 = vpow2.f32 %v9808_v9  ;;  %v9820_v37 = vmul.f32 1.442695, %v14399_v39  ;;  %v21461_v27 = vld [vmem:[#allocation157_spill] sm:$0xff]  ;;  %v21464_v9 = vld [vmem:[#allocation187_spill] sm:$0xff] }
0x1497   : > { %14406 = vpow2.f32 %v9814_v21 }
0x1498   : > { %v10003_v24 = vadd.f32 %v9971_v22, %v19743_v60  ;;  %v10106_v60 = vsel %vm842_vm2, %v14399_v39, 0.0  ;;  %v3719_v22 = vadd.f32 %v21459_v44, %v21458_v14 }
0x149a   : > { %v20106_v46 = vsel %vm842_vm2, %v21457_v45, %v10003_v24  ;;  %v5356_v45 = vadd.f32 %v21460_v11, %v3719_v22  ;;  %v21467_v22 = vld [vmem:[#allocation186_spill] sm:$0xff] }
0x149b   : > { %v20111_v54 = vsel %vm424_vm1, %v20106_v46, %v19913_v2  ;;  %v9812_v2 = vmul.f32 1.442695, %v20011_v53 }
0x149c   : > { %v6929_v52 = vadd.f32 %v21461_v27, %v5356_v45 }
0x149d   : > { %14408 = vpow2.f32 %v9812_v2 }
0x149e   : > { %14410 = vpow2.f32 %v9818_v10  ;;  %v8566_v21 = vadd.f32 %v21464_v9, %v6929_v52  ;;  %v21465_v10 = vld [vmem:[#allocation117_spill] sm:$0xff]  ;;  %v21470_v9 = vld [vmem:[#allocation92_spill] sm:$0xff] }
0x149f   : > { %14412 = vpow2.f32 %v9816_v62 }
0x14a0   : > { %14414 = vpow2.f32 %v9822_v7 }
0x14a1   : > { %10110 = vadd.xlane.f32.xlu0 %v10109_v5  ;;  %v14401_v59 = vpop.eup %14400  ;;  %14416 = vpow2.f32 %v9820_v37 }
0x14a2   : > { %v14403_v12 = vpop.eup %14402 }
0x14a3   : > { %v14405_v53 = vpop.eup %14404 }
0x14a4   : > { %v14407_v24 = vpop.eup %14406 }
0x14a7   : > { %10107 = vadd.xlane.f32.xlu1 %v10106_v60  ;;  %v3718_v60 = vadd.f32 %v21463_v0, %v21462_v56 }
0x14a9   : > { %v5355_v62 = vadd.f32 %v21465_v10, %v3718_v60  ;;  %v21471_v10 = vld [vmem:[#allocation131_spill] sm:$0xff] }
0x14aa   : > { %v14409_v5 = vpop.eup %14408 }
0x14ab   : > { %v14411_v39 = vpop.eup %14410 }
0x14ac   : > { %v14413_v37 = vpop.eup %14412 }
0x14b7   : > { %9900 = vrot.lane.b32.xlu0 %v14401_v59, %s14651_s24  ;;  %v14415_v59 = vpop.eup %14414 }
0x14b8   : > { %9906 = vrot.lane.b32.xlu1 %v14403_v12, %s14651_s24  ;;  %v21466_v12 = vld [vmem:[#allocation160_spill] sm:$0xff]  ;;  %v14417_v45 = vpop.eup %14416 }
0x14b9   : > { %v6928_v14 = vadd.f32 %v21466_v12, %v5355_v62 }
0x14bb   : > { %9904 = vrot.lane.b32.xlu0 %v14405_v53, %s14651_s24  ;;  %v8565_v53 = vadd.f32 %v21467_v22, %v6928_v14  ;;  %v10178_v14 = vmul.f32 %v19670_v20, %v19670_v20  ;;  %v10183_v22 = vmul.f32 %v19771_v63, %v19771_v63  ;;  %v21473_v20 = vld [vmem:[#allocation63_spill] sm:$0xff] }
0x14bc   : > { %9910 = vrot.lane.b32.xlu1 %v14407_v24, %s14651_s24  ;;  %v21468_v24 = vld [vmem:[#allocation91_spill] sm:$0xff] }
0x14bf   : > { %9908 = vrot.lane.b32.xlu0 %v14409_v5, %s14651_s24 }
0x14c0   : > { %9914 = vrot.lane.b32.xlu1 %v14411_v39, %s14651_s24  ;;  %v10099_v2 = vpop.xlane.xlu0 %10098  ;;  %v21469_v39 = vld [vmem:[#allocation124_spill] sm:$0xff] }
0x14c1   : > { %v20134_v7 = vadd.f32 %v10099_v2, %v8566_v21 }
0x14c3   : > { %9912 = vrot.lane.b32.xlu0 %v14413_v37, %s14651_s24  ;;  %v10177_v37 = vmul.f32 %v19614_v51, %v19614_v51  ;;  %v10181_v51 = vmul.f32 %v19715_v48, %v19715_v48  ;;  %v10182_v48 = vmul.f32 %v19815_v16, %v19815_v16  ;;  %v21478_v16 = vld [vmem:[#allocation189_spill] sm:$0xff] }
0x14c4   : > { %9918 = vrot.lane.b32.xlu1 %v14415_v59, %s14651_s24  ;;  %v9893_v44 = vpop.permute.xlu0 %9892 }
0x14c5   : > { %v9970_v11 = vmul.f32 %v9893_v44, %v21468_v24  ;;  %v10211_v59 = vsel %vm424_vm1, %v10177_v37, 0.0  ;;  %v10180_v44 = vmul.f32 %v19759_v17, %v19759_v17  ;;  %v10229_v17 = vsel %vm424_vm1, %v10183_v22, 0.0 }
0x14c6   : > { %v10096_v27 = vpop.xlane.xlu1 %10095  ;;  %v10226_v63 = vsel %vm424_vm1, %v10182_v48, 0.0  ;;  %v10189_v22 = vmul.f32 %v19939_v31, %v19939_v31  ;;  %v10191_v31 = vmul.f32 %v20000_v58, %v20000_v58  ;;  %v10193_v58 = vmul.f32 %v20056_v4, %v20056_v4 }
0x14c7   : > { %v10002_v52 = vadd.f32 %v9970_v11, %v19752_v36  ;;  %v20142_v5 = vadd.f32 %v10096_v27, %v8565_v53  ;;  %9916 = vrot.lane.b32.xlu0 %v14417_v45, %s14651_s24  ;;  %v21472_v53 = vld [vmem:[#allocation22_spill] sm:$0xff]  ;;  %v10220_v11 = vsel %vm424_vm1, %v10180_v44, 0.0  ;;  %v21474_v45 = vld [vmem:[#allocation129_spill] sm:$0xff] }
0x14c8   : > { %v3721_v24 = vadd.f32 %v21473_v20, %v21472_v53  ;;  %v21482_v20 = vld [vmem:[#allocation93_spill] sm:$0xff] }
0x14c9   : > { %v20147_v56 = vsel %vm842_vm2, %v21469_v39, %v10002_v52  ;;  %v10185_v52 = vmul.f32 %v19827_v49, %v19827_v49  ;;  %v21475_v39 = vld [vmem:[#allocation159_spill] sm:$0xff]  ;;  %v10187_v49 = vmul.f32 %v19883_v47, %v19883_v47  ;;  %v21481_v47 = vld [vmem:[#allocation188_spill] sm:$0xff] }
0x14ca   : > { %v9899_v0 = vpop.permute.xlu1 %9898  ;;  %v20152_v60 = vsel %vm424_vm1, %v20147_v56, %v19923_v23  ;;  %v10176_v23 = vmul.f32 %v19601_v38, %v19601_v38  ;;  %v10214_v38 = vsel %vm424_vm1, %v10178_v14, 0.0  ;;  %v5358_v27 = vadd.f32 %v21474_v45, %v3721_v24 }
0x14cb   : > { %v9973_v21 = vmul.f32 %v9899_v0, %v21470_v9  ;;  %v10184_v9 = vmul.f32 %v19871_v6, %v19871_v6  ;;  %v10186_v6 = vmul.f32 %v19927_v43, %v19927_v43  ;;  %v10188_v43 = vmul.f32 %v19988_v34, %v19988_v34 }
0x14cc   : > { %v10208_v12 = vsel %vm424_vm1, %v10176_v23, 0.0  ;;  %v6931_v0 = vadd.f32 %v21475_v39, %v5358_v27  ;;  %v10190_v34 = vmul.f32 %v20044_v8, %v20044_v8  ;;  %v10192_v8 = vmul.f32 %v20094_v42, %v20094_v42 }
0x14cd   : > { %v10005_v2 = vadd.f32 %v9973_v21, %v19799_v57  ;;  %v10179_v57 = vmul.f32 %v19660_v55, %v19660_v55  ;;  %v10223_v55 = vsel %vm424_vm1, %v10181_v51, 0.0  ;;  %v21476_v21 = vld [vmem:[#allocation24_spill] sm:$0xff]  ;;  %v21480_v51 = vld [vmem:[#allocation162_spill] sm:$0xff]  ;;  %v10238_v48 = vsel %vm424_vm1, %v10186_v6, 0.0 }
0x14ce   : > { %v8568_v37 = vadd.f32 %v21478_v16, %v6931_v0  ;;  %v10250_v16 = vsel %vm424_vm1, %v10190_v34, 0.0 }
0x14cf   : > { %v20158_v36 = vsel %vm842_vm2, %v21471_v10, %v10005_v2  ;;  %v21477_v2 = vld [vmem:[#allocation58_spill] sm:$0xff] }
0x14d0   : > { %v20163_v62 = vsel %vm424_vm1, %v20158_v36, %v19974_v25  ;;  %v10217_v25 = vsel %vm424_vm1, %v10179_v57, 0.0  ;;  %v3720_v10 = vadd.f32 %v21477_v2, %v21476_v21  ;;  %v21479_v57 = vld [vmem:[#allocation122_spill] sm:$0xff]  ;;  %v10253_v2 = vsel %vm424_vm1, %v10191_v31, 0.0  ;;  %v21489_v31 = vld [vmem:[#allocation96_spill] sm:$0xff] }
0x14e6   : > { %10212 = vadd.xlane.f32.xlu0 %v10211_v59  ;;  %v10235_v59 = vsel %vm424_vm1, %v10185_v52, 0.0  ;;  %v21483_v52 = vld [vmem:[#allocation128_spill] sm:$0xff] }
0x14e8   : > { %10209 = vadd.xlane.f32.xlu1 %v10208_v12  ;;  %v5357_v12 = vadd.f32 %v21479_v57, %v3720_v10  ;;  %v10197_v57 = vmul.f32 %v20158_v36, %v20158_v36 }
0x14ea   : > { %10218 = vadd.xlane.f32.xlu0 %v10217_v25  ;;  %v10232_v25 = vsel %vm424_vm1, %v10184_v9, 0.0  ;;  %v21484_v9 = vld [vmem:[#allocation94_spill] sm:$0xff] }
0x14ec   : > { %10215 = vadd.xlane.f32.xlu1 %v10214_v38  ;;  %v6930_v38 = vadd.f32 %v21480_v51, %v5357_v12 }
0x14ee   : > { %10224 = vadd.xlane.f32.xlu0 %v10223_v55  ;;  %v10241_v55 = vsel %vm424_vm1, %v10187_v49, 0.0  ;;  %v8567_v53 = vadd.f32 %v21481_v47, %v6930_v38  ;;  %v10194_v49 = vmul.f32 %v20147_v56, %v20147_v56 }
0x14f0   : > { %10221 = vadd.xlane.f32.xlu1 %v10220_v11  ;;  %v10262_v12 = vsel %vm424_vm1, %v10194_v49, 0.0 }
0x14f2   : > { %10230 = vadd.xlane.f32.xlu0 %v10229_v17  ;;  %v10247_v17 = vsel %vm424_vm1, %v10189_v22, 0.0 }
0x14f4   : > { %10227 = vadd.xlane.f32.xlu1 %v10226_v63  ;;  %v10244_v63 = vsel %vm424_vm1, %v10188_v43, 0.0 }
0x14f5   : > { %v10105_v23 = vpop.xlane.xlu0 %10104 }
0x14f6   : > { %v20204_v14 = vadd.f32 %v10105_v23, %v8568_v37  ;;  %10236 = vadd.xlane.f32.xlu0 %v10235_v59  ;;  %v21485_v37 = vld [vmem:[#allocation135_spill] sm:$0xff]  ;;  %v10259_v23 = vsel %vm424_vm1, %v10193_v58, 0.0  ;;  %v10195_v59 = vmul.f32 %v20106_v46, %v20106_v46 }
0x14f8   : > { %10233 = vadd.xlane.f32.xlu1 %v10232_v25  ;;  %v10265_v42 = vsel %vm424_vm1, %v10195_v59, 0.0 }
0x14f9   : > { %v9897_v44 = vpop.permute.xlu0 %9896 }
0x14fa   : > { %v9972_v24 = vmul.f32 %v9897_v44, %v21482_v20  ;;  %10242 = vadd.xlane.f32.xlu0 %v10241_v55  ;;  %v21486_v44 = vld [vmem:[#allocation95_spill] sm:$0xff] }
0x14fb   : > { %v10102_v11 = vpop.xlane.xlu1 %10101 }
0x14fc   : > { %v10004_v45 = vadd.f32 %v9972_v24, %v19808_v19  ;;  %v20219_v27 = vadd.f32 %v10102_v11, %v8567_v53  ;;  %10239 = vadd.xlane.f32.xlu1 %v10238_v48  ;;  %v21487_v53 = vld [vmem:[#allocation97_spill] sm:$0xff]  ;;  %v21488_v24 = vld [vmem:[#allocation132_spill] sm:$0xff] }
0x14fe   : > { %10248 = vadd.xlane.f32.xlu0 %v10247_v17  ;;  %v10164_v39 = vsel %vm842_vm2, %v21483_v52, %v10004_v45 }
0x14ff   : > { %v9903_v0 = vpop.permute.xlu1 %9902  ;;  %v20231_v19 = vsel %vm424_vm1, %v10164_v39, %v19984_v1  ;;  %v10196_v46 = vmul.f32 %v10164_v39, %v10164_v39 }
0x1500   : > { %v9975_v21 = vmul.f32 %v9903_v0, %v21484_v9  ;;  %10245 = vadd.xlane.f32.xlu1 %v10244_v63  ;;  %v21490_v63 = vld [vmem:[#allocation99_spill] sm:$0xff]  ;;  %v21491_v9 = vld [vmem:[#allocation136_spill] sm:$0xff] }
0x1501   : > { %v10268_v6 = vsel %vm424_vm1, %v10196_v46, 0.0  ;;  %v21498_v46 = vld [vmem:[#allocation101_spill] sm:$0xff] }
0x1502   : > { %v10007_v10 = vadd.f32 %v9975_v21, %v19855_v3  ;;  %10254 = vadd.xlane.f32.xlu0 %v10253_v2  ;;  %v10256_v3 = vsel %vm424_vm1, %v10192_v8, 0.0  ;;  %v21493_v8 = vld [vmem:[#allocation139_spill] sm:$0xff] }
0x1504   : > { %10251 = vadd.xlane.f32.xlu1 %v10250_v16  ;;  %v10167_v1 = vsel %vm842_vm2, %v21485_v37, %v10007_v10  ;;  %v21492_v10 = vld [vmem:[#allocation98_spill] sm:$0xff] }
0x1505   : > { %v20248_v4 = vsel %vm424_vm1, %v10167_v1, %v20030_v28  ;;  %v10271_v28 = vsel %vm424_vm1, %v10197_v57, 0.0  ;;  %v10199_v25 = vmul.f32 %v10167_v1, %v10167_v1  ;;  %v21495_v1 = vld [vmem:[#allocation60_spill] sm:$0xff]  ;;  %v21497_v57 = vld [vmem:[#allocation65_spill] sm:$0xff] }
0x1506   : > { %10260 = vadd.xlane.f32.xlu0 %v10259_v23 }
0x1507   : > { %v10277_v56 = vsel %vm424_vm1, %v10199_v25, 0.0  ;;  %v21499_v25 = vld [vmem:[#allocation140_spill] sm:$0xff] }
0x1508   : > { %10257 = vadd.xlane.f32.xlu1 %v10256_v3 }
0x150a   : > { %10266 = vadd.xlane.f32.xlu0 %v10265_v42 }
0x150c   : > { %10263 = vadd.xlane.f32.xlu1 %v10262_v12 }
0x150e   : > { %10272 = vadd.xlane.f32.xlu0 %v10271_v28 }
0x1510   : > { %10269 = vadd.xlane.f32.xlu1 %v10268_v6 }
0x1512   : > { %10278 = vadd.xlane.f32.xlu0 %v10277_v56  ;;  %v21500_v56 = vld [vmem:[#allocation126_spill] sm:$0xff] }
0x152a   : > { %v20260_v51 = vpop.xlane.xlu0 %10110 }
0x152e   : > { %v9901_v38 = vpop.permute.xlu0 %9900 }
0x152f   : > { %v9974_v36 = vmul.f32 %v9901_v38, %v21486_v44 }
0x1530   : > { %v20263_v55 = vpop.xlane.xlu1 %10107 }
0x1531   : > { %v10006_v22 = vadd.f32 %v9974_v36, %v19864_v32 }
0x1532   : > { %v9905_v47 = vpop.permute.xlu0 %9904 }
0x1533   : > { %v9976_v20 = vmul.f32 %v9905_v47, %v21487_v53  ;;  %v10166_v11 = vsel %vm842_vm2, %v21488_v24, %v10006_v22  ;;  %v21501_v47 = vld [vmem:[#allocation133_spill] sm:$0xff] }
0x1534   : > { %v9907_v48 = vpop.permute.xlu1 %9906  ;;  %v10198_v43 = vmul.f32 %v10166_v11, %v10166_v11  ;;  %v20271_v45 = vsel %vm424_vm1, %v10166_v11, %v20040_v50  ;;  %v21503_v11 = vld [vmem:[#allocation34_spill] sm:$0xff] }
0x1535   : > { %v10008_v17 = vadd.f32 %v9976_v20, %v19920_v33  ;;  %v9977_v52 = vmul.f32 %v9907_v48, %v21489_v31  ;;  %v21502_v20 = vld [vmem:[#allocation100_spill] sm:$0xff] }
0x1536   : > { %v9909_v39 = vpop.permute.xlu0 %9908  ;;  %v10274_v0 = vsel %vm424_vm1, %v10198_v43, 0.0  ;;  %v21504_v43 = vld [vmem:[#allocation164_spill] sm:$0xff] }
0x1537   : > { %v10009_v32 = vadd.f32 %v9977_v52, %v19911_v35  ;;  %v9978_v34 = vmul.f32 %v9909_v39, %v21490_v63  ;;  %10275 = vadd.xlane.f32.xlu1 %v10274_v0  ;;  %v10168_v21 = vsel %vm842_vm2, %v21491_v9, %v10008_v17  ;;  %v21494_v35 = vld [vmem:[#allocation26_spill] sm:$0xff]  ;;  %v21505_v0 = vld [vmem:[#allocation161_spill] sm:$0xff]  ;;  %v21506_v63 = vld [vmem:[#allocation103_spill] sm:$0xff] }
0x1538   : > { %v9911_v2 = vpop.permute.xlu1 %9910  ;;  %v10200_v58 = vmul.f32 %v10168_v21, %v10168_v21  ;;  %v20282_v50 = vsel %vm424_vm1, %v10168_v21, %v20090_v61  ;;  %v3722_v23 = vadd.f32 %v21495_v1, %v21494_v35  ;;  %v21496_v61 = vld [vmem:[#allocation25_spill] sm:$0xff]  ;;  %v21507_v9 = vld [vmem:[#allocation35_spill] sm:$0xff]  ;;  %v21510_v35 = vld [vmem:[#allocation102_spill] sm:$0xff] }
0x1539   : > { %v10010_v33 = vadd.f32 %v9978_v34, %v19981_v18  ;;  %v9979_v16 = vmul.f32 %v9911_v2, %v21492_v10  ;;  %v10169_v37 = vsel %vm842_vm2, %v21493_v8, %v10009_v32  ;;  %v3723_v12 = vadd.f32 %v21497_v57, %v21496_v61  ;;  %v21508_v2 = vld [vmem:[#allocation190_spill] sm:$0xff]  ;;  %v21509_v8 = vld [vmem:[#allocation191_spill] sm:$0xff] }
0x153a   : > { %v9913_v59 = vpop.permute.xlu0 %9912  ;;  %v10280_v3 = vsel %vm424_vm1, %v10200_v58, 0.0  ;;  %v10201_v49 = vmul.f32 %v10169_v37, %v10169_v37  ;;  %v20293_v42 = vsel %vm424_vm1, %v10169_v37, %v20080_v40  ;;  %v5359_v38 = vadd.f32 %v21500_v56, %v3722_v23  ;;  %v21511_v23 = vld [vmem:[#allocation36_spill] sm:$0xff] }
0x153b   : > { %v10011_v18 = vadd.f32 %v9979_v16, %v19972_v26  ;;  %v9980_v28 = vmul.f32 %v9913_v59, %v21498_v46  ;;  %10281 = vadd.xlane.f32.xlu1 %v10280_v3  ;;  %v10170_v6 = vsel %vm842_vm2, %v21499_v25, %v10010_v33  ;;  %v5360_v53 = vadd.f32 %v21501_v47, %v3723_v12  ;;  %v21512_v12 = vld [vmem:[#allocation37_spill] sm:$0xff]  ;;  %v21513_v25 = vld [vmem:[#allocation38_spill] sm:$0xff] }
0x153c   : > { %v9915_v44 = vpop.permute.xlu1 %9914  ;;  %v10283_v36 = vsel %vm424_vm1, %v10201_v49, 0.0  ;;  %v10202_v22 = vmul.f32 %v10170_v6, %v10170_v6  ;;  %v20305_v40 = vsel %vm424_vm1, %v10170_v6, %v20142_v5  ;;  %v6932_v17 = vadd.f32 %v21504_v43, %v5359_v38  ;;  %v21516_v43 = vld [vmem:[#allocation3_spill] sm:$0xff] }
0x153d   : > { %v10012_v26 = vadd.f32 %v9980_v28, %v20037_v30  ;;  %v9981_v24 = vmul.f32 %v9915_v44, %v21502_v20  ;;  %10284 = vadd.xlane.f32.xlu0 %v10283_v36  ;;  %v10171_v48 = vsel %vm842_vm2, %v21503_v11, %v10011_v18  ;;  %v6933_v32 = vadd.f32 %v21505_v0, %v5360_v53  ;;  %v21515_v20 = vld [vmem:[#allocation67_spill] sm:$0xff] }
0x153e   : > { %v9917_v31 = vpop.permute.xlu0 %9916  ;;  %v10286_v52 = vsel %vm424_vm1, %v10202_v22, 0.0  ;;  %v10203_v39 = vmul.f32 %v10171_v48, %v10171_v48  ;;  %v20316_v5 = vsel %vm424_vm1, %v10171_v48, %v20134_v7  ;;  %v8569_v58 = vadd.f32 %v21508_v2, %v6932_v17  ;;  %v21514_v22 = vld [vmem:[#allocation62_spill] sm:$0xff] }
0x153f   : > { %v10013_v30 = vadd.f32 %v9981_v24, %v20028_v13  ;;  %v9982_v34 = vmul.f32 %v9917_v31, %v21506_v63  ;;  %10287 = vadd.xlane.f32.xlu1 %v10286_v52  ;;  %v10172_v21 = vsel %vm842_vm2, %v21507_v9, %v10012_v26  ;;  %v8570_v37 = vadd.f32 %v21509_v8, %v6933_v32  ;;  %v21518_v63 = vld [vmem:[#allocation137_spill] sm:$0xff]  ;;  %v21519_v2 = vld [vmem:[#allocation130_spill] sm:$0xff] }
0x1540   : > { %v9919_v33 = vpop.permute.xlu1 %9918  ;;  %v10289_v10 = vsel %vm424_vm1, %v10203_v39, 0.0  ;;  %v10204_v16 = vmul.f32 %v10172_v21, %v10172_v21  ;;  %v20327_v7 = vsel %vm424_vm1, %v10172_v21, %v20219_v27  ;;  %v10142_v3 = vadd.f32 %v20263_v55, %v8569_v58  ;;  %v21517_v39 = vld [vmem:[#allocation28_spill] sm:$0xff] }
0x1541   : > { %v10014_v13 = vadd.f32 %v9982_v34, %v20087_v41  ;;  %v9983_v1 = vmul.f32 %v9919_v33, %v21510_v35  ;;  %10290 = vadd.xlane.f32.xlu0 %v10289_v10  ;;  %v10173_v59 = vsel %vm842_vm2, %v21511_v23, %v10013_v30  ;;  %v10143_v18 = vadd.f32 %v20260_v51, %v8570_v37  ;;  %v21521_v35 = vld [vmem:[#allocation112_spill] sm:$0xff] }
0x1542   : > { %v10292_v49 = vsel %vm424_vm1, %v10204_v16, 0.0  ;;  %v10205_v61 = vmul.f32 %v10173_v59, %v10173_v59  ;;  %v20338_v57 = vsel %vm424_vm1, %v10173_v59, %v20204_v14  ;;  %v21520_v16 = vld [vmem:[#allocation64_spill] sm:$0xff] }
0x1543   : > { %v10015_v27 = vadd.f32 %v9983_v1, %v20078_v29  ;;  %10293 = vadd.xlane.f32.xlu1 %v10292_v49  ;;  %v10174_v41 = vsel %vm842_vm2, %v21512_v12, %v10014_v13  ;;  %v21523_v12 = vld [vmem:[#allocation173_spill] sm:$0xff] }
0x1544   : > { %v10295_v46 = vsel %vm424_vm1, %v10205_v61, 0.0  ;;  %v10206_v28 = vmul.f32 %v10174_v41, %v10174_v41  ;;  %v20346_v55 = vsel %vm424_vm1, %v10174_v41, %v10142_v3  ;;  %v21522_v3 = vld [vmem:[#allocation134_spill] sm:$0xff] }
0x1545   : > { %10296 = vadd.xlane.f32.xlu0 %v10295_v46  ;;  %v10175_v14 = vsel %vm842_vm2, %v21513_v25, %v10015_v27 }
0x1546   : > { %v10298_v6 = vsel %vm424_vm1, %v10206_v28, 0.0  ;;  %v10207_v29 = vmul.f32 %v10175_v14, %v10175_v14  ;;  %v20352_v56 = vsel %vm424_vm1, %v10175_v14, %v10143_v18  ;;  %v21524_v28 = vld [vmem:[#allocation172_spill] sm:$0xff] }
0x1547   : > { %10299 = vadd.xlane.f32.xlu1 %v10298_v6 }
0x1548   : > { %v10301_v38 = vsel %vm424_vm1, %v10207_v29, 0.0  ;;  %v21525_v29 = vld [vmem:[#allocation166_spill] sm:$0xff] }
0x1549   : > { %10302 = vadd.xlane.f32.xlu0 %v10301_v38 }
0x156f   : > { %v10213_v51 = vpop.xlane.xlu0 %10212 }
0x1570   : > { %v10305_v44 = vmul.f32 -0.5, %v10213_v51 }
0x1571   : > { %v10210_v36 = vpop.xlane.xlu1 %10209 }
0x1572   : > { %v10370_v47 = vsel %vm10368_vm3, %v21514_v22, %v10305_v44  ;;  %v10304_v53 = vmul.f32 -0.5, %v10210_v36  ;;  %v21526_v36 = vld [vmem:[#allocation163_spill] sm:$0xff] }
0x1573   : > { %10403 = vst.msk [vmem:[%s20359_s28 + $0x8] sm:$0xff] %vm10401_vm4, %v10370_v47  ;;  %v10219_v26 = vpop.xlane.xlu0 %10218 }
0x1574   : > { %v10369_v24 = vsel %vm10368_vm3, %v21515_v20, %v10304_v53  ;;  %v10307_v11 = vmul.f32 -0.5, %v10219_v26  ;;  %v21527_v26 = vld [vmem:[#allocation4_spill] sm:$0xff] }
0x1575   : > { %10402 = vst.msk [vmem:[%s20359_s28] sm:$0xff] %vm10401_vm4, %v10369_v24  ;;  %v10216_v48 = vpop.xlane.xlu1 %10215 }
0x1576   : > { %v10372_v17 = vsel %vm10368_vm3, %v21516_v43, %v10307_v11  ;;  %v10306_v31 = vmul.f32 -0.5, %v10216_v48  ;;  %v21528_v48 = vld [vmem:[#allocation30_spill] sm:$0xff] }
0x1577   : > { %10405 = vst.msk [vmem:[%s20359_s28 + $0x18] sm:$0xff] %vm10401_vm4, %v10372_v17  ;;  %v10225_v52 = vpop.xlane.xlu0 %10224 }
0x1578   : > { %v10371_v0 = vsel %vm10368_vm3, %v21517_v39, %v10306_v31  ;;  %v10309_v32 = vmul.f32 -0.5, %v10225_v52  ;;  %v21529_v52 = vld [vmem:[#allocation2_spill] sm:$0xff] }
0x1579   : > { %10404 = vst.msk [vmem:[%s20359_s28 + $0x10] sm:$0xff] %vm10401_vm4, %v10371_v0  ;;  %v10222_v30 = vpop.xlane.xlu1 %10221 }
0x157a   : > { %v10374_v34 = vsel %vm10368_vm3, %v21518_v63, %v10309_v32  ;;  %v10308_v9 = vmul.f32 -0.5, %v10222_v30  ;;  %v21530_v30 = vld [vmem:[#allocation27_spill] sm:$0xff] }
0x157b   : > { %10407 = vst.msk [vmem:[%s20359_s28 + $0x28] sm:$0xff] %vm10401_vm4, %v10374_v34  ;;  %v10231_v21 = vpop.xlane.xlu0 %10230 }
0x157c   : > { %v10373_v58 = vsel %vm10368_vm3, %v21519_v2, %v10308_v9  ;;  %v10311_v33 = vmul.f32 -0.5, %v10231_v21 }
0x157d   : > { %10406 = vst.msk [vmem:[%s20359_s28 + $0x20] sm:$0xff] %vm10401_vm4, %v10373_v58  ;;  %v10228_v10 = vpop.xlane.xlu1 %10227 }
0x157e   : > { %v10376_v8 = vsel %vm10368_vm3, %v21520_v16, %v10311_v33  ;;  %v10310_v37 = vmul.f32 -0.5, %v10228_v10 }
0x157f   : > { %10409 = vst.msk [vmem:[%s20359_s28 + $0x38] sm:$0xff] %vm10401_vm4, %v10376_v8  ;;  %v10237_v13 = vpop.xlane.xlu0 %10236 }
0x1580   : > { %v10375_v1 = vsel %vm10368_vm3, %v21521_v35, %v10310_v37  ;;  %v10313_v23 = vmul.f32 -0.5, %v10237_v13 }
0x1581   : > { %10408 = vst.msk [vmem:[%s20359_s28 + $0x30] sm:$0xff] %vm10401_vm4, %v10375_v1  ;;  %v10234_v59 = vpop.xlane.xlu1 %10233 }
0x1582   : > { %v10378_v49 = vsel %vm10368_vm3, %v21522_v3, %v10313_v23  ;;  %v10312_v61 = vmul.f32 -0.5, %v10234_v59 }
0x1583   : > { %10411 = vst.msk [vmem:[%s20359_s28 + $0x48] sm:$0xff] %vm10401_vm4, %v10378_v49  ;;  %v10243_v27 = vpop.xlane.xlu0 %10242 }
0x1584   : > { %v10377_v41 = vsel %vm10368_vm3, %v21523_v12, %v10312_v61  ;;  %v10315_v18 = vmul.f32 -0.5, %v10243_v27 }
0x1585   : > { %10410 = vst.msk [vmem:[%s20359_s28 + $0x40] sm:$0xff] %vm10401_vm4, %v10377_v41  ;;  %v10240_v46 = vpop.xlane.xlu1 %10239 }
0x1586   : > { %v10380_v25 = vsel %vm10368_vm3, %v21524_v28, %v10315_v18  ;;  %v10314_v14 = vmul.f32 -0.5, %v10240_v46 }
0x1587   : > { %10413 = vst.msk [vmem:[%s20359_s28 + $0x58] sm:$0xff] %vm10401_vm4, %v10380_v25  ;;  %v10249_v6 = vpop.xlane.xlu0 %10248 }
0x1588   : > { %v10379_v38 = vsel %vm10368_vm3, %v21525_v29, %v10314_v14  ;;  %v10317_v51 = vmul.f32 -0.5, %v10249_v6 }
0x1589   : > { %10412 = vst.msk [vmem:[%s20359_s28 + $0x50] sm:$0xff] %vm10401_vm4, %v10379_v38  ;;  %v10246_v44 = vpop.xlane.xlu1 %10245 }
0x158a   : > { %v10382_v22 = vsel %vm10368_vm3, %v21526_v36, %v10317_v51  ;;  %v10316_v47 = vmul.f32 -0.5, %v10246_v44 }
0x158b   : > { %10415 = vst.msk [vmem:[%s20359_s28 + $0x68] sm:$0xff] %vm10401_vm4, %v10382_v22  ;;  %v10255_v53 = vpop.xlane.xlu0 %10254 }
0x158c   : > { %v10381_v20 = vsel %vm10368_vm3, %v21527_v26, %v10316_v47  ;;  %v10319_v24 = vmul.f32 -0.5, %v10255_v53 }
0x158d   : > { %10414 = vst.msk [vmem:[%s20359_s28 + $0x60] sm:$0xff] %vm10401_vm4, %v10381_v20  ;;  %v10252_v11 = vpop.xlane.xlu1 %10251 }
0x158e   : > { %v10384_v43 = vsel %vm10368_vm3, %v21528_v48, %v10319_v24  ;;  %v10318_v17 = vmul.f32 -0.5, %v10252_v11 }
0x158f   : > { %10417 = vst.msk [vmem:[%s20359_s28 + $0x78] sm:$0xff] %vm10401_vm4, %v10384_v43  ;;  %v10261_v31 = vpop.xlane.xlu0 %10260 }
0x1590   : > { %v10383_v39 = vsel %vm10368_vm3, %v21529_v52, %v10318_v17  ;;  %v10321_v0 = vmul.f32 -0.5, %v10261_v31 }
0x1591   : > { %10416 = vst.msk [vmem:[%s20359_s28 + $0x70] sm:$0xff] %vm10401_vm4, %v10383_v39  ;;  %v10258_v32 = vpop.xlane.xlu1 %10257 }
0x1592   : > { %v10386_v63 = vsel %vm10368_vm3, %v21530_v30, %v10321_v0  ;;  %v10320_v34 = vmul.f32 -0.5, %v10258_v32 }
0x1593   : > { %10419 = vst.msk [vmem:[%s20359_s28 + $0x88] sm:$0xff] %vm10401_vm4, %v10386_v63  ;;  %v10267_v9 = vpop.xlane.xlu0 %10266 }
0x1594   : > { %v10385_v21 = vsel %vm10368_vm3, %v20099_v15, %v10320_v34  ;;  %v10323_v2 = vmul.f32 -0.5, %v10267_v9 }
0x1595   : > { %10418 = vst.msk [vmem:[%s20359_s28 + $0x80] sm:$0xff] %vm10401_vm4, %v10385_v21  ;;  %v10264_v58 = vpop.xlane.xlu1 %10263 }
0x1596   : > { %v10388_v33 = vsel %vm10368_vm3, %v20111_v54, %v10323_v2  ;;  %v10322_v10 = vmul.f32 -0.5, %v10264_v58 }
0x1597   : > { %10421 = vst.msk [vmem:[%s20359_s28 + $0x98] sm:$0xff] %vm10401_vm4, %v10388_v33  ;;  %v10273_v16 = vpop.xlane.xlu0 %10272 }
0x1598   : > { %v10387_v8 = vsel %vm10368_vm3, %v20152_v60, %v10322_v10  ;;  %v10325_v37 = vmul.f32 -0.5, %v10273_v16 }
0x1599   : > { %10420 = vst.msk [vmem:[%s20359_s28 + $0x90] sm:$0xff] %vm10401_vm4, %v10387_v8  ;;  %v10270_v15 = vpop.xlane.xlu1 %10269 }
0x159a   : > { %v10390_v13 = vsel %vm10368_vm3, %v20163_v62, %v10325_v37  ;;  %v10324_v35 = vmul.f32 -0.5, %v10270_v15 }
0x159b   : > { %10423 = vst.msk [vmem:[%s20359_s28 + $0xa8] sm:$0xff] %vm10401_vm4, %v10390_v13  ;;  %v10279_v54 = vpop.xlane.xlu0 %10278 }
0x159c   : > { %v10389_v1 = vsel %vm10368_vm3, %v20231_v19, %v10324_v35  ;;  %v10327_v23 = vmul.f32 -0.5, %v10279_v54 }
0x159d   : > { %10422 = vst.msk [vmem:[%s20359_s28 + $0xa0] sm:$0xff] %vm10401_vm4, %v10389_v1 }
0x159e   : > { %v10392_v60 = vsel %vm10368_vm3, %v20248_v4, %v10327_v23 }
0x159f   : > { %10425 = vst.msk [vmem:[%s20359_s28 + $0xb8] sm:$0xff] %vm10401_vm4, %v10392_v60 }
0x15c0   : > { %v10276_v59 = vpop.xlane.xlu1 %10275 }
0x15c1   : > { %v10326_v3 = vmul.f32 -0.5, %v10276_v59 }
0x15c3   : > { %v10391_v62 = vsel %vm10368_vm3, %v20271_v45, %v10326_v3 }
0x15c4   : > { %10424 = vst.msk [vmem:[%s20359_s28 + $0xb0] sm:$0xff] %vm10401_vm4, %v10391_v62  ;;  %v10282_v49 = vpop.xlane.xlu1 %10281 }
0x15c5   : > { %v10328_v61 = vmul.f32 -0.5, %v10282_v49 }
0x15c6   : > { %v10285_v19 = vpop.xlane.xlu0 %10284 }
0x15c7   : > { %v10393_v27 = vsel %vm10368_vm3, %v20282_v50, %v10328_v61  ;;  %v10329_v12 = vmul.f32 -0.5, %v10285_v19 }
0x15c8   : > { %10426 = vst.msk [vmem:[%s20359_s28 + $0xc0] sm:$0xff] %vm10401_vm4, %v10393_v27  ;;  %v10288_v4 = vpop.xlane.xlu1 %10287 }
0x15c9   : > { %v10394_v41 = vsel %vm10368_vm3, %v20293_v42, %v10329_v12  ;;  %v10330_v18 = vmul.f32 -0.5, %v10288_v4 }
0x15ca   : > { %10427 = vst.msk [vmem:[%s20359_s28 + $0xc8] sm:$0xff] %vm10401_vm4, %v10394_v41  ;;  %v10291_v45 = vpop.xlane.xlu0 %10290 }
0x15cb   : > { %v10395_v46 = vsel %vm10368_vm3, %v20305_v40, %v10330_v18  ;;  %v10331_v28 = vmul.f32 -0.5, %v10291_v45 }
0x15cc   : > { %10428 = vst.msk [vmem:[%s20359_s28 + $0xd0] sm:$0xff] %vm10401_vm4, %v10395_v46  ;;  %v10294_v50 = vpop.xlane.xlu1 %10293 }
0x15cd   : > { %v10396_v25 = vsel %vm10368_vm3, %v20316_v5, %v10331_v28  ;;  %v10332_v14 = vmul.f32 -0.5, %v10294_v50 }
0x15ce   : > { %10429 = vst.msk [vmem:[%s20359_s28 + $0xd8] sm:$0xff] %vm10401_vm4, %v10396_v25  ;;  %v10297_v42 = vpop.xlane.xlu0 %10296 }
0x15cf   : > { %v10397_v6 = vsel %vm10368_vm3, %v20327_v7, %v10332_v14  ;;  %v10333_v29 = vmul.f32 -0.5, %v10297_v42 }
0x15d0   : > { %10430 = vst.msk [vmem:[%s20359_s28 + $0xe0] sm:$0xff] %vm10401_vm4, %v10397_v6  ;;  %v10300_v40 = vpop.xlane.xlu1 %10299 }
0x15d1   : > { %v10398_v38 = vsel %vm10368_vm3, %v20338_v57, %v10333_v29  ;;  %v10334_v51 = vmul.f32 -0.5, %v10300_v40 }
0x15d2   : > { %10431 = vst.msk [vmem:[%s20359_s28 + $0xe8] sm:$0xff] %vm10401_vm4, %v10398_v38  ;;  %v10303_v44 = vpop.xlane.xlu0 %10302 }
0x15d3   : > { %v10399_v5 = vsel %vm10368_vm3, %v20346_v55, %v10334_v51  ;;  %v10335_v36 = vmul.f32 -0.5, %v10303_v44 }
0x15d4   : > { %10432 = vst.msk [vmem:[%s20359_s28 + $0xf0] sm:$0xff] %vm10401_vm4, %v10399_v5 }
0x15d5   : > { %v10400_v7 = vsel %vm10368_vm3, %v20352_v56, %v10335_v36 }
0x15d6   : > { %10433 = vst.msk [vmem:[%s20359_s28 + $0xf8] sm:$0xff] %vm10401_vm4, %v10400_v7 }
0x15d7 PF: > { %s19_s30 = sadd.s32 1, %s14648_s30  }
0x15d8   : > { %p16_p4 = scmp.ge.s32.totalorder %s19_s30, 4  }
0x15da   :  { %18 = sbr.rel (!%p16_p4) target bundleno = 1 (0x1), region = 124 }

</bundles_post_ra>
